<compile_context>
chip_gen: v7x
topology: tpu7x:2x2x1
jax: 0.10.0
libtpu: 0.0.40
codegen_flags: <defaults>
</compile_context>

<pallas_src>
import jax
import jax.numpy as jnp
from jax.experimental import pallas as pl
from jax.experimental.pallas import tpu as pltpu


def _round_up(n, m):
    return ((n + m - 1) // m) * m


# --------------------------------------------------------------------------
# Kernel
# --------------------------------------------------------------------------
def vae_forward_kernel(x_ref, eps_ref,
                       w1_ref, b1_ref,
                       wml_ref, bml_ref,
                       w3_ref, b3_ref,
                       w4_ref, b4_ref,
                       recon_ref, mulv_ref):
    """One batch tile of the fused VAE forward.

    x_ref:   [TB, Dp]    bf16
    eps_ref: [TB, Lp]    f32
    weights: bf16, biases: f32 (all padded to multiples of 128)
    recon_ref: [TB, Dp]  f32
    mulv_ref:  [TB, 2Lp] f32  (mu | logvar, lane-dense slab)
    """
    lp = eps_ref.shape[1]                       # padded latent width (128)

    # encode: h = relu(x @ W1 + b1)                     (bf16 MXU, f32 acc)
    h = jnp.dot(x_ref[...], w1_ref[...],
                preferred_element_type=jnp.float32) + b1_ref[...]
    h = jnp.maximum(h, 0.0)                     # [TB, Hp] f32

    # fused mu|logvar head: one [Hp, 2*Lp] matmul instead of two tiny ones
    mulv = jnp.dot(h.astype(jnp.bfloat16), wml_ref[...],
                   preferred_element_type=jnp.float32) + bml_ref[...]
    mu = mulv[:, :lp]
    logvar = mulv[:, lp:]

    # reparameterize: z = mu + eps * exp(0.5 * logvar)  (f32 elementwise)
    # padded latent lanes: mu=0, logvar=0, eps=0 -> z=0 (harmless, w3 rows 0)
    z = mu + eps_ref[...] * jnp.exp(0.5 * logvar)

    # decode: h2 = relu(z @ W3 + b3); recon = sigmoid(h2 @ W4 + b4)
    h2 = jnp.dot(z.astype(jnp.bfloat16), w3_ref[...],
                 preferred_element_type=jnp.float32) + b3_ref[...]
    h2 = jnp.maximum(h2, 0.0)                   # [TB, Hp] f32
    logits = jnp.dot(h2.astype(jnp.bfloat16), w4_ref[...],
                     preferred_element_type=jnp.float32) + b4_ref[...]

    recon_ref[...] = jax.nn.sigmoid(logits)     # [TB, Dp] f32, lane-dense
    mulv_ref[...] = mulv                        # [TB, 2Lp] f32, lane-dense


# --------------------------------------------------------------------------
# Wrapper
# --------------------------------------------------------------------------
def _prepare_params(params, D, Dp, H, Hp, L, Lp):
    """Zero-pad + pack weights ([in, out] layout) and cast weights to bf16."""
    w1 = (jnp.zeros((Dp, Hp), jnp.float32)
          .at[:D, :H].set(params["w1"])).astype(jnp.bfloat16)
    b1 = jnp.zeros((1, Hp), jnp.float32).at[:, :H].set(params["b1"])

    wml = (jnp.zeros((Hp, 2 * Lp), jnp.float32)
           .at[:H, :L].set(params["wmu"])
           .at[:H, Lp:Lp + L].set(params["wlv"])).astype(jnp.bfloat16)
    bml = (jnp.zeros((1, 2 * Lp), jnp.float32)
           .at[:, :L].set(params["bmu"])
           .at[:, Lp:Lp + L].set(params["blv"]))

    w3 = (jnp.zeros((Lp, Hp), jnp.float32)
          .at[:L, :H].set(params["w3"])).astype(jnp.bfloat16)
    b3 = jnp.zeros((1, Hp), jnp.float32).at[:, :H].set(params["b3"])

    w4 = (jnp.zeros((Hp, Dp), jnp.float32)
          .at[:H, :D].set(params["w4"])).astype(jnp.bfloat16)
    b4 = jnp.zeros((1, Dp), jnp.float32).at[:, :D].set(params["b4"])

    return w1, b1, wml, bml, w3, b3, w4, b4


def simple_vae_forward(x, eps, params, *, image_size, hidden=400, latent=20,
                       block_b=128):
    """Fused VAE forward.  x: [..., image_size, image_size]; eps: [B, latent]."""
    D = image_size * image_size
    x_flat = x.reshape(-1, D)                   # matches x.view(-1, D)
    B = x_flat.shape[0]

    Dp = _round_up(D, 128)
    Hp = _round_up(hidden, 128)
    Lp = _round_up(latent, 128)

    block_b = _round_up(min(block_b, _round_up(B, 8)), 8)
    Bp = _round_up(B, block_b)
    n_blocks = Bp // block_b

    # pad + cast activation inputs (padded rows/lanes are zeros, trimmed later)
    x_pad = (jnp.zeros((Bp, Dp), jnp.float32)
             .at[:B, :D].set(x_flat)).astype(jnp.bfloat16)
    eps_pad = jnp.zeros((Bp, Lp), jnp.float32).at[:B, :latent].set(eps)

    w1, b1, wml, bml, w3, b3, w4, b4 = _prepare_params(
        params, D, Dp, hidden, Hp, latent, Lp)
    args = (x_pad, eps_pad, w1, b1, wml, bml, w3, b3, w4, b4)

    # activations: tiled over the batch grid axis
    def tiled(shape):
        return pl.BlockSpec((block_b, shape[1]), lambda i: (i, 0))

    # weights/biases: whole array, constant block index -> VMEM-resident,
    # DMA'd once across all grid steps
    def resident(shape):
        return pl.BlockSpec(shape, lambda i: (0, 0))

    in_specs = ([tiled(x_pad.shape), tiled(eps_pad.shape)]
                + [resident(a.shape) for a in args[2:]])
    out_specs = [
        pl.BlockSpec((block_b, Dp), lambda i: (i, 0)),      # recon
        pl.BlockSpec((block_b, 2 * Lp), lambda i: (i, 0)),  # mu|logvar slab
    ]
    out_shape = [
        jax.ShapeDtypeStruct((Bp, Dp), jnp.float32),
        jax.ShapeDtypeStruct((Bp, 2 * Lp), jnp.float32),
    ]

    # actual VMEM footprint (double-buffered), capped below v7x physical VMEM
    weight_bytes = sum(a.nbytes for a in args[2:])
    act_bytes = (block_b * Dp * 2          # x tile (bf16)
                 + block_b * Lp * 4        # eps tile
                 + block_b * Dp * 4        # recon tile
                 + block_b * 2 * Lp * 4)   # mu|logvar tile
    vmem_limit = min(max(2 * (weight_bytes + act_bytes) + (2 << 20), 8 << 20),
                     56 << 20)

    flops = 2 * Bp * (Dp * Hp + Hp * 2 * Lp + Lp * Hp + Hp * Dp)
    transcendentals = Bp * (Lp + Dp)            # exp (reparam) + sigmoid
    bytes_accessed = (sum(a.nbytes for a in args)
                      + Bp * Dp * 4 + Bp * 2 * Lp * 4)

    recon_pad, mulv_pad = pl.pallas_call(
        vae_forward_kernel,
        grid=(n_blocks,),
        in_specs=in_specs,
        out_specs=out_specs,
        out_shape=out_shape,
        compiler_params=pltpu.CompilerParams(
            dimension_semantics=("parallel",),
            vmem_limit_bytes=vmem_limit,
        ),
        cost_estimate=pl.CostEstimate(
            flops=flops,
            transcendentals=transcendentals,
            bytes_accessed=bytes_accessed,
        ),
    )(*args)

    recon = recon_pad[:B, :D]
    mu = mulv_pad[:B, :latent]
    logvar = mulv_pad[:B, Lp:Lp + latent]
    return recon, mu, logvar


# --------------------------------------------------------------------------
# Param init + pure-JAX reference (f32, unpadded) for correctness checking
# --------------------------------------------------------------------------
def init_params(key, image_size, hidden=400, latent=20):
    """Deterministic init mirroring nn.Linear shapes, stored as [in, out]."""
    D = image_size * image_size

    def linear(key, fan_in, fan_out):
        kw, kb = jax.random.split(key)
        bound = 1.0 / jnp.sqrt(fan_in)
        w = jax.random.uniform(kw, (fan_in, fan_out), jnp.float32, -bound, bound)
        b = jax.random.uniform(kb, (1, fan_out), jnp.float32, -bound, bound)
        return w, b

    k1, k2, k3, k4, k5 = jax.random.split(key, 5)
    w1, b1 = linear(k1, D, hidden)          # fc1
    wmu, bmu = linear(k2, hidden, latent)   # fc_mu
    wlv, blv = linear(k3, hidden, latent)   # fc_logvar
    w3, b3 = linear(k4, latent, hidden)     # fc3
    w4, b4 = linear(k5, hidden, D)          # fc4
    return dict(w1=w1, b1=b1, wmu=wmu, bmu=bmu, wlv=wlv, blv=blv,
                w3=w3, b3=b3, w4=w4, b4=b4)


def reference_forward(x_flat, eps, p):
    """Pure-JAX f32 reference of the PyTorch forward."""
    h = jnp.maximum(x_flat @ p["w1"] + p["b1"], 0.0)
    mu = h @ p["wmu"] + p["bmu"]
    logvar = h @ p["wlv"] + p["blv"]
    z = mu + eps * jnp.exp(0.5 * logvar)
    h2 = jnp.maximum(z @ p["w3"] + p["b3"], 0.0)
    recon = jax.nn.sigmoid(h2 @ p["w4"] + p["b4"])
    return recon, mu, logvar


# --------------------------------------------------------------------------
if __name__ == "__main__":
    image_size = 64          # module-level constant in the reference spec
    hidden, latent = 400, 20
    batch = 16               # small demo batch; block_b=8 -> 2 grid steps

    key = jax.random.PRNGKey(0)
    kx, keps, kp = jax.random.split(key, 3)

    # input in the PyTorch convention: NCHW with C=1
    x = jax.random.normal(kx, (batch, 1, image_size, image_size), jnp.float32)
    # torch.randn_like(std) replaced by deterministic eps generated here
    eps = jax.random.normal(keps, (batch, latent), jnp.float32)
    params = init_params(kp, image_size, hidden=hidden, latent=latent)

    recon, mu, logvar = simple_vae_forward(
        x, eps, params, image_size=image_size, hidden=hidden, latent=latent,
        block_b=8)
    jax.block_until_ready((recon, mu, logvar))

    # sanity check against a pure-JAX f32 reference (kernel uses bf16 weights
    # with f32 accumulation -> loosened tolerance)
    x_flat = x.reshape(-1, image_size * image_size)
    r_ref, mu_ref, lv_ref = reference_forward(x_flat, eps, params)
    assert recon.shape == r_ref.shape
    assert mu.shape == mu_ref.shape and logvar.shape == lv_ref.shape
    assert jnp.allclose(recon, r_ref, atol=2e-2, rtol=2e-2)
    assert jnp.allclose(mu, mu_ref, atol=2e-2, rtol=2e-2)
    assert jnp.allclose(logvar, lv_ref, atol=2e-2, rtol=2e-2)

    print("KERNEL_OK")
</pallas_src>

<mosaic_0001>
module attributes {stable_mosaic.version = 11 : i64} {
  func.func @vae_forward_kernel(%arg0: i32, %arg1: memref<8x4096xbf16, #tpu.memory_space<vmem>>, %arg2: memref<8x128xf32, #tpu.memory_space<vmem>>, %arg3: memref<4096x512xbf16, #tpu.memory_space<vmem>>, %arg4: memref<1x512xf32, #tpu.memory_space<vmem>>, %arg5: memref<512x256xbf16, #tpu.memory_space<vmem>>, %arg6: memref<1x256xf32, #tpu.memory_space<vmem>>, %arg7: memref<128x512xbf16, #tpu.memory_space<vmem>>, %arg8: memref<1x512xf32, #tpu.memory_space<vmem>>, %arg9: memref<512x4096xbf16, #tpu.memory_space<vmem>>, %arg10: memref<1x4096xf32, #tpu.memory_space<vmem>>, %arg11: memref<8x4096xf32, #tpu.memory_space<vmem>>, %arg12: memref<8x256xf32, #tpu.memory_space<vmem>>) attributes {dimension_semantics = [#tpu.dimension_semantics<parallel>], iteration_bounds = array<i64: 2>, scalar_prefetch = 0 : i64, scratch_operands = 0 : i64, tpu.core_type = #tpu.core_type<tc>, window_params = [{transform_indices = @transform_0, window_bounds = array<i64: 8, 4096>}, {transform_indices = @transform_1, window_bounds = array<i64: 8, 128>}, {pipeline_mode = #tpu.pipeline_mode<synchronous>, transform_indices = @transform_2, window_bounds = array<i64: 4096, 512>}, {pipeline_mode = #tpu.pipeline_mode<synchronous>, transform_indices = @transform_3, window_bounds = array<i64: 1, 512>}, {pipeline_mode = #tpu.pipeline_mode<synchronous>, transform_indices = @transform_4, window_bounds = array<i64: 512, 256>}, {pipeline_mode = #tpu.pipeline_mode<synchronous>, transform_indices = @transform_5, window_bounds = array<i64: 1, 256>}, {pipeline_mode = #tpu.pipeline_mode<synchronous>, transform_indices = @transform_6, window_bounds = array<i64: 128, 512>}, {pipeline_mode = #tpu.pipeline_mode<synchronous>, transform_indices = @transform_7, window_bounds = array<i64: 1, 512>}, {pipeline_mode = #tpu.pipeline_mode<synchronous>, transform_indices = @transform_8, window_bounds = array<i64: 512, 4096>}, {pipeline_mode = #tpu.pipeline_mode<synchronous>, transform_indices = @transform_9, window_bounds = array<i64: 1, 4096>}, {transform_indices = @transform_10, window_bounds = array<i64: 8, 4096>}, {transform_indices = @transform_11, window_bounds = array<i64: 8, 256>}]} {
    %c0 = arith.constant 0 : index
    %c0_0 = arith.constant 0 : index
    %0 = vector.load %arg1[%c0, %c0_0] : memref<8x4096xbf16, #tpu.memory_space<vmem>>, vector<8x4096xbf16>
    %c0_1 = arith.constant 0 : index
    %c0_2 = arith.constant 0 : index
    %1 = vector.load %arg3[%c0_1, %c0_2] : memref<4096x512xbf16, #tpu.memory_space<vmem>>, vector<4096x512xbf16>
    %cst = arith.constant dense<0.000000e+00> : vector<8x512xf32>
    %2 = tpu.matmul %0, %1, %cst {dimension_numbers = #tpu.dot_dimension_numbers<[1], [0], [0], [1], [0, 0, 1, 1], [], []>} : vector<8x4096xbf16>, vector<4096x512xbf16>, vector<8x512xf32> -> vector<8x512xf32>
    %c0_3 = arith.constant 0 : index
    %c0_4 = arith.constant 0 : index
    %3 = vector.load %arg4[%c0_3, %c0_4] : memref<1x512xf32, #tpu.memory_space<vmem>>, vector<1x512xf32>
    %4 = vector.broadcast %3 : vector<1x512xf32> to vector<8x512xf32>
    %5 = arith.addf %2, %4 : vector<8x512xf32>
    %cst_5 = arith.constant 0.000000e+00 : f32
    %6 = vector.broadcast %cst_5 : f32 to vector<8x512xf32>
    %7 = arith.maximumf %5, %6 : vector<8x512xf32>
    %8 = arith.truncf %7 : vector<8x512xf32> to vector<8x512xbf16>
    %c0_6 = arith.constant 0 : index
    %c0_7 = arith.constant 0 : index
    %9 = vector.load %arg5[%c0_6, %c0_7] : memref<512x256xbf16, #tpu.memory_space<vmem>>, vector<512x256xbf16>
    %cst_8 = arith.constant dense<0.000000e+00> : vector<8x256xf32>
    %10 = tpu.matmul %8, %9, %cst_8 {dimension_numbers = #tpu.dot_dimension_numbers<[1], [0], [0], [1], [0, 0, 1, 1], [], []>} : vector<8x512xbf16>, vector<512x256xbf16>, vector<8x256xf32> -> vector<8x256xf32>
    %c0_9 = arith.constant 0 : index
    %c0_10 = arith.constant 0 : index
    %11 = vector.load %arg6[%c0_9, %c0_10] : memref<1x256xf32, #tpu.memory_space<vmem>>, vector<1x256xf32>
    %12 = vector.broadcast %11 : vector<1x256xf32> to vector<8x256xf32>
    %13 = arith.addf %10, %12 : vector<8x256xf32>
    %14 = vector.extract_strided_slice %13 {offsets = [0, 0], sizes = [8, 128], strides = [1, 1]} : vector<8x256xf32> to vector<8x128xf32>
    %15 = vector.extract_strided_slice %13 {offsets = [0, 128], sizes = [8, 128], strides = [1, 1]} : vector<8x256xf32> to vector<8x128xf32>
    %c0_11 = arith.constant 0 : index
    %c0_12 = arith.constant 0 : index
    %16 = vector.load %arg2[%c0_11, %c0_12] : memref<8x128xf32, #tpu.memory_space<vmem>>, vector<8x128xf32>
    %cst_13 = arith.constant 5.000000e-01 : f32
    %17 = vector.broadcast %cst_13 : f32 to vector<8x128xf32>
    %18 = arith.mulf %17, %15 : vector<8x128xf32>
    %19 = math.exp %18 : vector<8x128xf32>
    %20 = arith.mulf %16, %19 : vector<8x128xf32>
    %21 = arith.addf %14, %20 : vector<8x128xf32>
    %22 = arith.truncf %21 : vector<8x128xf32> to vector<8x128xbf16>
    %c0_14 = arith.constant 0 : index
    %c0_15 = arith.constant 0 : index
    %23 = vector.load %arg7[%c0_14, %c0_15] : memref<128x512xbf16, #tpu.memory_space<vmem>>, vector<128x512xbf16>
    %cst_16 = arith.constant dense<0.000000e+00> : vector<8x512xf32>
    %24 = tpu.matmul %22, %23, %cst_16 {dimension_numbers = #tpu.dot_dimension_numbers<[1], [0], [0], [1], [0, 0, 1, 1], [], []>} : vector<8x128xbf16>, vector<128x512xbf16>, vector<8x512xf32> -> vector<8x512xf32>
    %c0_17 = arith.constant 0 : index
    %c0_18 = arith.constant 0 : index
    %25 = vector.load %arg8[%c0_17, %c0_18] : memref<1x512xf32, #tpu.memory_space<vmem>>, vector<1x512xf32>
    %26 = vector.broadcast %25 : vector<1x512xf32> to vector<8x512xf32>
    %27 = arith.addf %24, %26 : vector<8x512xf32>
    %cst_19 = arith.constant 0.000000e+00 : f32
    %28 = vector.broadcast %cst_19 : f32 to vector<8x512xf32>
    %29 = arith.maximumf %27, %28 : vector<8x512xf32>
    %30 = arith.truncf %29 : vector<8x512xf32> to vector<8x512xbf16>
    %c0_20 = arith.constant 0 : index
    %c0_21 = arith.constant 0 : index
    %31 = vector.load %arg9[%c0_20, %c0_21] : memref<512x4096xbf16, #tpu.memory_space<vmem>>, vector<512x4096xbf16>
    %cst_22 = arith.constant dense<0.000000e+00> : vector<8x4096xf32>
    %32 = tpu.matmul %30, %31, %cst_22 {dimension_numbers = #tpu.dot_dimension_numbers<[1], [0], [0], [1], [0, 0, 1, 1], [], []>} : vector<8x512xbf16>, vector<512x4096xbf16>, vector<8x4096xf32> -> vector<8x4096xf32>
    %c0_23 = arith.constant 0 : index
    %c0_24 = arith.constant 0 : index
    %33 = vector.load %arg10[%c0_23, %c0_24] : memref<1x4096xf32, #tpu.memory_space<vmem>>, vector<1x4096xf32>
    %34 = vector.broadcast %33 : vector<1x4096xf32> to vector<8x4096xf32>
    %35 = arith.addf %32, %34 : vector<8x4096xf32>
    %36 = arith.negf %35 : vector<8x4096xf32>
    %37 = math.exp %36 : vector<8x4096xf32>
    %cst_25 = arith.constant 1.000000e+00 : f32
    %38 = vector.broadcast %cst_25 : f32 to vector<8x4096xf32>
    %39 = arith.addf %38, %37 : vector<8x4096xf32>
    %40 = arith.divf %38, %39 : vector<8x4096xf32>
    %c0_26 = arith.constant 0 : index
    %c0_27 = arith.constant 0 : index
    %41 = vector.load %arg11[%c0_26, %c0_27] : memref<8x4096xf32, #tpu.memory_space<vmem>>, vector<8x4096xf32>
    tpu.vector_store %arg11[%c0_26, %c0_27], %40 {strides = array<i32>} : memref<8x4096xf32, #tpu.memory_space<vmem>>, vector<8x4096xf32>,
    %c0_28 = arith.constant 0 : index
    %c0_29 = arith.constant 0 : index
    %42 = vector.load %arg12[%c0_28, %c0_29] : memref<8x256xf32, #tpu.memory_space<vmem>>, vector<8x256xf32>
    tpu.vector_store %arg12[%c0_28, %c0_29], %13 {strides = array<i32>} : memref<8x256xf32, #tpu.memory_space<vmem>>, vector<8x256xf32>,
    return
  }
  func.func @transform_0(%arg0: i32) -> (i32, i32) {
    %c0_i32 = arith.constant 0 : i32
    %c0_i32_0 = arith.constant 0 : i32
    return %arg0, %c0_i32 : i32, i32
  }
  func.func @transform_1(%arg0: i32) -> (i32, i32) {
    %c0_i32 = arith.constant 0 : i32
    %c0_i32_0 = arith.constant 0 : i32
    return %arg0, %c0_i32 : i32, i32
  }
  func.func @transform_2(%arg0: i32) -> (i32, i32) {
    %c0_i32 = arith.constant 0 : i32
    %c0_i32_0 = arith.constant 0 : i32
    %c0_i32_1 = arith.constant 0 : i32
    return %c0_i32, %c0_i32_0 : i32, i32
  }
  func.func @transform_3(%arg0: i32) -> (i32, i32) {
    %c0_i32 = arith.constant 0 : i32
    %c0_i32_0 = arith.constant 0 : i32
    %c0_i32_1 = arith.constant 0 : i32
    return %c0_i32, %c0_i32_0 : i32, i32
  }
  func.func @transform_4(%arg0: i32) -> (i32, i32) {
    %c0_i32 = arith.constant 0 : i32
    %c0_i32_0 = arith.constant 0 : i32
    %c0_i32_1 = arith.constant 0 : i32
    return %c0_i32, %c0_i32_0 : i32, i32
  }
  func.func @transform_5(%arg0: i32) -> (i32, i32) {
    %c0_i32 = arith.constant 0 : i32
    %c0_i32_0 = arith.constant 0 : i32
    %c0_i32_1 = arith.constant 0 : i32
    return %c0_i32, %c0_i32_0 : i32, i32
  }
  func.func @transform_6(%arg0: i32) -> (i32, i32) {
    %c0_i32 = arith.constant 0 : i32
    %c0_i32_0 = arith.constant 0 : i32
    %c0_i32_1 = arith.constant 0 : i32
    return %c0_i32, %c0_i32_0 : i32, i32
  }
  func.func @transform_7(%arg0: i32) -> (i32, i32) {
    %c0_i32 = arith.constant 0 : i32
    %c0_i32_0 = arith.constant 0 : i32
    %c0_i32_1 = arith.constant 0 : i32
    return %c0_i32, %c0_i32_0 : i32, i32
  }
  func.func @transform_8(%arg0: i32) -> (i32, i32) {
    %c0_i32 = arith.constant 0 : i32
    %c0_i32_0 = arith.constant 0 : i32
    %c0_i32_1 = arith.constant 0 : i32
    return %c0_i32, %c0_i32_0 : i32, i32
  }
  func.func @transform_9(%arg0: i32) -> (i32, i32) {
    %c0_i32 = arith.constant 0 : i32
    %c0_i32_0 = arith.constant 0 : i32
    %c0_i32_1 = arith.constant 0 : i32
    return %c0_i32, %c0_i32_0 : i32, i32
  }
  func.func @transform_10(%arg0: i32) -> (i32, i32) {
    %c0_i32 = arith.constant 0 : i32
    %c0_i32_0 = arith.constant 0 : i32
    return %arg0, %c0_i32 : i32, i32
  }
  func.func @transform_11(%arg0: i32) -> (i32, i32) {
    %c0_i32 = arith.constant 0 : i32
    %c0_i32_0 = arith.constant 0 : i32
    return %arg0, %c0_i32 : i32, i32
  }
}

</mosaic_0001>

<bundles_post_ra>
// kernel: tpu_custom_call.1
= control target key start
LH: loop header
LB: loop body
LE: loop exit
PB: predicated region body
PF: predicated region fallthrough
CT: control target
= control target key end

     0   :  { %s22776_s0 = inlined_call_operand.hbm [shape: bf16[16,4096], index: 0, kind: input, shape index: {}]   ;;  %s22777_s1 = inlined_call_operand.hbm [shape: f32[16,128], index: 1, kind: input, shape index: {}]   ;;  %s22778_s2 = inlined_call_operand.hbm [shape: bf16[4096,512], index: 2, kind: input, shape index: {}]   ;;  %s22779_s3 = inlined_call_operand.hbm [shape: f32[1,512], index: 3, kind: input, shape index: {}]   ;;  %s22780_s4 = inlined_call_operand.hbm [shape: bf16[512,256], index: 4, kind: input, shape index: {}]   ;;  %s22781_s5 = inlined_call_operand.hbm [shape: f32[1,256], index: 5, kind: input, shape index: {}]   ;;  %s22782_s6 = inlined_call_operand.hbm [shape: bf16[128,512], index: 6, kind: input, shape index: {}]   ;;  %s22783_s7 = inlined_call_operand.hbm [shape: f32[1,512], index: 7, kind: input, shape index: {}]   ;;  %s22784_s8 = inlined_call_operand.hbm [shape: bf16[512,4096], index: 8, kind: input, shape index: {}]   ;;  %s22785_s9 = inlined_call_operand.hbm [shape: f32[1,4096], index: 9, kind: input, shape index: {}]   ;;  %s22786_s10 = inlined_call_operand.hbm [shape: f32[16,4096], index: 10, kind: output, shape index: {0}]   ;;  %s22787_s11 = inlined_call_operand.hbm [shape: f32[16,256], index: 11, kind: output, shape index: {1}]  }
   0x1   :  { %22797 = sst [smem:[#allocation32_spill]] %s22776_s0 }
   0x2   :  { %22798 = sst [smem:[#allocation33_spill]] %s22778_s2 }
   0x3   :  { %22799 = sst [smem:[#allocation34_spill]] %s22779_s3 }
   0x4   :  { %22800 = sst [smem:[#allocation35_spill]] %s22780_s4 }
   0x5   :  { %22801 = sst [smem:[#allocation36_spill]] %s22786_s10 }
   0x6   :  { %22802 = sst [smem:[#allocation37_spill]] %s22787_s11 }
   0x7   :  { %17 = vsyncpa [#allocation3], 0 }
   0x8   :  { %19 = vsyncpa [#allocation3 + $0x1], 0 }
   0x9   :  { %20 = vsyncpa [#allocation6], 0 }
   0xa   :  { %22 = vsyncpa [#allocation6 + $0x1], 0 }
   0xb   :  { %23 = vsyncpa [#allocation9], 0 }
   0xc   :  { %24 = vsyncpa [#allocation12], 0 }
   0xd   :  { %25 = vsyncpa [#allocation15], 0 }
   0xe   :  { %26 = vsyncpa [#allocation18], 0 }
   0xf   :  { %27 = vsyncpa [#allocation4], 0 }
  0x10   :  { %29 = vsyncpa [#allocation4 + $0x1], 0 }
  0x11   :  { %30 = vsyncpa [#allocation21], 0 }
  0x12   :  { %32 = vsyncpa [#allocation21 + $0x1], 0  ;;  %s21993_s17 = smov 0   ;;  %s21995_s18 = smov 0  }
  0x13   :  { %s21997_s19 = smov 0   ;;  %s21999_s20 = smov 0  }
  0x14 LB: > { %s21915_s21 = smov [#allocation7]   ;;  %s22014_s23 = sadd.s32 4294967295, %s21913_s20   ;;  %s21913_s20 = sphi %s21999_s20, %s22840_s20   ;;  %s21909_s19 = sphi %s21997_s19, %s22839_s19   ;;  %s21905_s18 = sphi %s21995_s18, %s22838_s18   ;;  %s21901_s17 = sphi %s21993_s17, %s22837_s17  }
  0x15   : > { %s327_s22 = sshll.u32 %s21915_s21, 4  ;;  %p17049_p0 = scmp.ge.s32.totalorder %s21913_s20, 1  ;;  %s22019_s22 = int_to_ptr.vmem [resolvable:$true] %s327_s22 }
  0x16   : > { %p22792_p1 = scmp.eq.s32.totalorder %s22014_s23, 0  ;;  %p315_p2 = scmp.lt.s32.totalorder %s21913_s20, 3 }
  0x17   : > { %s21916_s25 = smov [#allocation8]   ;;  %s21917_s28 = smov [#allocation11]  }
  0x18   : > { %p22021_p3 = pnand %p17049_p0, %p315_p2  ;;  %s341_s26 = sshll.u32 %s21916_s25, 4  ;;  %s22034_s26 = int_to_ptr.vmem [resolvable:$true] %s341_s26 }
  0x19   : > { %s365_s29 = sshll.u32 %s21917_s28, 4  ;;  %s22806_s2 = sld [smem:[#allocation33_spill]]  ;;  %s22036_s29 = int_to_ptr.vmem [resolvable:$true] %s365_s29 }
  0x1a   : > { %s22803_s24 = scalar_select %p22021_p3, 1, 0 }
  0x1b   : > { %p19562_p5 = pneg %p22021_p3 }
  0x1c   : > { %22804 = sst [smem:[#allocation31_spill]] %s22803_s24 }
  0x1d   : > { %p22030_p6 = pnand %p19562_p5, %p22792_p1 }
  0x1f   : > { %s21507_s13 = scalar_lea.hbm %s22806_s2, 131072  ;;  %p22046_p8 = pneg %p22030_p6 }
  0x20   : > { %p21508_p7 = scmp.ne.s32.totalorder %s22806_s2, %s21507_s13  ;;  %p21514_p11 = scmp.lt.u32.totalorder %s21507_s13, %s22806_s2 }
  0x22   : > { %p21510_p9 = pnand %p22046_p8, %p21508_p7 }
  0x24   : > { %p21511_p10 = pneg %p21510_p9 }
  0x26   : > { %p21516_p12 = pnand %p21514_p11, %p21511_p10 }
  0x28   : > { %21519 = shalt.err (!%p21516_p12)
}
  0x29   : > { %s21520_s28 = scalar_lea.vmem %s22019_s22, 131072  ;;  %p21528_p5 = scmp.lt.s32.totalorder %s22019_s22, %s22019_s22 }
  0x2a   : > { %p21521_p13 = scmp.ne.s32.totalorder %s22019_s22, %s21520_s28  ;;  %p21529_p4 = scmp.lt.s32.totalorder %s21520_s28, %s21520_s28 }
  0x2c   : > { %p21523_p0 = pnand %p21521_p13, %p22046_p8  ;;  %p21530_p7 = por %p21529_p4, %p21528_p5 }
  0x2e   : > { %p21524_p2 = pneg %p21523_p0 }
  0x30   : > { %p21531_p9 = pnand %p21530_p7, %p21524_p2 }
  0x32   : > { %21534 = shalt.err (!%p21531_p9)
}
  0x33   : > { %s22791_s30 = smov 256   ;;  %s22794_s12 = smov 16  }
  0x34   : > { %19565 = dma.hbm_to_vmem [thread:$0]  (!%p22030_p6), %s22806_s2, 131072, %s22019_s22, [#allocation6], %s22791_s30, %s22791_s30, %s22794_s12  }
  0x35   : > { %s22808_s3 = sld [smem:[#allocation34_spill]] }
  0x3b   : > { %s21535_s25 = scalar_lea.hbm %s22808_s3, 64 }
  0x3c   : > { %p21536_p4 = scmp.ne.s32.totalorder %s22808_s3, %s21535_s25  ;;  %p21542_p12 = scmp.lt.u32.totalorder %s21535_s25, %s22808_s3 }
  0x3e   : > { %p21538_p10 = pnand %p21536_p4, %p22046_p8 }
  0x40   : > { %p21539_p11 = pneg %p21538_p10 }
  0x42   : > { %p21544_p13 = pnand %p21542_p12, %p21539_p11 }
  0x44   : > { %21547 = shalt.err (!%p21544_p13)
}
  0x45   : > { %s21548_s22 = scalar_lea.vmem %s22034_s26, 64  ;;  %p21556_p7 = scmp.lt.s32.totalorder %s22034_s26, %s22034_s26 }
  0x46   : > { %p21549_p0 = scmp.ne.s32.totalorder %s22034_s26, %s21548_s22  ;;  %p21557_p9 = scmp.lt.s32.totalorder %s21548_s22, %s21548_s22 }
  0x48   : > { %p21551_p2 = pnand %p21549_p0, %p22046_p8  ;;  %p21558_p4 = por %p21557_p9, %p21556_p7 }
  0x4a   : > { %p21552_p5 = pneg %p21551_p2 }
  0x4c   : > { %p21559_p10 = pnand %p21558_p4, %p21552_p5 }
  0x4e   : > { %21562 = shalt.err (!%p21559_p10)
}
  0x4f   : > { %19568 = dma.hbm_to_vmem [thread:$0]  (!%p22030_p6), %s22808_s3, 64, %s22034_s26, [#allocation9]  }
  0x50   : > { %s21563_s14 = scalar_lea.hbm %s22781_s5, 32 }
  0x51   : > { %p21564_p11 = scmp.ne.s32.totalorder %s22781_s5, %s21563_s14  ;;  %p21570_p0 = scmp.lt.u32.totalorder %s21563_s14, %s22781_s5 }
  0x53   : > { %p21566_p12 = pnand %p21564_p11, %p22046_p8 }
  0x55   : > { %p21567_p13 = pneg %p21566_p12 }
  0x57   : > { %p21572_p2 = pnand %p21570_p0, %p21567_p13 }
  0x59   : > { %21575 = shalt.err (!%p21572_p2)
}
  0x5a   : > { %s21576_s26 = scalar_lea.vmem %s22036_s29, 32  ;;  %p21584_p4 = scmp.lt.s32.totalorder %s22036_s29, %s22036_s29 }
  0x5b   : > { %p21577_p5 = scmp.ne.s32.totalorder %s22036_s29, %s21576_s26  ;;  %p21585_p10 = scmp.lt.s32.totalorder %s21576_s26, %s21576_s26 }
  0x5d   : > { %p21579_p7 = pnand %p21577_p5, %p22046_p8  ;;  %p21586_p11 = por %p21585_p10, %p21584_p4 }
  0x5f   : > { %p21580_p9 = pneg %p21579_p7 }
  0x61   : > { %p21587_p12 = pnand %p21586_p11, %p21580_p9 }
  0x63   : > { %21590 = shalt.err (!%p21587_p12)
}
  0x64   : > { %19574 = dma.hbm_to_vmem [thread:$0]  (!%p22030_p6), %s22781_s5, 32, %s22036_s29, [#allocation12]  }
  0x65   : > { %s21920_s11 = smov [#allocation14]   ;;  %s21921_s13 = smov [#allocation10]  }
  0x66   : > { %s389_s24 = sshll.u32 %s21920_s11, 4  ;;  %s351_s14 = sshll.u32 %s21921_s13, 4  ;;  %s390_s24 = int_to_ptr.vmem [resolvable:$true] %s389_s24  ;;  %s352_s14 = int_to_ptr.vmem [resolvable:$true] %s351_s14 }
  0x67   : > { %s21591_s25 = scalar_lea.hbm %s22783_s7, 64 }
  0x68   : > { %p21592_p13 = scmp.ne.s32.totalorder %s22783_s7, %s21591_s25  ;;  %p21598_p5 = scmp.lt.u32.totalorder %s21591_s25, %s22783_s7 }
  0x6a   : > { %p21594_p0 = pnand %p21592_p13, %p22046_p8 }
  0x6c   : > { %p21595_p2 = pneg %p21594_p0 }
  0x6e   : > { %p21600_p7 = pnand %p21598_p5, %p21595_p2 }
  0x70   : > { %21603 = shalt.err (!%p21600_p7)
}
  0x71   : > { %s21604_s29 = scalar_lea.vmem %s390_s24, 64  ;;  %p21612_p11 = scmp.lt.s32.totalorder %s390_s24, %s390_s24 }
  0x72   : > { %p21605_p9 = scmp.ne.s32.totalorder %s390_s24, %s21604_s29  ;;  %p21613_p12 = scmp.lt.s32.totalorder %s21604_s29, %s21604_s29 }
  0x74   : > { %p21607_p4 = pnand %p21605_p9, %p22046_p8  ;;  %p21614_p1 = por %p21613_p12, %p21612_p11 }
  0x76   : > { %p21608_p10 = pneg %p21607_p4 }
  0x78   : > { %p21615_p3 = pnand %p21614_p1, %p21608_p10 }
  0x7a   : > { %21618 = shalt.err (!%p21615_p3)
}
  0x7b   : > { %19580 = dma.hbm_to_vmem [thread:$0]  (!%p22030_p6), %s22783_s7, 64, %s390_s24, [#allocation15]  }
  0x7c   : > { %s22809_s4 = sld [smem:[#allocation35_spill]] }
  0x82   : > { %s21619_s15 = scalar_lea.hbm %s22809_s4, 8192 }
  0x83   : > { %p21620_p13 = scmp.ne.s32.totalorder %s22809_s4, %s21619_s15  ;;  %p21626_p3 = scmp.lt.u32.totalorder %s21619_s15, %s22809_s4 }
  0x85   : > { %p21622_p0 = pnand %p21620_p13, %p22046_p8 }
  0x87   : > { %p21623_p1 = pneg %p21622_p0 }
  0x89   : > { %p21628_p2 = pnand %p21626_p3, %p21623_p1 }
  0x8b   : > { %21631 = shalt.err (!%p21628_p2)
}
  0x8c   : > { %s21632_s22 = scalar_lea.vmem %s352_s14, 8192  ;;  %p21640_p4 = scmp.lt.s32.totalorder %s352_s14, %s352_s14 }
  0x8d   : > { %p21633_p5 = scmp.ne.s32.totalorder %s352_s14, %s21632_s22  ;;  %p21641_p10 = scmp.lt.s32.totalorder %s21632_s22, %s21632_s22 }
  0x8f   : > { %p21635_p7 = pnand %p21633_p5, %p22046_p8  ;;  %p21642_p11 = por %p21641_p10, %p21640_p4 }
  0x91   : > { %p21636_p9 = pneg %p21635_p7 }
  0x93   : > { %p21643_p12 = pnand %p21642_p11, %p21636_p9 }
  0x95   : > { %21646 = shalt.err (!%p21643_p12)
}
  0x96   : > { %s21922_s24 = smov 128   ;;  %s21923_s29 = smov 8  }
  0x97   : > { %19571 = dma.hbm_to_vmem [thread:$0]  (!%p22030_p6), %s22809_s4, 8192, %s352_s14, [#allocation9], %s21922_s24, %s21922_s24, %s21923_s29  }
  0x98   : > { %s21924_s30 = smov [#allocation13]   ;;  %s21925_s15 = smov [#allocation16]  }
  0x99   : > { %s375_s13 = sshll.u32 %s21924_s30, 4  ;;  %s399_s21 = sshll.u32 %s21925_s15, 4  ;;  %s376_s13 = int_to_ptr.vmem [resolvable:$true] %s375_s13  ;;  %s400_s21 = int_to_ptr.vmem [resolvable:$true] %s399_s21 }
  0x9a   : > { %s21647_s26 = scalar_lea.hbm %s22782_s6, 4096 }
  0x9b   : > { %p21648_p13 = scmp.ne.s32.totalorder %s22782_s6, %s21647_s26  ;;  %p21654_p3 = scmp.lt.u32.totalorder %s21647_s26, %s22782_s6 }
  0x9d   : > { %p21650_p0 = pnand %p21648_p13, %p22046_p8 }
  0x9f   : > { %p21651_p1 = pneg %p21650_p0 }
  0xa1   : > { %p21656_p2 = pnand %p21654_p3, %p21651_p1 }
  0xa3   : > { %21659 = shalt.err (!%p21656_p2)
}
  0xa4   : > { %s21660_s14 = scalar_lea.vmem %s376_s13, 4096  ;;  %p21668_p4 = scmp.lt.s32.totalorder %s376_s13, %s376_s13 }
  0xa5   : > { %p21661_p5 = scmp.ne.s32.totalorder %s376_s13, %s21660_s14  ;;  %p21669_p10 = scmp.lt.s32.totalorder %s21660_s14, %s21660_s14 }
  0xa7   : > { %p21663_p7 = pnand %p21661_p5, %p22046_p8  ;;  %p21670_p11 = por %p21669_p10, %p21668_p4 }
  0xa9   : > { %p21664_p9 = pneg %p21663_p7 }
  0xab   : > { %p21671_p12 = pnand %p21670_p11, %p21664_p9 }
  0xad   : > { %21674 = shalt.err (!%p21671_p12)
}
  0xae   : > { %s22810_s12 = smov 16   ;;  %s22811_s29 = smov 256  }
  0xaf   : > { %19577 = dma.hbm_to_vmem [thread:$0]  (!%p22030_p6), %s22782_s6, 4096, %s376_s13, [#allocation12], %s22811_s29, %s22811_s29, %s22810_s12  }
  0xb0   : > { %s21675_s30 = scalar_lea.hbm %s22784_s8, 131072 }
  0xb1   : > { %p21676_p13 = scmp.ne.s32.totalorder %s22784_s8, %s21675_s30  ;;  %p21682_p3 = scmp.lt.u32.totalorder %s21675_s30, %s22784_s8 }
  0xb3   : > { %p21678_p0 = pnand %p21676_p13, %p22046_p8 }
  0xb5   : > { %p21679_p1 = pneg %p21678_p0 }
  0xb7   : > { %p21684_p2 = pnand %p21682_p3, %p21679_p1 }
  0xb9   : > { %21687 = shalt.err (!%p21684_p2)
}
  0xba   : > { %s21688_s22 = scalar_lea.vmem %s400_s21, 131072  ;;  %p21696_p4 = scmp.lt.s32.totalorder %s400_s21, %s400_s21 }
  0xbb   : > { %p21689_p5 = scmp.ne.s32.totalorder %s400_s21, %s21688_s22  ;;  %p21697_p10 = scmp.lt.s32.totalorder %s21688_s22, %s21688_s22 }
  0xbd   : > { %p21691_p7 = pnand %p21689_p5, %p22046_p8  ;;  %p21698_p11 = por %p21697_p10, %p21696_p4 }
  0xbf   : > { %p21692_p9 = pneg %p21691_p7 }
  0xc1   : > { %p21699_p12 = pnand %p21698_p11, %p21692_p9 }
  0xc3   : > { %21702 = shalt.err (!%p21699_p12)
}
  0xc4   : > { %s21926_s13 = smov 2048   ;;  %s21927_s29 = smov [#allocation17]  }
  0xc5   : > { %19583 = dma.hbm_to_vmem [thread:$0]  (!%p22030_p6), %s22784_s8, 131072, %s400_s21, [#allocation15], %s21926_s13, %s21926_s13, %s21922_s24  }
  0xc6   : > { %s413_s2 = sshll.u32 %s21927_s29, 4  ;;  %s21703_s11 = scalar_lea.hbm %s22785_s9, 512  ;;  %s414_s2 = int_to_ptr.vmem [resolvable:$true] %s413_s2 }
  0xc7   : > { %p21704_p13 = scmp.ne.s32.totalorder %s22785_s9, %s21703_s11  ;;  %p21710_p3 = scmp.lt.u32.totalorder %s21703_s11, %s22785_s9 }
  0xc9   : > { %p21706_p0 = pnand %p21704_p13, %p22046_p8 }
  0xcb   : > { %p21707_p1 = pneg %p21706_p0 }
  0xcd   : > { %p21712_p2 = pnand %p21710_p3, %p21707_p1 }
  0xcf   : > { %21715 = shalt.err (!%p21712_p2)
}
  0xd0   : > { %s21716_s24 = scalar_lea.vmem %s414_s2, 512  ;;  %p21724_p4 = scmp.lt.s32.totalorder %s414_s2, %s414_s2 }
  0xd1   : > { %p21717_p5 = scmp.ne.s32.totalorder %s414_s2, %s21716_s24  ;;  %p21725_p10 = scmp.lt.s32.totalorder %s21716_s24, %s21716_s24 }
  0xd3   : > { %p21719_p7 = pnand %p21717_p5, %p22046_p8  ;;  %p21726_p11 = por %p21725_p10, %p21724_p4 }
  0xd5   : > { %p21720_p9 = pneg %p21719_p7 }
  0xd7   : > { %p21727_p12 = pnand %p21726_p11, %p21720_p9 }
  0xd9   : > { %21730 = shalt.err (!%p21727_p12)
}
  0xda   : > { %19586 = dma.hbm_to_vmem [thread:$0]  (!%p22030_p6), %s22785_s9, 512, %s414_s2, [#allocation18]  }
  0xdb   : > { %s17048_s16 = sadd.s32 4294967294, %s21913_s20   ;;  %s22214_s27 = sadd.s32 1, %s21913_s20  }
  0xdc   : > { %s45_s22 = sadd.s32 1, %s21909_s19  ;;  %s42_s13 = ssub.s32 %s21913_s20, %s22214_s27 }
  0xdd   : > { %p52_p8 = scmp.ne.s32.totalorder %s21909_s19, %s21905_s18  ;;  %p43_p13 = scmp.eq.s32.totalorder %s42_s13, 0 }
  0xde   : > { %p53_p0 = scmp.eq.s32.totalorder %s21913_s20, 0  ;;  %p58_p1 = scmp.ne.s32.totalorder %s21905_s18, %s21901_s17 }
  0xdf   : > { %p276_p3 = scmp.eq.s32.totalorder %s22014_s23, 1  ;;  %p22812_p5 = scmp.eq.s32.totalorder %s22014_s23, 0 }
  0xe0   : > { %s22226_s14 = scalar_select %p43_p13, %s21909_s19, %s45_s22  }
  0xe1   : > { %p54_p2 = por %p53_p0, %p52_p8  ;;  %p22230_p7 = por %p22812_p5, %p58_p1 }
  0xe2   : > { %p22234_p6 = por %p276_p3, %p52_p8  ;;  %p282_p9 = scmp.eq.s32.totalorder %s17048_s16, 1 }
  0xe3   : > { %s22813_s12 = scalar_select %p22230_p7, 1, 0 }
  0xe4   : > { %s22814_s29 = scalar_select %p22234_p6, 1, 0 }
  0xe5   : > { %p19609_p4 = scmp.lt.s32.totalorder %s21913_s20, 2  ;;  %s22240_s2 = sand.u32 1, %s21909_s19  }
  0xe6   : > { %p22242_p10 = por %p282_p9, %p58_p1  ;;  %s17059_s10 = sshll.u32 %s22240_s2, 7 }
  0xe7   : > { %s19293_s11 = sshll.u32 %s21913_s20, 11  ;;  %s22816_s0 = sld [smem:[#allocation32_spill]] }
  0xe8   : > { %s22815_s3 = scalar_select %p22242_p10, 1, 0 }
  0xe9   : > { %s428_s28 = scalar_lea.vmem [#allocation2], %s17059_s10  ;;  %p22253_p11 = pnand %p19609_p4, %p54_p2 }
  0xea   : > { %s436_s24 = sshll.u32 %s428_s28, 4  ;;  %s425_s16 = scalar_lea.sflag [#allocation3], %s22240_s2  ;;  %s22257_s24 = int_to_ptr.vmem [resolvable:$true] %s436_s24 }
  0xeb   : > { %p21733_p8 = pneg %p22253_p11 }
  0xed   : > { %s22251_s25 = scalar_lea.hbm %s22816_s0, %s19293_s11  ;;  %s21736_s11 = scalar_lea.hbm %s22816_s0, 4096 }
  0xee   : > { %s21731_s22 = scalar_lea.hbm %s22251_s25, 2048  ;;  %p21737_p1 = scmp.lt.u32.totalorder %s22251_s25, %s22816_s0 }
  0xef   : > { %p21732_p12 = scmp.ne.s32.totalorder %s22251_s25, %s21731_s22  ;;  %p21738_p3 = scmp.lt.u32.totalorder %s21736_s11, %s21731_s22 }
  0xf0   : > { %p21740_p5 = scmp.lt.u32.totalorder %s21731_s22, %s22251_s25 }
  0xf1   : > { %p21734_p13 = pnand %p21733_p8, %p21732_p12  ;;  %p21739_p2 = por %p21738_p3, %p21737_p1 }
  0xf3   : > { %p21735_p0 = pneg %p21734_p13  ;;  %p21741_p9 = por %p21740_p5, %p21739_p2 }
  0xf5   : > { %p21742_p4 = pnand %p21741_p9, %p21735_p0 }
  0xf7   : > { %21745 = shalt.err (!%p21742_p4)
}
  0xf8   : > { %s21746_s28 = scalar_lea.vmem %s22257_s24, 2048  ;;  %s21928_s13 = smov [#allocation2]  }
  0xf9   : > { %p21747_p12 = scmp.ne.s32.totalorder %s22257_s24, %s21746_s28  ;;  %s21751_s10 = sshll.u32 %s21928_s13, 4  ;;  %s21752_s10 = int_to_ptr.vmem [resolvable:$false] %s21751_s10 }
  0xfa   : > { %s21753_s30 = scalar_lea.vmem %s21752_s10, 4096  ;;  %p21754_p6 = scmp.lt.s32.totalorder %s22257_s24, %s21752_s10 }
  0xfb   : > { %p21749_p13 = pnand %p21747_p12, %p21733_p8  ;;  %p21755_p1 = scmp.lt.s32.totalorder %s21753_s30, %s21746_s28 }
  0xfd   : > { %p21750_p10 = pneg %p21749_p13  ;;  %p21756_p3 = por %p21755_p1, %p21754_p6 }
  0xff   : > { %p21757_p2 = pnand %p21756_p3, %p21750_p10 }
 0x101   : > { %21760 = shalt.err (!%p21757_p2)
}
 0x102   : > { %19590 = dma.hbm_to_vmem [thread:$0]  (!%p22253_p11), %s22251_s25, 2048, %s22257_s24, %s425_s16  }
 0x103   : > { %s17062_s22 = sshll.u32 %s22240_s2, 3  ;;  %s17063_s11 = sshll.u32 %s21913_s20, 7 }
 0x104   : > { %s22291_s26 = scalar_lea.hbm %s22777_s1, %s17063_s11  ;;  %s447_s28 = scalar_lea.vmem [#allocation5], %s17062_s22 }
 0x105   : > { %s454_s10 = sshll.u32 %s447_s28, 4  ;;  %s22818_s30 = sand.u32 1, %s21913_s20   ;;  %s455_s10 = int_to_ptr.vmem [resolvable:$true] %s454_s10 }
 0x106   : > { %s444_s0 = scalar_lea.sflag [#allocation6], %s22818_s30  ;;  %s21761_s4 = scalar_lea.hbm %s22291_s26, 128 }
 0x107   : > { %p21762_p6 = scmp.ne.s32.totalorder %s22291_s26, %s21761_s4  ;;  %s21766_s24 = scalar_lea.hbm %s22777_s1, 256 }
 0x108   : > { %p21767_p5 = scmp.lt.u32.totalorder %s22291_s26, %s22777_s1  ;;  %p21768_p9 = scmp.lt.u32.totalorder %s21766_s24, %s21761_s4 }
 0x109   : > { %p21764_p10 = pnand %p21762_p6, %p21733_p8  ;;  %p21770_p12 = scmp.lt.u32.totalorder %s21761_s4, %s22291_s26 }
 0x10a   : > { %p21769_p4 = por %p21768_p9, %p21767_p5 }
 0x10b   : > { %p21765_p0 = pneg %p21764_p10 }
 0x10c   : > { %p21771_p13 = por %p21770_p12, %p21769_p4 }
 0x10e   : > { %p21772_p1 = pnand %p21771_p13, %p21765_p0 }
 0x110   : > { %21775 = shalt.err (!%p21772_p1)
}
 0x111   : > { %s21776_s22 = scalar_lea.vmem %s455_s10, 128  ;;  %s21929_s15 = smov [#allocation5]  }
 0x112   : > { %p21777_p3 = scmp.ne.s32.totalorder %s455_s10, %s21776_s22  ;;  %s21781_s13 = sshll.u32 %s21929_s15, 4  ;;  %s21782_s13 = int_to_ptr.vmem [resolvable:$false] %s21781_s13 }
 0x113   : > { %s21783_s28 = scalar_lea.vmem %s21782_s13, 256  ;;  %p21784_p10 = scmp.lt.s32.totalorder %s455_s10, %s21782_s13 }
 0x114   : > { %p21779_p2 = pnand %p21777_p3, %p21733_p8  ;;  %p21785_p7 = scmp.lt.s32.totalorder %s21783_s28, %s21776_s22 }
 0x116   : > { %p21780_p6 = pneg %p21779_p2  ;;  %p21786_p5 = por %p21785_p7, %p21784_p10 }
 0x118   : > { %p21787_p9 = pnand %p21786_p5, %p21780_p6 }
 0x11a   : > { %21790 = shalt.err (!%p21787_p9)
}
 0x11b   : > { %19593 = dma.hbm_to_vmem [thread:$0]  (!%p22253_p11), %s22291_s26, 128, %s455_s10, %s444_s0  }
 0x11c   : > { %s22819_s4 = sld [smem:[#allocation31_spill]] }
 0x122   : > { %p22820_p0 = scmp.ne.s32.totalorder %s22819_s4, 0 }
 0x123   : > { %s22317_s30 = sand.u32 (!%p22820_p0), 1, %s21905_s18   ;;  %p22821_p7 = scmp.ne.s32.totalorder (!%p22820_p0), %s22813_s12, 0 }
 0x124   : > { %463 = sbr.rel (%p22820_p0) target bundleno = 3302 (0xce6), region = 60  ;;  %s17065_s2 = sshll.u32 (!%p22820_p0), %s22317_s30, 7 }
 0x125   : > { %s466_s25 = scalar_lea.sflag (!%p22820_p0), [#allocation3], %s22317_s30  ;;  %s22321_s24 = scalar_lea.vmem (!%p22820_p0), [#allocation2], %s17065_s2 }
 0x12b   : > { %21864 = dma.done.wait (%p22821_p7), %s466_s25, 2048  }
 0x12c   : > { %21866 = vsyncadd (%p22821_p7), %s466_s25, 4294965248  ;;  %s474_s0 = sand.u32 1, %s22014_s23   ;;  %s17066_s21 = sshll.u32 %s22317_s30, 3 }
 0x12d   : > { %s475_s26 = scalar_lea.sflag [#allocation6], %s474_s0  ;;  %s22329_s10 = scalar_lea.vmem [#allocation5], %s17066_s21 }
 0x12e   : > { %21868 = dma.done.wait (%p22821_p7), %s475_s26, 128  }
 0x12f   : > { %21870 = vsyncadd (%p22821_p7), %s475_s26, 4294967168  ;;  %p22822_p11 = scmp.eq.s32.totalorder %s22014_s23, 0 }
 0x131   : > { %21872 = dma.done.wait (%p22822_p11), [#allocation6], 131072   ;;  %p22823_p8 = pmov %p22822_p11 }
 0x133   : > { %21874 = vsyncadd (%p22823_p8), [#allocation6], 4294836224  ;;  %p22824_p4 = pmov %p22823_p8 }
 0x135   : > { %21876 = dma.done.wait (%p22824_p4), [#allocation9], 8256   ;;  %p22825_p12 = pmov %p22824_p4 }
 0x136   : > { %p22826_p13 = pmov %p22824_p4 }
 0x137   : > { %21878 = vsyncadd (%p22825_p12), [#allocation9], 4294959040 }
 0x138   : > { %21880 = dma.done.wait (%p22826_p13), [#allocation12], 4128   ;;  %p22827_p1 = pmov %p22824_p4 }
 0x13a   : > { %21882 = vsyncadd (%p22827_p1), [#allocation12], 4294963168  ;;  %p22828_p3 = pmov %p22827_p1 }
 0x13b   : > { %p22829_p2 = pmov %p22827_p1 }
 0x13c   : > { %21884 = dma.done.wait (%p22828_p3), [#allocation15], 131136  }
 0x13d   : > { %21886 = vsyncadd (%p22829_p2), [#allocation15], 4294836160  ;;  %p22830_p6 = pmov %p22827_p1 }
 0x13e   : > { %p22831_p10 = pmov %p22827_p1 }
 0x13f   : > { %21888 = dma.done.wait (%p22830_p6), [#allocation18], 512  }
 0x140   : > { %21890 = vsyncadd (%p22831_p10), [#allocation18], 4294966784  ;;  %v19665_v0 = vld [vmem:[#allocation7 + $0x4] ss:$16 sps:$4 sm:$0xff]   ;;  %v19667_v1 = vld [vmem:[#allocation7 + $0xc] ss:$16 sps:$4 sm:$0xff]  }
 0x141   : > { %6854 = vmatprep.subr.bf16.mxu0 %v19665_v0  ;;  %v19669_v2 = vld [vmem:[#allocation7] ss:$16 sps:$4 sm:$0xff]   ;;  %v19670_v3 = vld [vmem:[#allocation7 + $0x8] ss:$16 sps:$4 sm:$0xff]   ;;  %7510 = vmatprep.subr.bf16.mxu1 %v19667_v1  ;;  %v19671_v4 = vld [vmem:[#allocation7 + $0x24] ss:$16 sps:$4 sm:$0xff]  }
 0x142   : > { %6855 = vmatpush1.bf16.msra.mxu0 %v19669_v2  ;;  %7511 = vmatpush1.bf16.msra.mxu1 %v19670_v3  ;;  %v19673_v5 = vld [vmem:[#allocation7 + $0x2c] ss:$16 sps:$4 sm:$0xff]   ;;  %v19675_v6 = vld [vmem:[#allocation7 + $0x20] ss:$16 sps:$4 sm:$0xff]   ;;  %v19676_v7 = vld [vmem:[#allocation7 + $0x28] ss:$16 sps:$4 sm:$0xff]  }
 0x143   : > { %6856 = vmatprep.subr.bf16.mxu0 %v19671_v4  ;;  %7512 = vmatprep.subr.bf16.mxu1 %v19673_v5  ;;  %v19677_v8 = vld [vmem:[#allocation7 + $0x44] ss:$16 sps:$4 sm:$0xff]   ;;  %v19679_v9 = vld [vmem:[#allocation7 + $0x4c] ss:$16 sps:$4 sm:$0xff]   ;;  %v19681_v10 = vld [vmem:[#allocation7 + $0x40] ss:$16 sps:$4 sm:$0xff]  }
 0x144   : > { %v19682_v11 = vld [vmem:[#allocation7 + $0x48] ss:$16 sps:$4 sm:$0xff]   ;;  %v19683_v12 = vld [vmem:[#allocation7 + $0x64] ss:$16 sps:$4 sm:$0xff]   ;;  %v19685_v13 = vld [vmem:[#allocation7 + $0x6c] ss:$16 sps:$4 sm:$0xff]  }
 0x145   : > { %v19687_v14 = vld [vmem:[#allocation7 + $0x60] ss:$16 sps:$4 sm:$0xff]   ;;  %v19688_v15 = vld [vmem:[#allocation7 + $0x68] ss:$16 sps:$4 sm:$0xff]   ;;  %v19689_v16 = vld [vmem:[#allocation7 + $0x84] ss:$16 sps:$4 sm:$0xff]  }
 0x146   : > { %6857 = vmatpush1.bf16.msra.mxu0 %v19675_v6  ;;  %7513 = vmatpush1.bf16.msra.mxu1 %v19676_v7  ;;  %v19691_v17 = vld [vmem:[#allocation7 + $0x8c] ss:$16 sps:$4 sm:$0xff]   ;;  %v19693_v18 = vld [vmem:[#allocation7 + $0x80] ss:$16 sps:$4 sm:$0xff]   ;;  %v19694_v19 = vld [vmem:[#allocation7 + $0x88] ss:$16 sps:$4 sm:$0xff]  }
 0x147   : > { %6858 = vmatprep.subr.bf16.mxu0 %v19677_v8  ;;  %7514 = vmatprep.subr.bf16.mxu1 %v19679_v9  ;;  %v19695_v20 = vld [vmem:[#allocation7 + $0xa4] ss:$16 sps:$4 sm:$0xff]   ;;  %v19697_v21 = vld [vmem:[#allocation7 + $0xac] ss:$16 sps:$4 sm:$0xff]   ;;  %v19699_v22 = vld [vmem:[#allocation7 + $0xa0] ss:$16 sps:$4 sm:$0xff]  }
 0x148   : > { %v19700_v23 = vld [vmem:[#allocation7 + $0xa8] ss:$16 sps:$4 sm:$0xff]   ;;  %v19701_v24 = vld [vmem:[#allocation7 + $0xc4] ss:$16 sps:$4 sm:$0xff]   ;;  %v19703_v25 = vld [vmem:[#allocation7 + $0xcc] ss:$16 sps:$4 sm:$0xff]  }
 0x149   : > { %v19705_v26 = vld [vmem:[#allocation7 + $0xc0] ss:$16 sps:$4 sm:$0xff]   ;;  %v19706_v27 = vld [vmem:[#allocation7 + $0xc8] ss:$16 sps:$4 sm:$0xff]   ;;  %v19707_v28 = vld [vmem:[#allocation7 + $0xe4] ss:$16 sps:$4 sm:$0xff]  }
 0x14a   : > { %6859 = vmatpush1.bf16.msra.mxu0 %v19681_v10  ;;  %7515 = vmatpush1.bf16.msra.mxu1 %v19682_v11  ;;  %v19709_v29 = vld [vmem:[#allocation7 + $0xec] ss:$16 sps:$4 sm:$0xff]   ;;  %v19711_v30 = vld [vmem:[#allocation7 + $0xe0] ss:$16 sps:$4 sm:$0xff]   ;;  %v19712_v31 = vld [vmem:[#allocation7 + $0xe8] ss:$16 sps:$4 sm:$0xff]  }
 0x14b   : > { %6860 = vmatprep.subr.bf16.mxu0 %v19683_v12  ;;  %7516 = vmatprep.subr.bf16.mxu1 %v19685_v13  ;;  %v19713_v32 = vld [vmem:[#allocation7 + $0x104] ss:$16 sps:$4 sm:$0xff]   ;;  %v19715_v33 = vld [vmem:[#allocation7 + $0x10c] ss:$16 sps:$4 sm:$0xff]   ;;  %v19717_v34 = vld [vmem:[#allocation7 + $0x100] ss:$16 sps:$4 sm:$0xff]  }
 0x14c   : > { %v19718_v35 = vld [vmem:[#allocation7 + $0x108] ss:$16 sps:$4 sm:$0xff]   ;;  %v19719_v36 = vld [vmem:[#allocation7 + $0x124] ss:$16 sps:$4 sm:$0xff]   ;;  %v19721_v37 = vld [vmem:[#allocation7 + $0x12c] ss:$16 sps:$4 sm:$0xff]  }
 0x14d   : > { %v19723_v38 = vld [vmem:[#allocation7 + $0x120] ss:$16 sps:$4 sm:$0xff]   ;;  %v19724_v39 = vld [vmem:[#allocation7 + $0x128] ss:$16 sps:$4 sm:$0xff]   ;;  %v19725_v40 = vld [vmem:[#allocation7 + $0x144] ss:$16 sps:$4 sm:$0xff]  }
 0x14e   : > { %6861 = vmatpush1.bf16.msra.mxu0 %v19687_v14  ;;  %7517 = vmatpush1.bf16.msra.mxu1 %v19688_v15  ;;  %v19727_v41 = vld [vmem:[#allocation7 + $0x14c] ss:$16 sps:$4 sm:$0xff]   ;;  %v19729_v42 = vld [vmem:[#allocation7 + $0x140] ss:$16 sps:$4 sm:$0xff]   ;;  %v19730_v43 = vld [vmem:[#allocation7 + $0x148] ss:$16 sps:$4 sm:$0xff]  }
 0x14f   : > { %6862 = vmatprep.subr.bf16.mxu0 %v19689_v16  ;;  %7518 = vmatprep.subr.bf16.mxu1 %v19691_v17  ;;  %v19731_v44 = vld [vmem:[#allocation7 + $0x164] ss:$16 sps:$4 sm:$0xff]   ;;  %v19733_v45 = vld [vmem:[#allocation7 + $0x16c] ss:$16 sps:$4 sm:$0xff]   ;;  %v19735_v47 = vld [vmem:[#allocation7 + $0x160] ss:$16 sps:$4 sm:$0xff]  }
 0x150   : > { %v560_v46 = vld [vmem:[%s22321_s24] sm:$0xff]  ;;  %v19736_v49 = vld [vmem:[#allocation7 + $0x168] ss:$16 sps:$4 sm:$0xff]   ;;  %v19739_v51 = vld [vmem:[#allocation7 + $0x18c] ss:$16 sps:$4 sm:$0xff]   ;;  %s17076_s12 = sshll.u32 %s22317_s30, 4 }
 0x151   : > { %v17078_v48 = vcombine.high %v560_v46, %v560_v46  ;;  %v19737_v50 = vld [vmem:[#allocation7 + $0x184] ss:$16 sps:$4 sm:$0xff]   ;;  %v19741_v52 = vld [vmem:[#allocation7 + $0x180] ss:$16 sps:$4 sm:$0xff]   ;;  %v19742_v53 = vld [vmem:[#allocation7 + $0x188] ss:$16 sps:$4 sm:$0xff]   ;;  %v17077_v4 = vcombine.low %v560_v46, %v560_v46 }
 0x152   : > { %6863 = vmatpush1.bf16.msra.mxu0 %v19693_v18  ;;  %7519 = vmatpush1.bf16.msra.mxu1 %v19694_v19  ;;  %v19743_v54 = vld [vmem:[#allocation7 + $0x1a4] ss:$16 sps:$4 sm:$0xff]   ;;  %v19745_v55 = vld [vmem:[#allocation7 + $0x1ac] ss:$16 sps:$4 sm:$0xff]   ;;  %v19747_v56 = vld [vmem:[#allocation7 + $0x1a0] ss:$16 sps:$4 sm:$0xff]  }
 0x153   : > { %6864 = vmatprep.subr.bf16.mxu0 %v19695_v20  ;;  %7520 = vmatprep.subr.bf16.mxu1 %v19697_v21  ;;  %v19748_v57 = vld [vmem:[#allocation7 + $0x1a8] ss:$16 sps:$4 sm:$0xff]   ;;  %v19749_v58 = vld [vmem:[#allocation7 + $0x1c4] ss:$16 sps:$4 sm:$0xff]   ;;  %v19751_v59 = vld [vmem:[#allocation7 + $0x1cc] ss:$16 sps:$4 sm:$0xff]  }
 0x154   : > { %6886 = vmatprep.mubr.bf16.mxu0 %v17078_v48  ;;  %7542 = vmatprep.mubr.bf16.mxu1 %v17078_v48  ;;  %v19753_v60 = vld [vmem:[#allocation7 + $0x1c0] ss:$16 sps:$4 sm:$0xff]   ;;  %v19754_v61 = vld [vmem:[#allocation7 + $0x1c8] ss:$16 sps:$4 sm:$0xff]   ;;  %v19755_v62 = vld [vmem:[#allocation7 + $0x1e4] ss:$16 sps:$4 sm:$0xff]  }
 0x155   : > { %v19757_v63 = vld [vmem:[#allocation7 + $0x1ec] ss:$16 sps:$4 sm:$0xff]   ;;  %v19759_v0 = vld [vmem:[#allocation7 + $0x1e0] ss:$16 sps:$4 sm:$0xff]   ;;  %v19760_v1 = vld [vmem:[#allocation7 + $0x1e8] ss:$16 sps:$4 sm:$0xff]  }
 0x156   : > { %6865 = vmatpush1.bf16.msra.mxu0 %v19699_v22  ;;  %7521 = vmatpush1.bf16.msra.mxu1 %v19700_v23  ;;  %v19765_v2 = vld [vmem:[#allocation7 + $0x204] ss:$16 sps:$4 sm:$0xff]   ;;  %v19768_v3 = vld [vmem:[#allocation7 + $0x20c] ss:$16 sps:$4 sm:$0xff]   ;;  %v19763_v5 = vld [vmem:[#allocation7 + $0x200] ss:$16 sps:$4 sm:$0xff]  }
 0x157   : > { %6866 = vmatprep.subr.bf16.mxu0 %v19701_v24  ;;  %7522 = vmatprep.subr.bf16.mxu1 %v19703_v25  ;;  %v19766_v6 = vld [vmem:[#allocation7 + $0x208] ss:$16 sps:$4 sm:$0xff]   ;;  %v19771_v7 = vld [vmem:[#allocation7 + $0x224] ss:$16 sps:$4 sm:$0xff]   ;;  %v19774_v8 = vld [vmem:[#allocation7 + $0x22c] ss:$16 sps:$4 sm:$0xff]  }
 0x158   : > { %v19769_v9 = vld [vmem:[#allocation7 + $0x220] ss:$16 sps:$4 sm:$0xff]   ;;  %v19772_v10 = vld [vmem:[#allocation7 + $0x228] ss:$16 sps:$4 sm:$0xff]   ;;  %v19777_v11 = vld [vmem:[#allocation7 + $0x244] ss:$16 sps:$4 sm:$0xff]  }
 0x159   : > { %v19780_v12 = vld [vmem:[#allocation7 + $0x24c] ss:$16 sps:$4 sm:$0xff]   ;;  %v19775_v13 = vld [vmem:[#allocation7 + $0x240] ss:$16 sps:$4 sm:$0xff]   ;;  %v19778_v14 = vld [vmem:[#allocation7 + $0x248] ss:$16 sps:$4 sm:$0xff]  }
 0x15a   : > { %6867 = vmatpush1.bf16.msra.mxu0 %v19705_v26  ;;  %7523 = vmatpush1.bf16.msra.mxu1 %v19706_v27  ;;  %v19783_v15 = vld [vmem:[#allocation7 + $0x264] ss:$16 sps:$4 sm:$0xff]   ;;  %v19786_v16 = vld [vmem:[#allocation7 + $0x26c] ss:$16 sps:$4 sm:$0xff]   ;;  %v19781_v17 = vld [vmem:[#allocation7 + $0x260] ss:$16 sps:$4 sm:$0xff]  }
 0x15b   : > { %6868 = vmatprep.subr.bf16.mxu0 %v19707_v28  ;;  %7524 = vmatprep.subr.bf16.mxu1 %v19709_v29  ;;  %v19784_v18 = vld [vmem:[#allocation7 + $0x268] ss:$16 sps:$4 sm:$0xff]   ;;  %v19789_v19 = vld [vmem:[#allocation7 + $0x284] ss:$16 sps:$4 sm:$0xff]   ;;  %v19792_v20 = vld [vmem:[#allocation7 + $0x28c] ss:$16 sps:$4 sm:$0xff]  }
 0x15c   : > { %v19787_v21 = vld [vmem:[#allocation7 + $0x280] ss:$16 sps:$4 sm:$0xff]   ;;  %v19790_v22 = vld [vmem:[#allocation7 + $0x288] ss:$16 sps:$4 sm:$0xff]   ;;  %v19795_v23 = vld [vmem:[#allocation7 + $0x2a4] ss:$16 sps:$4 sm:$0xff]  }
 0x15d   : > { %v19798_v24 = vld [vmem:[#allocation7 + $0x2ac] ss:$16 sps:$4 sm:$0xff]   ;;  %v19793_v25 = vld [vmem:[#allocation7 + $0x2a0] ss:$16 sps:$4 sm:$0xff]   ;;  %v19796_v26 = vld [vmem:[#allocation7 + $0x2a8] ss:$16 sps:$4 sm:$0xff]  }
 0x15e   : > { %6869 = vmatpush1.bf16.msra.mxu0 %v19711_v30  ;;  %7525 = vmatpush1.bf16.msra.mxu1 %v19712_v31  ;;  %v19801_v27 = vld [vmem:[#allocation7 + $0x2c4] ss:$16 sps:$4 sm:$0xff]   ;;  %v19804_v28 = vld [vmem:[#allocation7 + $0x2cc] ss:$16 sps:$4 sm:$0xff]   ;;  %v19799_v31 = vld [vmem:[#allocation7 + $0x2c0] ss:$16 sps:$4 sm:$0xff]  }
 0x15f   : > { %6870 = vmatprep.subr.bf16.mxu0 %v19713_v32  ;;  %7526 = vmatprep.subr.bf16.mxu1 %v19715_v33  ;;  %v22357_v29 = vld [vmem:[%s22321_s24 + $0x8] sm:$0xff]  ;;  %v19807_v33 = vld [vmem:[#allocation7 + $0x2e4] ss:$16 sps:$4 sm:$0xff]   ;;  %s22492_s16 = scalar_lea.vmem [#allocation20], %s17076_s12  ;;  %s17075_s11 = sshll.u32 %s22317_s30, 8 }
 0x160   : > { %v17080_v30 = vcombine.high %v22357_v29, %v22357_v29  ;;  %v19802_v32 = vld [vmem:[#allocation7 + $0x2c8] ss:$16 sps:$4 sm:$0xff]   ;;  %v19828_v46 = vld [vmem:[#allocation7 + $0x34c] ss:$16 sps:$4 sm:$0xff]   ;;  %s22552_s22 = scalar_lea.vmem [#allocation19], %s17075_s11  ;;  %s19295_s15 = sshll.u32 %s22014_s23, 8 }
 0x161   : > { %v19826_v48 = vld [vmem:[#allocation7 + $0x348] ss:$16 sps:$4 sm:$0xff]   ;;  %s16847_s13 = sshll.u32 %s22492_s16, 4  ;;  %s22832_s2 = sld [smem:[#allocation37_spill]]  ;;  %s16848_s13 = int_to_ptr.vmem [resolvable:$true] %s16847_s13 }
 0x162   : > { %6871 = vmatpush1.bf16.msra.mxu0 %v19717_v34  ;;  %7527 = vmatpush1.bf16.msra.mxu1 %v19718_v35  ;;  %v19810_v34 = vld [vmem:[#allocation7 + $0x2ec] ss:$16 sps:$4 sm:$0xff]   ;;  %v19805_v35 = vld [vmem:[#allocation7 + $0x2e0] ss:$16 sps:$4 sm:$0xff]   ;;  %s21791_s0 = scalar_lea.vmem %s16848_s13, 256  ;;  %p22833_p9 = scmp.ne.s32.totalorder %s22814_s29, 0 }
 0x163   : > { %6872 = vmatprep.subr.bf16.mxu0 %v19719_v36  ;;  %7528 = vmatprep.subr.bf16.mxu1 %v19721_v37  ;;  %v19808_v36 = vld [vmem:[#allocation7 + $0x2e8] ss:$16 sps:$4 sm:$0xff]   ;;  %v19813_v37 = vld [vmem:[#allocation7 + $0x304] ss:$16 sps:$4 sm:$0xff]   ;;  %p21792_p5 = scmp.ne.s32.totalorder %s16848_s13, %s21791_s0  ;;  %s21931_s21 = smov [#allocation20]  }
 0x164   : > { %s21795_s26 = sshll.u32 %s21931_s21, 4  ;;  %s21796_s26 = int_to_ptr.vmem [resolvable:$false] %s21795_s26 }
 0x165   : > { %p21793_p0 = pnand %p21792_p5, %p22833_p9  ;;  %p21798_p11 = scmp.lt.s32.totalorder %s16848_s13, %s21796_s26 }
 0x166   : > { %6873 = vmatpush1.bf16.msra.mxu0 %v19723_v38  ;;  %7529 = vmatpush1.bf16.msra.mxu1 %v19724_v39  ;;  %v19816_v38 = vld [vmem:[#allocation7 + $0x30c] ss:$16 sps:$4 sm:$0xff]   ;;  %v19811_v39 = vld [vmem:[#allocation7 + $0x300] ss:$16 sps:$4 sm:$0xff]  }
 0x167   : > { %6874 = vmatprep.subr.bf16.mxu0 %v19725_v40  ;;  %7530 = vmatprep.subr.bf16.mxu1 %v19727_v41  ;;  %v19814_v40 = vld [vmem:[#allocation7 + $0x308] ss:$16 sps:$4 sm:$0xff]   ;;  %v19819_v41 = vld [vmem:[#allocation7 + $0x324] ss:$16 sps:$4 sm:$0xff]   ;;  %s22695_s25 = scalar_lea.hbm %s22832_s2, %s19295_s15  ;;  %p21794_p7 = pneg %p21793_p0 }
 0x16a   : > { %6875 = vmatpush1.bf16.msra.mxu0 %v19729_v42  ;;  %7531 = vmatpush1.bf16.msra.mxu1 %v19730_v43  ;;  %v19822_v42 = vld [vmem:[#allocation7 + $0x32c] ss:$16 sps:$4 sm:$0xff]   ;;  %v19817_v43 = vld [vmem:[#allocation7 + $0x320] ss:$16 sps:$4 sm:$0xff]  }
 0x16b   : > { %6876 = vmatprep.subr.bf16.mxu0 %v19731_v44  ;;  %7532 = vmatprep.subr.bf16.mxu1 %v19733_v45  ;;  %v19820_v44 = vld [vmem:[#allocation7 + $0x328] ss:$16 sps:$4 sm:$0xff]   ;;  %v19825_v45 = vld [vmem:[#allocation7 + $0x344] ss:$16 sps:$4 sm:$0xff]  }
 0x16e   : > { %6877 = vmatpush1.bf16.msra.mxu0 %v19735_v47  ;;  %7533 = vmatpush1.bf16.msra.mxu1 %v19736_v49  ;;  %v19823_v47 = vld [vmem:[#allocation7 + $0x340] ss:$16 sps:$4 sm:$0xff]   ;;  %v19831_v49 = vld [vmem:[#allocation7 + $0x364] ss:$16 sps:$4 sm:$0xff]  }
 0x16f   : > { %6878 = vmatprep.subr.bf16.mxu0 %v19737_v50  ;;  %7534 = vmatprep.subr.bf16.mxu1 %v19739_v51  ;;  %v19834_v50 = vld [vmem:[#allocation7 + $0x36c] ss:$16 sps:$4 sm:$0xff]   ;;  %v19829_v51 = vld [vmem:[#allocation7 + $0x360] ss:$16 sps:$4 sm:$0xff]  }
 0x172   : > { %6879 = vmatpush1.bf16.msra.mxu0 %v19741_v52  ;;  %7535 = vmatpush1.bf16.msra.mxu1 %v19742_v53  ;;  %v19832_v52 = vld [vmem:[#allocation7 + $0x368] ss:$16 sps:$4 sm:$0xff]   ;;  %v19837_v53 = vld [vmem:[#allocation7 + $0x384] ss:$16 sps:$4 sm:$0xff]  }
 0x173   : > { %6880 = vmatprep.subr.bf16.mxu0 %v19743_v54  ;;  %7536 = vmatprep.subr.bf16.mxu1 %v19745_v55  ;;  %v19840_v54 = vld [vmem:[#allocation7 + $0x38c] ss:$16 sps:$4 sm:$0xff]   ;;  %v19835_v55 = vld [vmem:[#allocation7 + $0x380] ss:$16 sps:$4 sm:$0xff]  }
 0x176   : > { %6881 = vmatpush1.bf16.msra.mxu0 %v19747_v56  ;;  %7537 = vmatpush1.bf16.msra.mxu1 %v19748_v57  ;;  %v19838_v56 = vld [vmem:[#allocation7 + $0x388] ss:$16 sps:$4 sm:$0xff]   ;;  %v19843_v57 = vld [vmem:[#allocation7 + $0x3a4] ss:$16 sps:$4 sm:$0xff]  }
 0x177   : > { %6882 = vmatprep.subr.bf16.mxu0 %v19749_v58  ;;  %7538 = vmatprep.subr.bf16.mxu1 %v19751_v59  ;;  %v19846_v58 = vld [vmem:[#allocation7 + $0x3ac] ss:$16 sps:$4 sm:$0xff]   ;;  %v19841_v59 = vld [vmem:[#allocation7 + $0x3a0] ss:$16 sps:$4 sm:$0xff]  }
 0x17a   : > { %6883 = vmatpush1.bf16.msra.mxu0 %v19753_v60  ;;  %7539 = vmatpush1.bf16.msra.mxu1 %v19754_v61  ;;  %v19844_v60 = vld [vmem:[#allocation7 + $0x3a8] ss:$16 sps:$4 sm:$0xff]   ;;  %v19849_v61 = vld [vmem:[#allocation7 + $0x3c4] ss:$16 sps:$4 sm:$0xff]  }
 0x17b   : > { %6884 = vmatprep.subr.bf16.mxu0 %v19755_v62  ;;  %7540 = vmatprep.subr.bf16.mxu1 %v19757_v63  ;;  %v19852_v62 = vld [vmem:[#allocation7 + $0x3cc] ss:$16 sps:$4 sm:$0xff]   ;;  %v19847_v63 = vld [vmem:[#allocation7 + $0x3c0] ss:$16 sps:$4 sm:$0xff]  }
 0x17e   : > { %6885 = vmatpush1.bf16.msra.mxu0 %v19759_v0  ;;  %7541 = vmatpush1.bf16.msra.mxu1 %v19760_v1  ;;  %v19850_v0 = vld [vmem:[#allocation7 + $0x3c8] ss:$16 sps:$4 sm:$0xff]   ;;  %v19855_v1 = vld [vmem:[#allocation7 + $0x3e4] ss:$16 sps:$4 sm:$0xff]  }
 0x17f   : > { %6895 = vmatprep.subr.bf16.mxu0 %v19765_v2  ;;  %7551 = vmatprep.subr.bf16.mxu1 %v19768_v3  ;;  %v19858_v2 = vld [vmem:[#allocation7 + $0x3ec] ss:$16 sps:$4 sm:$0xff]   ;;  %v19853_v3 = vld [vmem:[#allocation7 + $0x3e0] ss:$16 sps:$4 sm:$0xff]  }
 0x181   : > { %6887 = vmatmul.mubr.bf16.vlgmr.msra.gmra.mrb[0].mxu0 %v17077_v4  ;;  %7543 = vmatmul.mubr.bf16.vlgmr.msra.gmra.mrb[0].mxu1 %v17077_v4  ;;  %v19856_v4 = vld [vmem:[#allocation7 + $0x3e8] ss:$16 sps:$4 sm:$0xff]  }
 0x182   : > { %6896 = vmatpush1.bf16.msra.mxu0 %v19763_v5  ;;  %7552 = vmatpush1.bf16.msra.mxu1 %v19766_v6  ;;  %v19863_v5 = vld [vmem:[#allocation7 + $0x404] ss:$16 sps:$4 sm:$0xff]   ;;  %v19866_v6 = vld [vmem:[#allocation7 + $0x40c] ss:$16 sps:$4 sm:$0xff]  }
 0x183   : > { %6897 = vmatprep.subr.bf16.mxu0 %v19771_v7  ;;  %7553 = vmatprep.subr.bf16.mxu1 %v19774_v8  ;;  %v17079_v7 = vcombine.low %v22357_v29, %v22357_v29  ;;  %v19861_v8 = vld [vmem:[#allocation7 + $0x400] ss:$16 sps:$4 sm:$0xff]   ;;  %v19896_v29 = vld [vmem:[#allocation7 + $0x4ac] ss:$16 sps:$4 sm:$0xff]  }
 0x184   : > { %6927 = vmatprep.mubr.bf16.mxu0 %v17080_v30  ;;  %7583 = vmatprep.mubr.bf16.mxu1 %v17080_v30  ;;  %v19891_v30 = vld [vmem:[#allocation7 + $0x4a0] ss:$16 sps:$4 sm:$0xff]  }
 0x186   : > { %6898 = vmatpush1.bf16.msra.mxu0 %v19769_v9  ;;  %7554 = vmatpush1.bf16.msra.mxu1 %v19772_v10  ;;  %v19864_v9 = vld [vmem:[#allocation7 + $0x408] ss:$16 sps:$4 sm:$0xff]   ;;  %v19869_v10 = vld [vmem:[#allocation7 + $0x424] ss:$16 sps:$4 sm:$0xff]  }
 0x187   : > { %6899 = vmatprep.subr.bf16.mxu0 %v19777_v11  ;;  %7555 = vmatprep.subr.bf16.mxu1 %v19780_v12  ;;  %v22364_v11 = vld [vmem:[%s22321_s24 + $0x10] sm:$0xff]  ;;  %v19872_v12 = vld [vmem:[#allocation7 + $0x42c] ss:$16 sps:$4 sm:$0xff]  }
 0x18a   : > { %6900 = vmatpush1.bf16.msra.mxu0 %v19775_v13  ;;  %7556 = vmatpush1.bf16.msra.mxu1 %v19778_v14  ;;  %v17082_v13 = vcombine.high %v22364_v11, %v22364_v11  ;;  %v19867_v14 = vld [vmem:[#allocation7 + $0x420] ss:$16 sps:$4 sm:$0xff]  }
 0x18b   : > { %6901 = vmatprep.subr.bf16.mxu0 %v19783_v15  ;;  %7557 = vmatprep.subr.bf16.mxu1 %v19786_v16  ;;  %v19870_v15 = vld [vmem:[#allocation7 + $0x428] ss:$16 sps:$4 sm:$0xff]   ;;  %v19875_v16 = vld [vmem:[#allocation7 + $0x444] ss:$16 sps:$4 sm:$0xff]  }
 0x18e   : > { %6902 = vmatpush1.bf16.msra.mxu0 %v19781_v17  ;;  %7558 = vmatpush1.bf16.msra.mxu1 %v19784_v18  ;;  %v19878_v17 = vld [vmem:[#allocation7 + $0x44c] ss:$16 sps:$4 sm:$0xff]   ;;  %v19873_v18 = vld [vmem:[#allocation7 + $0x440] ss:$16 sps:$4 sm:$0xff]  }
 0x18f   : > { %6903 = vmatprep.subr.bf16.mxu0 %v19789_v19  ;;  %7559 = vmatprep.subr.bf16.mxu1 %v19792_v20  ;;  %v19876_v19 = vld [vmem:[#allocation7 + $0x448] ss:$16 sps:$4 sm:$0xff]   ;;  %v19881_v20 = vld [vmem:[#allocation7 + $0x464] ss:$16 sps:$4 sm:$0xff]  }
 0x192   : > { %6904 = vmatpush1.bf16.msra.mxu0 %v19787_v21  ;;  %7560 = vmatpush1.bf16.msra.mxu1 %v19790_v22  ;;  %v19884_v21 = vld [vmem:[#allocation7 + $0x46c] ss:$16 sps:$4 sm:$0xff]   ;;  %v19879_v22 = vld [vmem:[#allocation7 + $0x460] ss:$16 sps:$4 sm:$0xff]  }
 0x193   : > { %6905 = vmatprep.subr.bf16.mxu0 %v19795_v23  ;;  %7561 = vmatprep.subr.bf16.mxu1 %v19798_v24  ;;  %v19882_v23 = vld [vmem:[#allocation7 + $0x468] ss:$16 sps:$4 sm:$0xff]   ;;  %v19887_v24 = vld [vmem:[#allocation7 + $0x484] ss:$16 sps:$4 sm:$0xff]  }
 0x196   : > { %6906 = vmatpush1.bf16.msra.mxu0 %v19793_v25  ;;  %7562 = vmatpush1.bf16.msra.mxu1 %v19796_v26  ;;  %v19890_v25 = vld [vmem:[#allocation7 + $0x48c] ss:$16 sps:$4 sm:$0xff]   ;;  %v19885_v26 = vld [vmem:[#allocation7 + $0x480] ss:$16 sps:$4 sm:$0xff]  }
 0x197   : > { %6907 = vmatprep.subr.bf16.mxu0 %v19801_v27  ;;  %7563 = vmatprep.subr.bf16.mxu1 %v19804_v28  ;;  %v19888_v27 = vld [vmem:[#allocation7 + $0x488] ss:$16 sps:$4 sm:$0xff]   ;;  %v19893_v28 = vld [vmem:[#allocation7 + $0x4a4] ss:$16 sps:$4 sm:$0xff]  }
 0x19a   : > { %6908 = vmatpush1.bf16.msra.mxu0 %v19799_v31  ;;  %7564 = vmatpush1.bf16.msra.mxu1 %v19802_v32  ;;  %v19894_v31 = vld [vmem:[#allocation7 + $0x4a8] ss:$16 sps:$4 sm:$0xff]   ;;  %v19899_v32 = vld [vmem:[#allocation7 + $0x4c4] ss:$16 sps:$4 sm:$0xff]  }
 0x19b   : > { %6909 = vmatprep.subr.bf16.mxu0 %v19807_v33  ;;  %7565 = vmatprep.subr.bf16.mxu1 %v19810_v34  ;;  %v19902_v33 = vld [vmem:[#allocation7 + $0x4cc] ss:$16 sps:$4 sm:$0xff]   ;;  %v19897_v34 = vld [vmem:[#allocation7 + $0x4c0] ss:$16 sps:$4 sm:$0xff]  }
 0x19e   : > { %6910 = vmatpush1.bf16.msra.mxu0 %v19805_v35  ;;  %7566 = vmatpush1.bf16.msra.mxu1 %v19808_v36  ;;  %v19900_v35 = vld [vmem:[#allocation7 + $0x4c8] ss:$16 sps:$4 sm:$0xff]   ;;  %v19905_v36 = vld [vmem:[#allocation7 + $0x4e4] ss:$16 sps:$4 sm:$0xff]  }
 0x19f   : > { %6911 = vmatprep.subr.bf16.mxu0 %v19813_v37  ;;  %7567 = vmatprep.subr.bf16.mxu1 %v19816_v38  ;;  %v19908_v37 = vld [vmem:[#allocation7 + $0x4ec] ss:$16 sps:$4 sm:$0xff]   ;;  %v19903_v38 = vld [vmem:[#allocation7 + $0x4e0] ss:$16 sps:$4 sm:$0xff]  }
 0x1a2   : > { %6912 = vmatpush1.bf16.msra.mxu0 %v19811_v39  ;;  %7568 = vmatpush1.bf16.msra.mxu1 %v19814_v40  ;;  %v19906_v39 = vld [vmem:[#allocation7 + $0x4e8] ss:$16 sps:$4 sm:$0xff]   ;;  %v19911_v40 = vld [vmem:[#allocation7 + $0x504] ss:$16 sps:$4 sm:$0xff]  }
 0x1a3   : > { %6913 = vmatprep.subr.bf16.mxu0 %v19819_v41  ;;  %7569 = vmatprep.subr.bf16.mxu1 %v19822_v42  ;;  %v19914_v41 = vld [vmem:[#allocation7 + $0x50c] ss:$16 sps:$4 sm:$0xff]   ;;  %v19909_v42 = vld [vmem:[#allocation7 + $0x500] ss:$16 sps:$4 sm:$0xff]  }
 0x1a6   : > { %6914 = vmatpush1.bf16.msra.mxu0 %v19817_v43  ;;  %7570 = vmatpush1.bf16.msra.mxu1 %v19820_v44  ;;  %v19912_v43 = vld [vmem:[#allocation7 + $0x508] ss:$16 sps:$4 sm:$0xff]   ;;  %v19917_v44 = vld [vmem:[#allocation7 + $0x524] ss:$16 sps:$4 sm:$0xff]  }
 0x1a7   : > { %6915 = vmatprep.subr.bf16.mxu0 %v19825_v45  ;;  %7571 = vmatprep.subr.bf16.mxu1 %v19828_v46  ;;  %v19920_v45 = vld [vmem:[#allocation7 + $0x52c] ss:$16 sps:$4 sm:$0xff]   ;;  %v19915_v46 = vld [vmem:[#allocation7 + $0x520] ss:$16 sps:$4 sm:$0xff]  }
 0x1aa   : > { %6916 = vmatpush1.bf16.msra.mxu0 %v19823_v47  ;;  %7572 = vmatpush1.bf16.msra.mxu1 %v19826_v48  ;;  %v19918_v47 = vld [vmem:[#allocation7 + $0x528] ss:$16 sps:$4 sm:$0xff]   ;;  %v19923_v48 = vld [vmem:[#allocation7 + $0x544] ss:$16 sps:$4 sm:$0xff]  }
 0x1ab   : > { %6917 = vmatprep.subr.bf16.mxu0 %v19831_v49  ;;  %7573 = vmatprep.subr.bf16.mxu1 %v19834_v50  ;;  %v19926_v49 = vld [vmem:[#allocation7 + $0x54c] ss:$16 sps:$4 sm:$0xff]   ;;  %v19921_v50 = vld [vmem:[#allocation7 + $0x540] ss:$16 sps:$4 sm:$0xff]  }
 0x1ae   : > { %6918 = vmatpush1.bf16.msra.mxu0 %v19829_v51  ;;  %7574 = vmatpush1.bf16.msra.mxu1 %v19832_v52  ;;  %v19924_v51 = vld [vmem:[#allocation7 + $0x548] ss:$16 sps:$4 sm:$0xff]   ;;  %v19929_v52 = vld [vmem:[#allocation7 + $0x564] ss:$16 sps:$4 sm:$0xff]  }
 0x1af   : > { %6919 = vmatprep.subr.bf16.mxu0 %v19837_v53  ;;  %7575 = vmatprep.subr.bf16.mxu1 %v19840_v54  ;;  %v19932_v53 = vld [vmem:[#allocation7 + $0x56c] ss:$16 sps:$4 sm:$0xff]   ;;  %v19927_v54 = vld [vmem:[#allocation7 + $0x560] ss:$16 sps:$4 sm:$0xff]  }
 0x1b2   : > { %6920 = vmatpush1.bf16.msra.mxu0 %v19835_v55  ;;  %7576 = vmatpush1.bf16.msra.mxu1 %v19838_v56  ;;  %v19930_v55 = vld [vmem:[#allocation7 + $0x568] ss:$16 sps:$4 sm:$0xff]   ;;  %v19935_v56 = vld [vmem:[#allocation7 + $0x584] ss:$16 sps:$4 sm:$0xff]  }
 0x1b3   : > { %6921 = vmatprep.subr.bf16.mxu0 %v19843_v57  ;;  %7577 = vmatprep.subr.bf16.mxu1 %v19846_v58  ;;  %v19938_v57 = vld [vmem:[#allocation7 + $0x58c] ss:$16 sps:$4 sm:$0xff]   ;;  %v19933_v58 = vld [vmem:[#allocation7 + $0x580] ss:$16 sps:$4 sm:$0xff]  }
 0x1b6   : > { %6922 = vmatpush1.bf16.msra.mxu0 %v19841_v59  ;;  %7578 = vmatpush1.bf16.msra.mxu1 %v19844_v60  ;;  %v19936_v59 = vld [vmem:[#allocation7 + $0x588] ss:$16 sps:$4 sm:$0xff]   ;;  %v19941_v60 = vld [vmem:[#allocation7 + $0x5a4] ss:$16 sps:$4 sm:$0xff]  }
 0x1b7   : > { %6923 = vmatprep.subr.bf16.mxu0 %v19849_v61  ;;  %7579 = vmatprep.subr.bf16.mxu1 %v19852_v62  ;;  %v19944_v61 = vld [vmem:[#allocation7 + $0x5ac] ss:$16 sps:$4 sm:$0xff]   ;;  %v19939_v62 = vld [vmem:[#allocation7 + $0x5a0] ss:$16 sps:$4 sm:$0xff]  }
 0x1ba   : > { %6924 = vmatpush1.bf16.msra.mxu0 %v19847_v63  ;;  %7580 = vmatpush1.bf16.msra.mxu1 %v19850_v0  ;;  %v19942_v63 = vld [vmem:[#allocation7 + $0x5a8] ss:$16 sps:$4 sm:$0xff]   ;;  %v19947_v0 = vld [vmem:[#allocation7 + $0x5c4] ss:$16 sps:$4 sm:$0xff]  }
 0x1bb   : > { %6925 = vmatprep.subr.bf16.mxu0 %v19855_v1  ;;  %7581 = vmatprep.subr.bf16.mxu1 %v19858_v2  ;;  %v19950_v1 = vld [vmem:[#allocation7 + $0x5cc] ss:$16 sps:$4 sm:$0xff]   ;;  %v19945_v2 = vld [vmem:[#allocation7 + $0x5c0] ss:$16 sps:$4 sm:$0xff]  }
 0x1be   : > { %6926 = vmatpush1.bf16.msra.mxu0 %v19853_v3  ;;  %7582 = vmatpush1.bf16.msra.mxu1 %v19856_v4  ;;  %v19948_v3 = vld [vmem:[#allocation7 + $0x5c8] ss:$16 sps:$4 sm:$0xff]   ;;  %v19953_v4 = vld [vmem:[#allocation7 + $0x5e4] ss:$16 sps:$4 sm:$0xff]  }
 0x1bf   : > { %6936 = vmatprep.subr.bf16.mxu0 %v19863_v5  ;;  %7592 = vmatprep.subr.bf16.mxu1 %v19866_v6  ;;  %v19956_v5 = vld [vmem:[#allocation7 + $0x5ec] ss:$16 sps:$4 sm:$0xff]   ;;  %v19951_v6 = vld [vmem:[#allocation7 + $0x5e0] ss:$16 sps:$4 sm:$0xff]  }
 0x1c1   : > { %6928 = vmatmul.mubr.bf16.vlgmr.msra.gmra.mrb[0].mxu0 %v17079_v7  ;;  %7584 = vmatmul.mubr.bf16.vlgmr.msra.gmra.mrb[0].mxu1 %v17079_v7  ;;  %v19954_v7 = vld [vmem:[#allocation7 + $0x5e8] ss:$16 sps:$4 sm:$0xff]  }
 0x1c2   : > { %6937 = vmatpush1.bf16.msra.mxu0 %v19861_v8  ;;  %7593 = vmatpush1.bf16.msra.mxu1 %v19864_v9  ;;  %v19961_v8 = vld [vmem:[#allocation7 + $0x604] ss:$16 sps:$4 sm:$0xff]   ;;  %v19964_v9 = vld [vmem:[#allocation7 + $0x60c] ss:$16 sps:$4 sm:$0xff]  }
 0x1c3   : > { %6938 = vmatprep.subr.bf16.mxu0 %v19869_v10  ;;  %7594 = vmatprep.subr.bf16.mxu1 %v19872_v12  ;;  %v19959_v10 = vld [vmem:[#allocation7 + $0x600] ss:$16 sps:$4 sm:$0xff]   ;;  %v17081_v12 = vcombine.low %v22364_v11, %v22364_v11  ;;  %v19976_v11 = vld [vmem:[#allocation7 + $0x64c] ss:$16 sps:$4 sm:$0xff]  }
 0x1c4   : > { %6968 = vmatprep.mubr.bf16.mxu0 %v17082_v13  ;;  %7624 = vmatprep.mubr.bf16.mxu1 %v17082_v13  ;;  %v19962_v13 = vld [vmem:[#allocation7 + $0x608] ss:$16 sps:$4 sm:$0xff]  }
 0x1c6   : > { %6939 = vmatpush1.bf16.msra.mxu0 %v19867_v14  ;;  %7595 = vmatpush1.bf16.msra.mxu1 %v19870_v15  ;;  %v22371_v14 = vld [vmem:[%s22321_s24 + $0x18] sm:$0xff]  ;;  %v19967_v15 = vld [vmem:[#allocation7 + $0x624] ss:$16 sps:$4 sm:$0xff]  }
 0x1c7   : > { %6940 = vmatprep.subr.bf16.mxu0 %v19875_v16  ;;  %7596 = vmatprep.subr.bf16.mxu1 %v19878_v17  ;;  %v19970_v16 = vld [vmem:[#allocation7 + $0x62c] ss:$16 sps:$4 sm:$0xff]   ;;  %v17084_v17 = vcombine.high %v22371_v14, %v22371_v14 }
 0x1ca   : > { %6941 = vmatpush1.bf16.msra.mxu0 %v19873_v18  ;;  %7597 = vmatpush1.bf16.msra.mxu1 %v19876_v19  ;;  %v19965_v18 = vld [vmem:[#allocation7 + $0x620] ss:$16 sps:$4 sm:$0xff]   ;;  %v19968_v19 = vld [vmem:[#allocation7 + $0x628] ss:$16 sps:$4 sm:$0xff]  }
 0x1cb   : > { %6942 = vmatprep.subr.bf16.mxu0 %v19881_v20  ;;  %7598 = vmatprep.subr.bf16.mxu1 %v19884_v21  ;;  %v19973_v20 = vld [vmem:[#allocation7 + $0x644] ss:$16 sps:$4 sm:$0xff]   ;;  %v19971_v21 = vld [vmem:[#allocation7 + $0x640] ss:$16 sps:$4 sm:$0xff]  }
 0x1ce   : > { %6943 = vmatpush1.bf16.msra.mxu0 %v19879_v22  ;;  %7599 = vmatpush1.bf16.msra.mxu1 %v19882_v23  ;;  %v19974_v22 = vld [vmem:[#allocation7 + $0x648] ss:$16 sps:$4 sm:$0xff]   ;;  %v19979_v23 = vld [vmem:[#allocation7 + $0x664] ss:$16 sps:$4 sm:$0xff]  }
 0x1cf   : > { %6944 = vmatprep.subr.bf16.mxu0 %v19887_v24  ;;  %7600 = vmatprep.subr.bf16.mxu1 %v19890_v25  ;;  %v19982_v24 = vld [vmem:[#allocation7 + $0x66c] ss:$16 sps:$4 sm:$0xff]   ;;  %v19977_v25 = vld [vmem:[#allocation7 + $0x660] ss:$16 sps:$4 sm:$0xff]  }
 0x1d2   : > { %6945 = vmatpush1.bf16.msra.mxu0 %v19885_v26  ;;  %7601 = vmatpush1.bf16.msra.mxu1 %v19888_v27  ;;  %v19980_v26 = vld [vmem:[#allocation7 + $0x668] ss:$16 sps:$4 sm:$0xff]   ;;  %v19985_v27 = vld [vmem:[#allocation7 + $0x684] ss:$16 sps:$4 sm:$0xff]  }
 0x1d3   : > { %6946 = vmatprep.subr.bf16.mxu0 %v19893_v28  ;;  %7602 = vmatprep.subr.bf16.mxu1 %v19896_v29  ;;  %v19988_v28 = vld [vmem:[#allocation7 + $0x68c] ss:$16 sps:$4 sm:$0xff]   ;;  %v19983_v29 = vld [vmem:[#allocation7 + $0x680] ss:$16 sps:$4 sm:$0xff]  }
 0x1d6   : > { %6947 = vmatpush1.bf16.msra.mxu0 %v19891_v30  ;;  %7603 = vmatpush1.bf16.msra.mxu1 %v19894_v31  ;;  %v19986_v30 = vld [vmem:[#allocation7 + $0x688] ss:$16 sps:$4 sm:$0xff]   ;;  %v19991_v31 = vld [vmem:[#allocation7 + $0x6a4] ss:$16 sps:$4 sm:$0xff]  }
 0x1d7   : > { %6948 = vmatprep.subr.bf16.mxu0 %v19899_v32  ;;  %7604 = vmatprep.subr.bf16.mxu1 %v19902_v33  ;;  %v19994_v32 = vld [vmem:[#allocation7 + $0x6ac] ss:$16 sps:$4 sm:$0xff]   ;;  %v19989_v33 = vld [vmem:[#allocation7 + $0x6a0] ss:$16 sps:$4 sm:$0xff]  }
 0x1da   : > { %6949 = vmatpush1.bf16.msra.mxu0 %v19897_v34  ;;  %7605 = vmatpush1.bf16.msra.mxu1 %v19900_v35  ;;  %v19992_v34 = vld [vmem:[#allocation7 + $0x6a8] ss:$16 sps:$4 sm:$0xff]   ;;  %v19997_v35 = vld [vmem:[#allocation7 + $0x6c4] ss:$16 sps:$4 sm:$0xff]  }
 0x1db   : > { %6950 = vmatprep.subr.bf16.mxu0 %v19905_v36  ;;  %7606 = vmatprep.subr.bf16.mxu1 %v19908_v37  ;;  %v20000_v36 = vld [vmem:[#allocation7 + $0x6cc] ss:$16 sps:$4 sm:$0xff]   ;;  %v19995_v37 = vld [vmem:[#allocation7 + $0x6c0] ss:$16 sps:$4 sm:$0xff]  }
 0x1de   : > { %6951 = vmatpush1.bf16.msra.mxu0 %v19903_v38  ;;  %7607 = vmatpush1.bf16.msra.mxu1 %v19906_v39  ;;  %v19998_v38 = vld [vmem:[#allocation7 + $0x6c8] ss:$16 sps:$4 sm:$0xff]   ;;  %v20003_v39 = vld [vmem:[#allocation7 + $0x6e4] ss:$16 sps:$4 sm:$0xff]  }
 0x1df   : > { %6952 = vmatprep.subr.bf16.mxu0 %v19911_v40  ;;  %7608 = vmatprep.subr.bf16.mxu1 %v19914_v41  ;;  %v20006_v40 = vld [vmem:[#allocation7 + $0x6ec] ss:$16 sps:$4 sm:$0xff]   ;;  %v20001_v41 = vld [vmem:[#allocation7 + $0x6e0] ss:$16 sps:$4 sm:$0xff]  }
 0x1e2   : > { %6953 = vmatpush1.bf16.msra.mxu0 %v19909_v42  ;;  %7609 = vmatpush1.bf16.msra.mxu1 %v19912_v43  ;;  %v20004_v42 = vld [vmem:[#allocation7 + $0x6e8] ss:$16 sps:$4 sm:$0xff]   ;;  %v20009_v43 = vld [vmem:[#allocation7 + $0x704] ss:$16 sps:$4 sm:$0xff]  }
 0x1e3   : > { %6954 = vmatprep.subr.bf16.mxu0 %v19917_v44  ;;  %7610 = vmatprep.subr.bf16.mxu1 %v19920_v45  ;;  %v20012_v44 = vld [vmem:[#allocation7 + $0x70c] ss:$16 sps:$4 sm:$0xff]   ;;  %v20007_v45 = vld [vmem:[#allocation7 + $0x700] ss:$16 sps:$4 sm:$0xff]  }
 0x1e6   : > { %6955 = vmatpush1.bf16.msra.mxu0 %v19915_v46  ;;  %7611 = vmatpush1.bf16.msra.mxu1 %v19918_v47  ;;  %v20010_v46 = vld [vmem:[#allocation7 + $0x708] ss:$16 sps:$4 sm:$0xff]   ;;  %v20015_v47 = vld [vmem:[#allocation7 + $0x724] ss:$16 sps:$4 sm:$0xff]  }
 0x1e7   : > { %6956 = vmatprep.subr.bf16.mxu0 %v19923_v48  ;;  %7612 = vmatprep.subr.bf16.mxu1 %v19926_v49  ;;  %v20018_v48 = vld [vmem:[#allocation7 + $0x72c] ss:$16 sps:$4 sm:$0xff]   ;;  %v20013_v49 = vld [vmem:[#allocation7 + $0x720] ss:$16 sps:$4 sm:$0xff]  }
 0x1ea   : > { %6957 = vmatpush1.bf16.msra.mxu0 %v19921_v50  ;;  %7613 = vmatpush1.bf16.msra.mxu1 %v19924_v51  ;;  %v20016_v50 = vld [vmem:[#allocation7 + $0x728] ss:$16 sps:$4 sm:$0xff]   ;;  %v20021_v51 = vld [vmem:[#allocation7 + $0x744] ss:$16 sps:$4 sm:$0xff]  }
 0x1eb   : > { %6958 = vmatprep.subr.bf16.mxu0 %v19929_v52  ;;  %7614 = vmatprep.subr.bf16.mxu1 %v19932_v53  ;;  %v20024_v52 = vld [vmem:[#allocation7 + $0x74c] ss:$16 sps:$4 sm:$0xff]   ;;  %v20019_v53 = vld [vmem:[#allocation7 + $0x740] ss:$16 sps:$4 sm:$0xff]  }
 0x1ee   : > { %6959 = vmatpush1.bf16.msra.mxu0 %v19927_v54  ;;  %7615 = vmatpush1.bf16.msra.mxu1 %v19930_v55  ;;  %v20022_v54 = vld [vmem:[#allocation7 + $0x748] ss:$16 sps:$4 sm:$0xff]   ;;  %v20027_v55 = vld [vmem:[#allocation7 + $0x764] ss:$16 sps:$4 sm:$0xff]  }
 0x1ef   : > { %6960 = vmatprep.subr.bf16.mxu0 %v19935_v56  ;;  %7616 = vmatprep.subr.bf16.mxu1 %v19938_v57  ;;  %v20030_v56 = vld [vmem:[#allocation7 + $0x76c] ss:$16 sps:$4 sm:$0xff]   ;;  %v20025_v57 = vld [vmem:[#allocation7 + $0x760] ss:$16 sps:$4 sm:$0xff]  }
 0x1f2   : > { %6961 = vmatpush1.bf16.msra.mxu0 %v19933_v58  ;;  %7617 = vmatpush1.bf16.msra.mxu1 %v19936_v59  ;;  %v20028_v58 = vld [vmem:[#allocation7 + $0x768] ss:$16 sps:$4 sm:$0xff]   ;;  %v20033_v59 = vld [vmem:[#allocation7 + $0x784] ss:$16 sps:$4 sm:$0xff]  }
 0x1f3   : > { %6962 = vmatprep.subr.bf16.mxu0 %v19941_v60  ;;  %7618 = vmatprep.subr.bf16.mxu1 %v19944_v61  ;;  %v20036_v60 = vld [vmem:[#allocation7 + $0x78c] ss:$16 sps:$4 sm:$0xff]   ;;  %v20031_v61 = vld [vmem:[#allocation7 + $0x780] ss:$16 sps:$4 sm:$0xff]  }
 0x1f6   : > { %6963 = vmatpush1.bf16.msra.mxu0 %v19939_v62  ;;  %7619 = vmatpush1.bf16.msra.mxu1 %v19942_v63  ;;  %v20034_v62 = vld [vmem:[#allocation7 + $0x788] ss:$16 sps:$4 sm:$0xff]   ;;  %v20039_v63 = vld [vmem:[#allocation7 + $0x7a4] ss:$16 sps:$4 sm:$0xff]  }
 0x1f7   : > { %6964 = vmatprep.subr.bf16.mxu0 %v19947_v0  ;;  %7620 = vmatprep.subr.bf16.mxu1 %v19950_v1  ;;  %v20042_v0 = vld [vmem:[#allocation7 + $0x7ac] ss:$16 sps:$4 sm:$0xff]   ;;  %v20037_v1 = vld [vmem:[#allocation7 + $0x7a0] ss:$16 sps:$4 sm:$0xff]  }
 0x1fa   : > { %6965 = vmatpush1.bf16.msra.mxu0 %v19945_v2  ;;  %7621 = vmatpush1.bf16.msra.mxu1 %v19948_v3  ;;  %v20040_v2 = vld [vmem:[#allocation7 + $0x7a8] ss:$16 sps:$4 sm:$0xff]   ;;  %v20045_v3 = vld [vmem:[#allocation7 + $0x7c4] ss:$16 sps:$4 sm:$0xff]  }
 0x1fb   : > { %6966 = vmatprep.subr.bf16.mxu0 %v19953_v4  ;;  %7622 = vmatprep.subr.bf16.mxu1 %v19956_v5  ;;  %v20048_v4 = vld [vmem:[#allocation7 + $0x7cc] ss:$16 sps:$4 sm:$0xff]   ;;  %v20043_v5 = vld [vmem:[#allocation7 + $0x7c0] ss:$16 sps:$4 sm:$0xff]  }
 0x1fe   : > { %6967 = vmatpush1.bf16.msra.mxu0 %v19951_v6  ;;  %7623 = vmatpush1.bf16.msra.mxu1 %v19954_v7  ;;  %v20046_v6 = vld [vmem:[#allocation7 + $0x7c8] ss:$16 sps:$4 sm:$0xff]   ;;  %v20051_v7 = vld [vmem:[#allocation7 + $0x7e4] ss:$16 sps:$4 sm:$0xff]  }
 0x1ff   : > { %6977 = vmatprep.subr.bf16.mxu0 %v19961_v8  ;;  %7633 = vmatprep.subr.bf16.mxu1 %v19964_v9  ;;  %v20054_v8 = vld [vmem:[#allocation7 + $0x7ec] ss:$16 sps:$4 sm:$0xff]   ;;  %v20049_v9 = vld [vmem:[#allocation7 + $0x7e0] ss:$16 sps:$4 sm:$0xff]  }
 0x201   : > { %6969 = vmatmul.mubr.bf16.vlgmr.msra.gmra.mrb[0].mxu0 %v17081_v12  ;;  %7625 = vmatmul.mubr.bf16.vlgmr.msra.gmra.mrb[0].mxu1 %v17081_v12  ;;  %v20059_v12 = vld [vmem:[#allocation7 + $0x804] ss:$16 sps:$4 sm:$0xff]  }
 0x202   : > { %6978 = vmatpush1.bf16.msra.mxu0 %v19959_v10  ;;  %7634 = vmatpush1.bf16.msra.mxu1 %v19962_v13  ;;  %v20052_v10 = vld [vmem:[#allocation7 + $0x7e8] ss:$16 sps:$4 sm:$0xff]   ;;  %v20062_v13 = vld [vmem:[#allocation7 + $0x80c] ss:$16 sps:$4 sm:$0xff]  }
 0x203   : > { %6979 = vmatprep.subr.bf16.mxu0 %v19967_v15  ;;  %7635 = vmatprep.subr.bf16.mxu1 %v19970_v16  ;;  %v20057_v15 = vld [vmem:[#allocation7 + $0x800] ss:$16 sps:$4 sm:$0xff]   ;;  %v17083_v16 = vcombine.low %v22371_v14, %v22371_v14  ;;  %v20071_v14 = vld [vmem:[#allocation7 + $0x844] ss:$16 sps:$4 sm:$0xff]  }
 0x204   : > { %7009 = vmatprep.mubr.bf16.mxu0 %v17084_v17  ;;  %7665 = vmatprep.mubr.bf16.mxu1 %v17084_v17  ;;  %v22378_v17 = vld [vmem:[%s22321_s24 + $0x20] sm:$0xff] }
 0x206   : > { %6980 = vmatpush1.bf16.msra.mxu0 %v19965_v18  ;;  %7636 = vmatpush1.bf16.msra.mxu1 %v19968_v19  ;;  %v20060_v18 = vld [vmem:[#allocation7 + $0x808] ss:$16 sps:$4 sm:$0xff]   ;;  %v20065_v19 = vld [vmem:[#allocation7 + $0x824] ss:$16 sps:$4 sm:$0xff]  }
 0x207   : > { %6981 = vmatprep.subr.bf16.mxu0 %v19973_v20  ;;  %7637 = vmatprep.subr.bf16.mxu1 %v19976_v11  ;;  %v20068_v20 = vld [vmem:[#allocation7 + $0x82c] ss:$16 sps:$4 sm:$0xff]   ;;  %v17086_v11 = vcombine.high %v22378_v17, %v22378_v17 }
 0x20a   : > { %6982 = vmatpush1.bf16.msra.mxu0 %v19971_v21  ;;  %7638 = vmatpush1.bf16.msra.mxu1 %v19974_v22  ;;  %v20063_v21 = vld [vmem:[#allocation7 + $0x820] ss:$16 sps:$4 sm:$0xff]   ;;  %v20066_v22 = vld [vmem:[#allocation7 + $0x828] ss:$16 sps:$4 sm:$0xff]  }
 0x20b   : > { %6983 = vmatprep.subr.bf16.mxu0 %v19979_v23  ;;  %7639 = vmatprep.subr.bf16.mxu1 %v19982_v24  ;;  %v20074_v23 = vld [vmem:[#allocation7 + $0x84c] ss:$16 sps:$4 sm:$0xff]   ;;  %v20069_v24 = vld [vmem:[#allocation7 + $0x840] ss:$16 sps:$4 sm:$0xff]  }
 0x20e   : > { %6984 = vmatpush1.bf16.msra.mxu0 %v19977_v25  ;;  %7640 = vmatpush1.bf16.msra.mxu1 %v19980_v26  ;;  %v20072_v25 = vld [vmem:[#allocation7 + $0x848] ss:$16 sps:$4 sm:$0xff]   ;;  %v20077_v26 = vld [vmem:[#allocation7 + $0x864] ss:$16 sps:$4 sm:$0xff]  }
 0x20f   : > { %6985 = vmatprep.subr.bf16.mxu0 %v19985_v27  ;;  %7641 = vmatprep.subr.bf16.mxu1 %v19988_v28  ;;  %v20080_v27 = vld [vmem:[#allocation7 + $0x86c] ss:$16 sps:$4 sm:$0xff]   ;;  %v20075_v28 = vld [vmem:[#allocation7 + $0x860] ss:$16 sps:$4 sm:$0xff]  }
 0x212   : > { %6986 = vmatpush1.bf16.msra.mxu0 %v19983_v29  ;;  %7642 = vmatpush1.bf16.msra.mxu1 %v19986_v30  ;;  %v20078_v29 = vld [vmem:[#allocation7 + $0x868] ss:$16 sps:$4 sm:$0xff]   ;;  %v20083_v30 = vld [vmem:[#allocation7 + $0x884] ss:$16 sps:$4 sm:$0xff]  }
 0x213   : > { %6987 = vmatprep.subr.bf16.mxu0 %v19991_v31  ;;  %7643 = vmatprep.subr.bf16.mxu1 %v19994_v32  ;;  %v20086_v31 = vld [vmem:[#allocation7 + $0x88c] ss:$16 sps:$4 sm:$0xff]   ;;  %v20081_v32 = vld [vmem:[#allocation7 + $0x880] ss:$16 sps:$4 sm:$0xff]  }
 0x216   : > { %6988 = vmatpush1.bf16.msra.mxu0 %v19989_v33  ;;  %7644 = vmatpush1.bf16.msra.mxu1 %v19992_v34  ;;  %v20084_v33 = vld [vmem:[#allocation7 + $0x888] ss:$16 sps:$4 sm:$0xff]   ;;  %v20089_v34 = vld [vmem:[#allocation7 + $0x8a4] ss:$16 sps:$4 sm:$0xff]  }
 0x217   : > { %6989 = vmatprep.subr.bf16.mxu0 %v19997_v35  ;;  %7645 = vmatprep.subr.bf16.mxu1 %v20000_v36  ;;  %v20092_v35 = vld [vmem:[#allocation7 + $0x8ac] ss:$16 sps:$4 sm:$0xff]   ;;  %v20087_v36 = vld [vmem:[#allocation7 + $0x8a0] ss:$16 sps:$4 sm:$0xff]  }
 0x21a   : > { %6990 = vmatpush1.bf16.msra.mxu0 %v19995_v37  ;;  %7646 = vmatpush1.bf16.msra.mxu1 %v19998_v38  ;;  %v20090_v37 = vld [vmem:[#allocation7 + $0x8a8] ss:$16 sps:$4 sm:$0xff]   ;;  %v20095_v38 = vld [vmem:[#allocation7 + $0x8c4] ss:$16 sps:$4 sm:$0xff]  }
 0x21b   : > { %6991 = vmatprep.subr.bf16.mxu0 %v20003_v39  ;;  %7647 = vmatprep.subr.bf16.mxu1 %v20006_v40  ;;  %v20098_v39 = vld [vmem:[#allocation7 + $0x8cc] ss:$16 sps:$4 sm:$0xff]   ;;  %v20093_v40 = vld [vmem:[#allocation7 + $0x8c0] ss:$16 sps:$4 sm:$0xff]  }
 0x21e   : > { %6992 = vmatpush1.bf16.msra.mxu0 %v20001_v41  ;;  %7648 = vmatpush1.bf16.msra.mxu1 %v20004_v42  ;;  %v20096_v41 = vld [vmem:[#allocation7 + $0x8c8] ss:$16 sps:$4 sm:$0xff]   ;;  %v20101_v42 = vld [vmem:[#allocation7 + $0x8e4] ss:$16 sps:$4 sm:$0xff]  }
 0x21f   : > { %6993 = vmatprep.subr.bf16.mxu0 %v20009_v43  ;;  %7649 = vmatprep.subr.bf16.mxu1 %v20012_v44  ;;  %v20104_v43 = vld [vmem:[#allocation7 + $0x8ec] ss:$16 sps:$4 sm:$0xff]   ;;  %v20099_v44 = vld [vmem:[#allocation7 + $0x8e0] ss:$16 sps:$4 sm:$0xff]  }
 0x222   : > { %6994 = vmatpush1.bf16.msra.mxu0 %v20007_v45  ;;  %7650 = vmatpush1.bf16.msra.mxu1 %v20010_v46  ;;  %v20102_v45 = vld [vmem:[#allocation7 + $0x8e8] ss:$16 sps:$4 sm:$0xff]   ;;  %v20107_v46 = vld [vmem:[#allocation7 + $0x904] ss:$16 sps:$4 sm:$0xff]  }
 0x223   : > { %6995 = vmatprep.subr.bf16.mxu0 %v20015_v47  ;;  %7651 = vmatprep.subr.bf16.mxu1 %v20018_v48  ;;  %v20110_v47 = vld [vmem:[#allocation7 + $0x90c] ss:$16 sps:$4 sm:$0xff]   ;;  %v20105_v48 = vld [vmem:[#allocation7 + $0x900] ss:$16 sps:$4 sm:$0xff]  }
 0x226   : > { %6996 = vmatpush1.bf16.msra.mxu0 %v20013_v49  ;;  %7652 = vmatpush1.bf16.msra.mxu1 %v20016_v50  ;;  %v20108_v49 = vld [vmem:[#allocation7 + $0x908] ss:$16 sps:$4 sm:$0xff]   ;;  %v20113_v50 = vld [vmem:[#allocation7 + $0x924] ss:$16 sps:$4 sm:$0xff]  }
 0x227   : > { %6997 = vmatprep.subr.bf16.mxu0 %v20021_v51  ;;  %7653 = vmatprep.subr.bf16.mxu1 %v20024_v52  ;;  %v20116_v51 = vld [vmem:[#allocation7 + $0x92c] ss:$16 sps:$4 sm:$0xff]   ;;  %v20111_v52 = vld [vmem:[#allocation7 + $0x920] ss:$16 sps:$4 sm:$0xff]  }
 0x22a   : > { %6998 = vmatpush1.bf16.msra.mxu0 %v20019_v53  ;;  %7654 = vmatpush1.bf16.msra.mxu1 %v20022_v54  ;;  %v20114_v53 = vld [vmem:[#allocation7 + $0x928] ss:$16 sps:$4 sm:$0xff]   ;;  %v20119_v54 = vld [vmem:[#allocation7 + $0x944] ss:$16 sps:$4 sm:$0xff]  }
 0x22b   : > { %6999 = vmatprep.subr.bf16.mxu0 %v20027_v55  ;;  %7655 = vmatprep.subr.bf16.mxu1 %v20030_v56  ;;  %v20122_v55 = vld [vmem:[#allocation7 + $0x94c] ss:$16 sps:$4 sm:$0xff]   ;;  %v20117_v56 = vld [vmem:[#allocation7 + $0x940] ss:$16 sps:$4 sm:$0xff]  }
 0x22e   : > { %7000 = vmatpush1.bf16.msra.mxu0 %v20025_v57  ;;  %7656 = vmatpush1.bf16.msra.mxu1 %v20028_v58  ;;  %v20120_v57 = vld [vmem:[#allocation7 + $0x948] ss:$16 sps:$4 sm:$0xff]   ;;  %v20125_v58 = vld [vmem:[#allocation7 + $0x964] ss:$16 sps:$4 sm:$0xff]  }
 0x22f   : > { %7001 = vmatprep.subr.bf16.mxu0 %v20033_v59  ;;  %7657 = vmatprep.subr.bf16.mxu1 %v20036_v60  ;;  %v20128_v59 = vld [vmem:[#allocation7 + $0x96c] ss:$16 sps:$4 sm:$0xff]   ;;  %v20123_v60 = vld [vmem:[#allocation7 + $0x960] ss:$16 sps:$4 sm:$0xff]  }
 0x232   : > { %7002 = vmatpush1.bf16.msra.mxu0 %v20031_v61  ;;  %7658 = vmatpush1.bf16.msra.mxu1 %v20034_v62  ;;  %v20126_v61 = vld [vmem:[#allocation7 + $0x968] ss:$16 sps:$4 sm:$0xff]   ;;  %v20131_v62 = vld [vmem:[#allocation7 + $0x984] ss:$16 sps:$4 sm:$0xff]  }
 0x233   : > { %7003 = vmatprep.subr.bf16.mxu0 %v20039_v63  ;;  %7659 = vmatprep.subr.bf16.mxu1 %v20042_v0  ;;  %v20134_v63 = vld [vmem:[#allocation7 + $0x98c] ss:$16 sps:$4 sm:$0xff]   ;;  %v20129_v0 = vld [vmem:[#allocation7 + $0x980] ss:$16 sps:$4 sm:$0xff]  }
 0x236   : > { %7004 = vmatpush1.bf16.msra.mxu0 %v20037_v1  ;;  %7660 = vmatpush1.bf16.msra.mxu1 %v20040_v2  ;;  %v20132_v1 = vld [vmem:[#allocation7 + $0x988] ss:$16 sps:$4 sm:$0xff]   ;;  %v20137_v2 = vld [vmem:[#allocation7 + $0x9a4] ss:$16 sps:$4 sm:$0xff]  }
 0x237   : > { %7005 = vmatprep.subr.bf16.mxu0 %v20045_v3  ;;  %7661 = vmatprep.subr.bf16.mxu1 %v20048_v4  ;;  %v20140_v3 = vld [vmem:[#allocation7 + $0x9ac] ss:$16 sps:$4 sm:$0xff]   ;;  %v20135_v4 = vld [vmem:[#allocation7 + $0x9a0] ss:$16 sps:$4 sm:$0xff]  }
 0x23a   : > { %7006 = vmatpush1.bf16.msra.mxu0 %v20043_v5  ;;  %7662 = vmatpush1.bf16.msra.mxu1 %v20046_v6  ;;  %v20138_v5 = vld [vmem:[#allocation7 + $0x9a8] ss:$16 sps:$4 sm:$0xff]   ;;  %v20143_v6 = vld [vmem:[#allocation7 + $0x9c4] ss:$16 sps:$4 sm:$0xff]  }
 0x23b   : > { %7007 = vmatprep.subr.bf16.mxu0 %v20051_v7  ;;  %7663 = vmatprep.subr.bf16.mxu1 %v20054_v8  ;;  %v20146_v7 = vld [vmem:[#allocation7 + $0x9cc] ss:$16 sps:$4 sm:$0xff]   ;;  %v20141_v8 = vld [vmem:[#allocation7 + $0x9c0] ss:$16 sps:$4 sm:$0xff]  }
 0x23e   : > { %7008 = vmatpush1.bf16.msra.mxu0 %v20049_v9  ;;  %7664 = vmatpush1.bf16.msra.mxu1 %v20052_v10  ;;  %v20144_v9 = vld [vmem:[#allocation7 + $0x9c8] ss:$16 sps:$4 sm:$0xff]   ;;  %v20149_v10 = vld [vmem:[#allocation7 + $0x9e4] ss:$16 sps:$4 sm:$0xff]  }
 0x23f   : > { %7018 = vmatprep.subr.bf16.mxu0 %v20059_v12  ;;  %7674 = vmatprep.subr.bf16.mxu1 %v20062_v13  ;;  %v20152_v12 = vld [vmem:[#allocation7 + $0x9ec] ss:$16 sps:$4 sm:$0xff]   ;;  %v20147_v13 = vld [vmem:[#allocation7 + $0x9e0] ss:$16 sps:$4 sm:$0xff]  }
 0x241   : > { %7010 = vmatmul.mubr.bf16.vlgmr.msra.gmra.mrb[0].mxu0 %v17083_v16  ;;  %7666 = vmatmul.mubr.bf16.vlgmr.msra.gmra.mrb[0].mxu1 %v17083_v16  ;;  %v20157_v16 = vld [vmem:[#allocation7 + $0xa04] ss:$16 sps:$4 sm:$0xff]  }
 0x242   : > { %7019 = vmatpush1.bf16.msra.mxu0 %v20057_v15  ;;  %7675 = vmatpush1.bf16.msra.mxu1 %v20060_v18  ;;  %v20150_v15 = vld [vmem:[#allocation7 + $0x9e8] ss:$16 sps:$4 sm:$0xff]   ;;  %v20160_v18 = vld [vmem:[#allocation7 + $0xa0c] ss:$16 sps:$4 sm:$0xff]  }
 0x243   : > { %7020 = vmatprep.subr.bf16.mxu0 %v20065_v19  ;;  %7676 = vmatprep.subr.bf16.mxu1 %v20068_v20  ;;  %v22383_v19 = vld [vmem:[%s22321_s24 + $0x28] sm:$0xff]  ;;  %v17085_v20 = vcombine.low %v22378_v17, %v22378_v17  ;;  %v20169_v17 = vld [vmem:[#allocation7 + $0xa44] ss:$16 sps:$4 sm:$0xff]  }
 0x244   : > { %7050 = vmatprep.mubr.bf16.mxu0 %v17086_v11  ;;  %7706 = vmatprep.mubr.bf16.mxu1 %v17086_v11  ;;  %v20155_v11 = vld [vmem:[#allocation7 + $0xa00] ss:$16 sps:$4 sm:$0xff]  }
 0x246   : > { %7021 = vmatpush1.bf16.msra.mxu0 %v20063_v21  ;;  %7677 = vmatpush1.bf16.msra.mxu1 %v20066_v22  ;;  %v20158_v21 = vld [vmem:[#allocation7 + $0xa08] ss:$16 sps:$4 sm:$0xff]   ;;  %v20163_v22 = vld [vmem:[#allocation7 + $0xa24] ss:$16 sps:$4 sm:$0xff]  }
 0x247   : > { %7022 = vmatprep.subr.bf16.mxu0 %v20071_v14  ;;  %7678 = vmatprep.subr.bf16.mxu1 %v20074_v23  ;;  %v20166_v14 = vld [vmem:[#allocation7 + $0xa2c] ss:$16 sps:$4 sm:$0xff]   ;;  %v17088_v23 = vcombine.high %v22383_v19, %v22383_v19 }
 0x24a   : > { %7023 = vmatpush1.bf16.msra.mxu0 %v20069_v24  ;;  %7679 = vmatpush1.bf16.msra.mxu1 %v20072_v25  ;;  %v20161_v24 = vld [vmem:[#allocation7 + $0xa20] ss:$16 sps:$4 sm:$0xff]   ;;  %v20164_v25 = vld [vmem:[#allocation7 + $0xa28] ss:$16 sps:$4 sm:$0xff]  }
 0x24b   : > { %7024 = vmatprep.subr.bf16.mxu0 %v20077_v26  ;;  %7680 = vmatprep.subr.bf16.mxu1 %v20080_v27  ;;  %v20172_v26 = vld [vmem:[#allocation7 + $0xa4c] ss:$16 sps:$4 sm:$0xff]   ;;  %v20167_v27 = vld [vmem:[#allocation7 + $0xa40] ss:$16 sps:$4 sm:$0xff]  }
 0x24e   : > { %7025 = vmatpush1.bf16.msra.mxu0 %v20075_v28  ;;  %7681 = vmatpush1.bf16.msra.mxu1 %v20078_v29  ;;  %v20170_v28 = vld [vmem:[#allocation7 + $0xa48] ss:$16 sps:$4 sm:$0xff]   ;;  %v20175_v29 = vld [vmem:[#allocation7 + $0xa64] ss:$16 sps:$4 sm:$0xff]  }
 0x24f   : > { %7026 = vmatprep.subr.bf16.mxu0 %v20083_v30  ;;  %7682 = vmatprep.subr.bf16.mxu1 %v20086_v31  ;;  %v20178_v30 = vld [vmem:[#allocation7 + $0xa6c] ss:$16 sps:$4 sm:$0xff]   ;;  %v20173_v31 = vld [vmem:[#allocation7 + $0xa60] ss:$16 sps:$4 sm:$0xff]  }
 0x252   : > { %7027 = vmatpush1.bf16.msra.mxu0 %v20081_v32  ;;  %7683 = vmatpush1.bf16.msra.mxu1 %v20084_v33  ;;  %v20176_v32 = vld [vmem:[#allocation7 + $0xa68] ss:$16 sps:$4 sm:$0xff]   ;;  %v20181_v33 = vld [vmem:[#allocation7 + $0xa84] ss:$16 sps:$4 sm:$0xff]  }
 0x253   : > { %7028 = vmatprep.subr.bf16.mxu0 %v20089_v34  ;;  %7684 = vmatprep.subr.bf16.mxu1 %v20092_v35  ;;  %v20184_v34 = vld [vmem:[#allocation7 + $0xa8c] ss:$16 sps:$4 sm:$0xff]   ;;  %v20179_v35 = vld [vmem:[#allocation7 + $0xa80] ss:$16 sps:$4 sm:$0xff]  }
 0x256   : > { %7029 = vmatpush1.bf16.msra.mxu0 %v20087_v36  ;;  %7685 = vmatpush1.bf16.msra.mxu1 %v20090_v37  ;;  %v20182_v36 = vld [vmem:[#allocation7 + $0xa88] ss:$16 sps:$4 sm:$0xff]   ;;  %v20187_v37 = vld [vmem:[#allocation7 + $0xaa4] ss:$16 sps:$4 sm:$0xff]  }
 0x257   : > { %7030 = vmatprep.subr.bf16.mxu0 %v20095_v38  ;;  %7686 = vmatprep.subr.bf16.mxu1 %v20098_v39  ;;  %v20190_v38 = vld [vmem:[#allocation7 + $0xaac] ss:$16 sps:$4 sm:$0xff]   ;;  %v20185_v39 = vld [vmem:[#allocation7 + $0xaa0] ss:$16 sps:$4 sm:$0xff]  }
 0x25a   : > { %7031 = vmatpush1.bf16.msra.mxu0 %v20093_v40  ;;  %7687 = vmatpush1.bf16.msra.mxu1 %v20096_v41  ;;  %v20188_v40 = vld [vmem:[#allocation7 + $0xaa8] ss:$16 sps:$4 sm:$0xff]   ;;  %v20193_v41 = vld [vmem:[#allocation7 + $0xac4] ss:$16 sps:$4 sm:$0xff]  }
 0x25b   : > { %7032 = vmatprep.subr.bf16.mxu0 %v20101_v42  ;;  %7688 = vmatprep.subr.bf16.mxu1 %v20104_v43  ;;  %v20196_v42 = vld [vmem:[#allocation7 + $0xacc] ss:$16 sps:$4 sm:$0xff]   ;;  %v20191_v43 = vld [vmem:[#allocation7 + $0xac0] ss:$16 sps:$4 sm:$0xff]  }
 0x25e   : > { %7033 = vmatpush1.bf16.msra.mxu0 %v20099_v44  ;;  %7689 = vmatpush1.bf16.msra.mxu1 %v20102_v45  ;;  %v20194_v44 = vld [vmem:[#allocation7 + $0xac8] ss:$16 sps:$4 sm:$0xff]   ;;  %v20199_v45 = vld [vmem:[#allocation7 + $0xae4] ss:$16 sps:$4 sm:$0xff]  }
 0x25f   : > { %7034 = vmatprep.subr.bf16.mxu0 %v20107_v46  ;;  %7690 = vmatprep.subr.bf16.mxu1 %v20110_v47  ;;  %v20202_v46 = vld [vmem:[#allocation7 + $0xaec] ss:$16 sps:$4 sm:$0xff]   ;;  %v20197_v47 = vld [vmem:[#allocation7 + $0xae0] ss:$16 sps:$4 sm:$0xff]  }
 0x262   : > { %7035 = vmatpush1.bf16.msra.mxu0 %v20105_v48  ;;  %7691 = vmatpush1.bf16.msra.mxu1 %v20108_v49  ;;  %v20200_v48 = vld [vmem:[#allocation7 + $0xae8] ss:$16 sps:$4 sm:$0xff]   ;;  %v20205_v49 = vld [vmem:[#allocation7 + $0xb04] ss:$16 sps:$4 sm:$0xff]  }
 0x263   : > { %7036 = vmatprep.subr.bf16.mxu0 %v20113_v50  ;;  %7692 = vmatprep.subr.bf16.mxu1 %v20116_v51  ;;  %v20208_v50 = vld [vmem:[#allocation7 + $0xb0c] ss:$16 sps:$4 sm:$0xff]   ;;  %v20203_v51 = vld [vmem:[#allocation7 + $0xb00] ss:$16 sps:$4 sm:$0xff]  }
 0x266   : > { %7037 = vmatpush1.bf16.msra.mxu0 %v20111_v52  ;;  %7693 = vmatpush1.bf16.msra.mxu1 %v20114_v53  ;;  %v20206_v52 = vld [vmem:[#allocation7 + $0xb08] ss:$16 sps:$4 sm:$0xff]   ;;  %v20211_v53 = vld [vmem:[#allocation7 + $0xb24] ss:$16 sps:$4 sm:$0xff]  }
 0x267   : > { %7038 = vmatprep.subr.bf16.mxu0 %v20119_v54  ;;  %7694 = vmatprep.subr.bf16.mxu1 %v20122_v55  ;;  %v20214_v54 = vld [vmem:[#allocation7 + $0xb2c] ss:$16 sps:$4 sm:$0xff]   ;;  %v20209_v55 = vld [vmem:[#allocation7 + $0xb20] ss:$16 sps:$4 sm:$0xff]  }
 0x26a   : > { %7039 = vmatpush1.bf16.msra.mxu0 %v20117_v56  ;;  %7695 = vmatpush1.bf16.msra.mxu1 %v20120_v57  ;;  %v20212_v56 = vld [vmem:[#allocation7 + $0xb28] ss:$16 sps:$4 sm:$0xff]   ;;  %v20217_v57 = vld [vmem:[#allocation7 + $0xb44] ss:$16 sps:$4 sm:$0xff]  }
 0x26b   : > { %7040 = vmatprep.subr.bf16.mxu0 %v20125_v58  ;;  %7696 = vmatprep.subr.bf16.mxu1 %v20128_v59  ;;  %v20220_v58 = vld [vmem:[#allocation7 + $0xb4c] ss:$16 sps:$4 sm:$0xff]   ;;  %v20215_v59 = vld [vmem:[#allocation7 + $0xb40] ss:$16 sps:$4 sm:$0xff]  }
 0x26e   : > { %7041 = vmatpush1.bf16.msra.mxu0 %v20123_v60  ;;  %7697 = vmatpush1.bf16.msra.mxu1 %v20126_v61  ;;  %v20218_v60 = vld [vmem:[#allocation7 + $0xb48] ss:$16 sps:$4 sm:$0xff]   ;;  %v20223_v61 = vld [vmem:[#allocation7 + $0xb64] ss:$16 sps:$4 sm:$0xff]  }
 0x26f   : > { %7042 = vmatprep.subr.bf16.mxu0 %v20131_v62  ;;  %7698 = vmatprep.subr.bf16.mxu1 %v20134_v63  ;;  %v20226_v62 = vld [vmem:[#allocation7 + $0xb6c] ss:$16 sps:$4 sm:$0xff]   ;;  %v20221_v63 = vld [vmem:[#allocation7 + $0xb60] ss:$16 sps:$4 sm:$0xff]  }
 0x272   : > { %7043 = vmatpush1.bf16.msra.mxu0 %v20129_v0  ;;  %7699 = vmatpush1.bf16.msra.mxu1 %v20132_v1  ;;  %v20224_v0 = vld [vmem:[#allocation7 + $0xb68] ss:$16 sps:$4 sm:$0xff]   ;;  %v20229_v1 = vld [vmem:[#allocation7 + $0xb84] ss:$16 sps:$4 sm:$0xff]  }
 0x273   : > { %7044 = vmatprep.subr.bf16.mxu0 %v20137_v2  ;;  %7700 = vmatprep.subr.bf16.mxu1 %v20140_v3  ;;  %v20232_v2 = vld [vmem:[#allocation7 + $0xb8c] ss:$16 sps:$4 sm:$0xff]   ;;  %v20227_v3 = vld [vmem:[#allocation7 + $0xb80] ss:$16 sps:$4 sm:$0xff]  }
 0x276   : > { %7045 = vmatpush1.bf16.msra.mxu0 %v20135_v4  ;;  %7701 = vmatpush1.bf16.msra.mxu1 %v20138_v5  ;;  %v20230_v4 = vld [vmem:[#allocation7 + $0xb88] ss:$16 sps:$4 sm:$0xff]   ;;  %v20235_v5 = vld [vmem:[#allocation7 + $0xba4] ss:$16 sps:$4 sm:$0xff]  }
 0x277   : > { %7046 = vmatprep.subr.bf16.mxu0 %v20143_v6  ;;  %7702 = vmatprep.subr.bf16.mxu1 %v20146_v7  ;;  %v20238_v6 = vld [vmem:[#allocation7 + $0xbac] ss:$16 sps:$4 sm:$0xff]   ;;  %v20233_v7 = vld [vmem:[#allocation7 + $0xba0] ss:$16 sps:$4 sm:$0xff]  }
 0x27a   : > { %7047 = vmatpush1.bf16.msra.mxu0 %v20141_v8  ;;  %7703 = vmatpush1.bf16.msra.mxu1 %v20144_v9  ;;  %v20236_v8 = vld [vmem:[#allocation7 + $0xba8] ss:$16 sps:$4 sm:$0xff]   ;;  %v20241_v9 = vld [vmem:[#allocation7 + $0xbc4] ss:$16 sps:$4 sm:$0xff]  }
 0x27b   : > { %7048 = vmatprep.subr.bf16.mxu0 %v20149_v10  ;;  %7704 = vmatprep.subr.bf16.mxu1 %v20152_v12  ;;  %v20244_v10 = vld [vmem:[#allocation7 + $0xbcc] ss:$16 sps:$4 sm:$0xff]   ;;  %v20239_v12 = vld [vmem:[#allocation7 + $0xbc0] ss:$16 sps:$4 sm:$0xff]  }
 0x27e   : > { %7049 = vmatpush1.bf16.msra.mxu0 %v20147_v13  ;;  %7705 = vmatpush1.bf16.msra.mxu1 %v20150_v15  ;;  %v20242_v13 = vld [vmem:[#allocation7 + $0xbc8] ss:$16 sps:$4 sm:$0xff]   ;;  %v20247_v15 = vld [vmem:[#allocation7 + $0xbe4] ss:$16 sps:$4 sm:$0xff]  }
 0x27f   : > { %7059 = vmatprep.subr.bf16.mxu0 %v20157_v16  ;;  %7715 = vmatprep.subr.bf16.mxu1 %v20160_v18  ;;  %v20250_v16 = vld [vmem:[#allocation7 + $0xbec] ss:$16 sps:$4 sm:$0xff]   ;;  %v20245_v18 = vld [vmem:[#allocation7 + $0xbe0] ss:$16 sps:$4 sm:$0xff]  }
 0x281   : > { %7051 = vmatmul.mubr.bf16.vlgmr.msra.gmra.mrb[0].mxu0 %v17085_v20  ;;  %7707 = vmatmul.mubr.bf16.vlgmr.msra.gmra.mrb[0].mxu1 %v17085_v20  ;;  %v20248_v20 = vld [vmem:[#allocation7 + $0xbe8] ss:$16 sps:$4 sm:$0xff]  }
 0x282   : > { %7060 = vmatpush1.bf16.msra.mxu0 %v20155_v11  ;;  %7716 = vmatpush1.bf16.msra.mxu1 %v20158_v21  ;;  %v20255_v11 = vld [vmem:[#allocation7 + $0xc04] ss:$16 sps:$4 sm:$0xff]   ;;  %v20258_v21 = vld [vmem:[#allocation7 + $0xc0c] ss:$16 sps:$4 sm:$0xff]  }
 0x283   : > { %7061 = vmatprep.subr.bf16.mxu0 %v20163_v22  ;;  %7717 = vmatprep.subr.bf16.mxu1 %v20166_v14  ;;  %v22390_v22 = vld [vmem:[%s22321_s24 + $0x30] sm:$0xff]  ;;  %v17087_v14 = vcombine.low %v22383_v19, %v22383_v19 }
 0x284   : > { %7091 = vmatprep.mubr.bf16.mxu0 %v17088_v23  ;;  %7747 = vmatprep.mubr.bf16.mxu1 %v17088_v23  ;;  %v20253_v23 = vld [vmem:[#allocation7 + $0xc00] ss:$16 sps:$4 sm:$0xff]   ;;  %v20267_v19 = vld [vmem:[#allocation7 + $0xc44] ss:$16 sps:$4 sm:$0xff]  }
 0x286   : > { %7062 = vmatpush1.bf16.msra.mxu0 %v20161_v24  ;;  %7718 = vmatpush1.bf16.msra.mxu1 %v20164_v25  ;;  %v20256_v24 = vld [vmem:[#allocation7 + $0xc08] ss:$16 sps:$4 sm:$0xff]   ;;  %v20261_v25 = vld [vmem:[#allocation7 + $0xc24] ss:$16 sps:$4 sm:$0xff]  }
 0x287   : > { %7063 = vmatprep.subr.bf16.mxu0 %v20169_v17  ;;  %7719 = vmatprep.subr.bf16.mxu1 %v20172_v26  ;;  %v20264_v17 = vld [vmem:[#allocation7 + $0xc2c] ss:$16 sps:$4 sm:$0xff]   ;;  %v17090_v26 = vcombine.high %v22390_v22, %v22390_v22 }
 0x28a   : > { %7064 = vmatpush1.bf16.msra.mxu0 %v20167_v27  ;;  %7720 = vmatpush1.bf16.msra.mxu1 %v20170_v28  ;;  %v20259_v27 = vld [vmem:[#allocation7 + $0xc20] ss:$16 sps:$4 sm:$0xff]   ;;  %v20262_v28 = vld [vmem:[#allocation7 + $0xc28] ss:$16 sps:$4 sm:$0xff]  }
 0x28b   : > { %7065 = vmatprep.subr.bf16.mxu0 %v20175_v29  ;;  %7721 = vmatprep.subr.bf16.mxu1 %v20178_v30  ;;  %v20270_v29 = vld [vmem:[#allocation7 + $0xc4c] ss:$16 sps:$4 sm:$0xff]   ;;  %v20265_v30 = vld [vmem:[#allocation7 + $0xc40] ss:$16 sps:$4 sm:$0xff]  }
 0x28e   : > { %7066 = vmatpush1.bf16.msra.mxu0 %v20173_v31  ;;  %7722 = vmatpush1.bf16.msra.mxu1 %v20176_v32  ;;  %v20268_v31 = vld [vmem:[#allocation7 + $0xc48] ss:$16 sps:$4 sm:$0xff]   ;;  %v20273_v32 = vld [vmem:[#allocation7 + $0xc64] ss:$16 sps:$4 sm:$0xff]  }
 0x28f   : > { %7067 = vmatprep.subr.bf16.mxu0 %v20181_v33  ;;  %7723 = vmatprep.subr.bf16.mxu1 %v20184_v34  ;;  %v20276_v33 = vld [vmem:[#allocation7 + $0xc6c] ss:$16 sps:$4 sm:$0xff]   ;;  %v20271_v34 = vld [vmem:[#allocation7 + $0xc60] ss:$16 sps:$4 sm:$0xff]  }
 0x292   : > { %7068 = vmatpush1.bf16.msra.mxu0 %v20179_v35  ;;  %7724 = vmatpush1.bf16.msra.mxu1 %v20182_v36  ;;  %v20274_v35 = vld [vmem:[#allocation7 + $0xc68] ss:$16 sps:$4 sm:$0xff]   ;;  %v20279_v36 = vld [vmem:[#allocation7 + $0xc84] ss:$16 sps:$4 sm:$0xff]  }
 0x293   : > { %7069 = vmatprep.subr.bf16.mxu0 %v20187_v37  ;;  %7725 = vmatprep.subr.bf16.mxu1 %v20190_v38  ;;  %v20282_v37 = vld [vmem:[#allocation7 + $0xc8c] ss:$16 sps:$4 sm:$0xff]   ;;  %v20277_v38 = vld [vmem:[#allocation7 + $0xc80] ss:$16 sps:$4 sm:$0xff]  }
 0x296   : > { %7070 = vmatpush1.bf16.msra.mxu0 %v20185_v39  ;;  %7726 = vmatpush1.bf16.msra.mxu1 %v20188_v40  ;;  %v20280_v39 = vld [vmem:[#allocation7 + $0xc88] ss:$16 sps:$4 sm:$0xff]   ;;  %v20285_v40 = vld [vmem:[#allocation7 + $0xca4] ss:$16 sps:$4 sm:$0xff]  }
 0x297   : > { %7071 = vmatprep.subr.bf16.mxu0 %v20193_v41  ;;  %7727 = vmatprep.subr.bf16.mxu1 %v20196_v42  ;;  %v20288_v41 = vld [vmem:[#allocation7 + $0xcac] ss:$16 sps:$4 sm:$0xff]   ;;  %v20283_v42 = vld [vmem:[#allocation7 + $0xca0] ss:$16 sps:$4 sm:$0xff]  }
 0x29a   : > { %7072 = vmatpush1.bf16.msra.mxu0 %v20191_v43  ;;  %7728 = vmatpush1.bf16.msra.mxu1 %v20194_v44  ;;  %v20286_v43 = vld [vmem:[#allocation7 + $0xca8] ss:$16 sps:$4 sm:$0xff]   ;;  %v20291_v44 = vld [vmem:[#allocation7 + $0xcc4] ss:$16 sps:$4 sm:$0xff]  }
 0x29b   : > { %7073 = vmatprep.subr.bf16.mxu0 %v20199_v45  ;;  %7729 = vmatprep.subr.bf16.mxu1 %v20202_v46  ;;  %v20294_v45 = vld [vmem:[#allocation7 + $0xccc] ss:$16 sps:$4 sm:$0xff]   ;;  %v20289_v46 = vld [vmem:[#allocation7 + $0xcc0] ss:$16 sps:$4 sm:$0xff]  }
 0x29e   : > { %7074 = vmatpush1.bf16.msra.mxu0 %v20197_v47  ;;  %7730 = vmatpush1.bf16.msra.mxu1 %v20200_v48  ;;  %v20292_v47 = vld [vmem:[#allocation7 + $0xcc8] ss:$16 sps:$4 sm:$0xff]   ;;  %v20297_v48 = vld [vmem:[#allocation7 + $0xce4] ss:$16 sps:$4 sm:$0xff]  }
 0x29f   : > { %7075 = vmatprep.subr.bf16.mxu0 %v20205_v49  ;;  %7731 = vmatprep.subr.bf16.mxu1 %v20208_v50  ;;  %v20300_v49 = vld [vmem:[#allocation7 + $0xcec] ss:$16 sps:$4 sm:$0xff]   ;;  %v20295_v50 = vld [vmem:[#allocation7 + $0xce0] ss:$16 sps:$4 sm:$0xff]  }
 0x2a2   : > { %7076 = vmatpush1.bf16.msra.mxu0 %v20203_v51  ;;  %7732 = vmatpush1.bf16.msra.mxu1 %v20206_v52  ;;  %v20298_v51 = vld [vmem:[#allocation7 + $0xce8] ss:$16 sps:$4 sm:$0xff]   ;;  %v20303_v52 = vld [vmem:[#allocation7 + $0xd04] ss:$16 sps:$4 sm:$0xff]  }
 0x2a3   : > { %7077 = vmatprep.subr.bf16.mxu0 %v20211_v53  ;;  %7733 = vmatprep.subr.bf16.mxu1 %v20214_v54  ;;  %v20306_v53 = vld [vmem:[#allocation7 + $0xd0c] ss:$16 sps:$4 sm:$0xff]   ;;  %v20301_v54 = vld [vmem:[#allocation7 + $0xd00] ss:$16 sps:$4 sm:$0xff]  }
 0x2a6   : > { %7078 = vmatpush1.bf16.msra.mxu0 %v20209_v55  ;;  %7734 = vmatpush1.bf16.msra.mxu1 %v20212_v56  ;;  %v20304_v55 = vld [vmem:[#allocation7 + $0xd08] ss:$16 sps:$4 sm:$0xff]   ;;  %v20309_v56 = vld [vmem:[#allocation7 + $0xd24] ss:$16 sps:$4 sm:$0xff]  }
 0x2a7   : > { %7079 = vmatprep.subr.bf16.mxu0 %v20217_v57  ;;  %7735 = vmatprep.subr.bf16.mxu1 %v20220_v58  ;;  %v20312_v57 = vld [vmem:[#allocation7 + $0xd2c] ss:$16 sps:$4 sm:$0xff]   ;;  %v20307_v58 = vld [vmem:[#allocation7 + $0xd20] ss:$16 sps:$4 sm:$0xff]  }
 0x2aa   : > { %7080 = vmatpush1.bf16.msra.mxu0 %v20215_v59  ;;  %7736 = vmatpush1.bf16.msra.mxu1 %v20218_v60  ;;  %v20310_v59 = vld [vmem:[#allocation7 + $0xd28] ss:$16 sps:$4 sm:$0xff]   ;;  %v20315_v60 = vld [vmem:[#allocation7 + $0xd44] ss:$16 sps:$4 sm:$0xff]  }
 0x2ab   : > { %7081 = vmatprep.subr.bf16.mxu0 %v20223_v61  ;;  %7737 = vmatprep.subr.bf16.mxu1 %v20226_v62  ;;  %v20318_v61 = vld [vmem:[#allocation7 + $0xd4c] ss:$16 sps:$4 sm:$0xff]   ;;  %v20313_v62 = vld [vmem:[#allocation7 + $0xd40] ss:$16 sps:$4 sm:$0xff]  }
 0x2ae   : > { %7082 = vmatpush1.bf16.msra.mxu0 %v20221_v63  ;;  %7738 = vmatpush1.bf16.msra.mxu1 %v20224_v0  ;;  %v20316_v63 = vld [vmem:[#allocation7 + $0xd48] ss:$16 sps:$4 sm:$0xff]   ;;  %v20321_v0 = vld [vmem:[#allocation7 + $0xd64] ss:$16 sps:$4 sm:$0xff]  }
 0x2af   : > { %7083 = vmatprep.subr.bf16.mxu0 %v20229_v1  ;;  %7739 = vmatprep.subr.bf16.mxu1 %v20232_v2  ;;  %v20324_v1 = vld [vmem:[#allocation7 + $0xd6c] ss:$16 sps:$4 sm:$0xff]   ;;  %v20319_v2 = vld [vmem:[#allocation7 + $0xd60] ss:$16 sps:$4 sm:$0xff]  }
 0x2b2   : > { %7084 = vmatpush1.bf16.msra.mxu0 %v20227_v3  ;;  %7740 = vmatpush1.bf16.msra.mxu1 %v20230_v4  ;;  %v20322_v3 = vld [vmem:[#allocation7 + $0xd68] ss:$16 sps:$4 sm:$0xff]   ;;  %v20327_v4 = vld [vmem:[#allocation7 + $0xd84] ss:$16 sps:$4 sm:$0xff]  }
 0x2b3   : > { %7085 = vmatprep.subr.bf16.mxu0 %v20235_v5  ;;  %7741 = vmatprep.subr.bf16.mxu1 %v20238_v6  ;;  %v20330_v5 = vld [vmem:[#allocation7 + $0xd8c] ss:$16 sps:$4 sm:$0xff]   ;;  %v20325_v6 = vld [vmem:[#allocation7 + $0xd80] ss:$16 sps:$4 sm:$0xff]  }
 0x2b6   : > { %7086 = vmatpush1.bf16.msra.mxu0 %v20233_v7  ;;  %7742 = vmatpush1.bf16.msra.mxu1 %v20236_v8  ;;  %v20328_v7 = vld [vmem:[#allocation7 + $0xd88] ss:$16 sps:$4 sm:$0xff]   ;;  %v20333_v8 = vld [vmem:[#allocation7 + $0xda4] ss:$16 sps:$4 sm:$0xff]  }
 0x2b7   : > { %7087 = vmatprep.subr.bf16.mxu0 %v20241_v9  ;;  %7743 = vmatprep.subr.bf16.mxu1 %v20244_v10  ;;  %v20336_v9 = vld [vmem:[#allocation7 + $0xdac] ss:$16 sps:$4 sm:$0xff]   ;;  %v20331_v10 = vld [vmem:[#allocation7 + $0xda0] ss:$16 sps:$4 sm:$0xff]  }
 0x2ba   : > { %7088 = vmatpush1.bf16.msra.mxu0 %v20239_v12  ;;  %7744 = vmatpush1.bf16.msra.mxu1 %v20242_v13  ;;  %v20334_v12 = vld [vmem:[#allocation7 + $0xda8] ss:$16 sps:$4 sm:$0xff]   ;;  %v20339_v13 = vld [vmem:[#allocation7 + $0xdc4] ss:$16 sps:$4 sm:$0xff]  }
 0x2bb   : > { %7089 = vmatprep.subr.bf16.mxu0 %v20247_v15  ;;  %7745 = vmatprep.subr.bf16.mxu1 %v20250_v16  ;;  %v20342_v15 = vld [vmem:[#allocation7 + $0xdcc] ss:$16 sps:$4 sm:$0xff]   ;;  %v20337_v16 = vld [vmem:[#allocation7 + $0xdc0] ss:$16 sps:$4 sm:$0xff]  }
 0x2be   : > { %7090 = vmatpush1.bf16.msra.mxu0 %v20245_v18  ;;  %7746 = vmatpush1.bf16.msra.mxu1 %v20248_v20  ;;  %v20340_v18 = vld [vmem:[#allocation7 + $0xdc8] ss:$16 sps:$4 sm:$0xff]   ;;  %v20345_v20 = vld [vmem:[#allocation7 + $0xde4] ss:$16 sps:$4 sm:$0xff]  }
 0x2bf   : > { %7100 = vmatprep.subr.bf16.mxu0 %v20255_v11  ;;  %7756 = vmatprep.subr.bf16.mxu1 %v20258_v21  ;;  %v20348_v11 = vld [vmem:[#allocation7 + $0xdec] ss:$16 sps:$4 sm:$0xff]   ;;  %v20343_v21 = vld [vmem:[#allocation7 + $0xde0] ss:$16 sps:$4 sm:$0xff]  }
 0x2c1   : > { %7092 = vmatmul.mubr.bf16.vlgmr.msra.gmra.mrb[0].mxu0 %v17087_v14  ;;  %7748 = vmatmul.mubr.bf16.vlgmr.msra.gmra.mrb[0].mxu1 %v17087_v14  ;;  %v20346_v14 = vld [vmem:[#allocation7 + $0xde8] ss:$16 sps:$4 sm:$0xff]  }
 0x2c2   : > { %7101 = vmatpush1.bf16.msra.mxu0 %v20253_v23  ;;  %7757 = vmatpush1.bf16.msra.mxu1 %v20256_v24  ;;  %v20353_v23 = vld [vmem:[#allocation7 + $0xe04] ss:$16 sps:$4 sm:$0xff]   ;;  %v20356_v24 = vld [vmem:[#allocation7 + $0xe0c] ss:$16 sps:$4 sm:$0xff]  }
 0x2c3   : > { %7102 = vmatprep.subr.bf16.mxu0 %v20261_v25  ;;  %7758 = vmatprep.subr.bf16.mxu1 %v20264_v17  ;;  %v22397_v25 = vld [vmem:[%s22321_s24 + $0x38] sm:$0xff]  ;;  %v17089_v17 = vcombine.low %v22390_v22, %v22390_v22  ;;  %v20365_v22 = vld [vmem:[#allocation7 + $0xe44] ss:$16 sps:$4 sm:$0xff]  }
 0x2c4   : > { %7132 = vmatprep.mubr.bf16.mxu0 %v17090_v26  ;;  %7788 = vmatprep.mubr.bf16.mxu1 %v17090_v26  ;;  %v20351_v26 = vld [vmem:[#allocation7 + $0xe00] ss:$16 sps:$4 sm:$0xff]  }
 0x2c6   : > { %7103 = vmatpush1.bf16.msra.mxu0 %v20259_v27  ;;  %7759 = vmatpush1.bf16.msra.mxu1 %v20262_v28  ;;  %v20354_v27 = vld [vmem:[#allocation7 + $0xe08] ss:$16 sps:$4 sm:$0xff]   ;;  %v20359_v28 = vld [vmem:[#allocation7 + $0xe24] ss:$16 sps:$4 sm:$0xff]  }
 0x2c7   : > { %7104 = vmatprep.subr.bf16.mxu0 %v20267_v19  ;;  %7760 = vmatprep.subr.bf16.mxu1 %v20270_v29  ;;  %v20362_v19 = vld [vmem:[#allocation7 + $0xe2c] ss:$16 sps:$4 sm:$0xff]   ;;  %v17092_v29 = vcombine.high %v22397_v25, %v22397_v25 }
 0x2ca   : > { %7105 = vmatpush1.bf16.msra.mxu0 %v20265_v30  ;;  %7761 = vmatpush1.bf16.msra.mxu1 %v20268_v31  ;;  %v20357_v30 = vld [vmem:[#allocation7 + $0xe20] ss:$16 sps:$4 sm:$0xff]   ;;  %v20360_v31 = vld [vmem:[#allocation7 + $0xe28] ss:$16 sps:$4 sm:$0xff]  }
 0x2cb   : > { %7106 = vmatprep.subr.bf16.mxu0 %v20273_v32  ;;  %7762 = vmatprep.subr.bf16.mxu1 %v20276_v33  ;;  %v20368_v32 = vld [vmem:[#allocation7 + $0xe4c] ss:$16 sps:$4 sm:$0xff]   ;;  %v20363_v33 = vld [vmem:[#allocation7 + $0xe40] ss:$16 sps:$4 sm:$0xff]  }
 0x2ce   : > { %7107 = vmatpush1.bf16.msra.mxu0 %v20271_v34  ;;  %7763 = vmatpush1.bf16.msra.mxu1 %v20274_v35  ;;  %v20366_v34 = vld [vmem:[#allocation7 + $0xe48] ss:$16 sps:$4 sm:$0xff]   ;;  %v20371_v35 = vld [vmem:[#allocation7 + $0xe64] ss:$16 sps:$4 sm:$0xff]  }
 0x2cf   : > { %7108 = vmatprep.subr.bf16.mxu0 %v20279_v36  ;;  %7764 = vmatprep.subr.bf16.mxu1 %v20282_v37  ;;  %v20374_v36 = vld [vmem:[#allocation7 + $0xe6c] ss:$16 sps:$4 sm:$0xff]   ;;  %v20369_v37 = vld [vmem:[#allocation7 + $0xe60] ss:$16 sps:$4 sm:$0xff]  }
 0x2d2   : > { %7109 = vmatpush1.bf16.msra.mxu0 %v20277_v38  ;;  %7765 = vmatpush1.bf16.msra.mxu1 %v20280_v39  ;;  %v20372_v38 = vld [vmem:[#allocation7 + $0xe68] ss:$16 sps:$4 sm:$0xff]   ;;  %v20377_v39 = vld [vmem:[#allocation7 + $0xe84] ss:$16 sps:$4 sm:$0xff]  }
 0x2d3   : > { %7110 = vmatprep.subr.bf16.mxu0 %v20285_v40  ;;  %7766 = vmatprep.subr.bf16.mxu1 %v20288_v41  ;;  %v20380_v40 = vld [vmem:[#allocation7 + $0xe8c] ss:$16 sps:$4 sm:$0xff]   ;;  %v20375_v41 = vld [vmem:[#allocation7 + $0xe80] ss:$16 sps:$4 sm:$0xff]  }
 0x2d6   : > { %7111 = vmatpush1.bf16.msra.mxu0 %v20283_v42  ;;  %7767 = vmatpush1.bf16.msra.mxu1 %v20286_v43  ;;  %v20378_v42 = vld [vmem:[#allocation7 + $0xe88] ss:$16 sps:$4 sm:$0xff]   ;;  %v20383_v43 = vld [vmem:[#allocation7 + $0xea4] ss:$16 sps:$4 sm:$0xff]  }
 0x2d7   : > { %7112 = vmatprep.subr.bf16.mxu0 %v20291_v44  ;;  %7768 = vmatprep.subr.bf16.mxu1 %v20294_v45  ;;  %v20386_v44 = vld [vmem:[#allocation7 + $0xeac] ss:$16 sps:$4 sm:$0xff]   ;;  %v20381_v45 = vld [vmem:[#allocation7 + $0xea0] ss:$16 sps:$4 sm:$0xff]  }
 0x2da   : > { %7113 = vmatpush1.bf16.msra.mxu0 %v20289_v46  ;;  %7769 = vmatpush1.bf16.msra.mxu1 %v20292_v47  ;;  %v20384_v46 = vld [vmem:[#allocation7 + $0xea8] ss:$16 sps:$4 sm:$0xff]   ;;  %v20389_v47 = vld [vmem:[#allocation7 + $0xec4] ss:$16 sps:$4 sm:$0xff]  }
 0x2db   : > { %7114 = vmatprep.subr.bf16.mxu0 %v20297_v48  ;;  %7770 = vmatprep.subr.bf16.mxu1 %v20300_v49  ;;  %v20392_v48 = vld [vmem:[#allocation7 + $0xecc] ss:$16 sps:$4 sm:$0xff]   ;;  %v20387_v49 = vld [vmem:[#allocation7 + $0xec0] ss:$16 sps:$4 sm:$0xff]  }
 0x2de   : > { %7115 = vmatpush1.bf16.msra.mxu0 %v20295_v50  ;;  %7771 = vmatpush1.bf16.msra.mxu1 %v20298_v51  ;;  %v20390_v50 = vld [vmem:[#allocation7 + $0xec8] ss:$16 sps:$4 sm:$0xff]   ;;  %v20395_v51 = vld [vmem:[#allocation7 + $0xee4] ss:$16 sps:$4 sm:$0xff]  }
 0x2df   : > { %7116 = vmatprep.subr.bf16.mxu0 %v20303_v52  ;;  %7772 = vmatprep.subr.bf16.mxu1 %v20306_v53  ;;  %v20398_v52 = vld [vmem:[#allocation7 + $0xeec] ss:$16 sps:$4 sm:$0xff]   ;;  %v20393_v53 = vld [vmem:[#allocation7 + $0xee0] ss:$16 sps:$4 sm:$0xff]  }
 0x2e2   : > { %7117 = vmatpush1.bf16.msra.mxu0 %v20301_v54  ;;  %7773 = vmatpush1.bf16.msra.mxu1 %v20304_v55  ;;  %v20396_v54 = vld [vmem:[#allocation7 + $0xee8] ss:$16 sps:$4 sm:$0xff]   ;;  %v20401_v55 = vld [vmem:[#allocation7 + $0xf04] ss:$16 sps:$4 sm:$0xff]  }
 0x2e3   : > { %7118 = vmatprep.subr.bf16.mxu0 %v20309_v56  ;;  %7774 = vmatprep.subr.bf16.mxu1 %v20312_v57  ;;  %v20404_v56 = vld [vmem:[#allocation7 + $0xf0c] ss:$16 sps:$4 sm:$0xff]   ;;  %v20399_v57 = vld [vmem:[#allocation7 + $0xf00] ss:$16 sps:$4 sm:$0xff]  }
 0x2e6   : > { %7119 = vmatpush1.bf16.msra.mxu0 %v20307_v58  ;;  %7775 = vmatpush1.bf16.msra.mxu1 %v20310_v59  ;;  %v20402_v58 = vld [vmem:[#allocation7 + $0xf08] ss:$16 sps:$4 sm:$0xff]   ;;  %v20407_v59 = vld [vmem:[#allocation7 + $0xf24] ss:$16 sps:$4 sm:$0xff]  }
 0x2e7   : > { %7120 = vmatprep.subr.bf16.mxu0 %v20315_v60  ;;  %7776 = vmatprep.subr.bf16.mxu1 %v20318_v61  ;;  %v20410_v60 = vld [vmem:[#allocation7 + $0xf2c] ss:$16 sps:$4 sm:$0xff]   ;;  %v20405_v61 = vld [vmem:[#allocation7 + $0xf20] ss:$16 sps:$4 sm:$0xff]  }
 0x2ea   : > { %7121 = vmatpush1.bf16.msra.mxu0 %v20313_v62  ;;  %7777 = vmatpush1.bf16.msra.mxu1 %v20316_v63  ;;  %v20408_v62 = vld [vmem:[#allocation7 + $0xf28] ss:$16 sps:$4 sm:$0xff]   ;;  %v20413_v63 = vld [vmem:[#allocation7 + $0xf44] ss:$16 sps:$4 sm:$0xff]  }
 0x2eb   : > { %7122 = vmatprep.subr.bf16.mxu0 %v20321_v0  ;;  %7778 = vmatprep.subr.bf16.mxu1 %v20324_v1  ;;  %v20416_v0 = vld [vmem:[#allocation7 + $0xf4c] ss:$16 sps:$4 sm:$0xff]   ;;  %v20411_v1 = vld [vmem:[#allocation7 + $0xf40] ss:$16 sps:$4 sm:$0xff]  }
 0x2ee   : > { %7123 = vmatpush1.bf16.msra.mxu0 %v20319_v2  ;;  %7779 = vmatpush1.bf16.msra.mxu1 %v20322_v3  ;;  %v20414_v2 = vld [vmem:[#allocation7 + $0xf48] ss:$16 sps:$4 sm:$0xff]   ;;  %v20419_v3 = vld [vmem:[#allocation7 + $0xf64] ss:$16 sps:$4 sm:$0xff]  }
 0x2ef   : > { %7124 = vmatprep.subr.bf16.mxu0 %v20327_v4  ;;  %7780 = vmatprep.subr.bf16.mxu1 %v20330_v5  ;;  %v20422_v4 = vld [vmem:[#allocation7 + $0xf6c] ss:$16 sps:$4 sm:$0xff]   ;;  %v20417_v5 = vld [vmem:[#allocation7 + $0xf60] ss:$16 sps:$4 sm:$0xff]  }
 0x2f2   : > { %7125 = vmatpush1.bf16.msra.mxu0 %v20325_v6  ;;  %7781 = vmatpush1.bf16.msra.mxu1 %v20328_v7  ;;  %v20420_v6 = vld [vmem:[#allocation7 + $0xf68] ss:$16 sps:$4 sm:$0xff]   ;;  %v20425_v7 = vld [vmem:[#allocation7 + $0xf84] ss:$16 sps:$4 sm:$0xff]  }
 0x2f3   : > { %7126 = vmatprep.subr.bf16.mxu0 %v20333_v8  ;;  %7782 = vmatprep.subr.bf16.mxu1 %v20336_v9  ;;  %v20428_v8 = vld [vmem:[#allocation7 + $0xf8c] ss:$16 sps:$4 sm:$0xff]   ;;  %v20423_v9 = vld [vmem:[#allocation7 + $0xf80] ss:$16 sps:$4 sm:$0xff]  }
 0x2f6   : > { %7127 = vmatpush1.bf16.msra.mxu0 %v20331_v10  ;;  %7783 = vmatpush1.bf16.msra.mxu1 %v20334_v12  ;;  %v20426_v10 = vld [vmem:[#allocation7 + $0xf88] ss:$16 sps:$4 sm:$0xff]   ;;  %v20431_v12 = vld [vmem:[#allocation7 + $0xfa4] ss:$16 sps:$4 sm:$0xff]  }
 0x2f7   : > { %7128 = vmatprep.subr.bf16.mxu0 %v20339_v13  ;;  %7784 = vmatprep.subr.bf16.mxu1 %v20342_v15  ;;  %v20434_v13 = vld [vmem:[#allocation7 + $0xfac] ss:$16 sps:$4 sm:$0xff]   ;;  %v20429_v15 = vld [vmem:[#allocation7 + $0xfa0] ss:$16 sps:$4 sm:$0xff]  }
 0x2fa   : > { %7129 = vmatpush1.bf16.msra.mxu0 %v20337_v16  ;;  %7785 = vmatpush1.bf16.msra.mxu1 %v20340_v18  ;;  %v20432_v16 = vld [vmem:[#allocation7 + $0xfa8] ss:$16 sps:$4 sm:$0xff]   ;;  %v20437_v18 = vld [vmem:[#allocation7 + $0xfc4] ss:$16 sps:$4 sm:$0xff]  }
 0x2fb   : > { %7130 = vmatprep.subr.bf16.mxu0 %v20345_v20  ;;  %7786 = vmatprep.subr.bf16.mxu1 %v20348_v11  ;;  %v20440_v20 = vld [vmem:[#allocation7 + $0xfcc] ss:$16 sps:$4 sm:$0xff]   ;;  %v20435_v11 = vld [vmem:[#allocation7 + $0xfc0] ss:$16 sps:$4 sm:$0xff]  }
 0x2fe   : > { %7131 = vmatpush1.bf16.msra.mxu0 %v20343_v21  ;;  %7787 = vmatpush1.bf16.msra.mxu1 %v20346_v14  ;;  %v20438_v21 = vld [vmem:[#allocation7 + $0xfc8] ss:$16 sps:$4 sm:$0xff]   ;;  %v20443_v14 = vld [vmem:[#allocation7 + $0xfe4] ss:$16 sps:$4 sm:$0xff]  }
 0x2ff   : > { %7141 = vmatprep.subr.bf16.mxu0 %v20353_v23  ;;  %7797 = vmatprep.subr.bf16.mxu1 %v20356_v24  ;;  %v20446_v23 = vld [vmem:[#allocation7 + $0xfec] ss:$16 sps:$4 sm:$0xff]   ;;  %v20441_v24 = vld [vmem:[#allocation7 + $0xfe0] ss:$16 sps:$4 sm:$0xff]  }
 0x301   : > { %7133 = vmatmul.mubr.bf16.vlgmr.msra.gmra.mrb[0].mxu0 %v17089_v17  ;;  %7789 = vmatmul.mubr.bf16.vlgmr.msra.gmra.mrb[0].mxu1 %v17089_v17  ;;  %v20444_v17 = vld [vmem:[#allocation7 + $0xfe8] ss:$16 sps:$4 sm:$0xff]  }
 0x302   : > { %7142 = vmatpush1.bf16.msra.mxu0 %v20351_v26  ;;  %7798 = vmatpush1.bf16.msra.mxu1 %v20354_v27  ;;  %v20451_v26 = vld [vmem:[#allocation7 + $0x1004] ss:$16 sps:$4 sm:$0xff]   ;;  %v20454_v27 = vld [vmem:[#allocation7 + $0x100c] ss:$16 sps:$4 sm:$0xff]  }
 0x303   : > { %7143 = vmatprep.subr.bf16.mxu0 %v20359_v28  ;;  %7799 = vmatprep.subr.bf16.mxu1 %v20362_v19  ;;  %v22404_v28 = vld [vmem:[%s22321_s24 + $0x40] sm:$0xff]  ;;  %v17091_v19 = vcombine.low %v22397_v25, %v22397_v25 }
 0x304   : > { %7173 = vmatprep.mubr.bf16.mxu0 %v17092_v29  ;;  %7829 = vmatprep.mubr.bf16.mxu1 %v17092_v29  ;;  %v20449_v29 = vld [vmem:[#allocation7 + $0x1000] ss:$16 sps:$4 sm:$0xff]   ;;  %v20463_v25 = vld [vmem:[#allocation7 + $0x1044] ss:$16 sps:$4 sm:$0xff]  }
 0x306   : > { %7144 = vmatpush1.bf16.msra.mxu0 %v20357_v30  ;;  %7800 = vmatpush1.bf16.msra.mxu1 %v20360_v31  ;;  %v20452_v30 = vld [vmem:[#allocation7 + $0x1008] ss:$16 sps:$4 sm:$0xff]   ;;  %v20457_v31 = vld [vmem:[#allocation7 + $0x1024] ss:$16 sps:$4 sm:$0xff]  }
 0x307   : > { %7145 = vmatprep.subr.bf16.mxu0 %v20365_v22  ;;  %7801 = vmatprep.subr.bf16.mxu1 %v20368_v32  ;;  %v20460_v22 = vld [vmem:[#allocation7 + $0x102c] ss:$16 sps:$4 sm:$0xff]   ;;  %v17094_v32 = vcombine.high %v22404_v28, %v22404_v28 }
 0x30a   : > { %7146 = vmatpush1.bf16.msra.mxu0 %v20363_v33  ;;  %7802 = vmatpush1.bf16.msra.mxu1 %v20366_v34  ;;  %v20455_v33 = vld [vmem:[#allocation7 + $0x1020] ss:$16 sps:$4 sm:$0xff]   ;;  %v20458_v34 = vld [vmem:[#allocation7 + $0x1028] ss:$16 sps:$4 sm:$0xff]  }
 0x30b   : > { %7147 = vmatprep.subr.bf16.mxu0 %v20371_v35  ;;  %7803 = vmatprep.subr.bf16.mxu1 %v20374_v36  ;;  %v20466_v35 = vld [vmem:[#allocation7 + $0x104c] ss:$16 sps:$4 sm:$0xff]   ;;  %v20461_v36 = vld [vmem:[#allocation7 + $0x1040] ss:$16 sps:$4 sm:$0xff]  }
 0x30e   : > { %7148 = vmatpush1.bf16.msra.mxu0 %v20369_v37  ;;  %7804 = vmatpush1.bf16.msra.mxu1 %v20372_v38  ;;  %v20464_v37 = vld [vmem:[#allocation7 + $0x1048] ss:$16 sps:$4 sm:$0xff]   ;;  %v20469_v38 = vld [vmem:[#allocation7 + $0x1064] ss:$16 sps:$4 sm:$0xff]  }
 0x30f   : > { %7149 = vmatprep.subr.bf16.mxu0 %v20377_v39  ;;  %7805 = vmatprep.subr.bf16.mxu1 %v20380_v40  ;;  %v20472_v39 = vld [vmem:[#allocation7 + $0x106c] ss:$16 sps:$4 sm:$0xff]   ;;  %v20467_v40 = vld [vmem:[#allocation7 + $0x1060] ss:$16 sps:$4 sm:$0xff]  }
 0x312   : > { %7150 = vmatpush1.bf16.msra.mxu0 %v20375_v41  ;;  %7806 = vmatpush1.bf16.msra.mxu1 %v20378_v42  ;;  %v20470_v41 = vld [vmem:[#allocation7 + $0x1068] ss:$16 sps:$4 sm:$0xff]   ;;  %v20475_v42 = vld [vmem:[#allocation7 + $0x1084] ss:$16 sps:$4 sm:$0xff]  }
 0x313   : > { %7151 = vmatprep.subr.bf16.mxu0 %v20383_v43  ;;  %7807 = vmatprep.subr.bf16.mxu1 %v20386_v44  ;;  %v20478_v43 = vld [vmem:[#allocation7 + $0x108c] ss:$16 sps:$4 sm:$0xff]   ;;  %v20473_v44 = vld [vmem:[#allocation7 + $0x1080] ss:$16 sps:$4 sm:$0xff]  }
 0x316   : > { %7152 = vmatpush1.bf16.msra.mxu0 %v20381_v45  ;;  %7808 = vmatpush1.bf16.msra.mxu1 %v20384_v46  ;;  %v20476_v45 = vld [vmem:[#allocation7 + $0x1088] ss:$16 sps:$4 sm:$0xff]   ;;  %v20481_v46 = vld [vmem:[#allocation7 + $0x10a4] ss:$16 sps:$4 sm:$0xff]  }
 0x317   : > { %7153 = vmatprep.subr.bf16.mxu0 %v20389_v47  ;;  %7809 = vmatprep.subr.bf16.mxu1 %v20392_v48  ;;  %v20484_v47 = vld [vmem:[#allocation7 + $0x10ac] ss:$16 sps:$4 sm:$0xff]   ;;  %v20479_v48 = vld [vmem:[#allocation7 + $0x10a0] ss:$16 sps:$4 sm:$0xff]  }
 0x31a   : > { %7154 = vmatpush1.bf16.msra.mxu0 %v20387_v49  ;;  %7810 = vmatpush1.bf16.msra.mxu1 %v20390_v50  ;;  %v20482_v49 = vld [vmem:[#allocation7 + $0x10a8] ss:$16 sps:$4 sm:$0xff]   ;;  %v20487_v50 = vld [vmem:[#allocation7 + $0x10c4] ss:$16 sps:$4 sm:$0xff]  }
 0x31b   : > { %7155 = vmatprep.subr.bf16.mxu0 %v20395_v51  ;;  %7811 = vmatprep.subr.bf16.mxu1 %v20398_v52  ;;  %v20490_v51 = vld [vmem:[#allocation7 + $0x10cc] ss:$16 sps:$4 sm:$0xff]   ;;  %v20485_v52 = vld [vmem:[#allocation7 + $0x10c0] ss:$16 sps:$4 sm:$0xff]  }
 0x31e   : > { %7156 = vmatpush1.bf16.msra.mxu0 %v20393_v53  ;;  %7812 = vmatpush1.bf16.msra.mxu1 %v20396_v54  ;;  %v20488_v53 = vld [vmem:[#allocation7 + $0x10c8] ss:$16 sps:$4 sm:$0xff]   ;;  %v20493_v54 = vld [vmem:[#allocation7 + $0x10e4] ss:$16 sps:$4 sm:$0xff]  }
 0x31f   : > { %7157 = vmatprep.subr.bf16.mxu0 %v20401_v55  ;;  %7813 = vmatprep.subr.bf16.mxu1 %v20404_v56  ;;  %v20496_v55 = vld [vmem:[#allocation7 + $0x10ec] ss:$16 sps:$4 sm:$0xff]   ;;  %v20491_v56 = vld [vmem:[#allocation7 + $0x10e0] ss:$16 sps:$4 sm:$0xff]  }
 0x322   : > { %7158 = vmatpush1.bf16.msra.mxu0 %v20399_v57  ;;  %7814 = vmatpush1.bf16.msra.mxu1 %v20402_v58  ;;  %v20494_v57 = vld [vmem:[#allocation7 + $0x10e8] ss:$16 sps:$4 sm:$0xff]   ;;  %v20499_v58 = vld [vmem:[#allocation7 + $0x1104] ss:$16 sps:$4 sm:$0xff]  }
 0x323   : > { %7159 = vmatprep.subr.bf16.mxu0 %v20407_v59  ;;  %7815 = vmatprep.subr.bf16.mxu1 %v20410_v60  ;;  %v20502_v59 = vld [vmem:[#allocation7 + $0x110c] ss:$16 sps:$4 sm:$0xff]   ;;  %v20497_v60 = vld [vmem:[#allocation7 + $0x1100] ss:$16 sps:$4 sm:$0xff]  }
 0x326   : > { %7160 = vmatpush1.bf16.msra.mxu0 %v20405_v61  ;;  %7816 = vmatpush1.bf16.msra.mxu1 %v20408_v62  ;;  %v20500_v61 = vld [vmem:[#allocation7 + $0x1108] ss:$16 sps:$4 sm:$0xff]   ;;  %v20505_v62 = vld [vmem:[#allocation7 + $0x1124] ss:$16 sps:$4 sm:$0xff]  }
 0x327   : > { %7161 = vmatprep.subr.bf16.mxu0 %v20413_v63  ;;  %7817 = vmatprep.subr.bf16.mxu1 %v20416_v0  ;;  %v20508_v63 = vld [vmem:[#allocation7 + $0x112c] ss:$16 sps:$4 sm:$0xff]   ;;  %v20503_v0 = vld [vmem:[#allocation7 + $0x1120] ss:$16 sps:$4 sm:$0xff]  }
 0x32a   : > { %7162 = vmatpush1.bf16.msra.mxu0 %v20411_v1  ;;  %7818 = vmatpush1.bf16.msra.mxu1 %v20414_v2  ;;  %v20506_v1 = vld [vmem:[#allocation7 + $0x1128] ss:$16 sps:$4 sm:$0xff]   ;;  %v20511_v2 = vld [vmem:[#allocation7 + $0x1144] ss:$16 sps:$4 sm:$0xff]  }
 0x32b   : > { %7163 = vmatprep.subr.bf16.mxu0 %v20419_v3  ;;  %7819 = vmatprep.subr.bf16.mxu1 %v20422_v4  ;;  %v20514_v3 = vld [vmem:[#allocation7 + $0x114c] ss:$16 sps:$4 sm:$0xff]   ;;  %v20509_v4 = vld [vmem:[#allocation7 + $0x1140] ss:$16 sps:$4 sm:$0xff]  }
 0x32e   : > { %7164 = vmatpush1.bf16.msra.mxu0 %v20417_v5  ;;  %7820 = vmatpush1.bf16.msra.mxu1 %v20420_v6  ;;  %v20512_v5 = vld [vmem:[#allocation7 + $0x1148] ss:$16 sps:$4 sm:$0xff]   ;;  %v20517_v6 = vld [vmem:[#allocation7 + $0x1164] ss:$16 sps:$4 sm:$0xff]  }
 0x32f   : > { %7165 = vmatprep.subr.bf16.mxu0 %v20425_v7  ;;  %7821 = vmatprep.subr.bf16.mxu1 %v20428_v8  ;;  %v20520_v7 = vld [vmem:[#allocation7 + $0x116c] ss:$16 sps:$4 sm:$0xff]   ;;  %v20515_v8 = vld [vmem:[#allocation7 + $0x1160] ss:$16 sps:$4 sm:$0xff]  }
 0x332   : > { %7166 = vmatpush1.bf16.msra.mxu0 %v20423_v9  ;;  %7822 = vmatpush1.bf16.msra.mxu1 %v20426_v10  ;;  %v20518_v9 = vld [vmem:[#allocation7 + $0x1168] ss:$16 sps:$4 sm:$0xff]   ;;  %v20523_v10 = vld [vmem:[#allocation7 + $0x1184] ss:$16 sps:$4 sm:$0xff]  }
 0x333   : > { %7167 = vmatprep.subr.bf16.mxu0 %v20431_v12  ;;  %7823 = vmatprep.subr.bf16.mxu1 %v20434_v13  ;;  %v20526_v12 = vld [vmem:[#allocation7 + $0x118c] ss:$16 sps:$4 sm:$0xff]   ;;  %v20521_v13 = vld [vmem:[#allocation7 + $0x1180] ss:$16 sps:$4 sm:$0xff]  }
 0x336   : > { %7168 = vmatpush1.bf16.msra.mxu0 %v20429_v15  ;;  %7824 = vmatpush1.bf16.msra.mxu1 %v20432_v16  ;;  %v20524_v15 = vld [vmem:[#allocation7 + $0x1188] ss:$16 sps:$4 sm:$0xff]   ;;  %v20529_v16 = vld [vmem:[#allocation7 + $0x11a4] ss:$16 sps:$4 sm:$0xff]  }
 0x337   : > { %7169 = vmatprep.subr.bf16.mxu0 %v20437_v18  ;;  %7825 = vmatprep.subr.bf16.mxu1 %v20440_v20  ;;  %v20532_v18 = vld [vmem:[#allocation7 + $0x11ac] ss:$16 sps:$4 sm:$0xff]   ;;  %v20527_v20 = vld [vmem:[#allocation7 + $0x11a0] ss:$16 sps:$4 sm:$0xff]  }
 0x33a   : > { %7170 = vmatpush1.bf16.msra.mxu0 %v20435_v11  ;;  %7826 = vmatpush1.bf16.msra.mxu1 %v20438_v21  ;;  %v20530_v11 = vld [vmem:[#allocation7 + $0x11a8] ss:$16 sps:$4 sm:$0xff]   ;;  %v20535_v21 = vld [vmem:[#allocation7 + $0x11c4] ss:$16 sps:$4 sm:$0xff]  }
 0x33b   : > { %7171 = vmatprep.subr.bf16.mxu0 %v20443_v14  ;;  %7827 = vmatprep.subr.bf16.mxu1 %v20446_v23  ;;  %v20538_v14 = vld [vmem:[#allocation7 + $0x11cc] ss:$16 sps:$4 sm:$0xff]   ;;  %v20533_v23 = vld [vmem:[#allocation7 + $0x11c0] ss:$16 sps:$4 sm:$0xff]  }
 0x33e   : > { %7172 = vmatpush1.bf16.msra.mxu0 %v20441_v24  ;;  %7828 = vmatpush1.bf16.msra.mxu1 %v20444_v17  ;;  %v20536_v24 = vld [vmem:[#allocation7 + $0x11c8] ss:$16 sps:$4 sm:$0xff]   ;;  %v20541_v17 = vld [vmem:[#allocation7 + $0x11e4] ss:$16 sps:$4 sm:$0xff]  }
 0x33f   : > { %7182 = vmatprep.subr.bf16.mxu0 %v20451_v26  ;;  %7838 = vmatprep.subr.bf16.mxu1 %v20454_v27  ;;  %v20544_v26 = vld [vmem:[#allocation7 + $0x11ec] ss:$16 sps:$4 sm:$0xff]   ;;  %v20539_v27 = vld [vmem:[#allocation7 + $0x11e0] ss:$16 sps:$4 sm:$0xff]  }
 0x341   : > { %7174 = vmatmul.mubr.bf16.vlgmr.msra.gmra.mrb[0].mxu0 %v17091_v19  ;;  %7830 = vmatmul.mubr.bf16.vlgmr.msra.gmra.mrb[0].mxu1 %v17091_v19  ;;  %v20542_v19 = vld [vmem:[#allocation7 + $0x11e8] ss:$16 sps:$4 sm:$0xff]  }
 0x342   : > { %7183 = vmatpush1.bf16.msra.mxu0 %v20449_v29  ;;  %7839 = vmatpush1.bf16.msra.mxu1 %v20452_v30  ;;  %v20549_v29 = vld [vmem:[#allocation7 + $0x1204] ss:$16 sps:$4 sm:$0xff]   ;;  %v20552_v30 = vld [vmem:[#allocation7 + $0x120c] ss:$16 sps:$4 sm:$0xff]  }
 0x343   : > { %7184 = vmatprep.subr.bf16.mxu0 %v20457_v31  ;;  %7840 = vmatprep.subr.bf16.mxu1 %v20460_v22  ;;  %v22411_v31 = vld [vmem:[%s22321_s24 + $0x48] sm:$0xff]  ;;  %v17093_v22 = vcombine.low %v22404_v28, %v22404_v28  ;;  %v20561_v28 = vld [vmem:[#allocation7 + $0x1244] ss:$16 sps:$4 sm:$0xff]  }
 0x344   : > { %7214 = vmatprep.mubr.bf16.mxu0 %v17094_v32  ;;  %7870 = vmatprep.mubr.bf16.mxu1 %v17094_v32  ;;  %v20547_v32 = vld [vmem:[#allocation7 + $0x1200] ss:$16 sps:$4 sm:$0xff]  }
 0x346   : > { %7185 = vmatpush1.bf16.msra.mxu0 %v20455_v33  ;;  %7841 = vmatpush1.bf16.msra.mxu1 %v20458_v34  ;;  %v20550_v33 = vld [vmem:[#allocation7 + $0x1208] ss:$16 sps:$4 sm:$0xff]   ;;  %v20555_v34 = vld [vmem:[#allocation7 + $0x1224] ss:$16 sps:$4 sm:$0xff]  }
 0x347   : > { %7186 = vmatprep.subr.bf16.mxu0 %v20463_v25  ;;  %7842 = vmatprep.subr.bf16.mxu1 %v20466_v35  ;;  %v20558_v25 = vld [vmem:[#allocation7 + $0x122c] ss:$16 sps:$4 sm:$0xff]   ;;  %v17096_v35 = vcombine.high %v22411_v31, %v22411_v31 }
 0x34a   : > { %7187 = vmatpush1.bf16.msra.mxu0 %v20461_v36  ;;  %7843 = vmatpush1.bf16.msra.mxu1 %v20464_v37  ;;  %v20553_v36 = vld [vmem:[#allocation7 + $0x1220] ss:$16 sps:$4 sm:$0xff]   ;;  %v20556_v37 = vld [vmem:[#allocation7 + $0x1228] ss:$16 sps:$4 sm:$0xff]  }
 0x34b   : > { %7188 = vmatprep.subr.bf16.mxu0 %v20469_v38  ;;  %7844 = vmatprep.subr.bf16.mxu1 %v20472_v39  ;;  %v20564_v38 = vld [vmem:[#allocation7 + $0x124c] ss:$16 sps:$4 sm:$0xff]   ;;  %v20559_v39 = vld [vmem:[#allocation7 + $0x1240] ss:$16 sps:$4 sm:$0xff]  }
 0x34e   : > { %7189 = vmatpush1.bf16.msra.mxu0 %v20467_v40  ;;  %7845 = vmatpush1.bf16.msra.mxu1 %v20470_v41  ;;  %v20562_v40 = vld [vmem:[#allocation7 + $0x1248] ss:$16 sps:$4 sm:$0xff]   ;;  %v20567_v41 = vld [vmem:[#allocation7 + $0x1264] ss:$16 sps:$4 sm:$0xff]  }
 0x34f   : > { %7190 = vmatprep.subr.bf16.mxu0 %v20475_v42  ;;  %7846 = vmatprep.subr.bf16.mxu1 %v20478_v43  ;;  %v20570_v42 = vld [vmem:[#allocation7 + $0x126c] ss:$16 sps:$4 sm:$0xff]   ;;  %v20565_v43 = vld [vmem:[#allocation7 + $0x1260] ss:$16 sps:$4 sm:$0xff]  }
 0x352   : > { %7191 = vmatpush1.bf16.msra.mxu0 %v20473_v44  ;;  %7847 = vmatpush1.bf16.msra.mxu1 %v20476_v45  ;;  %v20568_v44 = vld [vmem:[#allocation7 + $0x1268] ss:$16 sps:$4 sm:$0xff]   ;;  %v20573_v45 = vld [vmem:[#allocation7 + $0x1284] ss:$16 sps:$4 sm:$0xff]  }
 0x353   : > { %7192 = vmatprep.subr.bf16.mxu0 %v20481_v46  ;;  %7848 = vmatprep.subr.bf16.mxu1 %v20484_v47  ;;  %v20576_v46 = vld [vmem:[#allocation7 + $0x128c] ss:$16 sps:$4 sm:$0xff]   ;;  %v20571_v47 = vld [vmem:[#allocation7 + $0x1280] ss:$16 sps:$4 sm:$0xff]  }
 0x356   : > { %7193 = vmatpush1.bf16.msra.mxu0 %v20479_v48  ;;  %7849 = vmatpush1.bf16.msra.mxu1 %v20482_v49  ;;  %v20574_v48 = vld [vmem:[#allocation7 + $0x1288] ss:$16 sps:$4 sm:$0xff]   ;;  %v20579_v49 = vld [vmem:[#allocation7 + $0x12a4] ss:$16 sps:$4 sm:$0xff]  }
 0x357   : > { %7194 = vmatprep.subr.bf16.mxu0 %v20487_v50  ;;  %7850 = vmatprep.subr.bf16.mxu1 %v20490_v51  ;;  %v20582_v50 = vld [vmem:[#allocation7 + $0x12ac] ss:$16 sps:$4 sm:$0xff]   ;;  %v20577_v51 = vld [vmem:[#allocation7 + $0x12a0] ss:$16 sps:$4 sm:$0xff]  }
 0x35a   : > { %7195 = vmatpush1.bf16.msra.mxu0 %v20485_v52  ;;  %7851 = vmatpush1.bf16.msra.mxu1 %v20488_v53  ;;  %v20580_v52 = vld [vmem:[#allocation7 + $0x12a8] ss:$16 sps:$4 sm:$0xff]   ;;  %v20585_v53 = vld [vmem:[#allocation7 + $0x12c4] ss:$16 sps:$4 sm:$0xff]  }
 0x35b   : > { %7196 = vmatprep.subr.bf16.mxu0 %v20493_v54  ;;  %7852 = vmatprep.subr.bf16.mxu1 %v20496_v55  ;;  %v20588_v54 = vld [vmem:[#allocation7 + $0x12cc] ss:$16 sps:$4 sm:$0xff]   ;;  %v20583_v55 = vld [vmem:[#allocation7 + $0x12c0] ss:$16 sps:$4 sm:$0xff]  }
 0x35e   : > { %7197 = vmatpush1.bf16.msra.mxu0 %v20491_v56  ;;  %7853 = vmatpush1.bf16.msra.mxu1 %v20494_v57  ;;  %v20586_v56 = vld [vmem:[#allocation7 + $0x12c8] ss:$16 sps:$4 sm:$0xff]   ;;  %v20591_v57 = vld [vmem:[#allocation7 + $0x12e4] ss:$16 sps:$4 sm:$0xff]  }
 0x35f   : > { %7198 = vmatprep.subr.bf16.mxu0 %v20499_v58  ;;  %7854 = vmatprep.subr.bf16.mxu1 %v20502_v59  ;;  %v20594_v58 = vld [vmem:[#allocation7 + $0x12ec] ss:$16 sps:$4 sm:$0xff]   ;;  %v20589_v59 = vld [vmem:[#allocation7 + $0x12e0] ss:$16 sps:$4 sm:$0xff]  }
 0x362   : > { %7199 = vmatpush1.bf16.msra.mxu0 %v20497_v60  ;;  %7855 = vmatpush1.bf16.msra.mxu1 %v20500_v61  ;;  %v20592_v60 = vld [vmem:[#allocation7 + $0x12e8] ss:$16 sps:$4 sm:$0xff]   ;;  %v20597_v61 = vld [vmem:[#allocation7 + $0x1304] ss:$16 sps:$4 sm:$0xff]  }
 0x363   : > { %7200 = vmatprep.subr.bf16.mxu0 %v20505_v62  ;;  %7856 = vmatprep.subr.bf16.mxu1 %v20508_v63  ;;  %v20600_v62 = vld [vmem:[#allocation7 + $0x130c] ss:$16 sps:$4 sm:$0xff]   ;;  %v20595_v63 = vld [vmem:[#allocation7 + $0x1300] ss:$16 sps:$4 sm:$0xff]  }
 0x366   : > { %7201 = vmatpush1.bf16.msra.mxu0 %v20503_v0  ;;  %7857 = vmatpush1.bf16.msra.mxu1 %v20506_v1  ;;  %v20598_v0 = vld [vmem:[#allocation7 + $0x1308] ss:$16 sps:$4 sm:$0xff]   ;;  %v20603_v1 = vld [vmem:[#allocation7 + $0x1324] ss:$16 sps:$4 sm:$0xff]  }
 0x367   : > { %7202 = vmatprep.subr.bf16.mxu0 %v20511_v2  ;;  %7858 = vmatprep.subr.bf16.mxu1 %v20514_v3  ;;  %v20606_v2 = vld [vmem:[#allocation7 + $0x132c] ss:$16 sps:$4 sm:$0xff]   ;;  %v20601_v3 = vld [vmem:[#allocation7 + $0x1320] ss:$16 sps:$4 sm:$0xff]  }
 0x36a   : > { %7203 = vmatpush1.bf16.msra.mxu0 %v20509_v4  ;;  %7859 = vmatpush1.bf16.msra.mxu1 %v20512_v5  ;;  %v20604_v4 = vld [vmem:[#allocation7 + $0x1328] ss:$16 sps:$4 sm:$0xff]   ;;  %v20609_v5 = vld [vmem:[#allocation7 + $0x1344] ss:$16 sps:$4 sm:$0xff]  }
 0x36b   : > { %7204 = vmatprep.subr.bf16.mxu0 %v20517_v6  ;;  %7860 = vmatprep.subr.bf16.mxu1 %v20520_v7  ;;  %v20612_v6 = vld [vmem:[#allocation7 + $0x134c] ss:$16 sps:$4 sm:$0xff]   ;;  %v20607_v7 = vld [vmem:[#allocation7 + $0x1340] ss:$16 sps:$4 sm:$0xff]  }
 0x36e   : > { %7205 = vmatpush1.bf16.msra.mxu0 %v20515_v8  ;;  %7861 = vmatpush1.bf16.msra.mxu1 %v20518_v9  ;;  %v20610_v8 = vld [vmem:[#allocation7 + $0x1348] ss:$16 sps:$4 sm:$0xff]   ;;  %v20615_v9 = vld [vmem:[#allocation7 + $0x1364] ss:$16 sps:$4 sm:$0xff]  }
 0x36f   : > { %7206 = vmatprep.subr.bf16.mxu0 %v20523_v10  ;;  %7862 = vmatprep.subr.bf16.mxu1 %v20526_v12  ;;  %v20618_v10 = vld [vmem:[#allocation7 + $0x136c] ss:$16 sps:$4 sm:$0xff]   ;;  %v20613_v12 = vld [vmem:[#allocation7 + $0x1360] ss:$16 sps:$4 sm:$0xff]  }
 0x372   : > { %7207 = vmatpush1.bf16.msra.mxu0 %v20521_v13  ;;  %7863 = vmatpush1.bf16.msra.mxu1 %v20524_v15  ;;  %v20616_v13 = vld [vmem:[#allocation7 + $0x1368] ss:$16 sps:$4 sm:$0xff]   ;;  %v20621_v15 = vld [vmem:[#allocation7 + $0x1384] ss:$16 sps:$4 sm:$0xff]  }
 0x373   : > { %7208 = vmatprep.subr.bf16.mxu0 %v20529_v16  ;;  %7864 = vmatprep.subr.bf16.mxu1 %v20532_v18  ;;  %v20624_v16 = vld [vmem:[#allocation7 + $0x138c] ss:$16 sps:$4 sm:$0xff]   ;;  %v20619_v18 = vld [vmem:[#allocation7 + $0x1380] ss:$16 sps:$4 sm:$0xff]  }
 0x376   : > { %7209 = vmatpush1.bf16.msra.mxu0 %v20527_v20  ;;  %7865 = vmatpush1.bf16.msra.mxu1 %v20530_v11  ;;  %v20622_v20 = vld [vmem:[#allocation7 + $0x1388] ss:$16 sps:$4 sm:$0xff]   ;;  %v20627_v11 = vld [vmem:[#allocation7 + $0x13a4] ss:$16 sps:$4 sm:$0xff]  }
 0x377   : > { %7210 = vmatprep.subr.bf16.mxu0 %v20535_v21  ;;  %7866 = vmatprep.subr.bf16.mxu1 %v20538_v14  ;;  %v20630_v21 = vld [vmem:[#allocation7 + $0x13ac] ss:$16 sps:$4 sm:$0xff]   ;;  %v20625_v14 = vld [vmem:[#allocation7 + $0x13a0] ss:$16 sps:$4 sm:$0xff]  }
 0x37a   : > { %7211 = vmatpush1.bf16.msra.mxu0 %v20533_v23  ;;  %7867 = vmatpush1.bf16.msra.mxu1 %v20536_v24  ;;  %v20628_v23 = vld [vmem:[#allocation7 + $0x13a8] ss:$16 sps:$4 sm:$0xff]   ;;  %v20633_v24 = vld [vmem:[#allocation7 + $0x13c4] ss:$16 sps:$4 sm:$0xff]  }
 0x37b   : > { %7212 = vmatprep.subr.bf16.mxu0 %v20541_v17  ;;  %7868 = vmatprep.subr.bf16.mxu1 %v20544_v26  ;;  %v20636_v17 = vld [vmem:[#allocation7 + $0x13cc] ss:$16 sps:$4 sm:$0xff]   ;;  %v20631_v26 = vld [vmem:[#allocation7 + $0x13c0] ss:$16 sps:$4 sm:$0xff]  }
 0x37e   : > { %7213 = vmatpush1.bf16.msra.mxu0 %v20539_v27  ;;  %7869 = vmatpush1.bf16.msra.mxu1 %v20542_v19  ;;  %v20634_v27 = vld [vmem:[#allocation7 + $0x13c8] ss:$16 sps:$4 sm:$0xff]   ;;  %v20639_v19 = vld [vmem:[#allocation7 + $0x13e4] ss:$16 sps:$4 sm:$0xff]  }
 0x37f   : > { %7223 = vmatprep.subr.bf16.mxu0 %v20549_v29  ;;  %7879 = vmatprep.subr.bf16.mxu1 %v20552_v30  ;;  %v20642_v29 = vld [vmem:[#allocation7 + $0x13ec] ss:$16 sps:$4 sm:$0xff]   ;;  %v20637_v30 = vld [vmem:[#allocation7 + $0x13e0] ss:$16 sps:$4 sm:$0xff]  }
 0x381   : > { %7215 = vmatmul.mubr.bf16.vlgmr.msra.gmra.mrb[0].mxu0 %v17093_v22  ;;  %7871 = vmatmul.mubr.bf16.vlgmr.msra.gmra.mrb[0].mxu1 %v17093_v22  ;;  %v20640_v22 = vld [vmem:[#allocation7 + $0x13e8] ss:$16 sps:$4 sm:$0xff]  }
 0x382   : > { %7224 = vmatpush1.bf16.msra.mxu0 %v20547_v32  ;;  %7880 = vmatpush1.bf16.msra.mxu1 %v20550_v33  ;;  %v20647_v32 = vld [vmem:[#allocation7 + $0x1404] ss:$16 sps:$4 sm:$0xff]   ;;  %v20650_v33 = vld [vmem:[#allocation7 + $0x140c] ss:$16 sps:$4 sm:$0xff]  }
 0x383   : > { %7225 = vmatprep.subr.bf16.mxu0 %v20555_v34  ;;  %7881 = vmatprep.subr.bf16.mxu1 %v20558_v25  ;;  %v17095_v34 = vcombine.low %v22411_v31, %v22411_v31  ;;  %v22420_v25 = vld [vmem:[%s22321_s24 + $0x50] sm:$0xff] }
 0x384   : > { %7255 = vmatprep.mubr.bf16.mxu0 %v17096_v35  ;;  %7911 = vmatprep.mubr.bf16.mxu1 %v17096_v35  ;;  %v20645_v35 = vld [vmem:[#allocation7 + $0x1400] ss:$16 sps:$4 sm:$0xff]   ;;  %v20659_v31 = vld [vmem:[#allocation7 + $0x1444] ss:$16 sps:$4 sm:$0xff]  }
 0x386   : > { %7226 = vmatpush1.bf16.msra.mxu0 %v20553_v36  ;;  %7882 = vmatpush1.bf16.msra.mxu1 %v20556_v37  ;;  %v20648_v36 = vld [vmem:[#allocation7 + $0x1408] ss:$16 sps:$4 sm:$0xff]   ;;  %v20653_v37 = vld [vmem:[#allocation7 + $0x1424] ss:$16 sps:$4 sm:$0xff]  }
 0x387   : > { %7227 = vmatprep.subr.bf16.mxu0 %v20561_v28  ;;  %7883 = vmatprep.subr.bf16.mxu1 %v20564_v38  ;;  %v20656_v28 = vld [vmem:[#allocation7 + $0x142c] ss:$16 sps:$4 sm:$0xff]   ;;  %v17098_v38 = vcombine.high %v22420_v25, %v22420_v25 }
 0x38a   : > { %7228 = vmatpush1.bf16.msra.mxu0 %v20559_v39  ;;  %7884 = vmatpush1.bf16.msra.mxu1 %v20562_v40  ;;  %v20651_v39 = vld [vmem:[#allocation7 + $0x1420] ss:$16 sps:$4 sm:$0xff]   ;;  %v20654_v40 = vld [vmem:[#allocation7 + $0x1428] ss:$16 sps:$4 sm:$0xff]  }
 0x38b   : > { %7229 = vmatprep.subr.bf16.mxu0 %v20567_v41  ;;  %7885 = vmatprep.subr.bf16.mxu1 %v20570_v42  ;;  %v20662_v41 = vld [vmem:[#allocation7 + $0x144c] ss:$16 sps:$4 sm:$0xff]   ;;  %v20657_v42 = vld [vmem:[#allocation7 + $0x1440] ss:$16 sps:$4 sm:$0xff]  }
 0x38e   : > { %7230 = vmatpush1.bf16.msra.mxu0 %v20565_v43  ;;  %7886 = vmatpush1.bf16.msra.mxu1 %v20568_v44  ;;  %v20660_v43 = vld [vmem:[#allocation7 + $0x1448] ss:$16 sps:$4 sm:$0xff]   ;;  %v20665_v44 = vld [vmem:[#allocation7 + $0x1464] ss:$16 sps:$4 sm:$0xff]  }
 0x38f   : > { %7231 = vmatprep.subr.bf16.mxu0 %v20573_v45  ;;  %7887 = vmatprep.subr.bf16.mxu1 %v20576_v46  ;;  %v20668_v45 = vld [vmem:[#allocation7 + $0x146c] ss:$16 sps:$4 sm:$0xff]   ;;  %v20663_v46 = vld [vmem:[#allocation7 + $0x1460] ss:$16 sps:$4 sm:$0xff]  }
 0x392   : > { %7232 = vmatpush1.bf16.msra.mxu0 %v20571_v47  ;;  %7888 = vmatpush1.bf16.msra.mxu1 %v20574_v48  ;;  %v20666_v47 = vld [vmem:[#allocation7 + $0x1468] ss:$16 sps:$4 sm:$0xff]   ;;  %v20671_v48 = vld [vmem:[#allocation7 + $0x1484] ss:$16 sps:$4 sm:$0xff]  }
 0x393   : > { %7233 = vmatprep.subr.bf16.mxu0 %v20579_v49  ;;  %7889 = vmatprep.subr.bf16.mxu1 %v20582_v50  ;;  %v20674_v49 = vld [vmem:[#allocation7 + $0x148c] ss:$16 sps:$4 sm:$0xff]   ;;  %v20669_v50 = vld [vmem:[#allocation7 + $0x1480] ss:$16 sps:$4 sm:$0xff]  }
 0x396   : > { %7234 = vmatpush1.bf16.msra.mxu0 %v20577_v51  ;;  %7890 = vmatpush1.bf16.msra.mxu1 %v20580_v52  ;;  %v20672_v51 = vld [vmem:[#allocation7 + $0x1488] ss:$16 sps:$4 sm:$0xff]   ;;  %v20677_v52 = vld [vmem:[#allocation7 + $0x14a4] ss:$16 sps:$4 sm:$0xff]  }
 0x397   : > { %7235 = vmatprep.subr.bf16.mxu0 %v20585_v53  ;;  %7891 = vmatprep.subr.bf16.mxu1 %v20588_v54  ;;  %v20680_v53 = vld [vmem:[#allocation7 + $0x14ac] ss:$16 sps:$4 sm:$0xff]   ;;  %v20675_v54 = vld [vmem:[#allocation7 + $0x14a0] ss:$16 sps:$4 sm:$0xff]  }
 0x39a   : > { %7236 = vmatpush1.bf16.msra.mxu0 %v20583_v55  ;;  %7892 = vmatpush1.bf16.msra.mxu1 %v20586_v56  ;;  %v20678_v55 = vld [vmem:[#allocation7 + $0x14a8] ss:$16 sps:$4 sm:$0xff]   ;;  %v20683_v56 = vld [vmem:[#allocation7 + $0x14c4] ss:$16 sps:$4 sm:$0xff]  }
 0x39b   : > { %7237 = vmatprep.subr.bf16.mxu0 %v20591_v57  ;;  %7893 = vmatprep.subr.bf16.mxu1 %v20594_v58  ;;  %v20686_v57 = vld [vmem:[#allocation7 + $0x14cc] ss:$16 sps:$4 sm:$0xff]   ;;  %v20681_v58 = vld [vmem:[#allocation7 + $0x14c0] ss:$16 sps:$4 sm:$0xff]  }
 0x39e   : > { %7238 = vmatpush1.bf16.msra.mxu0 %v20589_v59  ;;  %7894 = vmatpush1.bf16.msra.mxu1 %v20592_v60  ;;  %v20684_v59 = vld [vmem:[#allocation7 + $0x14c8] ss:$16 sps:$4 sm:$0xff]   ;;  %v20689_v60 = vld [vmem:[#allocation7 + $0x14e4] ss:$16 sps:$4 sm:$0xff]  }
 0x39f   : > { %7239 = vmatprep.subr.bf16.mxu0 %v20597_v61  ;;  %7895 = vmatprep.subr.bf16.mxu1 %v20600_v62  ;;  %v20692_v61 = vld [vmem:[#allocation7 + $0x14ec] ss:$16 sps:$4 sm:$0xff]   ;;  %v20687_v62 = vld [vmem:[#allocation7 + $0x14e0] ss:$16 sps:$4 sm:$0xff]  }
 0x3a2   : > { %7240 = vmatpush1.bf16.msra.mxu0 %v20595_v63  ;;  %7896 = vmatpush1.bf16.msra.mxu1 %v20598_v0  ;;  %v20690_v63 = vld [vmem:[#allocation7 + $0x14e8] ss:$16 sps:$4 sm:$0xff]   ;;  %v20695_v0 = vld [vmem:[#allocation7 + $0x1504] ss:$16 sps:$4 sm:$0xff]  }
 0x3a3   : > { %7241 = vmatprep.subr.bf16.mxu0 %v20603_v1  ;;  %7897 = vmatprep.subr.bf16.mxu1 %v20606_v2  ;;  %v20698_v1 = vld [vmem:[#allocation7 + $0x150c] ss:$16 sps:$4 sm:$0xff]   ;;  %v20693_v2 = vld [vmem:[#allocation7 + $0x1500] ss:$16 sps:$4 sm:$0xff]  }
 0x3a6   : > { %7242 = vmatpush1.bf16.msra.mxu0 %v20601_v3  ;;  %7898 = vmatpush1.bf16.msra.mxu1 %v20604_v4  ;;  %v20696_v3 = vld [vmem:[#allocation7 + $0x1508] ss:$16 sps:$4 sm:$0xff]   ;;  %v20701_v4 = vld [vmem:[#allocation7 + $0x1524] ss:$16 sps:$4 sm:$0xff]  }
 0x3a7   : > { %7243 = vmatprep.subr.bf16.mxu0 %v20609_v5  ;;  %7899 = vmatprep.subr.bf16.mxu1 %v20612_v6  ;;  %v20704_v5 = vld [vmem:[#allocation7 + $0x152c] ss:$16 sps:$4 sm:$0xff]   ;;  %v20699_v6 = vld [vmem:[#allocation7 + $0x1520] ss:$16 sps:$4 sm:$0xff]  }
 0x3aa   : > { %7244 = vmatpush1.bf16.msra.mxu0 %v20607_v7  ;;  %7900 = vmatpush1.bf16.msra.mxu1 %v20610_v8  ;;  %v20702_v7 = vld [vmem:[#allocation7 + $0x1528] ss:$16 sps:$4 sm:$0xff]   ;;  %v20707_v8 = vld [vmem:[#allocation7 + $0x1544] ss:$16 sps:$4 sm:$0xff]  }
 0x3ab   : > { %7245 = vmatprep.subr.bf16.mxu0 %v20615_v9  ;;  %7901 = vmatprep.subr.bf16.mxu1 %v20618_v10  ;;  %v20710_v9 = vld [vmem:[#allocation7 + $0x154c] ss:$16 sps:$4 sm:$0xff]   ;;  %v20705_v10 = vld [vmem:[#allocation7 + $0x1540] ss:$16 sps:$4 sm:$0xff]  }
 0x3ae   : > { %7246 = vmatpush1.bf16.msra.mxu0 %v20613_v12  ;;  %7902 = vmatpush1.bf16.msra.mxu1 %v20616_v13  ;;  %v20708_v12 = vld [vmem:[#allocation7 + $0x1548] ss:$16 sps:$4 sm:$0xff]   ;;  %v20713_v13 = vld [vmem:[#allocation7 + $0x1564] ss:$16 sps:$4 sm:$0xff]  }
 0x3af   : > { %7247 = vmatprep.subr.bf16.mxu0 %v20621_v15  ;;  %7903 = vmatprep.subr.bf16.mxu1 %v20624_v16  ;;  %v20716_v15 = vld [vmem:[#allocation7 + $0x156c] ss:$16 sps:$4 sm:$0xff]   ;;  %v20711_v16 = vld [vmem:[#allocation7 + $0x1560] ss:$16 sps:$4 sm:$0xff]  }
 0x3b2   : > { %7248 = vmatpush1.bf16.msra.mxu0 %v20619_v18  ;;  %7904 = vmatpush1.bf16.msra.mxu1 %v20622_v20  ;;  %v20714_v18 = vld [vmem:[#allocation7 + $0x1568] ss:$16 sps:$4 sm:$0xff]   ;;  %v20719_v20 = vld [vmem:[#allocation7 + $0x1584] ss:$16 sps:$4 sm:$0xff]  }
 0x3b3   : > { %7249 = vmatprep.subr.bf16.mxu0 %v20627_v11  ;;  %7905 = vmatprep.subr.bf16.mxu1 %v20630_v21  ;;  %v20722_v11 = vld [vmem:[#allocation7 + $0x158c] ss:$16 sps:$4 sm:$0xff]   ;;  %v20717_v21 = vld [vmem:[#allocation7 + $0x1580] ss:$16 sps:$4 sm:$0xff]  }
 0x3b6   : > { %7250 = vmatpush1.bf16.msra.mxu0 %v20625_v14  ;;  %7906 = vmatpush1.bf16.msra.mxu1 %v20628_v23  ;;  %v20720_v14 = vld [vmem:[#allocation7 + $0x1588] ss:$16 sps:$4 sm:$0xff]   ;;  %v20725_v23 = vld [vmem:[#allocation7 + $0x15a4] ss:$16 sps:$4 sm:$0xff]  }
 0x3b7   : > { %7251 = vmatprep.subr.bf16.mxu0 %v20633_v24  ;;  %7907 = vmatprep.subr.bf16.mxu1 %v20636_v17  ;;  %v20728_v24 = vld [vmem:[#allocation7 + $0x15ac] ss:$16 sps:$4 sm:$0xff]   ;;  %v20723_v17 = vld [vmem:[#allocation7 + $0x15a0] ss:$16 sps:$4 sm:$0xff]  }
 0x3ba   : > { %7252 = vmatpush1.bf16.msra.mxu0 %v20631_v26  ;;  %7908 = vmatpush1.bf16.msra.mxu1 %v20634_v27  ;;  %v20726_v26 = vld [vmem:[#allocation7 + $0x15a8] ss:$16 sps:$4 sm:$0xff]   ;;  %v20731_v27 = vld [vmem:[#allocation7 + $0x15c4] ss:$16 sps:$4 sm:$0xff]  }
 0x3bb   : > { %7253 = vmatprep.subr.bf16.mxu0 %v20639_v19  ;;  %7909 = vmatprep.subr.bf16.mxu1 %v20642_v29  ;;  %v20734_v19 = vld [vmem:[#allocation7 + $0x15cc] ss:$16 sps:$4 sm:$0xff]   ;;  %v20729_v29 = vld [vmem:[#allocation7 + $0x15c0] ss:$16 sps:$4 sm:$0xff]  }
 0x3be   : > { %7254 = vmatpush1.bf16.msra.mxu0 %v20637_v30  ;;  %7910 = vmatpush1.bf16.msra.mxu1 %v20640_v22  ;;  %v20732_v30 = vld [vmem:[#allocation7 + $0x15c8] ss:$16 sps:$4 sm:$0xff]   ;;  %v20737_v22 = vld [vmem:[#allocation7 + $0x15e4] ss:$16 sps:$4 sm:$0xff]  }
 0x3bf   : > { %7264 = vmatprep.subr.bf16.mxu0 %v20647_v32  ;;  %7920 = vmatprep.subr.bf16.mxu1 %v20650_v33  ;;  %v20740_v32 = vld [vmem:[#allocation7 + $0x15ec] ss:$16 sps:$4 sm:$0xff]   ;;  %v20735_v33 = vld [vmem:[#allocation7 + $0x15e0] ss:$16 sps:$4 sm:$0xff]  }
 0x3c1   : > { %7256 = vmatmul.mubr.bf16.vlgmr.msra.gmra.mrb[0].mxu0 %v17095_v34  ;;  %7912 = vmatmul.mubr.bf16.vlgmr.msra.gmra.mrb[0].mxu1 %v17095_v34  ;;  %v20738_v34 = vld [vmem:[#allocation7 + $0x15e8] ss:$16 sps:$4 sm:$0xff]  }
 0x3c2   : > { %7265 = vmatpush1.bf16.msra.mxu0 %v20645_v35  ;;  %7921 = vmatpush1.bf16.msra.mxu1 %v20648_v36  ;;  %v20745_v35 = vld [vmem:[#allocation7 + $0x1604] ss:$16 sps:$4 sm:$0xff]   ;;  %v20748_v36 = vld [vmem:[#allocation7 + $0x160c] ss:$16 sps:$4 sm:$0xff]  }
 0x3c3   : > { %7266 = vmatprep.subr.bf16.mxu0 %v20653_v37  ;;  %7922 = vmatprep.subr.bf16.mxu1 %v20656_v28  ;;  %v17097_v37 = vcombine.low %v22420_v25, %v22420_v25  ;;  %v22427_v28 = vld [vmem:[%s22321_s24 + $0x58] sm:$0xff]  ;;  %v20757_v25 = vld [vmem:[#allocation7 + $0x1644] ss:$16 sps:$4 sm:$0xff]  }
 0x3c4   : > { %7296 = vmatprep.mubr.bf16.mxu0 %v17098_v38  ;;  %7952 = vmatprep.mubr.bf16.mxu1 %v17098_v38  ;;  %v20743_v38 = vld [vmem:[#allocation7 + $0x1600] ss:$16 sps:$4 sm:$0xff]  }
 0x3c6   : > { %7267 = vmatpush1.bf16.msra.mxu0 %v20651_v39  ;;  %7923 = vmatpush1.bf16.msra.mxu1 %v20654_v40  ;;  %v20746_v39 = vld [vmem:[#allocation7 + $0x1608] ss:$16 sps:$4 sm:$0xff]   ;;  %v20751_v40 = vld [vmem:[#allocation7 + $0x1624] ss:$16 sps:$4 sm:$0xff]  }
 0x3c7   : > { %7268 = vmatprep.subr.bf16.mxu0 %v20659_v31  ;;  %7924 = vmatprep.subr.bf16.mxu1 %v20662_v41  ;;  %v20754_v31 = vld [vmem:[#allocation7 + $0x162c] ss:$16 sps:$4 sm:$0xff]   ;;  %v17100_v41 = vcombine.high %v22427_v28, %v22427_v28 }
 0x3ca   : > { %7269 = vmatpush1.bf16.msra.mxu0 %v20657_v42  ;;  %7925 = vmatpush1.bf16.msra.mxu1 %v20660_v43  ;;  %v20749_v42 = vld [vmem:[#allocation7 + $0x1620] ss:$16 sps:$4 sm:$0xff]   ;;  %v20752_v43 = vld [vmem:[#allocation7 + $0x1628] ss:$16 sps:$4 sm:$0xff]  }
 0x3cb   : > { %7270 = vmatprep.subr.bf16.mxu0 %v20665_v44  ;;  %7926 = vmatprep.subr.bf16.mxu1 %v20668_v45  ;;  %v20760_v44 = vld [vmem:[#allocation7 + $0x164c] ss:$16 sps:$4 sm:$0xff]   ;;  %v20755_v45 = vld [vmem:[#allocation7 + $0x1640] ss:$16 sps:$4 sm:$0xff]  }
 0x3ce   : > { %7271 = vmatpush1.bf16.msra.mxu0 %v20663_v46  ;;  %7927 = vmatpush1.bf16.msra.mxu1 %v20666_v47  ;;  %v20758_v46 = vld [vmem:[#allocation7 + $0x1648] ss:$16 sps:$4 sm:$0xff]   ;;  %v20763_v47 = vld [vmem:[#allocation7 + $0x1664] ss:$16 sps:$4 sm:$0xff]  }
 0x3cf   : > { %7272 = vmatprep.subr.bf16.mxu0 %v20671_v48  ;;  %7928 = vmatprep.subr.bf16.mxu1 %v20674_v49  ;;  %v20766_v48 = vld [vmem:[#allocation7 + $0x166c] ss:$16 sps:$4 sm:$0xff]   ;;  %v20761_v49 = vld [vmem:[#allocation7 + $0x1660] ss:$16 sps:$4 sm:$0xff]  }
 0x3d2   : > { %7273 = vmatpush1.bf16.msra.mxu0 %v20669_v50  ;;  %7929 = vmatpush1.bf16.msra.mxu1 %v20672_v51  ;;  %v20764_v50 = vld [vmem:[#allocation7 + $0x1668] ss:$16 sps:$4 sm:$0xff]   ;;  %v20769_v51 = vld [vmem:[#allocation7 + $0x1684] ss:$16 sps:$4 sm:$0xff]  }
 0x3d3   : > { %7274 = vmatprep.subr.bf16.mxu0 %v20677_v52  ;;  %7930 = vmatprep.subr.bf16.mxu1 %v20680_v53  ;;  %v20772_v52 = vld [vmem:[#allocation7 + $0x168c] ss:$16 sps:$4 sm:$0xff]   ;;  %v20767_v53 = vld [vmem:[#allocation7 + $0x1680] ss:$16 sps:$4 sm:$0xff]  }
 0x3d6   : > { %7275 = vmatpush1.bf16.msra.mxu0 %v20675_v54  ;;  %7931 = vmatpush1.bf16.msra.mxu1 %v20678_v55  ;;  %v20770_v54 = vld [vmem:[#allocation7 + $0x1688] ss:$16 sps:$4 sm:$0xff]   ;;  %v20775_v55 = vld [vmem:[#allocation7 + $0x16a4] ss:$16 sps:$4 sm:$0xff]  }
 0x3d7   : > { %7276 = vmatprep.subr.bf16.mxu0 %v20683_v56  ;;  %7932 = vmatprep.subr.bf16.mxu1 %v20686_v57  ;;  %v20778_v56 = vld [vmem:[#allocation7 + $0x16ac] ss:$16 sps:$4 sm:$0xff]   ;;  %v20773_v57 = vld [vmem:[#allocation7 + $0x16a0] ss:$16 sps:$4 sm:$0xff]  }
 0x3da   : > { %7277 = vmatpush1.bf16.msra.mxu0 %v20681_v58  ;;  %7933 = vmatpush1.bf16.msra.mxu1 %v20684_v59  ;;  %v20776_v58 = vld [vmem:[#allocation7 + $0x16a8] ss:$16 sps:$4 sm:$0xff]   ;;  %v20781_v59 = vld [vmem:[#allocation7 + $0x16c4] ss:$16 sps:$4 sm:$0xff]  }
 0x3db   : > { %7278 = vmatprep.subr.bf16.mxu0 %v20689_v60  ;;  %7934 = vmatprep.subr.bf16.mxu1 %v20692_v61  ;;  %v20784_v60 = vld [vmem:[#allocation7 + $0x16cc] ss:$16 sps:$4 sm:$0xff]   ;;  %v20779_v61 = vld [vmem:[#allocation7 + $0x16c0] ss:$16 sps:$4 sm:$0xff]  }
 0x3de   : > { %7279 = vmatpush1.bf16.msra.mxu0 %v20687_v62  ;;  %7935 = vmatpush1.bf16.msra.mxu1 %v20690_v63  ;;  %v20782_v62 = vld [vmem:[#allocation7 + $0x16c8] ss:$16 sps:$4 sm:$0xff]   ;;  %v20787_v63 = vld [vmem:[#allocation7 + $0x16e4] ss:$16 sps:$4 sm:$0xff]  }
 0x3df   : > { %7280 = vmatprep.subr.bf16.mxu0 %v20695_v0  ;;  %7936 = vmatprep.subr.bf16.mxu1 %v20698_v1  ;;  %v20790_v0 = vld [vmem:[#allocation7 + $0x16ec] ss:$16 sps:$4 sm:$0xff]   ;;  %v20785_v1 = vld [vmem:[#allocation7 + $0x16e0] ss:$16 sps:$4 sm:$0xff]  }
 0x3e2   : > { %7281 = vmatpush1.bf16.msra.mxu0 %v20693_v2  ;;  %7937 = vmatpush1.bf16.msra.mxu1 %v20696_v3  ;;  %v20788_v2 = vld [vmem:[#allocation7 + $0x16e8] ss:$16 sps:$4 sm:$0xff]   ;;  %v20793_v3 = vld [vmem:[#allocation7 + $0x1704] ss:$16 sps:$4 sm:$0xff]  }
 0x3e3   : > { %7282 = vmatprep.subr.bf16.mxu0 %v20701_v4  ;;  %7938 = vmatprep.subr.bf16.mxu1 %v20704_v5  ;;  %v20796_v4 = vld [vmem:[#allocation7 + $0x170c] ss:$16 sps:$4 sm:$0xff]   ;;  %v20791_v5 = vld [vmem:[#allocation7 + $0x1700] ss:$16 sps:$4 sm:$0xff]  }
 0x3e6   : > { %7283 = vmatpush1.bf16.msra.mxu0 %v20699_v6  ;;  %7939 = vmatpush1.bf16.msra.mxu1 %v20702_v7  ;;  %v20794_v6 = vld [vmem:[#allocation7 + $0x1708] ss:$16 sps:$4 sm:$0xff]   ;;  %v20799_v7 = vld [vmem:[#allocation7 + $0x1724] ss:$16 sps:$4 sm:$0xff]  }
 0x3e7   : > { %7284 = vmatprep.subr.bf16.mxu0 %v20707_v8  ;;  %7940 = vmatprep.subr.bf16.mxu1 %v20710_v9  ;;  %v20802_v8 = vld [vmem:[#allocation7 + $0x172c] ss:$16 sps:$4 sm:$0xff]   ;;  %v20797_v9 = vld [vmem:[#allocation7 + $0x1720] ss:$16 sps:$4 sm:$0xff]  }
 0x3ea   : > { %7285 = vmatpush1.bf16.msra.mxu0 %v20705_v10  ;;  %7941 = vmatpush1.bf16.msra.mxu1 %v20708_v12  ;;  %v20800_v10 = vld [vmem:[#allocation7 + $0x1728] ss:$16 sps:$4 sm:$0xff]   ;;  %v20805_v12 = vld [vmem:[#allocation7 + $0x1744] ss:$16 sps:$4 sm:$0xff]  }
 0x3eb   : > { %7286 = vmatprep.subr.bf16.mxu0 %v20713_v13  ;;  %7942 = vmatprep.subr.bf16.mxu1 %v20716_v15  ;;  %v20808_v13 = vld [vmem:[#allocation7 + $0x174c] ss:$16 sps:$4 sm:$0xff]   ;;  %v20803_v15 = vld [vmem:[#allocation7 + $0x1740] ss:$16 sps:$4 sm:$0xff]  }
 0x3ee   : > { %7287 = vmatpush1.bf16.msra.mxu0 %v20711_v16  ;;  %7943 = vmatpush1.bf16.msra.mxu1 %v20714_v18  ;;  %v20806_v16 = vld [vmem:[#allocation7 + $0x1748] ss:$16 sps:$4 sm:$0xff]   ;;  %v20811_v18 = vld [vmem:[#allocation7 + $0x1764] ss:$16 sps:$4 sm:$0xff]  }
 0x3ef   : > { %7288 = vmatprep.subr.bf16.mxu0 %v20719_v20  ;;  %7944 = vmatprep.subr.bf16.mxu1 %v20722_v11  ;;  %v20814_v20 = vld [vmem:[#allocation7 + $0x176c] ss:$16 sps:$4 sm:$0xff]   ;;  %v20809_v11 = vld [vmem:[#allocation7 + $0x1760] ss:$16 sps:$4 sm:$0xff]  }
 0x3f2   : > { %7289 = vmatpush1.bf16.msra.mxu0 %v20717_v21  ;;  %7945 = vmatpush1.bf16.msra.mxu1 %v20720_v14  ;;  %v20812_v21 = vld [vmem:[#allocation7 + $0x1768] ss:$16 sps:$4 sm:$0xff]   ;;  %v20817_v14 = vld [vmem:[#allocation7 + $0x1784] ss:$16 sps:$4 sm:$0xff]  }
 0x3f3   : > { %7290 = vmatprep.subr.bf16.mxu0 %v20725_v23  ;;  %7946 = vmatprep.subr.bf16.mxu1 %v20728_v24  ;;  %v20820_v23 = vld [vmem:[#allocation7 + $0x178c] ss:$16 sps:$4 sm:$0xff]   ;;  %v20815_v24 = vld [vmem:[#allocation7 + $0x1780] ss:$16 sps:$4 sm:$0xff]  }
 0x3f6   : > { %7291 = vmatpush1.bf16.msra.mxu0 %v20723_v17  ;;  %7947 = vmatpush1.bf16.msra.mxu1 %v20726_v26  ;;  %v20818_v17 = vld [vmem:[#allocation7 + $0x1788] ss:$16 sps:$4 sm:$0xff]   ;;  %v20823_v26 = vld [vmem:[#allocation7 + $0x17a4] ss:$16 sps:$4 sm:$0xff]  }
 0x3f7   : > { %7292 = vmatprep.subr.bf16.mxu0 %v20731_v27  ;;  %7948 = vmatprep.subr.bf16.mxu1 %v20734_v19  ;;  %v20826_v27 = vld [vmem:[#allocation7 + $0x17ac] ss:$16 sps:$4 sm:$0xff]   ;;  %v20821_v19 = vld [vmem:[#allocation7 + $0x17a0] ss:$16 sps:$4 sm:$0xff]  }
 0x3fa   : > { %7293 = vmatpush1.bf16.msra.mxu0 %v20729_v29  ;;  %7949 = vmatpush1.bf16.msra.mxu1 %v20732_v30  ;;  %v20824_v29 = vld [vmem:[#allocation7 + $0x17a8] ss:$16 sps:$4 sm:$0xff]   ;;  %v20829_v30 = vld [vmem:[#allocation7 + $0x17c4] ss:$16 sps:$4 sm:$0xff]  }
 0x3fb   : > { %7294 = vmatprep.subr.bf16.mxu0 %v20737_v22  ;;  %7950 = vmatprep.subr.bf16.mxu1 %v20740_v32  ;;  %v20832_v22 = vld [vmem:[#allocation7 + $0x17cc] ss:$16 sps:$4 sm:$0xff]   ;;  %v20827_v32 = vld [vmem:[#allocation7 + $0x17c0] ss:$16 sps:$4 sm:$0xff]  }
 0x3fe   : > { %7295 = vmatpush1.bf16.msra.mxu0 %v20735_v33  ;;  %7951 = vmatpush1.bf16.msra.mxu1 %v20738_v34  ;;  %v20830_v33 = vld [vmem:[#allocation7 + $0x17c8] ss:$16 sps:$4 sm:$0xff]   ;;  %v20835_v34 = vld [vmem:[#allocation7 + $0x17e4] ss:$16 sps:$4 sm:$0xff]  }
 0x3ff   : > { %7305 = vmatprep.subr.bf16.mxu0 %v20745_v35  ;;  %7961 = vmatprep.subr.bf16.mxu1 %v20748_v36  ;;  %v20838_v35 = vld [vmem:[#allocation7 + $0x17ec] ss:$16 sps:$4 sm:$0xff]   ;;  %v20833_v36 = vld [vmem:[#allocation7 + $0x17e0] ss:$16 sps:$4 sm:$0xff]  }
 0x401   : > { %7297 = vmatmul.mubr.bf16.vlgmr.msra.gmra.mrb[0].mxu0 %v17097_v37  ;;  %7953 = vmatmul.mubr.bf16.vlgmr.msra.gmra.mrb[0].mxu1 %v17097_v37  ;;  %v20836_v37 = vld [vmem:[#allocation7 + $0x17e8] ss:$16 sps:$4 sm:$0xff]  }
 0x402   : > { %7306 = vmatpush1.bf16.msra.mxu0 %v20743_v38  ;;  %7962 = vmatpush1.bf16.msra.mxu1 %v20746_v39  ;;  %v20843_v38 = vld [vmem:[#allocation7 + $0x1804] ss:$16 sps:$4 sm:$0xff]   ;;  %v20846_v39 = vld [vmem:[#allocation7 + $0x180c] ss:$16 sps:$4 sm:$0xff]  }
 0x403   : > { %7307 = vmatprep.subr.bf16.mxu0 %v20751_v40  ;;  %7963 = vmatprep.subr.bf16.mxu1 %v20754_v31  ;;  %v17099_v40 = vcombine.low %v22427_v28, %v22427_v28  ;;  %v22434_v31 = vld [vmem:[%s22321_s24 + $0x60] sm:$0xff] }
 0x404   : > { %7337 = vmatprep.mubr.bf16.mxu0 %v17100_v41  ;;  %7993 = vmatprep.mubr.bf16.mxu1 %v17100_v41  ;;  %v20841_v41 = vld [vmem:[#allocation7 + $0x1800] ss:$16 sps:$4 sm:$0xff]   ;;  %v20855_v28 = vld [vmem:[#allocation7 + $0x1844] ss:$16 sps:$4 sm:$0xff]  }
 0x406   : > { %7308 = vmatpush1.bf16.msra.mxu0 %v20749_v42  ;;  %7964 = vmatpush1.bf16.msra.mxu1 %v20752_v43  ;;  %v20844_v42 = vld [vmem:[#allocation7 + $0x1808] ss:$16 sps:$4 sm:$0xff]   ;;  %v20849_v43 = vld [vmem:[#allocation7 + $0x1824] ss:$16 sps:$4 sm:$0xff]  }
 0x407   : > { %7309 = vmatprep.subr.bf16.mxu0 %v20757_v25  ;;  %7965 = vmatprep.subr.bf16.mxu1 %v20760_v44  ;;  %v20852_v25 = vld [vmem:[#allocation7 + $0x182c] ss:$16 sps:$4 sm:$0xff]   ;;  %v17102_v44 = vcombine.high %v22434_v31, %v22434_v31 }
 0x40a   : > { %7310 = vmatpush1.bf16.msra.mxu0 %v20755_v45  ;;  %7966 = vmatpush1.bf16.msra.mxu1 %v20758_v46  ;;  %v20847_v45 = vld [vmem:[#allocation7 + $0x1820] ss:$16 sps:$4 sm:$0xff]   ;;  %v20850_v46 = vld [vmem:[#allocation7 + $0x1828] ss:$16 sps:$4 sm:$0xff]  }
 0x40b   : > { %7311 = vmatprep.subr.bf16.mxu0 %v20763_v47  ;;  %7967 = vmatprep.subr.bf16.mxu1 %v20766_v48  ;;  %v20858_v47 = vld [vmem:[#allocation7 + $0x184c] ss:$16 sps:$4 sm:$0xff]   ;;  %v20853_v48 = vld [vmem:[#allocation7 + $0x1840] ss:$16 sps:$4 sm:$0xff]  }
 0x40e   : > { %7312 = vmatpush1.bf16.msra.mxu0 %v20761_v49  ;;  %7968 = vmatpush1.bf16.msra.mxu1 %v20764_v50  ;;  %v20856_v49 = vld [vmem:[#allocation7 + $0x1848] ss:$16 sps:$4 sm:$0xff]   ;;  %v20861_v50 = vld [vmem:[#allocation7 + $0x1864] ss:$16 sps:$4 sm:$0xff]  }
 0x40f   : > { %7313 = vmatprep.subr.bf16.mxu0 %v20769_v51  ;;  %7969 = vmatprep.subr.bf16.mxu1 %v20772_v52  ;;  %v20864_v51 = vld [vmem:[#allocation7 + $0x186c] ss:$16 sps:$4 sm:$0xff]   ;;  %v20859_v52 = vld [vmem:[#allocation7 + $0x1860] ss:$16 sps:$4 sm:$0xff]  }
 0x412   : > { %7314 = vmatpush1.bf16.msra.mxu0 %v20767_v53  ;;  %7970 = vmatpush1.bf16.msra.mxu1 %v20770_v54  ;;  %v20862_v53 = vld [vmem:[#allocation7 + $0x1868] ss:$16 sps:$4 sm:$0xff]   ;;  %v20867_v54 = vld [vmem:[#allocation7 + $0x1884] ss:$16 sps:$4 sm:$0xff]  }
 0x413   : > { %7315 = vmatprep.subr.bf16.mxu0 %v20775_v55  ;;  %7971 = vmatprep.subr.bf16.mxu1 %v20778_v56  ;;  %v20870_v55 = vld [vmem:[#allocation7 + $0x188c] ss:$16 sps:$4 sm:$0xff]   ;;  %v20865_v56 = vld [vmem:[#allocation7 + $0x1880] ss:$16 sps:$4 sm:$0xff]  }
 0x416   : > { %7316 = vmatpush1.bf16.msra.mxu0 %v20773_v57  ;;  %7972 = vmatpush1.bf16.msra.mxu1 %v20776_v58  ;;  %v20868_v57 = vld [vmem:[#allocation7 + $0x1888] ss:$16 sps:$4 sm:$0xff]   ;;  %v20873_v58 = vld [vmem:[#allocation7 + $0x18a4] ss:$16 sps:$4 sm:$0xff]  }
 0x417   : > { %7317 = vmatprep.subr.bf16.mxu0 %v20781_v59  ;;  %7973 = vmatprep.subr.bf16.mxu1 %v20784_v60  ;;  %v20876_v59 = vld [vmem:[#allocation7 + $0x18ac] ss:$16 sps:$4 sm:$0xff]   ;;  %v20871_v60 = vld [vmem:[#allocation7 + $0x18a0] ss:$16 sps:$4 sm:$0xff]  }
 0x41a   : > { %7318 = vmatpush1.bf16.msra.mxu0 %v20779_v61  ;;  %7974 = vmatpush1.bf16.msra.mxu1 %v20782_v62  ;;  %v20874_v61 = vld [vmem:[#allocation7 + $0x18a8] ss:$16 sps:$4 sm:$0xff]   ;;  %v20879_v62 = vld [vmem:[#allocation7 + $0x18c4] ss:$16 sps:$4 sm:$0xff]  }
 0x41b   : > { %7319 = vmatprep.subr.bf16.mxu0 %v20787_v63  ;;  %7975 = vmatprep.subr.bf16.mxu1 %v20790_v0  ;;  %v20882_v63 = vld [vmem:[#allocation7 + $0x18cc] ss:$16 sps:$4 sm:$0xff]   ;;  %v20877_v0 = vld [vmem:[#allocation7 + $0x18c0] ss:$16 sps:$4 sm:$0xff]  }
 0x41e   : > { %7320 = vmatpush1.bf16.msra.mxu0 %v20785_v1  ;;  %7976 = vmatpush1.bf16.msra.mxu1 %v20788_v2  ;;  %v20880_v1 = vld [vmem:[#allocation7 + $0x18c8] ss:$16 sps:$4 sm:$0xff]   ;;  %v20885_v2 = vld [vmem:[#allocation7 + $0x18e4] ss:$16 sps:$4 sm:$0xff]  }
 0x41f   : > { %7321 = vmatprep.subr.bf16.mxu0 %v20793_v3  ;;  %7977 = vmatprep.subr.bf16.mxu1 %v20796_v4  ;;  %v20888_v3 = vld [vmem:[#allocation7 + $0x18ec] ss:$16 sps:$4 sm:$0xff]   ;;  %v20883_v4 = vld [vmem:[#allocation7 + $0x18e0] ss:$16 sps:$4 sm:$0xff]  }
 0x422   : > { %7322 = vmatpush1.bf16.msra.mxu0 %v20791_v5  ;;  %7978 = vmatpush1.bf16.msra.mxu1 %v20794_v6  ;;  %v20886_v5 = vld [vmem:[#allocation7 + $0x18e8] ss:$16 sps:$4 sm:$0xff]   ;;  %v20891_v6 = vld [vmem:[#allocation7 + $0x1904] ss:$16 sps:$4 sm:$0xff]  }
 0x423   : > { %7323 = vmatprep.subr.bf16.mxu0 %v20799_v7  ;;  %7979 = vmatprep.subr.bf16.mxu1 %v20802_v8  ;;  %v20894_v7 = vld [vmem:[#allocation7 + $0x190c] ss:$16 sps:$4 sm:$0xff]   ;;  %v20889_v8 = vld [vmem:[#allocation7 + $0x1900] ss:$16 sps:$4 sm:$0xff]  }
 0x426   : > { %7324 = vmatpush1.bf16.msra.mxu0 %v20797_v9  ;;  %7980 = vmatpush1.bf16.msra.mxu1 %v20800_v10  ;;  %v20892_v9 = vld [vmem:[#allocation7 + $0x1908] ss:$16 sps:$4 sm:$0xff]   ;;  %v20897_v10 = vld [vmem:[#allocation7 + $0x1924] ss:$16 sps:$4 sm:$0xff]  }
 0x427   : > { %7325 = vmatprep.subr.bf16.mxu0 %v20805_v12  ;;  %7981 = vmatprep.subr.bf16.mxu1 %v20808_v13  ;;  %v20900_v12 = vld [vmem:[#allocation7 + $0x192c] ss:$16 sps:$4 sm:$0xff]   ;;  %v20895_v13 = vld [vmem:[#allocation7 + $0x1920] ss:$16 sps:$4 sm:$0xff]  }
 0x42a   : > { %7326 = vmatpush1.bf16.msra.mxu0 %v20803_v15  ;;  %7982 = vmatpush1.bf16.msra.mxu1 %v20806_v16  ;;  %v20898_v15 = vld [vmem:[#allocation7 + $0x1928] ss:$16 sps:$4 sm:$0xff]   ;;  %v20903_v16 = vld [vmem:[#allocation7 + $0x1944] ss:$16 sps:$4 sm:$0xff]  }
 0x42b   : > { %7327 = vmatprep.subr.bf16.mxu0 %v20811_v18  ;;  %7983 = vmatprep.subr.bf16.mxu1 %v20814_v20  ;;  %v20906_v18 = vld [vmem:[#allocation7 + $0x194c] ss:$16 sps:$4 sm:$0xff]   ;;  %v20901_v20 = vld [vmem:[#allocation7 + $0x1940] ss:$16 sps:$4 sm:$0xff]  }
 0x42e   : > { %7328 = vmatpush1.bf16.msra.mxu0 %v20809_v11  ;;  %7984 = vmatpush1.bf16.msra.mxu1 %v20812_v21  ;;  %v20904_v11 = vld [vmem:[#allocation7 + $0x1948] ss:$16 sps:$4 sm:$0xff]   ;;  %v20909_v21 = vld [vmem:[#allocation7 + $0x1964] ss:$16 sps:$4 sm:$0xff]  }
 0x42f   : > { %7329 = vmatprep.subr.bf16.mxu0 %v20817_v14  ;;  %7985 = vmatprep.subr.bf16.mxu1 %v20820_v23  ;;  %v20912_v14 = vld [vmem:[#allocation7 + $0x196c] ss:$16 sps:$4 sm:$0xff]   ;;  %v20907_v23 = vld [vmem:[#allocation7 + $0x1960] ss:$16 sps:$4 sm:$0xff]  }
 0x432   : > { %7330 = vmatpush1.bf16.msra.mxu0 %v20815_v24  ;;  %7986 = vmatpush1.bf16.msra.mxu1 %v20818_v17  ;;  %v20910_v24 = vld [vmem:[#allocation7 + $0x1968] ss:$16 sps:$4 sm:$0xff]   ;;  %v20915_v17 = vld [vmem:[#allocation7 + $0x1984] ss:$16 sps:$4 sm:$0xff]  }
 0x433   : > { %7331 = vmatprep.subr.bf16.mxu0 %v20823_v26  ;;  %7987 = vmatprep.subr.bf16.mxu1 %v20826_v27  ;;  %v20918_v26 = vld [vmem:[#allocation7 + $0x198c] ss:$16 sps:$4 sm:$0xff]   ;;  %v20913_v27 = vld [vmem:[#allocation7 + $0x1980] ss:$16 sps:$4 sm:$0xff]  }
 0x436   : > { %7332 = vmatpush1.bf16.msra.mxu0 %v20821_v19  ;;  %7988 = vmatpush1.bf16.msra.mxu1 %v20824_v29  ;;  %v20916_v19 = vld [vmem:[#allocation7 + $0x1988] ss:$16 sps:$4 sm:$0xff]   ;;  %v20921_v29 = vld [vmem:[#allocation7 + $0x19a4] ss:$16 sps:$4 sm:$0xff]  }
 0x437   : > { %7333 = vmatprep.subr.bf16.mxu0 %v20829_v30  ;;  %7989 = vmatprep.subr.bf16.mxu1 %v20832_v22  ;;  %v20924_v30 = vld [vmem:[#allocation7 + $0x19ac] ss:$16 sps:$4 sm:$0xff]   ;;  %v20919_v22 = vld [vmem:[#allocation7 + $0x19a0] ss:$16 sps:$4 sm:$0xff]  }
 0x43a   : > { %7334 = vmatpush1.bf16.msra.mxu0 %v20827_v32  ;;  %7990 = vmatpush1.bf16.msra.mxu1 %v20830_v33  ;;  %v20922_v32 = vld [vmem:[#allocation7 + $0x19a8] ss:$16 sps:$4 sm:$0xff]   ;;  %v20927_v33 = vld [vmem:[#allocation7 + $0x19c4] ss:$16 sps:$4 sm:$0xff]  }
 0x43b   : > { %7335 = vmatprep.subr.bf16.mxu0 %v20835_v34  ;;  %7991 = vmatprep.subr.bf16.mxu1 %v20838_v35  ;;  %v20930_v34 = vld [vmem:[#allocation7 + $0x19cc] ss:$16 sps:$4 sm:$0xff]   ;;  %v20925_v35 = vld [vmem:[#allocation7 + $0x19c0] ss:$16 sps:$4 sm:$0xff]  }
 0x43e   : > { %7336 = vmatpush1.bf16.msra.mxu0 %v20833_v36  ;;  %7992 = vmatpush1.bf16.msra.mxu1 %v20836_v37  ;;  %v20928_v36 = vld [vmem:[#allocation7 + $0x19c8] ss:$16 sps:$4 sm:$0xff]   ;;  %v20933_v37 = vld [vmem:[#allocation7 + $0x19e4] ss:$16 sps:$4 sm:$0xff]  }
 0x43f   : > { %7346 = vmatprep.subr.bf16.mxu0 %v20843_v38  ;;  %8002 = vmatprep.subr.bf16.mxu1 %v20846_v39  ;;  %v20936_v38 = vld [vmem:[#allocation7 + $0x19ec] ss:$16 sps:$4 sm:$0xff]   ;;  %v20931_v39 = vld [vmem:[#allocation7 + $0x19e0] ss:$16 sps:$4 sm:$0xff]  }
 0x441   : > { %7338 = vmatmul.mubr.bf16.vlgmr.msra.gmra.mrb[0].mxu0 %v17099_v40  ;;  %7994 = vmatmul.mubr.bf16.vlgmr.msra.gmra.mrb[0].mxu1 %v17099_v40  ;;  %v20934_v40 = vld [vmem:[#allocation7 + $0x19e8] ss:$16 sps:$4 sm:$0xff]  }
 0x442   : > { %7347 = vmatpush1.bf16.msra.mxu0 %v20841_v41  ;;  %8003 = vmatpush1.bf16.msra.mxu1 %v20844_v42  ;;  %v20941_v41 = vld [vmem:[#allocation7 + $0x1a04] ss:$16 sps:$4 sm:$0xff]   ;;  %v20944_v42 = vld [vmem:[#allocation7 + $0x1a0c] ss:$16 sps:$4 sm:$0xff]  }
 0x443   : > { %7348 = vmatprep.subr.bf16.mxu0 %v20849_v43  ;;  %8004 = vmatprep.subr.bf16.mxu1 %v20852_v25  ;;  %v17101_v43 = vcombine.low %v22434_v31, %v22434_v31  ;;  %v22441_v25 = vld [vmem:[%s22321_s24 + $0x68] sm:$0xff]  ;;  %v20953_v31 = vld [vmem:[#allocation7 + $0x1a44] ss:$16 sps:$4 sm:$0xff]  }
 0x444   : > { %7378 = vmatprep.mubr.bf16.mxu0 %v17102_v44  ;;  %8034 = vmatprep.mubr.bf16.mxu1 %v17102_v44  ;;  %v20939_v44 = vld [vmem:[#allocation7 + $0x1a00] ss:$16 sps:$4 sm:$0xff]  }
 0x446   : > { %7349 = vmatpush1.bf16.msra.mxu0 %v20847_v45  ;;  %8005 = vmatpush1.bf16.msra.mxu1 %v20850_v46  ;;  %v20942_v45 = vld [vmem:[#allocation7 + $0x1a08] ss:$16 sps:$4 sm:$0xff]   ;;  %v20947_v46 = vld [vmem:[#allocation7 + $0x1a24] ss:$16 sps:$4 sm:$0xff]  }
 0x447   : > { %7350 = vmatprep.subr.bf16.mxu0 %v20855_v28  ;;  %8006 = vmatprep.subr.bf16.mxu1 %v20858_v47  ;;  %v20950_v28 = vld [vmem:[#allocation7 + $0x1a2c] ss:$16 sps:$4 sm:$0xff]   ;;  %v17104_v47 = vcombine.high %v22441_v25, %v22441_v25 }
 0x44a   : > { %7351 = vmatpush1.bf16.msra.mxu0 %v20853_v48  ;;  %8007 = vmatpush1.bf16.msra.mxu1 %v20856_v49  ;;  %v20945_v48 = vld [vmem:[#allocation7 + $0x1a20] ss:$16 sps:$4 sm:$0xff]   ;;  %v20948_v49 = vld [vmem:[#allocation7 + $0x1a28] ss:$16 sps:$4 sm:$0xff]  }
 0x44b   : > { %7352 = vmatprep.subr.bf16.mxu0 %v20861_v50  ;;  %8008 = vmatprep.subr.bf16.mxu1 %v20864_v51  ;;  %v20956_v50 = vld [vmem:[#allocation7 + $0x1a4c] ss:$16 sps:$4 sm:$0xff]   ;;  %v20951_v51 = vld [vmem:[#allocation7 + $0x1a40] ss:$16 sps:$4 sm:$0xff]  }
 0x44e   : > { %7353 = vmatpush1.bf16.msra.mxu0 %v20859_v52  ;;  %8009 = vmatpush1.bf16.msra.mxu1 %v20862_v53  ;;  %v20954_v52 = vld [vmem:[#allocation7 + $0x1a48] ss:$16 sps:$4 sm:$0xff]   ;;  %v20959_v53 = vld [vmem:[#allocation7 + $0x1a64] ss:$16 sps:$4 sm:$0xff]  }
 0x44f   : > { %7354 = vmatprep.subr.bf16.mxu0 %v20867_v54  ;;  %8010 = vmatprep.subr.bf16.mxu1 %v20870_v55  ;;  %v20962_v54 = vld [vmem:[#allocation7 + $0x1a6c] ss:$16 sps:$4 sm:$0xff]   ;;  %v20957_v55 = vld [vmem:[#allocation7 + $0x1a60] ss:$16 sps:$4 sm:$0xff]  }
 0x452   : > { %7355 = vmatpush1.bf16.msra.mxu0 %v20865_v56  ;;  %8011 = vmatpush1.bf16.msra.mxu1 %v20868_v57  ;;  %v20960_v56 = vld [vmem:[#allocation7 + $0x1a68] ss:$16 sps:$4 sm:$0xff]   ;;  %v20965_v57 = vld [vmem:[#allocation7 + $0x1a84] ss:$16 sps:$4 sm:$0xff]  }
 0x453   : > { %7356 = vmatprep.subr.bf16.mxu0 %v20873_v58  ;;  %8012 = vmatprep.subr.bf16.mxu1 %v20876_v59  ;;  %v20968_v58 = vld [vmem:[#allocation7 + $0x1a8c] ss:$16 sps:$4 sm:$0xff]   ;;  %v20963_v59 = vld [vmem:[#allocation7 + $0x1a80] ss:$16 sps:$4 sm:$0xff]  }
 0x456   : > { %7357 = vmatpush1.bf16.msra.mxu0 %v20871_v60  ;;  %8013 = vmatpush1.bf16.msra.mxu1 %v20874_v61  ;;  %v20966_v60 = vld [vmem:[#allocation7 + $0x1a88] ss:$16 sps:$4 sm:$0xff]   ;;  %v20971_v61 = vld [vmem:[#allocation7 + $0x1aa4] ss:$16 sps:$4 sm:$0xff]  }
 0x457   : > { %7358 = vmatprep.subr.bf16.mxu0 %v20879_v62  ;;  %8014 = vmatprep.subr.bf16.mxu1 %v20882_v63  ;;  %v20974_v62 = vld [vmem:[#allocation7 + $0x1aac] ss:$16 sps:$4 sm:$0xff]   ;;  %v20969_v63 = vld [vmem:[#allocation7 + $0x1aa0] ss:$16 sps:$4 sm:$0xff]  }
 0x45a   : > { %7359 = vmatpush1.bf16.msra.mxu0 %v20877_v0  ;;  %8015 = vmatpush1.bf16.msra.mxu1 %v20880_v1  ;;  %v20972_v0 = vld [vmem:[#allocation7 + $0x1aa8] ss:$16 sps:$4 sm:$0xff]   ;;  %v20977_v1 = vld [vmem:[#allocation7 + $0x1ac4] ss:$16 sps:$4 sm:$0xff]  }
 0x45b   : > { %7360 = vmatprep.subr.bf16.mxu0 %v20885_v2  ;;  %8016 = vmatprep.subr.bf16.mxu1 %v20888_v3  ;;  %v20980_v2 = vld [vmem:[#allocation7 + $0x1acc] ss:$16 sps:$4 sm:$0xff]   ;;  %v20975_v3 = vld [vmem:[#allocation7 + $0x1ac0] ss:$16 sps:$4 sm:$0xff]  }
 0x45e   : > { %7361 = vmatpush1.bf16.msra.mxu0 %v20883_v4  ;;  %8017 = vmatpush1.bf16.msra.mxu1 %v20886_v5  ;;  %v20978_v4 = vld [vmem:[#allocation7 + $0x1ac8] ss:$16 sps:$4 sm:$0xff]   ;;  %v20983_v5 = vld [vmem:[#allocation7 + $0x1ae4] ss:$16 sps:$4 sm:$0xff]  }
 0x45f   : > { %7362 = vmatprep.subr.bf16.mxu0 %v20891_v6  ;;  %8018 = vmatprep.subr.bf16.mxu1 %v20894_v7  ;;  %v20986_v6 = vld [vmem:[#allocation7 + $0x1aec] ss:$16 sps:$4 sm:$0xff]   ;;  %v20981_v7 = vld [vmem:[#allocation7 + $0x1ae0] ss:$16 sps:$4 sm:$0xff]  }
 0x462   : > { %7363 = vmatpush1.bf16.msra.mxu0 %v20889_v8  ;;  %8019 = vmatpush1.bf16.msra.mxu1 %v20892_v9  ;;  %v20984_v8 = vld [vmem:[#allocation7 + $0x1ae8] ss:$16 sps:$4 sm:$0xff]   ;;  %v20989_v9 = vld [vmem:[#allocation7 + $0x1b04] ss:$16 sps:$4 sm:$0xff]  }
 0x463   : > { %7364 = vmatprep.subr.bf16.mxu0 %v20897_v10  ;;  %8020 = vmatprep.subr.bf16.mxu1 %v20900_v12  ;;  %v20992_v10 = vld [vmem:[#allocation7 + $0x1b0c] ss:$16 sps:$4 sm:$0xff]   ;;  %v20987_v12 = vld [vmem:[#allocation7 + $0x1b00] ss:$16 sps:$4 sm:$0xff]  }
 0x466   : > { %7365 = vmatpush1.bf16.msra.mxu0 %v20895_v13  ;;  %8021 = vmatpush1.bf16.msra.mxu1 %v20898_v15  ;;  %v20990_v13 = vld [vmem:[#allocation7 + $0x1b08] ss:$16 sps:$4 sm:$0xff]   ;;  %v20995_v15 = vld [vmem:[#allocation7 + $0x1b24] ss:$16 sps:$4 sm:$0xff]  }
 0x467   : > { %7366 = vmatprep.subr.bf16.mxu0 %v20903_v16  ;;  %8022 = vmatprep.subr.bf16.mxu1 %v20906_v18  ;;  %v20998_v16 = vld [vmem:[#allocation7 + $0x1b2c] ss:$16 sps:$4 sm:$0xff]   ;;  %v20993_v18 = vld [vmem:[#allocation7 + $0x1b20] ss:$16 sps:$4 sm:$0xff]  }
 0x46a   : > { %7367 = vmatpush1.bf16.msra.mxu0 %v20901_v20  ;;  %8023 = vmatpush1.bf16.msra.mxu1 %v20904_v11  ;;  %v20996_v20 = vld [vmem:[#allocation7 + $0x1b28] ss:$16 sps:$4 sm:$0xff]   ;;  %v21001_v11 = vld [vmem:[#allocation7 + $0x1b44] ss:$16 sps:$4 sm:$0xff]  }
 0x46b   : > { %7368 = vmatprep.subr.bf16.mxu0 %v20909_v21  ;;  %8024 = vmatprep.subr.bf16.mxu1 %v20912_v14  ;;  %v21004_v21 = vld [vmem:[#allocation7 + $0x1b4c] ss:$16 sps:$4 sm:$0xff]   ;;  %v20999_v14 = vld [vmem:[#allocation7 + $0x1b40] ss:$16 sps:$4 sm:$0xff]  }
 0x46e   : > { %7369 = vmatpush1.bf16.msra.mxu0 %v20907_v23  ;;  %8025 = vmatpush1.bf16.msra.mxu1 %v20910_v24  ;;  %v21002_v23 = vld [vmem:[#allocation7 + $0x1b48] ss:$16 sps:$4 sm:$0xff]   ;;  %v21007_v24 = vld [vmem:[#allocation7 + $0x1b64] ss:$16 sps:$4 sm:$0xff]  }
 0x46f   : > { %7370 = vmatprep.subr.bf16.mxu0 %v20915_v17  ;;  %8026 = vmatprep.subr.bf16.mxu1 %v20918_v26  ;;  %v21010_v17 = vld [vmem:[#allocation7 + $0x1b6c] ss:$16 sps:$4 sm:$0xff]   ;;  %v21005_v26 = vld [vmem:[#allocation7 + $0x1b60] ss:$16 sps:$4 sm:$0xff]  }
 0x472   : > { %7371 = vmatpush1.bf16.msra.mxu0 %v20913_v27  ;;  %8027 = vmatpush1.bf16.msra.mxu1 %v20916_v19  ;;  %v21008_v27 = vld [vmem:[#allocation7 + $0x1b68] ss:$16 sps:$4 sm:$0xff]   ;;  %v21013_v19 = vld [vmem:[#allocation7 + $0x1b84] ss:$16 sps:$4 sm:$0xff]  }
 0x473   : > { %7372 = vmatprep.subr.bf16.mxu0 %v20921_v29  ;;  %8028 = vmatprep.subr.bf16.mxu1 %v20924_v30  ;;  %v21016_v29 = vld [vmem:[#allocation7 + $0x1b8c] ss:$16 sps:$4 sm:$0xff]   ;;  %v21011_v30 = vld [vmem:[#allocation7 + $0x1b80] ss:$16 sps:$4 sm:$0xff]  }
 0x476   : > { %7373 = vmatpush1.bf16.msra.mxu0 %v20919_v22  ;;  %8029 = vmatpush1.bf16.msra.mxu1 %v20922_v32  ;;  %v21014_v22 = vld [vmem:[#allocation7 + $0x1b88] ss:$16 sps:$4 sm:$0xff]   ;;  %v21019_v32 = vld [vmem:[#allocation7 + $0x1ba4] ss:$16 sps:$4 sm:$0xff]  }
 0x477   : > { %7374 = vmatprep.subr.bf16.mxu0 %v20927_v33  ;;  %8030 = vmatprep.subr.bf16.mxu1 %v20930_v34  ;;  %v21022_v33 = vld [vmem:[#allocation7 + $0x1bac] ss:$16 sps:$4 sm:$0xff]   ;;  %v21017_v34 = vld [vmem:[#allocation7 + $0x1ba0] ss:$16 sps:$4 sm:$0xff]  }
 0x47a   : > { %7375 = vmatpush1.bf16.msra.mxu0 %v20925_v35  ;;  %8031 = vmatpush1.bf16.msra.mxu1 %v20928_v36  ;;  %v21020_v35 = vld [vmem:[#allocation7 + $0x1ba8] ss:$16 sps:$4 sm:$0xff]   ;;  %v21025_v36 = vld [vmem:[#allocation7 + $0x1bc4] ss:$16 sps:$4 sm:$0xff]  }
 0x47b   : > { %7376 = vmatprep.subr.bf16.mxu0 %v20933_v37  ;;  %8032 = vmatprep.subr.bf16.mxu1 %v20936_v38  ;;  %v21028_v37 = vld [vmem:[#allocation7 + $0x1bcc] ss:$16 sps:$4 sm:$0xff]   ;;  %v21023_v38 = vld [vmem:[#allocation7 + $0x1bc0] ss:$16 sps:$4 sm:$0xff]  }
 0x47e   : > { %7377 = vmatpush1.bf16.msra.mxu0 %v20931_v39  ;;  %8033 = vmatpush1.bf16.msra.mxu1 %v20934_v40  ;;  %v21026_v39 = vld [vmem:[#allocation7 + $0x1bc8] ss:$16 sps:$4 sm:$0xff]   ;;  %v21031_v40 = vld [vmem:[#allocation7 + $0x1be4] ss:$16 sps:$4 sm:$0xff]  }
 0x47f   : > { %7387 = vmatprep.subr.bf16.mxu0 %v20941_v41  ;;  %8043 = vmatprep.subr.bf16.mxu1 %v20944_v42  ;;  %v21034_v41 = vld [vmem:[#allocation7 + $0x1bec] ss:$16 sps:$4 sm:$0xff]   ;;  %v21029_v42 = vld [vmem:[#allocation7 + $0x1be0] ss:$16 sps:$4 sm:$0xff]  }
 0x481   : > { %7379 = vmatmul.mubr.bf16.vlgmr.msra.gmra.mrb[0].mxu0 %v17101_v43  ;;  %8035 = vmatmul.mubr.bf16.vlgmr.msra.gmra.mrb[0].mxu1 %v17101_v43  ;;  %v21032_v43 = vld [vmem:[#allocation7 + $0x1be8] ss:$16 sps:$4 sm:$0xff]  }
 0x482   : > { %7388 = vmatpush1.bf16.msra.mxu0 %v20939_v44  ;;  %8044 = vmatpush1.bf16.msra.mxu1 %v20942_v45  ;;  %v21039_v44 = vld [vmem:[#allocation7 + $0x1c04] ss:$16 sps:$4 sm:$0xff]   ;;  %v21042_v45 = vld [vmem:[#allocation7 + $0x1c0c] ss:$16 sps:$4 sm:$0xff]  }
 0x483   : > { %7389 = vmatprep.subr.bf16.mxu0 %v20947_v46  ;;  %8045 = vmatprep.subr.bf16.mxu1 %v20950_v28  ;;  %v17103_v46 = vcombine.low %v22441_v25, %v22441_v25  ;;  %v22448_v28 = vld [vmem:[%s22321_s24 + $0x70] sm:$0xff] }
 0x484   : > { %7419 = vmatprep.mubr.bf16.mxu0 %v17104_v47  ;;  %8075 = vmatprep.mubr.bf16.mxu1 %v17104_v47  ;;  %v21037_v47 = vld [vmem:[#allocation7 + $0x1c00] ss:$16 sps:$4 sm:$0xff]   ;;  %v21051_v25 = vld [vmem:[#allocation7 + $0x1c44] ss:$16 sps:$4 sm:$0xff]  }
 0x486   : > { %7390 = vmatpush1.bf16.msra.mxu0 %v20945_v48  ;;  %8046 = vmatpush1.bf16.msra.mxu1 %v20948_v49  ;;  %v21040_v48 = vld [vmem:[#allocation7 + $0x1c08] ss:$16 sps:$4 sm:$0xff]   ;;  %v21045_v49 = vld [vmem:[#allocation7 + $0x1c24] ss:$16 sps:$4 sm:$0xff]  }
 0x487   : > { %7391 = vmatprep.subr.bf16.mxu0 %v20953_v31  ;;  %8047 = vmatprep.subr.bf16.mxu1 %v20956_v50  ;;  %v21048_v31 = vld [vmem:[#allocation7 + $0x1c2c] ss:$16 sps:$4 sm:$0xff]   ;;  %v17106_v50 = vcombine.high %v22448_v28, %v22448_v28 }
 0x48a   : > { %7392 = vmatpush1.bf16.msra.mxu0 %v20951_v51  ;;  %8048 = vmatpush1.bf16.msra.mxu1 %v20954_v52  ;;  %v21043_v51 = vld [vmem:[#allocation7 + $0x1c20] ss:$16 sps:$4 sm:$0xff]   ;;  %v21046_v52 = vld [vmem:[#allocation7 + $0x1c28] ss:$16 sps:$4 sm:$0xff]  }
 0x48b   : > { %7393 = vmatprep.subr.bf16.mxu0 %v20959_v53  ;;  %8049 = vmatprep.subr.bf16.mxu1 %v20962_v54  ;;  %v21054_v53 = vld [vmem:[#allocation7 + $0x1c4c] ss:$16 sps:$4 sm:$0xff]   ;;  %v21049_v54 = vld [vmem:[#allocation7 + $0x1c40] ss:$16 sps:$4 sm:$0xff]  }
 0x48e   : > { %7394 = vmatpush1.bf16.msra.mxu0 %v20957_v55  ;;  %8050 = vmatpush1.bf16.msra.mxu1 %v20960_v56  ;;  %v21052_v55 = vld [vmem:[#allocation7 + $0x1c48] ss:$16 sps:$4 sm:$0xff]   ;;  %v21057_v56 = vld [vmem:[#allocation7 + $0x1c64] ss:$16 sps:$4 sm:$0xff]  }
 0x48f   : > { %7395 = vmatprep.subr.bf16.mxu0 %v20965_v57  ;;  %8051 = vmatprep.subr.bf16.mxu1 %v20968_v58  ;;  %v21060_v57 = vld [vmem:[#allocation7 + $0x1c6c] ss:$16 sps:$4 sm:$0xff]   ;;  %v21055_v58 = vld [vmem:[#allocation7 + $0x1c60] ss:$16 sps:$4 sm:$0xff]  }
 0x492   : > { %7396 = vmatpush1.bf16.msra.mxu0 %v20963_v59  ;;  %8052 = vmatpush1.bf16.msra.mxu1 %v20966_v60  ;;  %v21058_v59 = vld [vmem:[#allocation7 + $0x1c68] ss:$16 sps:$4 sm:$0xff]   ;;  %v21063_v60 = vld [vmem:[#allocation7 + $0x1c84] ss:$16 sps:$4 sm:$0xff]  }
 0x493   : > { %7397 = vmatprep.subr.bf16.mxu0 %v20971_v61  ;;  %8053 = vmatprep.subr.bf16.mxu1 %v20974_v62  ;;  %v21066_v61 = vld [vmem:[#allocation7 + $0x1c8c] ss:$16 sps:$4 sm:$0xff]   ;;  %v21061_v62 = vld [vmem:[#allocation7 + $0x1c80] ss:$16 sps:$4 sm:$0xff]  }
 0x496   : > { %7398 = vmatpush1.bf16.msra.mxu0 %v20969_v63  ;;  %8054 = vmatpush1.bf16.msra.mxu1 %v20972_v0  ;;  %v21064_v63 = vld [vmem:[#allocation7 + $0x1c88] ss:$16 sps:$4 sm:$0xff]   ;;  %v21069_v0 = vld [vmem:[#allocation7 + $0x1ca4] ss:$16 sps:$4 sm:$0xff]  }
 0x497   : > { %7399 = vmatprep.subr.bf16.mxu0 %v20977_v1  ;;  %8055 = vmatprep.subr.bf16.mxu1 %v20980_v2  ;;  %v21072_v1 = vld [vmem:[#allocation7 + $0x1cac] ss:$16 sps:$4 sm:$0xff]   ;;  %v21067_v2 = vld [vmem:[#allocation7 + $0x1ca0] ss:$16 sps:$4 sm:$0xff]  }
 0x49a   : > { %7400 = vmatpush1.bf16.msra.mxu0 %v20975_v3  ;;  %8056 = vmatpush1.bf16.msra.mxu1 %v20978_v4  ;;  %v21070_v3 = vld [vmem:[#allocation7 + $0x1ca8] ss:$16 sps:$4 sm:$0xff]   ;;  %v21075_v4 = vld [vmem:[#allocation7 + $0x1cc4] ss:$16 sps:$4 sm:$0xff]  }
 0x49b   : > { %7401 = vmatprep.subr.bf16.mxu0 %v20983_v5  ;;  %8057 = vmatprep.subr.bf16.mxu1 %v20986_v6  ;;  %v21078_v5 = vld [vmem:[#allocation7 + $0x1ccc] ss:$16 sps:$4 sm:$0xff]   ;;  %v21073_v6 = vld [vmem:[#allocation7 + $0x1cc0] ss:$16 sps:$4 sm:$0xff]  }
 0x49e   : > { %7402 = vmatpush1.bf16.msra.mxu0 %v20981_v7  ;;  %8058 = vmatpush1.bf16.msra.mxu1 %v20984_v8  ;;  %v21076_v7 = vld [vmem:[#allocation7 + $0x1cc8] ss:$16 sps:$4 sm:$0xff]   ;;  %v21081_v8 = vld [vmem:[#allocation7 + $0x1ce4] ss:$16 sps:$4 sm:$0xff]  }
 0x49f   : > { %7403 = vmatprep.subr.bf16.mxu0 %v20989_v9  ;;  %8059 = vmatprep.subr.bf16.mxu1 %v20992_v10  ;;  %v21084_v9 = vld [vmem:[#allocation7 + $0x1cec] ss:$16 sps:$4 sm:$0xff]   ;;  %v21079_v10 = vld [vmem:[#allocation7 + $0x1ce0] ss:$16 sps:$4 sm:$0xff]  }
 0x4a2   : > { %7404 = vmatpush1.bf16.msra.mxu0 %v20987_v12  ;;  %8060 = vmatpush1.bf16.msra.mxu1 %v20990_v13  ;;  %v21082_v12 = vld [vmem:[#allocation7 + $0x1ce8] ss:$16 sps:$4 sm:$0xff]   ;;  %v21087_v13 = vld [vmem:[#allocation7 + $0x1d04] ss:$16 sps:$4 sm:$0xff]  }
 0x4a3   : > { %7405 = vmatprep.subr.bf16.mxu0 %v20995_v15  ;;  %8061 = vmatprep.subr.bf16.mxu1 %v20998_v16  ;;  %v21090_v15 = vld [vmem:[#allocation7 + $0x1d0c] ss:$16 sps:$4 sm:$0xff]   ;;  %v21085_v16 = vld [vmem:[#allocation7 + $0x1d00] ss:$16 sps:$4 sm:$0xff]  }
 0x4a6   : > { %7406 = vmatpush1.bf16.msra.mxu0 %v20993_v18  ;;  %8062 = vmatpush1.bf16.msra.mxu1 %v20996_v20  ;;  %v21088_v18 = vld [vmem:[#allocation7 + $0x1d08] ss:$16 sps:$4 sm:$0xff]   ;;  %v21093_v20 = vld [vmem:[#allocation7 + $0x1d24] ss:$16 sps:$4 sm:$0xff]  }
 0x4a7   : > { %7407 = vmatprep.subr.bf16.mxu0 %v21001_v11  ;;  %8063 = vmatprep.subr.bf16.mxu1 %v21004_v21  ;;  %v21096_v11 = vld [vmem:[#allocation7 + $0x1d2c] ss:$16 sps:$4 sm:$0xff]   ;;  %v21091_v21 = vld [vmem:[#allocation7 + $0x1d20] ss:$16 sps:$4 sm:$0xff]  }
 0x4aa   : > { %7408 = vmatpush1.bf16.msra.mxu0 %v20999_v14  ;;  %8064 = vmatpush1.bf16.msra.mxu1 %v21002_v23  ;;  %v21094_v14 = vld [vmem:[#allocation7 + $0x1d28] ss:$16 sps:$4 sm:$0xff]   ;;  %v21099_v23 = vld [vmem:[#allocation7 + $0x1d44] ss:$16 sps:$4 sm:$0xff]  }
 0x4ab   : > { %7409 = vmatprep.subr.bf16.mxu0 %v21007_v24  ;;  %8065 = vmatprep.subr.bf16.mxu1 %v21010_v17  ;;  %v21102_v24 = vld [vmem:[#allocation7 + $0x1d4c] ss:$16 sps:$4 sm:$0xff]   ;;  %v21097_v17 = vld [vmem:[#allocation7 + $0x1d40] ss:$16 sps:$4 sm:$0xff]  }
 0x4ae   : > { %7410 = vmatpush1.bf16.msra.mxu0 %v21005_v26  ;;  %8066 = vmatpush1.bf16.msra.mxu1 %v21008_v27  ;;  %v21100_v26 = vld [vmem:[#allocation7 + $0x1d48] ss:$16 sps:$4 sm:$0xff]   ;;  %v21105_v27 = vld [vmem:[#allocation7 + $0x1d64] ss:$16 sps:$4 sm:$0xff]  }
 0x4af   : > { %7411 = vmatprep.subr.bf16.mxu0 %v21013_v19  ;;  %8067 = vmatprep.subr.bf16.mxu1 %v21016_v29  ;;  %v21108_v19 = vld [vmem:[#allocation7 + $0x1d6c] ss:$16 sps:$4 sm:$0xff]   ;;  %v21103_v29 = vld [vmem:[#allocation7 + $0x1d60] ss:$16 sps:$4 sm:$0xff]  }
 0x4b2   : > { %7412 = vmatpush1.bf16.msra.mxu0 %v21011_v30  ;;  %8068 = vmatpush1.bf16.msra.mxu1 %v21014_v22  ;;  %v21106_v30 = vld [vmem:[#allocation7 + $0x1d68] ss:$16 sps:$4 sm:$0xff]   ;;  %v21111_v22 = vld [vmem:[#allocation7 + $0x1d84] ss:$16 sps:$4 sm:$0xff]  }
 0x4b3   : > { %7413 = vmatprep.subr.bf16.mxu0 %v21019_v32  ;;  %8069 = vmatprep.subr.bf16.mxu1 %v21022_v33  ;;  %v21114_v32 = vld [vmem:[#allocation7 + $0x1d8c] ss:$16 sps:$4 sm:$0xff]   ;;  %v21109_v33 = vld [vmem:[#allocation7 + $0x1d80] ss:$16 sps:$4 sm:$0xff]  }
 0x4b6   : > { %7414 = vmatpush1.bf16.msra.mxu0 %v21017_v34  ;;  %8070 = vmatpush1.bf16.msra.mxu1 %v21020_v35  ;;  %v21112_v34 = vld [vmem:[#allocation7 + $0x1d88] ss:$16 sps:$4 sm:$0xff]   ;;  %v21117_v35 = vld [vmem:[#allocation7 + $0x1da4] ss:$16 sps:$4 sm:$0xff]  }
 0x4b7   : > { %7415 = vmatprep.subr.bf16.mxu0 %v21025_v36  ;;  %8071 = vmatprep.subr.bf16.mxu1 %v21028_v37  ;;  %v21120_v36 = vld [vmem:[#allocation7 + $0x1dac] ss:$16 sps:$4 sm:$0xff]   ;;  %v21115_v37 = vld [vmem:[#allocation7 + $0x1da0] ss:$16 sps:$4 sm:$0xff]  }
 0x4ba   : > { %7416 = vmatpush1.bf16.msra.mxu0 %v21023_v38  ;;  %8072 = vmatpush1.bf16.msra.mxu1 %v21026_v39  ;;  %v21118_v38 = vld [vmem:[#allocation7 + $0x1da8] ss:$16 sps:$4 sm:$0xff]   ;;  %v21123_v39 = vld [vmem:[#allocation7 + $0x1dc4] ss:$16 sps:$4 sm:$0xff]  }
 0x4bb   : > { %7417 = vmatprep.subr.bf16.mxu0 %v21031_v40  ;;  %8073 = vmatprep.subr.bf16.mxu1 %v21034_v41  ;;  %v21126_v40 = vld [vmem:[#allocation7 + $0x1dcc] ss:$16 sps:$4 sm:$0xff]   ;;  %v21121_v41 = vld [vmem:[#allocation7 + $0x1dc0] ss:$16 sps:$4 sm:$0xff]  }
 0x4be   : > { %7418 = vmatpush1.bf16.msra.mxu0 %v21029_v42  ;;  %8074 = vmatpush1.bf16.msra.mxu1 %v21032_v43  ;;  %v21124_v42 = vld [vmem:[#allocation7 + $0x1dc8] ss:$16 sps:$4 sm:$0xff]   ;;  %v21129_v43 = vld [vmem:[#allocation7 + $0x1de4] ss:$16 sps:$4 sm:$0xff]  }
 0x4bf   : > { %7428 = vmatprep.subr.bf16.mxu0 %v21039_v44  ;;  %8084 = vmatprep.subr.bf16.mxu1 %v21042_v45  ;;  %v21132_v44 = vld [vmem:[#allocation7 + $0x1dec] ss:$16 sps:$4 sm:$0xff]   ;;  %v21127_v45 = vld [vmem:[#allocation7 + $0x1de0] ss:$16 sps:$4 sm:$0xff]  }
 0x4c1   : > { %7420 = vmatmul.mubr.bf16.vlgmr.msra.gmra.mrb[0].mxu0 %v17103_v46  ;;  %8076 = vmatmul.mubr.bf16.vlgmr.msra.gmra.mrb[0].mxu1 %v17103_v46  ;;  %v21130_v46 = vld [vmem:[#allocation7 + $0x1de8] ss:$16 sps:$4 sm:$0xff]  }
 0x4c2   : > { %7429 = vmatpush1.bf16.msra.mxu0 %v21037_v47  ;;  %8085 = vmatpush1.bf16.msra.mxu1 %v21040_v48  ;;  %v21137_v47 = vld [vmem:[#allocation7 + $0x1e04] ss:$16 sps:$4 sm:$0xff]   ;;  %v21140_v48 = vld [vmem:[#allocation7 + $0x1e0c] ss:$16 sps:$4 sm:$0xff]  }
 0x4c3   : > { %7430 = vmatprep.subr.bf16.mxu0 %v21045_v49  ;;  %8086 = vmatprep.subr.bf16.mxu1 %v21048_v31  ;;  %v17105_v49 = vcombine.low %v22448_v28, %v22448_v28  ;;  %v22455_v31 = vld [vmem:[%s22321_s24 + $0x78] sm:$0xff]  ;;  %v21149_v28 = vld [vmem:[#allocation7 + $0x1e44] ss:$16 sps:$4 sm:$0xff]   ;;  %s16819_s24 = scalar_lea.sflag [#allocation21], %s22317_s30 }
 0x4c4   : > { %7460 = vmatprep.mubr.bf16.mxu0 %v17106_v50  ;;  %8116 = vmatprep.mubr.bf16.mxu1 %v17106_v50  ;;  %v21135_v50 = vld [vmem:[#allocation7 + $0x1e00] ss:$16 sps:$4 sm:$0xff]  }
 0x4c6   : > { %7431 = vmatpush1.bf16.msra.mxu0 %v21043_v51  ;;  %8087 = vmatpush1.bf16.msra.mxu1 %v21046_v52  ;;  %v21138_v51 = vld [vmem:[#allocation7 + $0x1e08] ss:$16 sps:$4 sm:$0xff]   ;;  %v21143_v52 = vld [vmem:[#allocation7 + $0x1e24] ss:$16 sps:$4 sm:$0xff]  }
 0x4c7   : > { %7432 = vmatprep.subr.bf16.mxu0 %v21051_v25  ;;  %8088 = vmatprep.subr.bf16.mxu1 %v21054_v53  ;;  %v21146_v25 = vld [vmem:[#allocation7 + $0x1e2c] ss:$16 sps:$4 sm:$0xff]   ;;  %v17108_v53 = vcombine.high %v22455_v31, %v22455_v31 }
 0x4ca   : > { %7433 = vmatpush1.bf16.msra.mxu0 %v21049_v54  ;;  %8089 = vmatpush1.bf16.msra.mxu1 %v21052_v55  ;;  %v21141_v54 = vld [vmem:[#allocation7 + $0x1e20] ss:$16 sps:$4 sm:$0xff]   ;;  %v21144_v55 = vld [vmem:[#allocation7 + $0x1e28] ss:$16 sps:$4 sm:$0xff]  }
 0x4cb   : > { %7434 = vmatprep.subr.bf16.mxu0 %v21057_v56  ;;  %8090 = vmatprep.subr.bf16.mxu1 %v21060_v57  ;;  %v21152_v56 = vld [vmem:[#allocation7 + $0x1e4c] ss:$16 sps:$4 sm:$0xff]   ;;  %v21147_v57 = vld [vmem:[#allocation7 + $0x1e40] ss:$16 sps:$4 sm:$0xff]  }
 0x4ce   : > { %7435 = vmatpush1.bf16.msra.mxu0 %v21055_v58  ;;  %8091 = vmatpush1.bf16.msra.mxu1 %v21058_v59  ;;  %v21150_v58 = vld [vmem:[#allocation7 + $0x1e48] ss:$16 sps:$4 sm:$0xff]   ;;  %v21155_v59 = vld [vmem:[#allocation7 + $0x1e64] ss:$16 sps:$4 sm:$0xff]  }
 0x4cf   : > { %7436 = vmatprep.subr.bf16.mxu0 %v21063_v60  ;;  %8092 = vmatprep.subr.bf16.mxu1 %v21066_v61  ;;  %v21158_v60 = vld [vmem:[#allocation7 + $0x1e6c] ss:$16 sps:$4 sm:$0xff]   ;;  %v21153_v61 = vld [vmem:[#allocation7 + $0x1e60] ss:$16 sps:$4 sm:$0xff]  }
 0x4d2   : > { %7437 = vmatpush1.bf16.msra.mxu0 %v21061_v62  ;;  %8093 = vmatpush1.bf16.msra.mxu1 %v21064_v63  ;;  %v21156_v62 = vld [vmem:[#allocation7 + $0x1e68] ss:$16 sps:$4 sm:$0xff]   ;;  %v21161_v63 = vld [vmem:[#allocation7 + $0x1e84] ss:$16 sps:$4 sm:$0xff]  }
 0x4d3   : > { %7438 = vmatprep.subr.bf16.mxu0 %v21069_v0  ;;  %8094 = vmatprep.subr.bf16.mxu1 %v21072_v1  ;;  %v21164_v0 = vld [vmem:[#allocation7 + $0x1e8c] ss:$16 sps:$4 sm:$0xff]   ;;  %v21159_v1 = vld [vmem:[#allocation7 + $0x1e80] ss:$16 sps:$4 sm:$0xff]  }
 0x4d6   : > { %7439 = vmatpush1.bf16.msra.mxu0 %v21067_v2  ;;  %8095 = vmatpush1.bf16.msra.mxu1 %v21070_v3  ;;  %v21162_v2 = vld [vmem:[#allocation7 + $0x1e88] ss:$16 sps:$4 sm:$0xff]   ;;  %v21167_v3 = vld [vmem:[#allocation7 + $0x1ea4] ss:$16 sps:$4 sm:$0xff]  }
 0x4d7   : > { %7440 = vmatprep.subr.bf16.mxu0 %v21075_v4  ;;  %8096 = vmatprep.subr.bf16.mxu1 %v21078_v5  ;;  %v21170_v4 = vld [vmem:[#allocation7 + $0x1eac] ss:$16 sps:$4 sm:$0xff]   ;;  %v21165_v5 = vld [vmem:[#allocation7 + $0x1ea0] ss:$16 sps:$4 sm:$0xff]  }
 0x4da   : > { %7441 = vmatpush1.bf16.msra.mxu0 %v21073_v6  ;;  %8097 = vmatpush1.bf16.msra.mxu1 %v21076_v7  ;;  %v21168_v6 = vld [vmem:[#allocation7 + $0x1ea8] ss:$16 sps:$4 sm:$0xff]   ;;  %v21173_v7 = vld [vmem:[#allocation7 + $0x1ec4] ss:$16 sps:$4 sm:$0xff]  }
 0x4db   : > { %7442 = vmatprep.subr.bf16.mxu0 %v21081_v8  ;;  %8098 = vmatprep.subr.bf16.mxu1 %v21084_v9  ;;  %v21176_v8 = vld [vmem:[#allocation7 + $0x1ecc] ss:$16 sps:$4 sm:$0xff]   ;;  %v21171_v9 = vld [vmem:[#allocation7 + $0x1ec0] ss:$16 sps:$4 sm:$0xff]  }
 0x4de   : > { %7443 = vmatpush1.bf16.msra.mxu0 %v21079_v10  ;;  %8099 = vmatpush1.bf16.msra.mxu1 %v21082_v12  ;;  %v21174_v10 = vld [vmem:[#allocation7 + $0x1ec8] ss:$16 sps:$4 sm:$0xff]   ;;  %v21179_v12 = vld [vmem:[#allocation7 + $0x1ee4] ss:$16 sps:$4 sm:$0xff]  }
 0x4df   : > { %7444 = vmatprep.subr.bf16.mxu0 %v21087_v13  ;;  %8100 = vmatprep.subr.bf16.mxu1 %v21090_v15  ;;  %v21182_v13 = vld [vmem:[#allocation7 + $0x1eec] ss:$16 sps:$4 sm:$0xff]   ;;  %v21177_v15 = vld [vmem:[#allocation7 + $0x1ee0] ss:$16 sps:$4 sm:$0xff]  }
 0x4e2   : > { %7445 = vmatpush1.bf16.msra.mxu0 %v21085_v16  ;;  %8101 = vmatpush1.bf16.msra.mxu1 %v21088_v18  ;;  %v21180_v16 = vld [vmem:[#allocation7 + $0x1ee8] ss:$16 sps:$4 sm:$0xff]   ;;  %v21185_v18 = vld [vmem:[#allocation7 + $0x1f04] ss:$16 sps:$4 sm:$0xff]  }
 0x4e3   : > { %7446 = vmatprep.subr.bf16.mxu0 %v21093_v20  ;;  %8102 = vmatprep.subr.bf16.mxu1 %v21096_v11  ;;  %v21188_v20 = vld [vmem:[#allocation7 + $0x1f0c] ss:$16 sps:$4 sm:$0xff]   ;;  %v21183_v11 = vld [vmem:[#allocation7 + $0x1f00] ss:$16 sps:$4 sm:$0xff]  }
 0x4e6   : > { %7447 = vmatpush1.bf16.msra.mxu0 %v21091_v21  ;;  %8103 = vmatpush1.bf16.msra.mxu1 %v21094_v14  ;;  %v21186_v21 = vld [vmem:[#allocation7 + $0x1f08] ss:$16 sps:$4 sm:$0xff]   ;;  %v21191_v14 = vld [vmem:[#allocation7 + $0x1f24] ss:$16 sps:$4 sm:$0xff]  }
 0x4e7   : > { %7448 = vmatprep.subr.bf16.mxu0 %v21099_v23  ;;  %8104 = vmatprep.subr.bf16.mxu1 %v21102_v24  ;;  %v21194_v23 = vld [vmem:[#allocation7 + $0x1f2c] ss:$16 sps:$4 sm:$0xff]   ;;  %v21189_v24 = vld [vmem:[#allocation7 + $0x1f20] ss:$16 sps:$4 sm:$0xff]  }
 0x4ea   : > { %7449 = vmatpush1.bf16.msra.mxu0 %v21097_v17  ;;  %8105 = vmatpush1.bf16.msra.mxu1 %v21100_v26  ;;  %v21192_v17 = vld [vmem:[#allocation7 + $0x1f28] ss:$16 sps:$4 sm:$0xff]   ;;  %v21197_v26 = vld [vmem:[#allocation7 + $0x1f44] ss:$16 sps:$4 sm:$0xff]  }
 0x4eb   : > { %7450 = vmatprep.subr.bf16.mxu0 %v21105_v27  ;;  %8106 = vmatprep.subr.bf16.mxu1 %v21108_v19  ;;  %v21200_v27 = vld [vmem:[#allocation7 + $0x1f4c] ss:$16 sps:$4 sm:$0xff]   ;;  %v21195_v19 = vld [vmem:[#allocation7 + $0x1f40] ss:$16 sps:$4 sm:$0xff]  }
 0x4ee   : > { %7451 = vmatpush1.bf16.msra.mxu0 %v21103_v29  ;;  %8107 = vmatpush1.bf16.msra.mxu1 %v21106_v30  ;;  %v21198_v29 = vld [vmem:[#allocation7 + $0x1f48] ss:$16 sps:$4 sm:$0xff]   ;;  %v21203_v30 = vld [vmem:[#allocation7 + $0x1f64] ss:$16 sps:$4 sm:$0xff]  }
 0x4ef   : > { %7452 = vmatprep.subr.bf16.mxu0 %v21111_v22  ;;  %8108 = vmatprep.subr.bf16.mxu1 %v21114_v32  ;;  %v21206_v22 = vld [vmem:[#allocation7 + $0x1f6c] ss:$16 sps:$4 sm:$0xff]   ;;  %v21201_v32 = vld [vmem:[#allocation7 + $0x1f60] ss:$16 sps:$4 sm:$0xff]  }
 0x4f2   : > { %7453 = vmatpush1.bf16.msra.mxu0 %v21109_v33  ;;  %8109 = vmatpush1.bf16.msra.mxu1 %v21112_v34  ;;  %v21204_v33 = vld [vmem:[#allocation7 + $0x1f68] ss:$16 sps:$4 sm:$0xff]   ;;  %v21209_v34 = vld [vmem:[#allocation7 + $0x1f84] ss:$16 sps:$4 sm:$0xff]  }
 0x4f3   : > { %7454 = vmatprep.subr.bf16.mxu0 %v21117_v35  ;;  %8110 = vmatprep.subr.bf16.mxu1 %v21120_v36  ;;  %v21212_v35 = vld [vmem:[#allocation7 + $0x1f8c] ss:$16 sps:$4 sm:$0xff]   ;;  %v21207_v36 = vld [vmem:[#allocation7 + $0x1f80] ss:$16 sps:$4 sm:$0xff]  }
 0x4f6   : > { %7455 = vmatpush1.bf16.msra.mxu0 %v21115_v37  ;;  %8111 = vmatpush1.bf16.msra.mxu1 %v21118_v38  ;;  %v21210_v37 = vld [vmem:[#allocation7 + $0x1f88] ss:$16 sps:$4 sm:$0xff]   ;;  %v21215_v38 = vld [vmem:[#allocation7 + $0x1fa4] ss:$16 sps:$4 sm:$0xff]  }
 0x4f7   : > { %7456 = vmatprep.subr.bf16.mxu0 %v21123_v39  ;;  %8112 = vmatprep.subr.bf16.mxu1 %v21126_v40  ;;  %v21218_v39 = vld [vmem:[#allocation7 + $0x1fac] ss:$16 sps:$4 sm:$0xff]   ;;  %v21213_v40 = vld [vmem:[#allocation7 + $0x1fa0] ss:$16 sps:$4 sm:$0xff]  }
 0x4fa   : > { %7457 = vmatpush1.bf16.msra.mxu0 %v21121_v41  ;;  %8113 = vmatpush1.bf16.msra.mxu1 %v21124_v42  ;;  %v21216_v41 = vld [vmem:[#allocation7 + $0x1fa8] ss:$16 sps:$4 sm:$0xff]   ;;  %v21221_v42 = vld [vmem:[#allocation7 + $0x1fc4] ss:$16 sps:$4 sm:$0xff]  }
 0x4fb   : > { %7458 = vmatprep.subr.bf16.mxu0 %v21129_v43  ;;  %8114 = vmatprep.subr.bf16.mxu1 %v21132_v44  ;;  %v21224_v43 = vld [vmem:[#allocation7 + $0x1fcc] ss:$16 sps:$4 sm:$0xff]   ;;  %v21219_v44 = vld [vmem:[#allocation7 + $0x1fc0] ss:$16 sps:$4 sm:$0xff]  }
 0x4fe   : > { %7459 = vmatpush1.bf16.msra.mxu0 %v21127_v45  ;;  %8115 = vmatpush1.bf16.msra.mxu1 %v21130_v46  ;;  %v21222_v45 = vld [vmem:[#allocation7 + $0x1fc8] ss:$16 sps:$4 sm:$0xff]   ;;  %v21227_v46 = vld [vmem:[#allocation7 + $0x1fe4] ss:$16 sps:$4 sm:$0xff]  }
 0x4ff   : > { %7469 = vmatprep.subr.bf16.mxu0 %v21137_v47  ;;  %8125 = vmatprep.subr.bf16.mxu1 %v21140_v48  ;;  %v21230_v47 = vld [vmem:[#allocation7 + $0x1fec] ss:$16 sps:$4 sm:$0xff]   ;;  %v21225_v48 = vld [vmem:[#allocation7 + $0x1fe0] ss:$16 sps:$4 sm:$0xff]  }
 0x501   : > { %7461 = vmatmul.mubr.bf16.vlgmr.msra.gmra.mrb[0].mxu0 %v17105_v49  ;;  %8117 = vmatmul.mubr.bf16.vlgmr.msra.gmra.mrb[0].mxu1 %v17105_v49  ;;  %v21228_v49 = vld [vmem:[#allocation7 + $0x1fe8] ss:$16 sps:$4 sm:$0xff]  }
 0x502   : > { %7470 = vmatpush1.bf16.msra.mxu0 %v21135_v50  ;;  %8126 = vmatpush1.bf16.msra.mxu1 %v21138_v51  ;;  %v21235_v50 = vld [vmem:[#allocation10 + $0x4] ss:$8 sps:$4 sm:$0xff]   ;;  %v17107_v51 = vcombine.low %v22455_v31, %v22455_v31  ;;  %v21245_v31 = vld [vmem:[#allocation10 + $0x40] ss:$8 sps:$4 sm:$0xff]  }
 0x503   : > { %7471 = vmatprep.subr.bf16.mxu0 %v21143_v52  ;;  %8127 = vmatprep.subr.bf16.mxu1 %v21146_v25  ;;  %v21233_v52 = vld [vmem:[#allocation10] ss:$8 sps:$4 sm:$0xff]   ;;  %v21238_v25 = vld [vmem:[#allocation10 + $0x14] ss:$8 sps:$4 sm:$0xff]  }
 0x504   : > { %7501 = vmatprep.mubr.bf16.mxu0 %v17108_v53  ;;  %8157 = vmatprep.mubr.bf16.mxu1 %v17108_v53  ;;  %v21236_v53 = vld [vmem:[#allocation10 + $0x10] ss:$8 sps:$4 sm:$0xff]  }
 0x506   : > { %7472 = vmatpush1.bf16.msra.mxu0 %v21141_v54  ;;  %8128 = vmatpush1.bf16.msra.mxu1 %v21144_v55  ;;  %v21241_v54 = vld [vmem:[#allocation10 + $0x24] ss:$8 sps:$4 sm:$0xff]   ;;  %v21239_v55 = vld [vmem:[#allocation10 + $0x20] ss:$8 sps:$4 sm:$0xff]  }
 0x507   : > { %7473 = vmatprep.subr.bf16.mxu0 %v21149_v28  ;;  %8129 = vmatprep.subr.bf16.mxu1 %v21152_v56  ;;  %v21244_v28 = vld [vmem:[#allocation10 + $0x34] ss:$8 sps:$4 sm:$0xff]   ;;  %v21242_v56 = vld [vmem:[#allocation10 + $0x30] ss:$8 sps:$4 sm:$0xff]  }
 0x50a   : > { %7474 = vmatpush1.bf16.msra.mxu0 %v21147_v57  ;;  %8130 = vmatpush1.bf16.msra.mxu1 %v21150_v58  ;;  %v21247_v57 = vld [vmem:[#allocation10 + $0x44] ss:$8 sps:$4 sm:$0xff]   ;;  %v21250_v58 = vld [vmem:[#allocation10 + $0x54] ss:$8 sps:$4 sm:$0xff]  }
 0x50b   : > { %7475 = vmatprep.subr.bf16.mxu0 %v21155_v59  ;;  %8131 = vmatprep.subr.bf16.mxu1 %v21158_v60  ;;  %v21248_v59 = vld [vmem:[#allocation10 + $0x50] ss:$8 sps:$4 sm:$0xff]   ;;  %v21253_v60 = vld [vmem:[#allocation10 + $0x64] ss:$8 sps:$4 sm:$0xff]  }
 0x50e   : > { %7476 = vmatpush1.bf16.msra.mxu0 %v21153_v61  ;;  %8132 = vmatpush1.bf16.msra.mxu1 %v21156_v62  ;;  %v21251_v61 = vld [vmem:[#allocation10 + $0x60] ss:$8 sps:$4 sm:$0xff]   ;;  %v21256_v62 = vld [vmem:[#allocation10 + $0x74] ss:$8 sps:$4 sm:$0xff]  }
 0x50f   : > { %7477 = vmatprep.subr.bf16.mxu0 %v21161_v63  ;;  %8133 = vmatprep.subr.bf16.mxu1 %v21164_v0  ;;  %v21254_v63 = vld [vmem:[#allocation10 + $0x70] ss:$8 sps:$4 sm:$0xff]   ;;  %v21259_v0 = vld [vmem:[#allocation10 + $0x84] ss:$8 sps:$4 sm:$0xff]  }
 0x512   : > { %7478 = vmatpush1.bf16.msra.mxu0 %v21159_v1  ;;  %8134 = vmatpush1.bf16.msra.mxu1 %v21162_v2  ;;  %v21257_v1 = vld [vmem:[#allocation10 + $0x80] ss:$8 sps:$4 sm:$0xff]   ;;  %v21262_v2 = vld [vmem:[#allocation10 + $0x94] ss:$8 sps:$4 sm:$0xff]  }
 0x513   : > { %7479 = vmatprep.subr.bf16.mxu0 %v21167_v3  ;;  %8135 = vmatprep.subr.bf16.mxu1 %v21170_v4  ;;  %v21260_v3 = vld [vmem:[#allocation10 + $0x90] ss:$8 sps:$4 sm:$0xff]   ;;  %v21265_v4 = vld [vmem:[#allocation10 + $0xa4] ss:$8 sps:$4 sm:$0xff]  }
 0x516   : > { %7480 = vmatpush1.bf16.msra.mxu0 %v21165_v5  ;;  %8136 = vmatpush1.bf16.msra.mxu1 %v21168_v6  ;;  %v21263_v5 = vld [vmem:[#allocation10 + $0xa0] ss:$8 sps:$4 sm:$0xff]   ;;  %v21268_v6 = vld [vmem:[#allocation10 + $0xb4] ss:$8 sps:$4 sm:$0xff]  }
 0x517   : > { %7481 = vmatprep.subr.bf16.mxu0 %v21173_v7  ;;  %8137 = vmatprep.subr.bf16.mxu1 %v21176_v8  ;;  %v21266_v7 = vld [vmem:[#allocation10 + $0xb0] ss:$8 sps:$4 sm:$0xff]   ;;  %v21271_v8 = vld [vmem:[#allocation10 + $0xc4] ss:$8 sps:$4 sm:$0xff]  }
 0x51a   : > { %7482 = vmatpush1.bf16.msra.mxu0 %v21171_v9  ;;  %8138 = vmatpush1.bf16.msra.mxu1 %v21174_v10  ;;  %v21269_v9 = vld [vmem:[#allocation10 + $0xc0] ss:$8 sps:$4 sm:$0xff]   ;;  %v21274_v10 = vld [vmem:[#allocation10 + $0xd4] ss:$8 sps:$4 sm:$0xff]  }
 0x51b   : > { %7483 = vmatprep.subr.bf16.mxu0 %v21179_v12  ;;  %8139 = vmatprep.subr.bf16.mxu1 %v21182_v13  ;;  %v21272_v12 = vld [vmem:[#allocation10 + $0xd0] ss:$8 sps:$4 sm:$0xff]   ;;  %v21277_v13 = vld [vmem:[#allocation10 + $0xe4] ss:$8 sps:$4 sm:$0xff]  }
 0x51e   : > { %7484 = vmatpush1.bf16.msra.mxu0 %v21177_v15  ;;  %8140 = vmatpush1.bf16.msra.mxu1 %v21180_v16  ;;  %v21275_v15 = vld [vmem:[#allocation10 + $0xe0] ss:$8 sps:$4 sm:$0xff]   ;;  %v21280_v16 = vld [vmem:[#allocation10 + $0xf4] ss:$8 sps:$4 sm:$0xff]  }
 0x51f   : > { %7485 = vmatprep.subr.bf16.mxu0 %v21185_v18  ;;  %8141 = vmatprep.subr.bf16.mxu1 %v21188_v20  ;;  %v21278_v18 = vld [vmem:[#allocation10 + $0xf0] ss:$8 sps:$4 sm:$0xff]   ;;  %v21283_v20 = vld [vmem:[#allocation10 + $0x104] ss:$8 sps:$4 sm:$0xff]  }
 0x522   : > { %7486 = vmatpush1.bf16.msra.mxu0 %v21183_v11  ;;  %8142 = vmatpush1.bf16.msra.mxu1 %v21186_v21  ;;  %v21329_v11 = vld [vmem:[#allocation13] ss:$16 sps:$4 sm:$0xff]   ;;  %v21331_v21 = vld [vmem:[#allocation13 + $0x4] ss:$16 sps:$4 sm:$0xff]  }
 0x523   : > { %7487 = vmatprep.subr.bf16.mxu0 %v21191_v14  ;;  %8143 = vmatprep.subr.bf16.mxu1 %v21194_v23  ;;  %v21334_v14 = vld [vmem:[#allocation13 + $0x24] ss:$16 sps:$4 sm:$0xff]   ;;  %v21332_v23 = vld [vmem:[#allocation13 + $0x20] ss:$16 sps:$4 sm:$0xff]  }
 0x526   : > { %7488 = vmatpush1.bf16.msra.mxu0 %v21189_v24  ;;  %8144 = vmatpush1.bf16.msra.mxu1 %v21192_v17  ;;  %v1602_v24 = vlaneseq }
 0x527   : > { %7489 = vmatprep.subr.bf16.mxu0 %v21197_v26  ;;  %8145 = vmatprep.subr.bf16.mxu1 %v21200_v27  ;;  %v22466_v27 = vld [vmem:[#allocation8] sm:$0xf] }
 0x528   : > { %v22461_v17 = vshrl.u32 %v1602_v24, 7  ;;  %v21340_v24 = vld [vmem:[#allocation13 + $0x64] ss:$16 sps:$4 sm:$0xff]  }
 0x52a   : > { %7490 = vmatpush1.bf16.msra.mxu0 %v21195_v19  ;;  %8146 = vmatpush1.bf16.msra.mxu1 %v21198_v29  ;;  %v22464_v26 = vsub.s32 0, %v22461_v17  ;;  %v22469_v19 = vsub.s32 1, %v22461_v17  ;;  %v22472_v29 = vsub.s32 3, %v22461_v17 }
 0x52b   : > { %7491 = vmatprep.subr.bf16.mxu0 %v21203_v30  ;;  %8147 = vmatprep.subr.bf16.mxu1 %v21206_v22 }
 0x52c   : > { %v1605_v30 = vrot.slane %v22466_v27, %v22464_v26  ;;  %v1609_v22 = vrot.slane %v22466_v27, %v22469_v19 }
 0x52e   : > { %7492 = vmatpush1.bf16.msra.mxu0 %v21201_v32  ;;  %8148 = vmatpush1.bf16.msra.mxu1 %v21204_v33  ;;  %v1617_v32 = vrot.slane %v22466_v27, %v22472_v29 }
 0x52f   : > { %7493 = vmatprep.subr.bf16.mxu0 %v21209_v34  ;;  %8149 = vmatprep.subr.bf16.mxu1 %v21212_v35 }
 0x532   : > { %7494 = vmatpush1.bf16.msra.mxu0 %v21207_v36  ;;  %8150 = vmatpush1.bf16.msra.mxu1 %v21210_v37 }
 0x533   : > { %7495 = vmatprep.subr.bf16.mxu0 %v21215_v38  ;;  %8151 = vmatprep.subr.bf16.mxu1 %v21218_v39 }
 0x536   : > { %7496 = vmatpush1.bf16.msra.mxu0 %v21213_v40  ;;  %8152 = vmatpush1.bf16.msra.mxu1 %v21216_v41 }
 0x537   : > { %7497 = vmatprep.subr.bf16.mxu0 %v21221_v42  ;;  %8153 = vmatprep.subr.bf16.mxu1 %v21224_v43 }
 0x53a   : > { %7498 = vmatpush1.bf16.msra.mxu0 %v21219_v44  ;;  %8154 = vmatpush1.bf16.msra.mxu1 %v21222_v45 }
 0x53b   : > { %7499 = vmatprep.subr.bf16.mxu0 %v21227_v46  ;;  %8155 = vmatprep.subr.bf16.mxu1 %v21230_v47 }
 0x53e   : > { %7500 = vmatpush1.bf16.msra.mxu0 %v21225_v48  ;;  %8156 = vmatpush1.bf16.msra.mxu1 %v21228_v49  ;;  %v21281_v48 = vld [vmem:[#allocation10 + $0x100] ss:$8 sps:$4 sm:$0xff]  }
 0x53f   : > { %8570 = vmatprep.subr.bf16.mxu0 %v21235_v50  ;;  %8873 = vmatprep.subr.bf16.mxu1 %v21331_v21  ;;  %v21286_v50 = vld [vmem:[#allocation10 + $0x114] ss:$8 sps:$4 sm:$0xff]  }
 0x541   : > { %7502 = vmatmul.mubr.bf16.vlgmr.msra.gmra.mrb[0].mxu0 %v17107_v51  ;;  %8158 = vmatmul.mubr.bf16.vlgmr.msra.gmra.mrb[0].mxu1 %v17107_v51 }
 0x542   : > { %8571 = vmatpush1.bf16.msra.mxu0 %v21233_v52  ;;  %8874 = vmatpush1.bf16.msra.mxu1 %v21329_v11  ;;  %v21284_v52 = vld [vmem:[#allocation10 + $0x110] ss:$8 sps:$4 sm:$0xff]  }
 0x543   : > { %8572 = vmatprep.subr.bf16.mxu0 %v21238_v25  ;;  %8875 = vmatprep.subr.bf16.mxu1 %v21334_v14  ;;  %v21289_v25 = vld [vmem:[#allocation10 + $0x124] ss:$8 sps:$4 sm:$0xff]  }
 0x544   : > { %v21337_v14 = vld [vmem:[#allocation13 + $0x44] ss:$16 sps:$4 sm:$0xff]  }
 0x546   : > { %8573 = vmatpush1.bf16.msra.mxu0 %v21236_v53  ;;  %8876 = vmatpush1.bf16.msra.mxu1 %v21332_v23  ;;  %v21287_v53 = vld [vmem:[#allocation10 + $0x120] ss:$8 sps:$4 sm:$0xff]  }
 0x547   : > { %8574 = vmatprep.subr.bf16.mxu0 %v21241_v54  ;;  %v21292_v54 = vld [vmem:[#allocation10 + $0x134] ss:$8 sps:$4 sm:$0xff]   ;;  %8877 = vmatprep.subr.bf16.mxu1 %v21337_v14 }
 0x548   : > { %v21335_v23 = vld [vmem:[#allocation13 + $0x40] ss:$16 sps:$4 sm:$0xff]  }
 0x549   : > { %v9332_v14 = vld [vmem:[#allocation16 + $0xb88] sm:$0xff] }
 0x54a   : > { %8575 = vmatpush1.bf16.msra.mxu0 %v21239_v55  ;;  %v21290_v55 = vld [vmem:[#allocation10 + $0x130] ss:$8 sps:$4 sm:$0xff]   ;;  %8878 = vmatpush1.bf16.msra.mxu1 %v21335_v23 }
 0x54b   : > { %8576 = vmatprep.subr.bf16.mxu0 %v21244_v28  ;;  %v21295_v28 = vld [vmem:[#allocation10 + $0x144] ss:$8 sps:$4 sm:$0xff]   ;;  %8879 = vmatprep.subr.bf16.mxu1 %v21340_v24 }
 0x54e   : > { %8577 = vmatpush1.bf16.msra.mxu0 %v21242_v56  ;;  %v21293_v56 = vld [vmem:[#allocation10 + $0x140] ss:$8 sps:$4 sm:$0xff]  }
 0x54f   : > { %8578 = vmatprep.subr.bf16.mxu0 %v21247_v57  ;;  %v21298_v57 = vld [vmem:[#allocation10 + $0x154] ss:$8 sps:$4 sm:$0xff]  }
 0x552   : > { %8579 = vmatpush1.bf16.msra.mxu0 %v21245_v31  ;;  %v21296_v31 = vld [vmem:[#allocation10 + $0x150] ss:$8 sps:$4 sm:$0xff]  }
 0x553   : > { %8580 = vmatprep.subr.bf16.mxu0 %v21250_v58  ;;  %v21301_v58 = vld [vmem:[#allocation10 + $0x164] ss:$8 sps:$4 sm:$0xff]  }
 0x556   : > { %8581 = vmatpush1.bf16.msra.mxu0 %v21248_v59  ;;  %v21299_v59 = vld [vmem:[#allocation10 + $0x160] ss:$8 sps:$4 sm:$0xff]  }
 0x557   : > { %8582 = vmatprep.subr.bf16.mxu0 %v21253_v60  ;;  %v21304_v60 = vld [vmem:[#allocation10 + $0x174] ss:$8 sps:$4 sm:$0xff]  }
 0x55a   : > { %8583 = vmatpush1.bf16.msra.mxu0 %v21251_v61  ;;  %v21302_v61 = vld [vmem:[#allocation10 + $0x170] ss:$8 sps:$4 sm:$0xff]  }
 0x55b   : > { %8584 = vmatprep.subr.bf16.mxu0 %v21256_v62  ;;  %v21307_v62 = vld [vmem:[#allocation10 + $0x184] ss:$8 sps:$4 sm:$0xff]  }
 0x55e   : > { %8585 = vmatpush1.bf16.msra.mxu0 %v21254_v63  ;;  %v21305_v63 = vld [vmem:[#allocation10 + $0x180] ss:$8 sps:$4 sm:$0xff]  }
 0x55f   : > { %8586 = vmatprep.subr.bf16.mxu0 %v21259_v0  ;;  %v21310_v0 = vld [vmem:[#allocation10 + $0x194] ss:$8 sps:$4 sm:$0xff]  }
 0x562   : > { %8587 = vmatpush1.bf16.msra.mxu0 %v21257_v1  ;;  %v21308_v1 = vld [vmem:[#allocation10 + $0x190] ss:$8 sps:$4 sm:$0xff]  }
 0x563   : > { %8588 = vmatprep.subr.bf16.mxu0 %v21262_v2  ;;  %v21313_v2 = vld [vmem:[#allocation10 + $0x1a4] ss:$8 sps:$4 sm:$0xff]  }
 0x566   : > { %8589 = vmatpush1.bf16.msra.mxu0 %v21260_v3  ;;  %v21311_v3 = vld [vmem:[#allocation10 + $0x1a0] ss:$8 sps:$4 sm:$0xff]  }
 0x567   : > { %8590 = vmatprep.subr.bf16.mxu0 %v21265_v4  ;;  %v21316_v4 = vld [vmem:[#allocation10 + $0x1b4] ss:$8 sps:$4 sm:$0xff]  }
 0x56a   : > { %8591 = vmatpush1.bf16.msra.mxu0 %v21263_v5  ;;  %v21314_v5 = vld [vmem:[#allocation10 + $0x1b0] ss:$8 sps:$4 sm:$0xff]  }
 0x56b   : > { %8592 = vmatprep.subr.bf16.mxu0 %v21268_v6  ;;  %v21319_v6 = vld [vmem:[#allocation10 + $0x1c4] ss:$8 sps:$4 sm:$0xff]  }
 0x56e   : > { %8593 = vmatpush1.bf16.msra.mxu0 %v21266_v7  ;;  %v21317_v7 = vld [vmem:[#allocation10 + $0x1c0] ss:$8 sps:$4 sm:$0xff]  }
 0x56f   : > { %8594 = vmatprep.subr.bf16.mxu0 %v21271_v8  ;;  %v22483_v8 = vsub.s32 2, %v22461_v17 }
 0x572   : > { %8595 = vmatpush1.bf16.msra.mxu0 %v21269_v9  ;;  %v21322_v9 = vld [vmem:[#allocation10 + $0x1d4] ss:$8 sps:$4 sm:$0xff]  }
 0x573   : > { %8596 = vmatprep.subr.bf16.mxu0 %v21274_v10  ;;  %v21320_v10 = vld [vmem:[#allocation10 + $0x1d0] ss:$8 sps:$4 sm:$0xff]  }
 0x576   : > { %8597 = vmatpush1.bf16.msra.mxu0 %v21272_v12  ;;  %v1613_v12 = vrot.slane %v22466_v27, %v22483_v8  ;;  %v21338_v27 = vld [vmem:[#allocation13 + $0x60] ss:$16 sps:$4 sm:$0xff]  }
 0x577   : > { %8598 = vmatprep.subr.bf16.mxu0 %v21277_v13  ;;  %v21325_v13 = vld [vmem:[#allocation10 + $0x1e4] ss:$8 sps:$4 sm:$0xff]   ;;  %8880 = vmatpush1.bf16.msra.mxu1 %v21338_v27 }
 0x578   : > { %v9348_v27 = vld [vmem:[#allocation16 + $0xc08] sm:$0xff] }
 0x57a   : > { %8599 = vmatpush1.bf16.msra.mxu0 %v21275_v15  ;;  %v21323_v15 = vld [vmem:[#allocation10 + $0x1e0] ss:$8 sps:$4 sm:$0xff]  }
 0x57b   : > { %8600 = vmatprep.subr.bf16.mxu0 %v21280_v16 }
 0x57e   : > { %8601 = vmatpush1.bf16.msra.mxu0 %v21278_v18  ;;  %v21328_v18 = vld [vmem:[#allocation10 + $0x1f4] ss:$8 sps:$4 sm:$0xff]  }
 0x57f   : > { %8611 = vmatprep.subr.bf16.mxu0 %v21283_v20  ;;  %v21326_v20 = vld [vmem:[#allocation10 + $0x1f0] ss:$8 sps:$4 sm:$0xff]  }
 0x614   : > { %v7503_v33 = vpop.f32.mrb[0].mxu0  ;;  %v22480_v34 = vpop.f32.mrb[0].mxu1 }
 0x615   : > { %v19296_v35 = vadd.f32 %v7503_v33, %v1605_v30  ;;  %v7505_v36 = vpop.f32.mrb[1].mxu0  ;;  %v8161_v37 = vpop.f32.mrb[1].mxu1  ;;  %v19298_v16 = vadd.f32 %v22480_v34, %v1613_v12  ;;  %v21343_v30 = vld [vmem:[#allocation13 + $0x84] ss:$16 sps:$4 sm:$0xff]   ;;  %v21344_v33 = vld [vmem:[#allocation13 + $0xa0] ss:$16 sps:$4 sm:$0xff]  }
 0x616   : > { %v19297_v38 = vadd.f32 %v7505_v36, %v1609_v22  ;;  %v19299_v39 = vadd.f32 %v8161_v37, %v1617_v32  ;;  %v7507_v40 = vpop.f32.mrb[2].mxu0  ;;  %v8163_v41 = vpop.f32.mrb[2].mxu1  ;;  %v21341_v22 = vld [vmem:[#allocation13 + $0x80] ss:$16 sps:$4 sm:$0xff]   ;;  %8881 = vmatprep.subr.bf16.mxu1 %v21343_v30  ;;  %v21346_v32 = vld [vmem:[#allocation13 + $0xa4] ss:$16 sps:$4 sm:$0xff]  }
 0x617   : > { %v8166_v42 = vmax.f32 %v19296_v35, 0.0  ;;  %v7508_v43 = vpop.f32.mrb[3].mxu0  ;;  %v8164_v44 = vpop.f32.mrb[3].mxu1  ;;  %v8168_v11 = vmax.f32 %v19298_v16, 0.0  ;;  %8882 = vmatpush1.bf16.msra.mxu1 %v21341_v22  ;;  %v21349_v34 = vld [vmem:[#allocation13 + $0xc4] ss:$16 sps:$4 sm:$0xff]  }
 0x618   : > { %v8167_v45 = vmax.f32 %v19297_v38, 0.0  ;;  %v8169_v46 = vmax.f32 %v19299_v39, 0.0  ;;  %8883 = vmatprep.subr.bf16.mxu1 %v21346_v32  ;;  %v21930_v35 = vmov 0   ;;  %v21347_v36 = vld [vmem:[#allocation13 + $0xc0] ss:$16 sps:$4 sm:$0xff]  }
 0x619   : > { %v8170_v49 = vpack.c.bf16 %v8166_v42, %v8166_v42  ;;  %v8172_v21 = vpack.c.bf16 %v8168_v11, %v8168_v11  ;;  %8905 = vmatprep.mubr.bf16.mxu1 %v21930_v35  ;;  %v21352_v37 = vld [vmem:[#allocation13 + $0xe4] ss:$16 sps:$4 sm:$0xff]   ;;  %v21350_v38 = vld [vmem:[#allocation13 + $0xe0] ss:$16 sps:$4 sm:$0xff]   ;;  %v21355_v39 = vld [vmem:[#allocation13 + $0xc] ss:$16 sps:$4 sm:$0xff]  }
 0x61a   : > { %v8171_v47 = vpack.c.bf16 %v8167_v45, %v8167_v45  ;;  %v8173_v51 = vpack.c.bf16 %v8169_v46, %v8169_v46  ;;  %v8964_v40 = vld [vmem:[#allocation16 + $0x8] sm:$0xff] }
 0x61b   : > { %8884 = vmatpush1.bf16.msra.mxu1 %v21344_v33  ;;  %v8980_v41 = vld [vmem:[#allocation16 + $0x88] sm:$0xff] }
 0x61c   : > { %8602 = vmatprep.mubr.bf16.mxu0 %v8171_v47  ;;  %8885 = vmatprep.subr.bf16.mxu1 %v21349_v34  ;;  %v18231_v42 = vcombine.low %v8964_v40, %v8980_v41  ;;  %v18232_v43 = vcombine.high %v8964_v40, %v8980_v41  ;;  %v8996_v44 = vld [vmem:[#allocation16 + $0x108] sm:$0xff] }
 0x61d   : > { %8603 = vmatmul.mubr.bf16.vlgmr.msra.gmra.mrb[4].mxu0 %v8170_v49  ;;  %v9012_v45 = vld [vmem:[#allocation16 + $0x188] sm:$0xff] }
 0x61e   : > { %8612 = vmatpush1.bf16.msra.mxu0 %v21281_v48  ;;  %8643 = vmatprep.mubr.bf16.mxu0 %v8173_v51  ;;  %v18264_v46 = vcombine.high %v8996_v44, %v9012_v45  ;;  %v18263_v47 = vcombine.low %v8996_v44, %v9012_v45  ;;  %v9028_v48 = vld [vmem:[#allocation16 + $0x208] sm:$0xff] }
 0x61f   : > { %8613 = vmatprep.subr.bf16.mxu0 %v21286_v50  ;;  %8886 = vmatpush1.bf16.msra.mxu1 %v21347_v36  ;;  %v9044_v49 = vld [vmem:[#allocation16 + $0x288] sm:$0xff] }
 0x620   : > { %8887 = vmatprep.subr.bf16.mxu1 %v21352_v37  ;;  %v18296_v50 = vcombine.high %v9028_v48, %v9044_v49  ;;  %v18295_v51 = vcombine.low %v9028_v48, %v9044_v49  ;;  %v9268_v12 = vld [vmem:[#allocation16 + $0x988] sm:$0xff] }
 0x621   : > { %v9284_v16 = vld [vmem:[#allocation16 + $0xa08] sm:$0xff] }
 0x622   : > { %8614 = vmatpush1.bf16.msra.mxu0 %v21284_v52  ;;  %v9060_v52 = vld [vmem:[#allocation16 + $0x308] sm:$0xff] }
 0x623   : > { %8615 = vmatprep.subr.bf16.mxu0 %v21289_v25  ;;  %8888 = vmatpush1.bf16.msra.mxu1 %v21350_v38  ;;  %v9076_v25 = vld [vmem:[#allocation16 + $0x388] sm:$0xff]  ;;  %v8238_v38 = vld [vmem:[#allocation11] sm:$0x3] }
 0x624   : > { %8914 = vmatprep.subr.bf16.mxu1 %v21355_v39  ;;  %v9364_v30 = vld [vmem:[#allocation16 + $0xc88] sm:$0xff]  ;;  %v8243_v39 = vrot.slane %v8238_v38, %v22464_v26  ;;  %v8247_v40 = vrot.slane %v8238_v38, %v22469_v19  ;;  %v9203_v38 = vld [vmem:[#allocation16 + $0x780] sm:$0xff] }
 0x625   : > { %v18616_v22 = vcombine.high %v9348_v27, %v9364_v30  ;;  %v18615_v32 = vcombine.low %v9348_v27, %v9364_v30  ;;  %v9380_v33 = vld [vmem:[#allocation16 + $0xd08] sm:$0xff]  ;;  %v9139_v27 = vld [vmem:[#allocation16 + $0x580] sm:$0xff] }
 0x626   : > { %8616 = vmatpush1.bf16.msra.mxu0 %v21287_v53  ;;  %v18328_v53 = vcombine.high %v9060_v52, %v9076_v25  ;;  %v9396_v34 = vld [vmem:[#allocation16 + $0xd88] sm:$0xff] }
 0x627   : > { %8617 = vmatprep.subr.bf16.mxu0 %v21292_v54  ;;  %v18327_v54 = vcombine.low %v9060_v52, %v9076_v25  ;;  %v18648_v36 = vcombine.high %v9380_v33, %v9396_v34  ;;  %v18647_v37 = vcombine.low %v9380_v33, %v9396_v34  ;;  %v8652_v49 = vld [vmem:[%s22329_s10] sm:$0xff]  ;;  %s21797_s10 = scalar_lea.vmem %s21796_s26, 512 }
 0x628   : > { %v21353_v25 = vld [vmem:[#allocation13 + $0x8] ss:$16 sps:$4 sm:$0xff]   ;;  %p21799_p8 = scmp.lt.s32.totalorder %s21797_s10, %s21791_s0 }
 0x629   : > { %v9171_v33 = vld [vmem:[#allocation16 + $0x680] sm:$0xff] }
 0x62a   : > { %8618 = vmatpush1.bf16.msra.mxu0 %v21290_v55  ;;  %v9092_v55 = vld [vmem:[#allocation16 + $0x408] sm:$0xff]  ;;  %p21800_p4 = por %p21799_p8, %p21798_p11 }
 0x62b   : > { %8619 = vmatprep.subr.bf16.mxu0 %v21295_v28  ;;  %v9108_v28 = vld [vmem:[#allocation16 + $0x488] sm:$0xff] }
 0x62c   : > { %p21801_p12 = pnand %p21800_p4, %p21794_p7 }
 0x62e   : > { %8620 = vmatpush1.bf16.msra.mxu0 %v21293_v56  ;;  %v18360_v56 = vcombine.high %v9092_v55, %v9108_v28 }
 0x62f   : > { %8621 = vmatprep.subr.bf16.mxu0 %v21298_v57  ;;  %v18359_v57 = vcombine.low %v9092_v55, %v9108_v28  ;;  %v21356_v55 = vld [vmem:[#allocation13 + $0x28] ss:$16 sps:$4 sm:$0xff]   ;;  %v21361_v28 = vld [vmem:[#allocation13 + $0x4c] ss:$16 sps:$4 sm:$0xff]  }
 0x632   : > { %8622 = vmatpush1.bf16.msra.mxu0 %v21296_v31  ;;  %v9124_v31 = vld [vmem:[#allocation16 + $0x508] sm:$0xff] }
 0x633   : > { %8623 = vmatprep.subr.bf16.mxu0 %v21301_v58  ;;  %v9140_v58 = vld [vmem:[#allocation16 + $0x588] sm:$0xff] }
 0x636   : > { %8624 = vmatpush1.bf16.msra.mxu0 %v21299_v59  ;;  %v18392_v59 = vcombine.high %v9124_v31, %v9140_v58 }
 0x637   : > { %8625 = vmatprep.subr.bf16.mxu0 %v21304_v60  ;;  %v18391_v60 = vcombine.low %v9124_v31, %v9140_v58  ;;  %v21362_v31 = vld [vmem:[#allocation13 + $0x68] ss:$16 sps:$4 sm:$0xff]   ;;  %v21367_v58 = vld [vmem:[#allocation13 + $0x8c] ss:$16 sps:$4 sm:$0xff]  }
 0x63a   : > { %8626 = vmatpush1.bf16.msra.mxu0 %v21302_v61  ;;  %v9156_v61 = vld [vmem:[#allocation16 + $0x608] sm:$0xff] }
 0x63b   : > { %8627 = vmatprep.subr.bf16.mxu0 %v21307_v62  ;;  %v9172_v62 = vld [vmem:[#allocation16 + $0x688] sm:$0xff] }
 0x63e   : > { %8628 = vmatpush1.bf16.msra.mxu0 %v21305_v63  ;;  %v18424_v63 = vcombine.high %v9156_v61, %v9172_v62 }
 0x63f   : > { %8629 = vmatprep.subr.bf16.mxu0 %v21310_v0  ;;  %v18423_v0 = vcombine.low %v9156_v61, %v9172_v62  ;;  %v21368_v61 = vld [vmem:[#allocation13 + $0xa8] ss:$16 sps:$4 sm:$0xff]   ;;  %v21373_v62 = vld [vmem:[#allocation13 + $0xcc] ss:$16 sps:$4 sm:$0xff]  }
 0x642   : > { %8630 = vmatpush1.bf16.msra.mxu0 %v21308_v1  ;;  %v9188_v1 = vld [vmem:[#allocation16 + $0x708] sm:$0xff] }
 0x643   : > { %8631 = vmatprep.subr.bf16.mxu0 %v21313_v2  ;;  %v9204_v2 = vld [vmem:[#allocation16 + $0x788] sm:$0xff] }
 0x646   : > { %8632 = vmatpush1.bf16.msra.mxu0 %v21311_v3  ;;  %v18456_v3 = vcombine.high %v9188_v1, %v9204_v2 }
 0x647   : > { %8633 = vmatprep.subr.bf16.mxu0 %v21316_v4  ;;  %v18455_v4 = vcombine.low %v9188_v1, %v9204_v2  ;;  %v8979_v1 = vld [vmem:[#allocation16 + $0x80] sm:$0xff] }
 0x648   : > { %v21374_v2 = vld [vmem:[#allocation13 + $0xe8] ss:$16 sps:$4 sm:$0xff]  }
 0x64a   : > { %8634 = vmatpush1.bf16.msra.mxu0 %v21314_v5  ;;  %v9220_v5 = vld [vmem:[#allocation16 + $0x808] sm:$0xff] }
 0x64b   : > { %8635 = vmatprep.subr.bf16.mxu0 %v21319_v6  ;;  %v9236_v6 = vld [vmem:[#allocation16 + $0x888] sm:$0xff] }
 0x64e   : > { %8636 = vmatpush1.bf16.msra.mxu0 %v21317_v7  ;;  %v18488_v7 = vcombine.high %v9220_v5, %v9236_v6 }
 0x64f   : > { %8637 = vmatprep.subr.bf16.mxu0 %v21322_v9  ;;  %v18487_v9 = vcombine.low %v9220_v5, %v9236_v6  ;;  %v9011_v5 = vld [vmem:[#allocation16 + $0x180] sm:$0xff] }
 0x652   : > { %8638 = vmatpush1.bf16.msra.mxu0 %v21320_v10  ;;  %v9252_v10 = vld [vmem:[#allocation16 + $0x908] sm:$0xff] }
 0x653   : > { %8639 = vmatprep.subr.bf16.mxu0 %v21325_v13  ;;  %v18520_v13 = vcombine.high %v9252_v10, %v9268_v12 }
 0x656   : > { %8640 = vmatpush1.bf16.msra.mxu0 %v21323_v15  ;;  %v18519_v15 = vcombine.low %v9252_v10, %v9268_v12  ;;  %v9043_v10 = vld [vmem:[#allocation16 + $0x280] sm:$0xff] }
 0x657   : > { %8641 = vmatprep.subr.bf16.mxu0 %v21328_v18  ;;  %v9300_v18 = vld [vmem:[#allocation16 + $0xa88] sm:$0xff] }
 0x658   : > { %v18551_v11 = vcombine.low %v9284_v16, %v9300_v18 }
 0x65a   : > { %8642 = vmatpush1.bf16.msra.mxu0 %v21326_v20  ;;  %v18552_v20 = vcombine.high %v9284_v16, %v9300_v18  ;;  %v9075_v16 = vld [vmem:[#allocation16 + $0x380] sm:$0xff] }
 0x65b   : > { %15357 = vmatprep.subr.bf16.mxu0 %v18232_v43 }
 0x65d   : > { %8644 = vmatmul.mubr.bf16.vlgmr.msra.gmra.mrb[4].mxu0 %v8172_v21  ;;  %v9316_v21 = vld [vmem:[#allocation16 + $0xb08] sm:$0xff] }
 0x65e   : > { %15358 = vmatpush1.bf16.msra.mxu0 %v18231_v42  ;;  %v18584_v23 = vcombine.high %v9316_v21, %v9332_v14  ;;  %v18583_v24 = vcombine.low %v9316_v21, %v9332_v14  ;;  %v9107_v21 = vld [vmem:[#allocation16 + $0x480] sm:$0xff] }
 0x65f   : > { %15359 = vmatprep.subr.bf16.mxu0 %v18264_v46 }
 0x662   : > { %15360 = vmatpush1.bf16.msra.mxu0 %v18263_v47 }
 0x663   : > { %15361 = vmatprep.subr.bf16.mxu0 %v18296_v50 }
 0x666   : > { %15362 = vmatpush1.bf16.msra.mxu0 %v18295_v51 }
 0x667   : > { %15363 = vmatprep.subr.bf16.mxu0 %v18328_v53 }
 0x66a   : > { %15364 = vmatpush1.bf16.msra.mxu0 %v18327_v54  ;;  %v21358_v54 = vld [vmem:[#allocation13 + $0x2c] ss:$16 sps:$4 sm:$0xff]  }
 0x66b   : > { %15365 = vmatprep.subr.bf16.mxu0 %v18360_v56  ;;  %v21359_v56 = vld [vmem:[#allocation13 + $0x48] ss:$16 sps:$4 sm:$0xff]  }
 0x66e   : > { %15366 = vmatpush1.bf16.msra.mxu0 %v18359_v57  ;;  %v21364_v57 = vld [vmem:[#allocation13 + $0x6c] ss:$16 sps:$4 sm:$0xff]  }
 0x66f   : > { %15367 = vmatprep.subr.bf16.mxu0 %v18392_v59  ;;  %v21365_v59 = vld [vmem:[#allocation13 + $0x88] ss:$16 sps:$4 sm:$0xff]  }
 0x672   : > { %15368 = vmatpush1.bf16.msra.mxu0 %v18391_v60  ;;  %v21370_v60 = vld [vmem:[#allocation13 + $0xac] ss:$16 sps:$4 sm:$0xff]  }
 0x673   : > { %15369 = vmatprep.subr.bf16.mxu0 %v18424_v63  ;;  %v21376_v63 = vld [vmem:[#allocation13 + $0xec] ss:$16 sps:$4 sm:$0xff]  }
 0x676   : > { %15370 = vmatpush1.bf16.msra.mxu0 %v18423_v0  ;;  %v8963_v0 = vld [vmem:[#allocation16] sm:$0xff] }
 0x677   : > { %15371 = vmatprep.subr.bf16.mxu0 %v18456_v3  ;;  %v18230_v3 = vcombine.high %v8963_v0, %v8979_v1  ;;  %v18229_v6 = vcombine.low %v8963_v0, %v8979_v1  ;;  %v9412_v0 = vld [vmem:[#allocation16 + $0xe08] sm:$0xff] }
 0x67a   : > { %15372 = vmatpush1.bf16.msra.mxu0 %v18455_v4  ;;  %v8995_v4 = vld [vmem:[#allocation16 + $0x100] sm:$0xff] }
 0x67b   : > { %15373 = vmatprep.subr.bf16.mxu0 %v18488_v7  ;;  %v18262_v7 = vcombine.high %v8995_v4, %v9011_v5  ;;  %v18261_v12 = vcombine.low %v8995_v4, %v9011_v5 }
 0x67e   : > { %15374 = vmatpush1.bf16.msra.mxu0 %v18487_v9  ;;  %v9027_v9 = vld [vmem:[#allocation16 + $0x200] sm:$0xff] }
 0x67f   : > { %15375 = vmatprep.subr.bf16.mxu0 %v18520_v13  ;;  %v18294_v13 = vcombine.high %v9027_v9, %v9043_v10  ;;  %v18293_v18 = vcombine.low %v9027_v9, %v9043_v10  ;;  %v9444_v9 = vld [vmem:[#allocation16 + $0xf08] sm:$0xff] }
 0x682   : > { %15376 = vmatpush1.bf16.msra.mxu0 %v18519_v15  ;;  %v9059_v15 = vld [vmem:[#allocation16 + $0x300] sm:$0xff] }
 0x683   : > { %15377 = vmatprep.subr.bf16.mxu0 %v18552_v20  ;;  %v18326_v20 = vcombine.high %v9059_v15, %v9075_v16  ;;  %v18325_v14 = vcombine.low %v9059_v15, %v9075_v16 }
 0x686   : > { %15378 = vmatpush1.bf16.msra.mxu0 %v18551_v11  ;;  %v9091_v11 = vld [vmem:[#allocation16 + $0x400] sm:$0xff] }
 0x687   : > { %15379 = vmatprep.subr.bf16.mxu0 %v18584_v23  ;;  %v18358_v23 = vcombine.high %v9091_v11, %v9107_v21  ;;  %v18357_v30 = vcombine.low %v9091_v11, %v9107_v21  ;;  %v9476_v11 = vld [vmem:[#allocation16 + $0x1008] sm:$0xff] }
 0x68a   : > { %15380 = vmatpush1.bf16.msra.mxu0 %v18583_v24  ;;  %v9123_v24 = vld [vmem:[#allocation16 + $0x500] sm:$0xff] }
 0x68b   : > { %15381 = vmatprep.subr.bf16.mxu0 %v18616_v22  ;;  %v18390_v22 = vcombine.high %v9123_v24, %v9139_v27  ;;  %v18389_v34 = vcombine.low %v9123_v24, %v9139_v27 }
 0x68e   : > { %15382 = vmatpush1.bf16.msra.mxu0 %v18615_v32  ;;  %v9155_v32 = vld [vmem:[#allocation16 + $0x600] sm:$0xff] }
 0x68f   : > { %15383 = vmatprep.subr.bf16.mxu0 %v18648_v36  ;;  %v18422_v36 = vcombine.high %v9155_v32, %v9171_v33 }
 0x692   : > { %15384 = vmatpush1.bf16.msra.mxu0 %v18647_v37  ;;  %v9187_v37 = vld [vmem:[#allocation16 + $0x700] sm:$0xff] }
 0x730   : > { %v8645_v41 = vpop.f32.mrb[4].mxu0 }
 0x731   : > { %v19300_v42 = vadd.f32 %v8645_v41, %v8243_v39  ;;  %v8647_v43 = vpop.f32.mrb[5].mxu0  ;;  %v18421_v39 = vcombine.low %v9155_v32, %v9171_v33  ;;  %v9219_v41 = vld [vmem:[#allocation16 + $0x800] sm:$0xff] }
 0x732   : > { %v19301_v44 = vadd.f32 %v8647_v43, %v8247_v40  ;;  %v8649_v45 = vpop.f32.mrb[6].mxu0  ;;  %v18454_v40 = vcombine.high %v9187_v37, %v9203_v38  ;;  %v18453_v43 = vcombine.low %v9187_v37, %v9203_v38 }
 0x733   : > { %16811 = vst [vmem:[%s22492_s16] sm:$0xff] %v19300_v42  ;;  %v8650_v46 = vpop.f32.mrb[7].mxu0  ;;  %v9251_v45 = vld [vmem:[#allocation16 + $0x900] sm:$0xff] }
 0x734   : > { %v8653_v47 = vmul.f32 0.5, %v19301_v44  ;;  %16812 = vst [vmem:[%s22492_s16 + $0x8] sm:$0xff] %v19301_v44  ;;  %v9267_v46 = vld [vmem:[#allocation16 + $0x980] sm:$0xff] }
 0x736   : > { %v8654_v48 = vmul.f32 1.442695, %v8653_v47 }
 0x738   : > { %21377 = vpow2.f32 %v8654_v48  ;;  %v18518_v48 = vcombine.high %v9251_v45, %v9267_v46 }
 0x742   : > { %v21378_v50 = vpop.eup %21377 }
 0x743   : > { %v8656_v51 = vmul.f32 %v21378_v50, %v8652_v49  ;;  %v9283_v49 = vld [vmem:[#allocation16 + $0xa00] sm:$0xff] }
 0x744   : > { %v9299_v50 = vld [vmem:[#allocation16 + $0xa80] sm:$0xff] }
 0x745   : > { %v8657_v52 = vadd.f32 %v19300_v42, %v8656_v51  ;;  %v9235_v42 = vld [vmem:[#allocation16 + $0x880] sm:$0xff]  ;;  %v18517_v51 = vcombine.low %v9251_v45, %v9267_v46  ;;  %v9524_v45 = vld [vmem:[#allocation16 + $0x1188] sm:$0xff] }
 0x746   : > { %v18486_v44 = vcombine.high %v9219_v41, %v9235_v42  ;;  %v18485_v47 = vcombine.low %v9219_v41, %v9235_v42  ;;  %v9507_v41 = vld [vmem:[#allocation16 + $0x1100] sm:$0xff] }
 0x747   : > { %v8658_v53 = vpack.c.bf16 %v8657_v52, %v8657_v52  ;;  %v18550_v52 = vcombine.high %v9283_v49, %v9299_v50 }
 0x749   : > { %8906 = vmatmul.mubr.bf16.vlgmr.msra.gmra.mrb[4].mxu1 %v8658_v53 }
 0x74a   : > { %8915 = vmatpush1.bf16.msra.mxu1 %v21353_v25  ;;  %8946 = vmatprep.mubr.bf16.mxu1 %v21930_v35  ;;  %v21371_v35 = vld [vmem:[#allocation13 + $0xc8] ss:$16 sps:$4 sm:$0xff]  }
 0x74b   : > { %8916 = vmatprep.subr.bf16.mxu1 %v21358_v54  ;;  %v9315_v25 = vld [vmem:[#allocation16 + $0xb00] sm:$0xff]  ;;  %v18549_v54 = vcombine.low %v9283_v49, %v9299_v50 }
 0x74c   : > { %v9539_v50 = vld [vmem:[#allocation16 + $0x1200] sm:$0xff] }
 0x74e   : > { %8917 = vmatpush1.bf16.msra.mxu1 %v21356_v55 }
 0x74f   : > { %8918 = vmatprep.subr.bf16.mxu1 %v21361_v28  ;;  %v9347_v28 = vld [vmem:[#allocation16 + $0xc00] sm:$0xff] }
 0x752   : > { %8919 = vmatpush1.bf16.msra.mxu1 %v21359_v56  ;;  %v9363_v56 = vld [vmem:[#allocation16 + $0xc80] sm:$0xff] }
 0x753   : > { %8920 = vmatprep.subr.bf16.mxu1 %v21364_v57 }
 0x756   : > { %8921 = vmatpush1.bf16.msra.mxu1 %v21362_v31  ;;  %v18614_v31 = vcombine.high %v9347_v28, %v9363_v56 }
 0x757   : > { %8922 = vmatprep.subr.bf16.mxu1 %v21367_v58  ;;  %v9379_v58 = vld [vmem:[#allocation16 + $0xd00] sm:$0xff] }
 0x75a   : > { %8923 = vmatpush1.bf16.msra.mxu1 %v21365_v59  ;;  %v9395_v59 = vld [vmem:[#allocation16 + $0xd80] sm:$0xff] }
 0x75b   : > { %8924 = vmatprep.subr.bf16.mxu1 %v21370_v60  ;;  %v18613_v60 = vcombine.low %v9347_v28, %v9363_v56  ;;  %v9571_v56 = vld [vmem:[#allocation16 + $0x1300] sm:$0xff] }
 0x75e   : > { %8925 = vmatpush1.bf16.msra.mxu1 %v21368_v61  ;;  %v18646_v61 = vcombine.high %v9379_v58, %v9395_v59 }
 0x75f   : > { %8926 = vmatprep.subr.bf16.mxu1 %v21373_v62  ;;  %v18645_v62 = vcombine.low %v9379_v58, %v9395_v59  ;;  %v9588_v58 = vld [vmem:[#allocation16 + $0x1388] sm:$0xff] }
 0x762   : > { %8927 = vmatpush1.bf16.msra.mxu1 %v21371_v35  ;;  %v9411_v35 = vld [vmem:[#allocation16 + $0xe00] sm:$0xff] }
 0x763   : > { %8928 = vmatprep.subr.bf16.mxu1 %v21376_v63  ;;  %v9427_v63 = vld [vmem:[#allocation16 + $0xe80] sm:$0xff] }
 0x764   : > { %v18678_v1 = vcombine.high %v9411_v35, %v9427_v63  ;;  %v18677_v5 = vcombine.low %v9411_v35, %v9427_v63  ;;  %v9603_v35 = vld [vmem:[#allocation16 + $0x1400] sm:$0xff] }
 0x765   : > { %v9619_v63 = vld [vmem:[#allocation16 + $0x1480] sm:$0xff] }
 0x766   : > { %8929 = vmatpush1.bf16.msra.mxu1 %v21374_v2  ;;  %v9428_v2 = vld [vmem:[#allocation16 + $0xe88] sm:$0xff] }
 0x767   : > { %15275 = vmatprep.subr.bf16.mxu1 %v18230_v3  ;;  %v18679_v3 = vcombine.low %v9412_v0, %v9428_v2  ;;  %v18680_v4 = vcombine.high %v9412_v0, %v9428_v2  ;;  %v9604_v0 = vld [vmem:[#allocation16 + $0x1408] sm:$0xff] }
 0x769   : > { %8947 = vmatmul.mubr.bf16.vlgmr.msra.gmra.mrb[8].mxu1 %v8658_v53  ;;  %v9331_v53 = vld [vmem:[#allocation16 + $0xb80] sm:$0xff]  ;;  %15385 = vmatprep.subr.bf16.mxu0 %v18680_v4  ;;  %v18870_v4 = vcombine.high %v9603_v35, %v9619_v63 }
 0x76a   : > { %15276 = vmatpush1.bf16.msra.mxu1 %v18229_v6  ;;  %v18582_v55 = vcombine.high %v9315_v25, %v9331_v53  ;;  %v18581_v57 = vcombine.low %v9315_v25, %v9331_v53  ;;  %v9443_v6 = vld [vmem:[#allocation16 + $0xf00] sm:$0xff]  ;;  %15386 = vmatpush1.bf16.msra.mxu0 %v18679_v3  ;;  %v9556_v25 = vld [vmem:[#allocation16 + $0x1288] sm:$0xff] }
 0x76b   : > { %15277 = vmatprep.subr.bf16.mxu1 %v18262_v7  ;;  %v9459_v7 = vld [vmem:[#allocation16 + $0xf80] sm:$0xff] }
 0x76c   : > { %v18710_v10 = vcombine.high %v9443_v6, %v9459_v7  ;;  %v18709_v16 = vcombine.low %v9443_v6, %v9459_v7  ;;  %v9635_v6 = vld [vmem:[#allocation16 + $0x1500] sm:$0xff] }
 0x76d   : > { %v9651_v7 = vld [vmem:[#allocation16 + $0x1580] sm:$0xff] }
 0x76e   : > { %15278 = vmatpush1.bf16.msra.mxu1 %v18261_v12  ;;  %v9460_v12 = vld [vmem:[#allocation16 + $0xf88] sm:$0xff] }
 0x76f   : > { %15279 = vmatprep.subr.bf16.mxu1 %v18294_v13  ;;  %v18711_v13 = vcombine.low %v9444_v9, %v9460_v12  ;;  %v18712_v15 = vcombine.high %v9444_v9, %v9460_v12  ;;  %v9636_v9 = vld [vmem:[#allocation16 + $0x1508] sm:$0xff]  ;;  %v18869_v12 = vcombine.low %v9603_v35, %v9619_v63  ;;  %v9795_v35 = vld [vmem:[#allocation16 + $0x1a00] sm:$0xff] }
 0x770   : > { %v9811_v63 = vld [vmem:[#allocation16 + $0x1a80] sm:$0xff] }
 0x771   : > { %15387 = vmatprep.subr.bf16.mxu0 %v18712_v15  ;;  %v18902_v15 = vcombine.high %v9635_v6, %v9651_v7 }
 0x772   : > { %15280 = vmatpush1.bf16.msra.mxu1 %v18293_v18  ;;  %v9475_v18 = vld [vmem:[#allocation16 + $0x1000] sm:$0xff]  ;;  %15388 = vmatpush1.bf16.msra.mxu0 %v18711_v13 }
 0x773   : > { %15281 = vmatprep.subr.bf16.mxu1 %v18326_v20  ;;  %v9491_v20 = vld [vmem:[#allocation16 + $0x1080] sm:$0xff] }
 0x774   : > { %v18742_v21 = vcombine.high %v9475_v18, %v9491_v20 }
 0x776   : > { %15282 = vmatpush1.bf16.msra.mxu1 %v18325_v14  ;;  %v9492_v14 = vld [vmem:[#allocation16 + $0x1088] sm:$0xff] }
 0x777   : > { %15283 = vmatprep.subr.bf16.mxu1 %v18358_v23  ;;  %v18741_v23 = vcombine.low %v9475_v18, %v9491_v20  ;;  %v18743_v24 = vcombine.low %v9476_v11, %v9492_v14  ;;  %v18744_v27 = vcombine.high %v9476_v11, %v9492_v14  ;;  %v9667_v18 = vld [vmem:[#allocation16 + $0x1600] sm:$0xff]  ;;  %v9668_v11 = vld [vmem:[#allocation16 + $0x1608] sm:$0xff]  ;;  %v18901_v14 = vcombine.low %v9635_v6, %v9651_v7 }
 0x778   : > { %v9683_v20 = vld [vmem:[#allocation16 + $0x1680] sm:$0xff] }
 0x779   : > { %15398 = vmatprep.subr.bf16.mxu0 %v18744_v27  ;;  %v9827_v6 = vld [vmem:[#allocation16 + $0x1b00] sm:$0xff] }
 0x77a   : > { %15284 = vmatpush1.bf16.msra.mxu1 %v18357_v30  ;;  %v22498_v30 = vld [vmem:[#allocation14] sm:$0xf]  ;;  %v9843_v7 = vld [vmem:[#allocation16 + $0x1b80] sm:$0xff] }
 0x77b   : > { %15285 = vmatprep.subr.bf16.mxu1 %v18390_v22  ;;  %v8696_v22 = vrot.slane %v22498_v30, %v22464_v26  ;;  %v8700_v32 = vrot.slane %v22498_v30, %v22469_v19 }
 0x77e   : > { %15286 = vmatpush1.bf16.msra.mxu1 %v18389_v34 }
 0x77f   : > { %15287 = vmatprep.subr.bf16.mxu1 %v18422_v36 }
 0x782   : > { %15288 = vmatpush1.bf16.msra.mxu1 %v18421_v39 }
 0x783   : > { %15289 = vmatprep.subr.bf16.mxu1 %v18454_v40 }
 0x786   : > { %15290 = vmatpush1.bf16.msra.mxu1 %v18453_v43  ;;  %v9523_v43 = vld [vmem:[#allocation16 + $0x1180] sm:$0xff] }
 0x787   : > { %15291 = vmatprep.subr.bf16.mxu1 %v18486_v44  ;;  %v9508_v44 = vld [vmem:[#allocation16 + $0x1108] sm:$0xff]  ;;  %v18773_v53 = vcombine.low %v9507_v41, %v9523_v43 }
 0x788   : > { %v18776_v49 = vcombine.high %v9508_v44, %v9524_v45 }
 0x78a   : > { %15292 = vmatpush1.bf16.msra.mxu1 %v18485_v47 }
 0x78b   : > { %15293 = vmatprep.subr.bf16.mxu1 %v18518_v48  ;;  %v18774_v48 = vcombine.high %v9507_v41, %v9523_v43  ;;  %v9731_v41 = vld [vmem:[#allocation16 + $0x1800] sm:$0xff] }
 0x78c   : > { %v9747_v43 = vld [vmem:[#allocation16 + $0x1880] sm:$0xff] }
 0x78e   : > { %15294 = vmatpush1.bf16.msra.mxu1 %v18517_v51  ;;  %v9555_v51 = vld [vmem:[#allocation16 + $0x1280] sm:$0xff] }
 0x78f   : > { %15295 = vmatprep.subr.bf16.mxu1 %v18550_v52  ;;  %v9540_v52 = vld [vmem:[#allocation16 + $0x1208] sm:$0xff]  ;;  %v18805_v59 = vcombine.low %v9539_v50, %v9555_v51 }
 0x790   : > { %v18808_v28 = vcombine.high %v9540_v52, %v9556_v25 }
 0x792   : > { %15296 = vmatpush1.bf16.msra.mxu1 %v18549_v54  ;;  %v18775_v54 = vcombine.low %v9508_v44, %v9524_v45  ;;  %v9732_v44 = vld [vmem:[#allocation16 + $0x1808] sm:$0xff] }
 0x793   : > { %15297 = vmatprep.subr.bf16.mxu1 %v18582_v55  ;;  %v18806_v55 = vcombine.high %v9539_v50, %v9555_v51  ;;  %v9748_v45 = vld [vmem:[#allocation16 + $0x1888] sm:$0xff] }
 0x796   : > { %15298 = vmatpush1.bf16.msra.mxu1 %v18581_v57  ;;  %v9587_v57 = vld [vmem:[#allocation16 + $0x1380] sm:$0xff] }
 0x797   : > { %15299 = vmatprep.subr.bf16.mxu1 %v18614_v31  ;;  %v9572_v31 = vld [vmem:[#allocation16 + $0x1308] sm:$0xff]  ;;  %v18837_v2 = vcombine.low %v9571_v56, %v9587_v57 }
 0x798   : > { %v18839_v3 = vcombine.low %v9572_v31, %v9588_v58 }
 0x79a   : > { %15300 = vmatpush1.bf16.msra.mxu1 %v18613_v60  ;;  %v18807_v60 = vcombine.low %v9540_v52, %v9556_v25 }
 0x79b   : > { %15301 = vmatprep.subr.bf16.mxu1 %v18646_v61  ;;  %v18838_v61 = vcombine.high %v9571_v56, %v9587_v57  ;;  %v9779_v56 = vld [vmem:[#allocation16 + $0x1980] sm:$0xff]  ;;  %v9764_v57 = vld [vmem:[#allocation16 + $0x1908] sm:$0xff] }
 0x79e   : > { %15302 = vmatpush1.bf16.msra.mxu1 %v18645_v62  ;;  %v18840_v62 = vcombine.high %v9572_v31, %v9588_v58  ;;  %v9780_v31 = vld [vmem:[#allocation16 + $0x1988] sm:$0xff] }
 0x79f   : > { %15303 = vmatprep.subr.bf16.mxu1 %v18678_v1  ;;  %v9620_v1 = vld [vmem:[#allocation16 + $0x1488] sm:$0xff] }
 0x7a0   : > { %v18871_v13 = vcombine.low %v9604_v0, %v9620_v1 }
 0x7a2   : > { %15304 = vmatpush1.bf16.msra.mxu1 %v18677_v5  ;;  %v18872_v5 = vcombine.high %v9604_v0, %v9620_v1  ;;  %v9796_v0 = vld [vmem:[#allocation16 + $0x1a08] sm:$0xff] }
 0x7a3   : > { %15305 = vmatprep.subr.bf16.mxu1 %v18710_v10  ;;  %v9652_v10 = vld [vmem:[#allocation16 + $0x1588] sm:$0xff] }
 0x7a4   : > { %v9812_v1 = vld [vmem:[#allocation16 + $0x1a88] sm:$0xff] }
 0x7a6   : > { %15306 = vmatpush1.bf16.msra.mxu1 %v18709_v16  ;;  %v18904_v16 = vcombine.high %v9636_v9, %v9652_v10 }
 0x7a7   : > { %15316 = vmatprep.subr.bf16.mxu1 %v18742_v21  ;;  %v9684_v21 = vld [vmem:[#allocation16 + $0x1688] sm:$0xff] }
 0x7a8   : > { %v18936_v27 = vcombine.high %v9668_v11, %v9684_v21 }
 0x81c   : > { %v8907_v33 = vpop.f32.mrb[4].mxu1 }
 0x81d   : > { %v8908_v34 = vadd.f32 %v8907_v33, %v8696_v22  ;;  %v8909_v36 = vpop.f32.mrb[5].mxu1  ;;  %v9699_v22 = vld [vmem:[#allocation16 + $0x1700] sm:$0xff]  ;;  %v9700_v33 = vld [vmem:[#allocation16 + $0x1708] sm:$0xff] }
 0x81e   : > { %v8910_v37 = vadd.f32 %v8909_v36, %v8700_v32  ;;  %v8911_v38 = vpop.f32.mrb[6].mxu1  ;;  %v9715_v32 = vld [vmem:[#allocation16 + $0x1780] sm:$0xff]  ;;  %v8708_v36 = vrot.slane %v22498_v30, %v22472_v29 }
 0x81f   : > { %v8955_v39 = vmax.f32 %v8908_v34, 0.0  ;;  %v8912_v40 = vpop.f32.mrb[7].mxu1  ;;  %v9716_v34 = vld [vmem:[#allocation16 + $0x1788] sm:$0xff]  ;;  %v18935_v38 = vcombine.low %v9668_v11, %v9684_v21  ;;  %v18965_v51 = vcombine.low %v9699_v22, %v9715_v32 }
 0x820   : > { %v8956_v42 = vmax.f32 %v8910_v37, 0.0  ;;  %v18933_v37 = vcombine.low %v9667_v18, %v9683_v20  ;;  %v18968_v40 = vcombine.high %v9700_v33, %v9716_v34  ;;  %v18967_v52 = vcombine.low %v9700_v33, %v9716_v34  ;;  %v9860_v11 = vld [vmem:[#allocation16 + $0x1c08] sm:$0xff] }
 0x821   : > { %v22506_v47 = vpack.c.bf16 %v8955_v39, %v8955_v39  ;;  %v18966_v39 = vcombine.high %v9699_v22, %v9715_v32  ;;  %v9876_v21 = vld [vmem:[#allocation16 + $0x1c88] sm:$0xff]  ;;  %v9891_v22 = vld [vmem:[#allocation16 + $0x1d00] sm:$0xff] }
 0x822   : > { %v22504_v46 = vpack.c.bf16 %v8956_v42, %v8956_v42  ;;  %v9907_v32 = vld [vmem:[#allocation16 + $0x1d80] sm:$0xff]  ;;  %v9892_v33 = vld [vmem:[#allocation16 + $0x1d08] sm:$0xff] }
 0x823   : > { %v9908_v34 = vld [vmem:[#allocation16 + $0x1d88] sm:$0xff] }
 0x824   : > { %15307 = vmatprep.mubr.bf16.mxu1 %v22504_v46  ;;  %15389 = vmatprep.mubr.bf16.mxu0 %v22504_v46 }
 0x825   : > { %15308 = vmatmul.mubr.bf16.vlgmr.msra.gmra.mrb[12].mxu1 %v22506_v47  ;;  %15390 = vmatmul.mubr.bf16.vlgmr.msra.gmra.mrb[8].mxu0 %v22506_v47 }
 0x826   : > { %15317 = vmatpush1.bf16.msra.mxu1 %v18741_v23  ;;  %15399 = vmatpush1.bf16.msra.mxu0 %v18743_v24  ;;  %v18903_v23 = vcombine.low %v9636_v9, %v9652_v10  ;;  %v18934_v24 = vcombine.high %v9667_v18, %v9683_v20  ;;  %v9828_v9 = vld [vmem:[#allocation16 + $0x1b08] sm:$0xff]  ;;  %v9859_v18 = vld [vmem:[#allocation16 + $0x1c00] sm:$0xff] }
 0x827   : > { %15318 = vmatprep.subr.bf16.mxu1 %v18774_v48  ;;  %15400 = vmatprep.subr.bf16.mxu0 %v18776_v49  ;;  %v9844_v10 = vld [vmem:[#allocation16 + $0x1b88] sm:$0xff]  ;;  %v9875_v20 = vld [vmem:[#allocation16 + $0x1c80] sm:$0xff] }
 0x82a   : > { %15319 = vmatpush1.bf16.msra.mxu1 %v18773_v53  ;;  %15401 = vmatpush1.bf16.msra.mxu0 %v18775_v54  ;;  %v18998_v53 = vcombine.high %v9731_v41, %v9747_v43  ;;  %v19000_v54 = vcombine.high %v9732_v44, %v9748_v45 }
 0x82b   : > { %15320 = vmatprep.subr.bf16.mxu1 %v18806_v55  ;;  %15402 = vmatprep.subr.bf16.mxu0 %v18808_v28  ;;  %v9763_v55 = vld [vmem:[#allocation16 + $0x1900] sm:$0xff] }
 0x82e   : > { %15321 = vmatpush1.bf16.msra.mxu1 %v18805_v59  ;;  %15403 = vmatpush1.bf16.msra.mxu0 %v18807_v60  ;;  %v18997_v59 = vcombine.low %v9731_v41, %v9747_v43  ;;  %v18999_v60 = vcombine.low %v9732_v44, %v9748_v45  ;;  %v9939_v41 = vld [vmem:[#allocation16 + $0x1e80] sm:$0xff]  ;;  %v9924_v43 = vld [vmem:[#allocation16 + $0x1e08] sm:$0xff]  ;;  %v19157_v45 = vcombine.low %v9891_v22, %v9907_v32 }
 0x82f   : > { %15322 = vmatprep.subr.bf16.mxu1 %v18838_v61  ;;  %15404 = vmatprep.subr.bf16.mxu0 %v18840_v62  ;;  %v19030_v61 = vcombine.high %v9763_v55, %v9779_v56  ;;  %v19032_v62 = vcombine.high %v9764_v57, %v9780_v31  ;;  %v9940_v44 = vld [vmem:[#allocation16 + $0x1e88] sm:$0xff] }
 0x832   : > { %15323 = vmatpush1.bf16.msra.mxu1 %v18837_v2  ;;  %15405 = vmatpush1.bf16.msra.mxu0 %v18839_v3  ;;  %v19029_v2 = vcombine.low %v9763_v55, %v9779_v56  ;;  %v19031_v3 = vcombine.low %v9764_v57, %v9780_v31 }
 0x833   : > { %15324 = vmatprep.subr.bf16.mxu1 %v18870_v4  ;;  %15406 = vmatprep.subr.bf16.mxu0 %v18872_v5  ;;  %v19062_v4 = vcombine.high %v9795_v35, %v9811_v63  ;;  %v19064_v5 = vcombine.high %v9796_v0, %v9812_v1 }
 0x836   : > { %15325 = vmatpush1.bf16.msra.mxu1 %v18869_v12  ;;  %15407 = vmatpush1.bf16.msra.mxu0 %v18871_v13  ;;  %v19061_v12 = vcombine.low %v9795_v35, %v9811_v63  ;;  %v19063_v13 = vcombine.low %v9796_v0, %v9812_v1 }
 0x837   : > { %15326 = vmatprep.subr.bf16.mxu1 %v18902_v15  ;;  %15408 = vmatprep.subr.bf16.mxu0 %v18904_v16  ;;  %v19094_v15 = vcombine.high %v9827_v6, %v9843_v7  ;;  %v19096_v16 = vcombine.high %v9828_v9, %v9844_v10 }
 0x83a   : > { %15327 = vmatpush1.bf16.msra.mxu1 %v18901_v14  ;;  %15409 = vmatpush1.bf16.msra.mxu0 %v18903_v23  ;;  %v19093_v14 = vcombine.low %v9827_v6, %v9843_v7  ;;  %v19095_v23 = vcombine.low %v9828_v9, %v9844_v10 }
 0x83b   : > { %15328 = vmatprep.subr.bf16.mxu1 %v18934_v24  ;;  %15410 = vmatprep.subr.bf16.mxu0 %v18936_v27  ;;  %v19126_v24 = vcombine.high %v9859_v18, %v9875_v20  ;;  %v19128_v27 = vcombine.high %v9860_v11, %v9876_v21 }
 0x83c   : > { %v22514_v42 = vpop.f32.mrb[8].mxu1 }
 0x83d   : > { %v8950_v48 = vpop.f32.mrb[9].mxu1 }
 0x83e   : > { %v8951_v49 = vadd.f32 %v8950_v48, %v8708_v36  ;;  %v8952_v50 = vpop.f32.mrb[10].mxu1  ;;  %15329 = vmatpush1.bf16.msra.mxu1 %v18933_v37  ;;  %15411 = vmatpush1.bf16.msra.mxu0 %v18935_v38  ;;  %v19125_v36 = vcombine.low %v9859_v18, %v9875_v20  ;;  %v19127_v37 = vcombine.low %v9860_v11, %v9876_v21 }
 0x83f   : > { %v8953_v25 = vpop.f32.mrb[11].mxu1  ;;  %15330 = vmatprep.subr.bf16.mxu1 %v18966_v39  ;;  %15412 = vmatprep.subr.bf16.mxu0 %v18968_v40  ;;  %v19158_v38 = vcombine.high %v9891_v22, %v9907_v32  ;;  %v19160_v39 = vcombine.high %v9892_v33, %v9908_v34  ;;  %v9923_v40 = vld [vmem:[#allocation16 + $0x1e00] sm:$0xff]  ;;  %v19159_v48 = vcombine.low %v9892_v33, %v9908_v34 }
 0x840   : > { %v8958_v28 = vmax.f32 %v8951_v49, 0.0  ;;  %v8704_v49 = vrot.slane %v22498_v30, %v22483_v8  ;;  %v19190_v50 = vcombine.high %v9923_v40, %v9939_v41  ;;  %v9971_v25 = vld [vmem:[#allocation16 + $0x1f80] sm:$0xff]  ;;  %v19189_v55 = vcombine.low %v9923_v40, %v9939_v41  ;;  %v8981_v30 = vld [vmem:[#allocation16 + $0x90] sm:$0xff] }
 0x842   : > { %v22516_v58 = vpack.c.bf16 %v8958_v28, %v8958_v28  ;;  %15331 = vmatpush1.bf16.msra.mxu1 %v18965_v51  ;;  %15413 = vmatpush1.bf16.msra.mxu0 %v18967_v52  ;;  %v19192_v51 = vcombine.high %v9924_v43, %v9940_v44  ;;  %v9955_v52 = vld [vmem:[#allocation16 + $0x1f00] sm:$0xff]  ;;  %v19191_v28 = vcombine.low %v9924_v43, %v9940_v44 }
 0x843   : > { %15332 = vmatprep.subr.bf16.mxu1 %v18998_v53  ;;  %15414 = vmatprep.subr.bf16.mxu0 %v19000_v54  ;;  %v9956_v53 = vld [vmem:[#allocation16 + $0x1f08] sm:$0xff]  ;;  %v8949_v56 = vadd.f32 %v22514_v42, %v8704_v49  ;;  %v19222_v57 = vcombine.high %v9955_v52, %v9971_v25  ;;  %v8998_v42 = vld [vmem:[#allocation16 + $0x118] sm:$0xff] }
 0x844   : > { %15348 = vmatprep.mubr.bf16.mxu1 %v22516_v58  ;;  %15430 = vmatprep.mubr.bf16.mxu0 %v22516_v58  ;;  %v9972_v54 = vld [vmem:[#allocation16 + $0x1f88] sm:$0xff]  ;;  %v9126_v49 = vld [vmem:[#allocation16 + $0x518] sm:$0xff] }
 0x845   : > { %v19224_v31 = vcombine.high %v9956_v53, %v9972_v54  ;;  %v19223_v35 = vcombine.low %v9956_v53, %v9972_v54  ;;  %v8957_v63 = vmax.f32 %v8949_v56, 0.0  ;;  %v9157_v54 = vld [vmem:[#allocation16 + $0x610] sm:$0xff]  ;;  %v9174_v56 = vld [vmem:[#allocation16 + $0x698] sm:$0xff] }
 0x846   : > { %15333 = vmatpush1.bf16.msra.mxu1 %v18997_v59  ;;  %15415 = vmatpush1.bf16.msra.mxu0 %v18999_v60  ;;  %v8965_v59 = vld [vmem:[#allocation16 + $0x10] sm:$0xff]  ;;  %v8966_v60 = vld [vmem:[#allocation16 + $0x18] sm:$0xff] }
 0x847   : > { %15334 = vmatprep.subr.bf16.mxu1 %v19030_v61  ;;  %15416 = vmatprep.subr.bf16.mxu0 %v19032_v62  ;;  %v8982_v61 = vld [vmem:[#allocation16 + $0x98] sm:$0xff]  ;;  %v19221_v62 = vcombine.low %v9955_v52, %v9971_v25  ;;  %v18234_v0 = vcombine.high %v8965_v59, %v8981_v30  ;;  %v22523_v6 = vpack.c.bf16 %v8957_v63, %v8957_v63 }
 0x848   : > { %v18236_v1 = vcombine.high %v8966_v60, %v8982_v61  ;;  %v18235_v7 = vcombine.low %v8966_v60, %v8982_v61  ;;  %v9189_v60 = vld [vmem:[#allocation16 + $0x710] sm:$0xff] }
 0x849   : > { %v9205_v61 = vld [vmem:[#allocation16 + $0x790] sm:$0xff] }
 0x84a   : > { %15335 = vmatpush1.bf16.msra.mxu1 %v19029_v2  ;;  %15417 = vmatpush1.bf16.msra.mxu0 %v19031_v3  ;;  %v8997_v2 = vld [vmem:[#allocation16 + $0x110] sm:$0xff] }
 0x84b   : > { %15336 = vmatprep.subr.bf16.mxu1 %v19062_v4  ;;  %15418 = vmatprep.subr.bf16.mxu0 %v19064_v5  ;;  %v9013_v3 = vld [vmem:[#allocation16 + $0x190] sm:$0xff]  ;;  %v9014_v4 = vld [vmem:[#allocation16 + $0x198] sm:$0xff]  ;;  %v18233_v5 = vcombine.low %v8965_v59, %v8981_v30 }
 0x84c   : > { %v18266_v9 = vcombine.high %v8997_v2, %v9013_v3  ;;  %v18268_v10 = vcombine.high %v8998_v42, %v9014_v4  ;;  %v18265_v18 = vcombine.low %v8997_v2, %v9013_v3  ;;  %v18267_v20 = vcombine.low %v8998_v42, %v9014_v4  ;;  %v9221_v3 = vld [vmem:[#allocation16 + $0x810] sm:$0xff]  ;;  %v9222_v4 = vld [vmem:[#allocation16 + $0x818] sm:$0xff] }
 0x84d   : > { %v9237_v42 = vld [vmem:[#allocation16 + $0x890] sm:$0xff] }
 0x84e   : > { %15337 = vmatpush1.bf16.msra.mxu1 %v19061_v12  ;;  %15419 = vmatpush1.bf16.msra.mxu0 %v19063_v13  ;;  %v9029_v12 = vld [vmem:[#allocation16 + $0x210] sm:$0xff] }
 0x84f   : > { %15338 = vmatprep.subr.bf16.mxu1 %v19094_v15  ;;  %15420 = vmatprep.subr.bf16.mxu0 %v19096_v16  ;;  %v9045_v13 = vld [vmem:[#allocation16 + $0x290] sm:$0xff]  ;;  %v9030_v15 = vld [vmem:[#allocation16 + $0x218] sm:$0xff] }
 0x850   : > { %v9046_v16 = vld [vmem:[#allocation16 + $0x298] sm:$0xff]  ;;  %v18298_v11 = vcombine.high %v9029_v12, %v9045_v13  ;;  %v18297_v22 = vcombine.low %v9029_v12, %v9045_v13  ;;  %v9253_v13 = vld [vmem:[#allocation16 + $0x910] sm:$0xff] }
 0x851   : > { %v18300_v21 = vcombine.high %v9030_v15, %v9046_v16  ;;  %v18299_v32 = vcombine.low %v9030_v15, %v9046_v16  ;;  %v9269_v15 = vld [vmem:[#allocation16 + $0x990] sm:$0xff]  ;;  %v9254_v16 = vld [vmem:[#allocation16 + $0x918] sm:$0xff] }
 0x852   : > { %15339 = vmatpush1.bf16.msra.mxu1 %v19093_v14  ;;  %15421 = vmatpush1.bf16.msra.mxu0 %v19095_v23  ;;  %v9061_v14 = vld [vmem:[#allocation16 + $0x310] sm:$0xff] }
 0x853   : > { %15340 = vmatprep.subr.bf16.mxu1 %v19126_v24  ;;  %15422 = vmatprep.subr.bf16.mxu0 %v19128_v27  ;;  %v9077_v23 = vld [vmem:[#allocation16 + $0x390] sm:$0xff]  ;;  %v9062_v24 = vld [vmem:[#allocation16 + $0x318] sm:$0xff] }
 0x854   : > { %v9078_v27 = vld [vmem:[#allocation16 + $0x398] sm:$0xff]  ;;  %v18330_v33 = vcombine.high %v9061_v14, %v9077_v23  ;;  %v18329_v40 = vcombine.low %v9061_v14, %v9077_v23  ;;  %v9285_v23 = vld [vmem:[#allocation16 + $0xa10] sm:$0xff] }
 0x855   : > { %v18332_v34 = vcombine.high %v9062_v24, %v9078_v27  ;;  %v18331_v41 = vcombine.low %v9062_v24, %v9078_v27  ;;  %v9301_v24 = vld [vmem:[#allocation16 + $0xa90] sm:$0xff]  ;;  %v9286_v27 = vld [vmem:[#allocation16 + $0xa18] sm:$0xff] }
 0x856   : > { %15341 = vmatpush1.bf16.msra.mxu1 %v19125_v36  ;;  %15423 = vmatpush1.bf16.msra.mxu0 %v19127_v37  ;;  %v9093_v36 = vld [vmem:[#allocation16 + $0x410] sm:$0xff] }
 0x857   : > { %15342 = vmatprep.subr.bf16.mxu1 %v19158_v38  ;;  %15424 = vmatprep.subr.bf16.mxu0 %v19160_v39  ;;  %v9109_v37 = vld [vmem:[#allocation16 + $0x490] sm:$0xff]  ;;  %v9094_v38 = vld [vmem:[#allocation16 + $0x418] sm:$0xff] }
 0x858   : > { %v9110_v39 = vld [vmem:[#allocation16 + $0x498] sm:$0xff]  ;;  %v18362_v43 = vcombine.high %v9093_v36, %v9109_v37 }
 0x859   : > { %v18364_v44 = vcombine.high %v9094_v38, %v9110_v39  ;;  %v18363_v52 = vcombine.low %v9094_v38, %v9110_v39  ;;  %v9333_v38 = vld [vmem:[#allocation16 + $0xb90] sm:$0xff]  ;;  %v9318_v39 = vld [vmem:[#allocation16 + $0xb18] sm:$0xff] }
 0x85a   : > { %15343 = vmatpush1.bf16.msra.mxu1 %v19157_v45  ;;  %15425 = vmatpush1.bf16.msra.mxu0 %v19159_v48  ;;  %v9125_v45 = vld [vmem:[#allocation16 + $0x510] sm:$0xff] }
 0x85b   : > { %15344 = vmatprep.subr.bf16.mxu1 %v19190_v50  ;;  %15426 = vmatprep.subr.bf16.mxu0 %v19192_v51  ;;  %v9141_v48 = vld [vmem:[#allocation16 + $0x590] sm:$0xff]  ;;  %v9142_v50 = vld [vmem:[#allocation16 + $0x598] sm:$0xff]  ;;  %v18361_v51 = vcombine.low %v9093_v36, %v9109_v37 }
 0x85c   : > { %v18394_v25 = vcombine.high %v9125_v45, %v9141_v48  ;;  %v18396_v53 = vcombine.high %v9126_v49, %v9142_v50  ;;  %v9317_v37 = vld [vmem:[#allocation16 + $0xb10] sm:$0xff] }
 0x85e   : > { %15345 = vmatpush1.bf16.msra.mxu1 %v19189_v55  ;;  %15427 = vmatpush1.bf16.msra.mxu0 %v19191_v28  ;;  %v9173_v55 = vld [vmem:[#allocation16 + $0x690] sm:$0xff]  ;;  %v9158_v28 = vld [vmem:[#allocation16 + $0x618] sm:$0xff] }
 0x85f   : > { %15346 = vmatprep.subr.bf16.mxu1 %v19222_v57  ;;  %15428 = vmatprep.subr.bf16.mxu0 %v19224_v31  ;;  %v18393_v57 = vcombine.low %v9125_v45, %v9141_v48  ;;  %v18395_v31 = vcombine.low %v9126_v49, %v9142_v50  ;;  %v18426_v59 = vcombine.high %v9157_v54, %v9173_v55  ;;  %v9349_v48 = vld [vmem:[#allocation16 + $0xc10] sm:$0xff]  ;;  %v9350_v50 = vld [vmem:[#allocation16 + $0xc18] sm:$0xff] }
 0x860   : > { %v18428_v30 = vcombine.high %v9158_v28, %v9174_v56  ;;  %v18425_v63 = vcombine.low %v9157_v54, %v9173_v55  ;;  %v9365_v49 = vld [vmem:[#allocation16 + $0xc90] sm:$0xff] }
 0x861   : > { %v9381_v55 = vld [vmem:[#allocation16 + $0xd10] sm:$0xff] }
 0x862   : > { %15347 = vmatpush1.bf16.msra.mxu1 %v19221_v62  ;;  %15429 = vmatpush1.bf16.msra.mxu0 %v19223_v35  ;;  %v9190_v62 = vld [vmem:[#allocation16 + $0x718] sm:$0xff] }
 0x863   : > { %15439 = vmatprep.subr.bf16.mxu1 %v18234_v0  ;;  %15521 = vmatprep.subr.bf16.mxu0 %v18236_v1  ;;  %v9206_v35 = vld [vmem:[#allocation16 + $0x798] sm:$0xff]  ;;  %v18427_v0 = vcombine.low %v9158_v28, %v9174_v56  ;;  %v18458_v1 = vcombine.high %v9189_v60, %v9205_v61  ;;  %v9397_v28 = vld [vmem:[#allocation16 + $0xd90] sm:$0xff] }
 0x864   : > { %v18460_v2 = vcombine.high %v9190_v62, %v9206_v35  ;;  %v9382_v56 = vld [vmem:[#allocation16 + $0xd18] sm:$0xff] }
 0x865   : > { %15349 = vmatmul.mubr.bf16.vlgmr.msra.gmra.mrb[12].mxu1 %v22523_v6  ;;  %15431 = vmatmul.mubr.bf16.vlgmr.msra.gmra.mrb[8].mxu0 %v22523_v6 }
 0x866   : > { %15440 = vmatpush1.bf16.msra.mxu1 %v18233_v5  ;;  %15471 = vmatprep.mubr.bf16.mxu1 %v22504_v46  ;;  %v9238_v5 = vld [vmem:[#allocation16 + $0x898] sm:$0xff] }
 0x867   : > { %15522 = vmatpush1.bf16.msra.mxu0 %v18235_v7  ;;  %15553 = vmatprep.mubr.bf16.mxu0 %v22504_v46  ;;  %v18457_v7 = vcombine.low %v9189_v60, %v9205_v61  ;;  %v18492_v12 = vcombine.high %v9222_v4, %v9238_v5  ;;  %v9413_v61 = vld [vmem:[#allocation16 + $0xe10] sm:$0xff] }
 0x868   : > { %15441 = vmatprep.subr.bf16.mxu1 %v18266_v9  ;;  %15523 = vmatprep.subr.bf16.mxu0 %v18268_v10  ;;  %v18459_v9 = vcombine.low %v9190_v62, %v9206_v35  ;;  %v18490_v10 = vcombine.high %v9221_v3, %v9237_v42  ;;  %v9429_v62 = vld [vmem:[#allocation16 + $0xe90] sm:$0xff]  ;;  %v9414_v35 = vld [vmem:[#allocation16 + $0xe18] sm:$0xff] }
 0x86a   : > { %15442 = vmatpush1.bf16.msra.mxu1 %v18265_v18  ;;  %v9270_v18 = vld [vmem:[#allocation16 + $0x998] sm:$0xff] }
 0x86b   : > { %15524 = vmatpush1.bf16.msra.mxu0 %v18267_v20  ;;  %15443 = vmatprep.subr.bf16.mxu1 %v18298_v11  ;;  %v18489_v20 = vcombine.low %v9221_v3, %v9237_v42  ;;  %v18491_v11 = vcombine.low %v9222_v4, %v9238_v5  ;;  %v18524_v14 = vcombine.high %v9254_v16, %v9270_v18  ;;  %v9445_v42 = vld [vmem:[#allocation16 + $0xf10] sm:$0xff]  ;;  %v9446_v5 = vld [vmem:[#allocation16 + $0xf18] sm:$0xff] }
 0x86c   : > { %15525 = vmatprep.subr.bf16.mxu0 %v18300_v21  ;;  %v18522_v21 = vcombine.high %v9253_v13, %v9269_v15  ;;  %v9461_v4 = vld [vmem:[#allocation16 + $0xf90] sm:$0xff] }
 0x86e   : > { %15444 = vmatpush1.bf16.msra.mxu1 %v18297_v22  ;;  %v9302_v22 = vld [vmem:[#allocation16 + $0xa98] sm:$0xff] }
 0x86f   : > { %15526 = vmatpush1.bf16.msra.mxu0 %v18299_v32  ;;  %15445 = vmatprep.subr.bf16.mxu1 %v18330_v33  ;;  %v18521_v32 = vcombine.low %v9253_v13, %v9269_v15  ;;  %v18523_v33 = vcombine.low %v9254_v16, %v9270_v18  ;;  %v18556_v36 = vcombine.high %v9286_v27, %v9302_v22  ;;  %v9477_v15 = vld [vmem:[#allocation16 + $0x1010] sm:$0xff]  ;;  %v9478_v18 = vld [vmem:[#allocation16 + $0x1018] sm:$0xff] }
 0x870   : > { %15527 = vmatprep.subr.bf16.mxu0 %v18332_v34  ;;  %v18554_v34 = vcombine.high %v9285_v23, %v9301_v24  ;;  %v9493_v16 = vld [vmem:[#allocation16 + $0x1090] sm:$0xff] }
 0x872   : > { %15446 = vmatpush1.bf16.msra.mxu1 %v18329_v40  ;;  %v9334_v40 = vld [vmem:[#allocation16 + $0xb98] sm:$0xff] }
 0x873   : > { %15528 = vmatpush1.bf16.msra.mxu0 %v18331_v41  ;;  %15447 = vmatprep.subr.bf16.mxu1 %v18362_v43  ;;  %v18553_v41 = vcombine.low %v9285_v23, %v9301_v24  ;;  %v18555_v43 = vcombine.low %v9286_v27, %v9302_v22  ;;  %v18588_v45 = vcombine.high %v9318_v39, %v9334_v40  ;;  %v9509_v24 = vld [vmem:[#allocation16 + $0x1110] sm:$0xff] }
 0x874   : > { %15529 = vmatprep.subr.bf16.mxu0 %v18364_v44  ;;  %v18586_v44 = vcombine.high %v9317_v37, %v9333_v38  ;;  %v9525_v27 = vld [vmem:[#allocation16 + $0x1190] sm:$0xff]  ;;  %v18745_v22 = vcombine.low %v9477_v15, %v9493_v16 }
 0x876   : > { %15448 = vmatpush1.bf16.msra.mxu1 %v18361_v51  ;;  %v9366_v51 = vld [vmem:[#allocation16 + $0xc98] sm:$0xff] }
 0x877   : > { %15530 = vmatpush1.bf16.msra.mxu0 %v18363_v52  ;;  %15449 = vmatprep.subr.bf16.mxu1 %v18394_v25  ;;  %v18585_v52 = vcombine.low %v9317_v37, %v9333_v38  ;;  %v18587_v25 = vcombine.low %v9318_v39, %v9334_v40  ;;  %v18620_v54 = vcombine.high %v9350_v50, %v9366_v51  ;;  %v9541_v37 = vld [vmem:[#allocation16 + $0x1210] sm:$0xff]  ;;  %v9542_v40 = vld [vmem:[#allocation16 + $0x1218] sm:$0xff] }
 0x878   : > { %15531 = vmatprep.subr.bf16.mxu0 %v18396_v53  ;;  %v18618_v53 = vcombine.high %v9349_v48, %v9365_v49  ;;  %v9557_v38 = vld [vmem:[#allocation16 + $0x1290] sm:$0xff] }
 0x87a   : > { %15450 = vmatpush1.bf16.msra.mxu1 %v18393_v57  ;;  %v9398_v57 = vld [vmem:[#allocation16 + $0xd98] sm:$0xff] }
 0x87b   : > { %15532 = vmatpush1.bf16.msra.mxu0 %v18395_v31  ;;  %15451 = vmatprep.subr.bf16.mxu1 %v18426_v59  ;;  %v18617_v31 = vcombine.low %v9349_v48, %v9365_v49  ;;  %v18619_v59 = vcombine.low %v9350_v50, %v9366_v51  ;;  %v18652_v60 = vcombine.high %v9382_v56, %v9398_v57  ;;  %v9573_v49 = vld [vmem:[#allocation16 + $0x1310] sm:$0xff]  ;;  %v9574_v51 = vld [vmem:[#allocation16 + $0x1318] sm:$0xff] }
 0x87c   : > { %15533 = vmatprep.subr.bf16.mxu0 %v18428_v30  ;;  %v18650_v30 = vcombine.high %v9381_v55, %v9397_v28  ;;  %v9589_v50 = vld [vmem:[#allocation16 + $0x1390] sm:$0xff] }
 0x87e   : > { %15452 = vmatpush1.bf16.msra.mxu1 %v18425_v63  ;;  %v9430_v63 = vld [vmem:[#allocation16 + $0xe98] sm:$0xff] }
 0x87f   : > { %15534 = vmatpush1.bf16.msra.mxu0 %v18427_v0  ;;  %15453 = vmatprep.subr.bf16.mxu1 %v18458_v1  ;;  %v18649_v0 = vcombine.low %v9381_v55, %v9397_v28  ;;  %v18651_v1 = vcombine.low %v9382_v56, %v9398_v57  ;;  %v18684_v3 = vcombine.high %v9414_v35, %v9430_v63  ;;  %v9605_v28 = vld [vmem:[#allocation16 + $0x1410] sm:$0xff]  ;;  %v9606_v57 = vld [vmem:[#allocation16 + $0x1418] sm:$0xff] }
 0x880   : > { %15535 = vmatprep.subr.bf16.mxu0 %v18460_v2  ;;  %v18682_v2 = vcombine.high %v9413_v61, %v9429_v62  ;;  %v9621_v56 = vld [vmem:[#allocation16 + $0x1490] sm:$0xff] }
 0x882   : > { %15454 = vmatpush1.bf16.msra.mxu1 %v18457_v7  ;;  %v9462_v7 = vld [vmem:[#allocation16 + $0xf98] sm:$0xff] }
 0x883   : > { %15536 = vmatpush1.bf16.msra.mxu0 %v18459_v9  ;;  %15455 = vmatprep.subr.bf16.mxu1 %v18490_v10  ;;  %v18681_v9 = vcombine.low %v9413_v61, %v9429_v62  ;;  %v18683_v10 = vcombine.low %v9414_v35, %v9430_v63  ;;  %v18716_v13 = vcombine.high %v9446_v5, %v9462_v7  ;;  %v9637_v62 = vld [vmem:[#allocation16 + $0x1510] sm:$0xff]  ;;  %v9638_v63 = vld [vmem:[#allocation16 + $0x1518] sm:$0xff] }
 0x884   : > { %15537 = vmatprep.subr.bf16.mxu0 %v18492_v12  ;;  %v18714_v12 = vcombine.high %v9445_v42, %v9461_v4  ;;  %v9653_v35 = vld [vmem:[#allocation16 + $0x1590] sm:$0xff] }
 0x886   : > { %15456 = vmatpush1.bf16.msra.mxu1 %v18489_v20  ;;  %v9494_v20 = vld [vmem:[#allocation16 + $0x1098] sm:$0xff] }
 0x887   : > { %15538 = vmatpush1.bf16.msra.mxu0 %v18491_v11  ;;  %15457 = vmatprep.subr.bf16.mxu1 %v18522_v21  ;;  %v18713_v11 = vcombine.low %v9445_v42, %v9461_v4  ;;  %v18715_v21 = vcombine.low %v9446_v5, %v9462_v7  ;;  %v18748_v23 = vcombine.high %v9478_v18, %v9494_v20  ;;  %v9669_v4 = vld [vmem:[#allocation16 + $0x1610] sm:$0xff]  ;;  %v9670_v7 = vld [vmem:[#allocation16 + $0x1618] sm:$0xff] }
 0x888   : > { %15539 = vmatprep.subr.bf16.mxu0 %v18524_v14  ;;  %v18746_v14 = vcombine.high %v9477_v15, %v9493_v16  ;;  %v9685_v5 = vld [vmem:[#allocation16 + $0x1690] sm:$0xff] }
 0x889   : > { %v9701_v16 = vld [vmem:[#allocation16 + $0x1710] sm:$0xff] }
 0x88a   : > { %15458 = vmatpush1.bf16.msra.mxu1 %v18521_v32  ;;  %v9510_v32 = vld [vmem:[#allocation16 + $0x1118] sm:$0xff] }
 0x88b   : > { %15540 = vmatpush1.bf16.msra.mxu0 %v18523_v33  ;;  %15459 = vmatprep.subr.bf16.mxu1 %v18554_v34  ;;  %v9526_v33 = vld [vmem:[#allocation16 + $0x1198] sm:$0xff]  ;;  %v18747_v34 = vcombine.low %v9478_v18, %v9494_v20  ;;  %v9717_v18 = vld [vmem:[#allocation16 + $0x1790] sm:$0xff] }
 0x88c   : > { %15541 = vmatprep.subr.bf16.mxu0 %v18556_v36  ;;  %v18778_v36 = vcombine.high %v9509_v24, %v9525_v27  ;;  %v18780_v39 = vcombine.high %v9510_v32, %v9526_v33  ;;  %v9702_v20 = vld [vmem:[#allocation16 + $0x1718] sm:$0xff] }
 0x88e   : > { %15460 = vmatpush1.bf16.msra.mxu1 %v18553_v41  ;;  %v9558_v41 = vld [vmem:[#allocation16 + $0x1298] sm:$0xff] }
 0x88f   : > { %15542 = vmatpush1.bf16.msra.mxu0 %v18555_v43  ;;  %15461 = vmatprep.subr.bf16.mxu1 %v18586_v44  ;;  %v18777_v43 = vcombine.low %v9509_v24, %v9525_v27  ;;  %v18779_v44 = vcombine.low %v9510_v32, %v9526_v33  ;;  %v18812_v48 = vcombine.high %v9542_v40, %v9558_v41  ;;  %v9733_v27 = vld [vmem:[#allocation16 + $0x1810] sm:$0xff]  ;;  %v9734_v32 = vld [vmem:[#allocation16 + $0x1818] sm:$0xff] }
 0x890   : > { %15543 = vmatprep.subr.bf16.mxu0 %v18588_v45  ;;  %v18810_v45 = vcombine.high %v9541_v37, %v9557_v38  ;;  %v9750_v33 = vld [vmem:[#allocation16 + $0x1898] sm:$0xff] }
 0x892   : > { %15462 = vmatpush1.bf16.msra.mxu1 %v18585_v52  ;;  %v9590_v52 = vld [vmem:[#allocation16 + $0x1398] sm:$0xff] }
 0x893   : > { %15544 = vmatpush1.bf16.msra.mxu0 %v18587_v25  ;;  %15463 = vmatprep.subr.bf16.mxu1 %v18618_v53  ;;  %v18809_v25 = vcombine.low %v9541_v37, %v9557_v38  ;;  %v18811_v53 = vcombine.low %v9542_v40, %v9558_v41  ;;  %v18844_v55 = vcombine.high %v9574_v51, %v9590_v52  ;;  %v9781_v40 = vld [vmem:[#allocation16 + $0x1990] sm:$0xff]  ;;  %v9766_v41 = vld [vmem:[#allocation16 + $0x1918] sm:$0xff] }
 0x894   : > { %15545 = vmatprep.subr.bf16.mxu0 %v18620_v54  ;;  %v18842_v54 = vcombine.high %v9573_v49, %v9589_v50  ;;  %v19004_v38 = vcombine.high %v9734_v32, %v9750_v33 }
 0x896   : > { %15464 = vmatpush1.bf16.msra.mxu1 %v18617_v31  ;;  %v9622_v31 = vld [vmem:[#allocation16 + $0x1498] sm:$0xff] }
 0x897   : > { %15546 = vmatpush1.bf16.msra.mxu0 %v18619_v59  ;;  %15465 = vmatprep.subr.bf16.mxu1 %v18650_v30  ;;  %v18841_v59 = vcombine.low %v9573_v49, %v9589_v50  ;;  %v18843_v30 = vcombine.low %v9574_v51, %v9590_v52  ;;  %v18876_v61 = vcombine.high %v9606_v57, %v9622_v31  ;;  %v9797_v50 = vld [vmem:[#allocation16 + $0x1a10] sm:$0xff]  ;;  %v9798_v52 = vld [vmem:[#allocation16 + $0x1a18] sm:$0xff] }
 0x898   : > { %15547 = vmatprep.subr.bf16.mxu0 %v18652_v60  ;;  %v18874_v60 = vcombine.high %v9605_v28, %v9621_v56  ;;  %v9813_v51 = vld [vmem:[#allocation16 + $0x1a90] sm:$0xff] }
 0x89a   : > { %15466 = vmatpush1.bf16.msra.mxu1 %v18649_v0  ;;  %v9654_v0 = vld [vmem:[#allocation16 + $0x1598] sm:$0xff] }
 0x89b   : > { %15548 = vmatpush1.bf16.msra.mxu0 %v18651_v1  ;;  %15467 = vmatprep.subr.bf16.mxu1 %v18682_v2  ;;  %v18873_v1 = vcombine.low %v9605_v28, %v9621_v56  ;;  %v18875_v2 = vcombine.low %v9606_v57, %v9622_v31  ;;  %v18908_v42 = vcombine.high %v9638_v63, %v9654_v0  ;;  %v9829_v56 = vld [vmem:[#allocation16 + $0x1b10] sm:$0xff]  ;;  %v9830_v31 = vld [vmem:[#allocation16 + $0x1b18] sm:$0xff] }
 0x89c   : > { %15549 = vmatprep.subr.bf16.mxu0 %v18684_v3  ;;  %v18906_v3 = vcombine.high %v9637_v62, %v9653_v35  ;;  %v9845_v57 = vld [vmem:[#allocation16 + $0x1b90] sm:$0xff] }
 0x89e   : > { %15468 = vmatpush1.bf16.msra.mxu1 %v18681_v9  ;;  %v9686_v9 = vld [vmem:[#allocation16 + $0x1698] sm:$0xff] }
 0x89f   : > { %15550 = vmatpush1.bf16.msra.mxu0 %v18683_v10  ;;  %15469 = vmatprep.subr.bf16.mxu1 %v18714_v12  ;;  %v18905_v10 = vcombine.low %v9637_v62, %v9653_v35  ;;  %v18907_v12 = vcombine.low %v9638_v63, %v9654_v0  ;;  %v18940_v15 = vcombine.high %v9670_v7, %v9686_v9  ;;  %v9861_v35 = vld [vmem:[#allocation16 + $0x1c10] sm:$0xff]  ;;  %v9862_v0 = vld [vmem:[#allocation16 + $0x1c18] sm:$0xff] }
 0x8a0   : > { %15551 = vmatprep.subr.bf16.mxu0 %v18716_v13  ;;  %v18938_v13 = vcombine.high %v9669_v4, %v9685_v5  ;;  %v9877_v63 = vld [vmem:[#allocation16 + $0x1c90] sm:$0xff] }
 0x8a2   : > { %15470 = vmatpush1.bf16.msra.mxu1 %v18713_v11  ;;  %v9718_v11 = vld [vmem:[#allocation16 + $0x1798] sm:$0xff] }
 0x8a3   : > { %15552 = vmatpush1.bf16.msra.mxu0 %v18715_v21  ;;  %15480 = vmatprep.subr.bf16.mxu1 %v18746_v14  ;;  %v18937_v21 = vcombine.low %v9669_v4, %v9685_v5  ;;  %v18939_v14 = vcombine.low %v9670_v7, %v9686_v9  ;;  %v18972_v24 = vcombine.high %v9702_v20, %v9718_v11  ;;  %v9893_v5 = vld [vmem:[#allocation16 + $0x1d10] sm:$0xff]  ;;  %v9894_v9 = vld [vmem:[#allocation16 + $0x1d18] sm:$0xff] }
 0x8a4   : > { %15562 = vmatprep.subr.bf16.mxu0 %v18748_v23  ;;  %v18970_v23 = vcombine.high %v9701_v16, %v9717_v18  ;;  %v9909_v7 = vld [vmem:[#allocation16 + $0x1d90] sm:$0xff] }
 0x8a5   : > { %15472 = vmatmul.mubr.bf16.vlgmr.msra.gmra.mrb[16].mxu1 %v22506_v47 }
 0x8a6   : > { %15554 = vmatmul.mubr.bf16.vlgmr.msra.gmra.mrb[12].mxu0 %v22506_v47  ;;  %15481 = vmatpush1.bf16.msra.mxu1 %v18745_v22  ;;  %v9749_v22 = vld [vmem:[#allocation16 + $0x1890] sm:$0xff] }
 0x8a7   : > { %15512 = vmatprep.mubr.bf16.mxu1 %v22516_v58  ;;  %15563 = vmatpush1.bf16.msra.mxu0 %v18747_v34  ;;  %v18969_v34 = vcombine.low %v9701_v16, %v9717_v18  ;;  %v19002_v37 = vcombine.high %v9733_v27, %v9749_v22  ;;  %v9925_v18 = vld [vmem:[#allocation16 + $0x1e10] sm:$0xff] }
 0x8a8   : > { %15594 = vmatprep.mubr.bf16.mxu0 %v22516_v58  ;;  %15482 = vmatprep.subr.bf16.mxu1 %v18778_v36  ;;  %v18971_v36 = vcombine.low %v9702_v20, %v9718_v11  ;;  %v9941_v20 = vld [vmem:[#allocation16 + $0x1e90] sm:$0xff]  ;;  %v9926_v11 = vld [vmem:[#allocation16 + $0x1e18] sm:$0xff] }
 0x8a9   : > { %15564 = vmatprep.subr.bf16.mxu0 %v18780_v39  ;;  %v9765_v39 = vld [vmem:[#allocation16 + $0x1910] sm:$0xff] }
 0x8aa   : > { %15483 = vmatpush1.bf16.msra.mxu1 %v18777_v43  ;;  %v9782_v43 = vld [vmem:[#allocation16 + $0x1998] sm:$0xff] }
 0x8ab   : > { %15565 = vmatpush1.bf16.msra.mxu0 %v18779_v44  ;;  %15484 = vmatprep.subr.bf16.mxu1 %v18810_v45  ;;  %v19001_v44 = vcombine.low %v9733_v27, %v9749_v22  ;;  %v19003_v45 = vcombine.low %v9734_v32, %v9750_v33  ;;  %v19036_v49 = vcombine.high %v9766_v41, %v9782_v43  ;;  %v9957_v22 = vld [vmem:[#allocation16 + $0x1f10] sm:$0xff]  ;;  %v9958_v33 = vld [vmem:[#allocation16 + $0x1f18] sm:$0xff] }
 0x8ac   : > { %15566 = vmatprep.subr.bf16.mxu0 %v18812_v48  ;;  %v19034_v48 = vcombine.high %v9765_v39, %v9781_v40  ;;  %v9973_v32 = vld [vmem:[#allocation16 + $0x1f90] sm:$0xff] }
 0x8ae   : > { %15485 = vmatpush1.bf16.msra.mxu1 %v18809_v25  ;;  %v9814_v25 = vld [vmem:[#allocation16 + $0x1a98] sm:$0xff] }
 0x8af   : > { %15567 = vmatpush1.bf16.msra.mxu0 %v18811_v53  ;;  %15486 = vmatprep.subr.bf16.mxu1 %v18842_v54  ;;  %v19033_v53 = vcombine.low %v9765_v39, %v9781_v40  ;;  %v19035_v54 = vcombine.low %v9766_v41, %v9782_v43  ;;  %v19068_v28 = vcombine.high %v9798_v52, %v9814_v25  ;;  %v8967_v40 = vld [vmem:[#allocation16 + $0x20] sm:$0xff]  ;;  %v8968_v43 = vld [vmem:[#allocation16 + $0x28] sm:$0xff] }
 0x8b0   : > { %15568 = vmatprep.subr.bf16.mxu0 %v18844_v55  ;;  %v19066_v55 = vcombine.high %v9797_v50, %v9813_v51  ;;  %v8983_v41 = vld [vmem:[#allocation16 + $0xa0] sm:$0xff] }
 0x8b2   : > { %15487 = vmatpush1.bf16.msra.mxu1 %v18841_v59  ;;  %v9846_v59 = vld [vmem:[#allocation16 + $0x1b98] sm:$0xff] }
 0x8b3   : > { %15569 = vmatpush1.bf16.msra.mxu0 %v18843_v30  ;;  %15488 = vmatprep.subr.bf16.mxu1 %v18874_v60  ;;  %v19065_v30 = vcombine.low %v9797_v50, %v9813_v51  ;;  %v19067_v60 = vcombine.low %v9798_v52, %v9814_v25  ;;  %v19100_v62 = vcombine.high %v9830_v31, %v9846_v59  ;;  %v8999_v51 = vld [vmem:[#allocation16 + $0x120] sm:$0xff] }
 0x8b4   : > { %15570 = vmatprep.subr.bf16.mxu0 %v18876_v61  ;;  %v19098_v61 = vcombine.high %v9829_v56, %v9845_v57  ;;  %v9015_v52 = vld [vmem:[#allocation16 + $0x1a0] sm:$0xff]  ;;  %v18237_v25 = vcombine.low %v8967_v40, %v8983_v41 }
 0x8b6   : > { %15489 = vmatpush1.bf16.msra.mxu1 %v18873_v1  ;;  %v9878_v1 = vld [vmem:[#allocation16 + $0x1c98] sm:$0xff] }
 0x8b7   : > { %15571 = vmatpush1.bf16.msra.mxu0 %v18875_v2  ;;  %15490 = vmatprep.subr.bf16.mxu1 %v18906_v3  ;;  %v19097_v2 = vcombine.low %v9829_v56, %v9845_v57  ;;  %v19099_v3 = vcombine.low %v9830_v31, %v9846_v59  ;;  %v19132_v4 = vcombine.high %v9862_v0, %v9878_v1  ;;  %v9031_v56 = vld [vmem:[#allocation16 + $0x220] sm:$0xff]  ;;  %v9032_v59 = vld [vmem:[#allocation16 + $0x228] sm:$0xff] }
 0x8b8   : > { %15572 = vmatprep.subr.bf16.mxu0 %v18908_v42  ;;  %v19130_v42 = vcombine.high %v9861_v35, %v9877_v63  ;;  %v9047_v57 = vld [vmem:[#allocation16 + $0x2a0] sm:$0xff] }
 0x8ba   : > { %15491 = vmatpush1.bf16.msra.mxu1 %v18905_v10  ;;  %v9910_v10 = vld [vmem:[#allocation16 + $0x1d98] sm:$0xff] }
 0x8bb   : > { %15573 = vmatpush1.bf16.msra.mxu0 %v18907_v12  ;;  %15492 = vmatprep.subr.bf16.mxu1 %v18938_v13  ;;  %v19129_v12 = vcombine.low %v9861_v35, %v9877_v63  ;;  %v19131_v13 = vcombine.low %v9862_v0, %v9878_v1  ;;  %v19164_v16 = vcombine.high %v9894_v9, %v9910_v10  ;;  %v9063_v63 = vld [vmem:[#allocation16 + $0x320] sm:$0xff]  ;;  %v9064_v1 = vld [vmem:[#allocation16 + $0x328] sm:$0xff] }
 0x8bc   : > { %15574 = vmatprep.subr.bf16.mxu0 %v18940_v15  ;;  %v19162_v15 = vcombine.high %v9893_v5, %v9909_v7  ;;  %v9079_v0 = vld [vmem:[#allocation16 + $0x3a0] sm:$0xff] }
 0x8be   : > { %15493 = vmatpush1.bf16.msra.mxu1 %v18937_v21  ;;  %v9942_v21 = vld [vmem:[#allocation16 + $0x1e98] sm:$0xff] }
 0x8bf   : > { %15575 = vmatpush1.bf16.msra.mxu0 %v18939_v14  ;;  %15494 = vmatprep.subr.bf16.mxu1 %v18970_v23  ;;  %v19161_v14 = vcombine.low %v9893_v5, %v9909_v7  ;;  %v19163_v23 = vcombine.low %v9894_v9, %v9910_v10  ;;  %v19196_v27 = vcombine.high %v9926_v11, %v9942_v21  ;;  %v9095_v7 = vld [vmem:[#allocation16 + $0x420] sm:$0xff]  ;;  %v9096_v10 = vld [vmem:[#allocation16 + $0x428] sm:$0xff] }
 0x8c0   : > { %15576 = vmatprep.subr.bf16.mxu0 %v18972_v24  ;;  %v19194_v24 = vcombine.high %v9925_v18, %v9941_v20  ;;  %v9111_v9 = vld [vmem:[#allocation16 + $0x4a0] sm:$0xff] }
 0x8c2   : > { %15495 = vmatpush1.bf16.msra.mxu1 %v18969_v34  ;;  %v9974_v34 = vld [vmem:[#allocation16 + $0x1f98] sm:$0xff] }
 0x8c3   : > { %15577 = vmatpush1.bf16.msra.mxu0 %v18971_v36  ;;  %15496 = vmatprep.subr.bf16.mxu1 %v19002_v37  ;;  %v19193_v36 = vcombine.low %v9925_v18, %v9941_v20  ;;  %v19195_v37 = vcombine.low %v9926_v11, %v9942_v21  ;;  %v19228_v39 = vcombine.high %v9958_v33, %v9974_v34  ;;  %v9127_v20 = vld [vmem:[#allocation16 + $0x520] sm:$0xff]  ;;  %v9128_v21 = vld [vmem:[#allocation16 + $0x528] sm:$0xff] }
 0x8c4   : > { %15578 = vmatprep.subr.bf16.mxu0 %v19004_v38  ;;  %v19226_v38 = vcombine.high %v9957_v22, %v9973_v32  ;;  %v9143_v11 = vld [vmem:[#allocation16 + $0x5a0] sm:$0xff] }
 0x8c6   : > { %15497 = vmatpush1.bf16.msra.mxu1 %v19001_v44  ;;  %v8984_v44 = vld [vmem:[#allocation16 + $0xa8] sm:$0xff] }
 0x8c7   : > { %15579 = vmatpush1.bf16.msra.mxu0 %v19003_v45  ;;  %15498 = vmatprep.subr.bf16.mxu1 %v19034_v48  ;;  %v19225_v45 = vcombine.low %v9957_v22, %v9973_v32  ;;  %v19227_v48 = vcombine.low %v9958_v33, %v9974_v34  ;;  %v18240_v50 = vcombine.high %v8968_v43, %v8984_v44  ;;  %v9159_v32 = vld [vmem:[#allocation16 + $0x620] sm:$0xff]  ;;  %v9160_v34 = vld [vmem:[#allocation16 + $0x628] sm:$0xff] }
 0x8c8   : > { %15580 = vmatprep.subr.bf16.mxu0 %v19036_v49  ;;  %v18238_v49 = vcombine.high %v8967_v40, %v8983_v41  ;;  %v9175_v33 = vld [vmem:[#allocation16 + $0x6a0] sm:$0xff] }
 0x8c9   : > { %v9191_v41 = vld [vmem:[#allocation16 + $0x720] sm:$0xff] }
 0x8ca   : > { %15499 = vmatpush1.bf16.msra.mxu1 %v19033_v53  ;;  %v9000_v53 = vld [vmem:[#allocation16 + $0x128] sm:$0xff] }
 0x8cb   : > { %15581 = vmatpush1.bf16.msra.mxu0 %v19035_v54  ;;  %15500 = vmatprep.subr.bf16.mxu1 %v19066_v55  ;;  %v9016_v54 = vld [vmem:[#allocation16 + $0x1a8] sm:$0xff]  ;;  %v18239_v55 = vcombine.low %v8968_v43, %v8984_v44  ;;  %v9207_v43 = vld [vmem:[#allocation16 + $0x7a0] sm:$0xff] }
 0x8cc   : > { %15582 = vmatprep.subr.bf16.mxu0 %v19068_v28  ;;  %v18270_v28 = vcombine.high %v8999_v51, %v9015_v52  ;;  %v18272_v31 = vcombine.high %v9000_v53, %v9016_v54  ;;  %v9192_v44 = vld [vmem:[#allocation16 + $0x728] sm:$0xff] }
 0x8ce   : > { %15501 = vmatpush1.bf16.msra.mxu1 %v19065_v30  ;;  %v9048_v30 = vld [vmem:[#allocation16 + $0x2a8] sm:$0xff] }
 0x8cf   : > { %15583 = vmatpush1.bf16.msra.mxu0 %v19067_v60  ;;  %15502 = vmatprep.subr.bf16.mxu1 %v19098_v61  ;;  %v18269_v60 = vcombine.low %v8999_v51, %v9015_v52  ;;  %v18271_v61 = vcombine.low %v9000_v53, %v9016_v54  ;;  %v18304_v35 = vcombine.high %v9032_v59, %v9048_v30  ;;  %v9223_v52 = vld [vmem:[#allocation16 + $0x820] sm:$0xff]  ;;  %v9224_v53 = vld [vmem:[#allocation16 + $0x828] sm:$0xff] }
 0x8d0   : > { %15584 = vmatprep.subr.bf16.mxu0 %v19100_v62  ;;  %v18302_v62 = vcombine.high %v9031_v56, %v9047_v57  ;;  %v9240_v54 = vld [vmem:[#allocation16 + $0x8a8] sm:$0xff] }
 0x8d2   : > { %15503 = vmatpush1.bf16.msra.mxu1 %v19097_v2  ;;  %v9080_v2 = vld [vmem:[#allocation16 + $0x3a8] sm:$0xff] }
 0x8d3   : > { %15585 = vmatpush1.bf16.msra.mxu0 %v19099_v3  ;;  %15504 = vmatprep.subr.bf16.mxu1 %v19130_v42  ;;  %v18301_v3 = vcombine.low %v9031_v56, %v9047_v57  ;;  %v18303_v42 = vcombine.low %v9032_v59, %v9048_v30  ;;  %v18336_v5 = vcombine.high %v9064_v1, %v9080_v2  ;;  %v9271_v59 = vld [vmem:[#allocation16 + $0x9a0] sm:$0xff]  ;;  %v9256_v30 = vld [vmem:[#allocation16 + $0x928] sm:$0xff] }
 0x8d4   : > { %15586 = vmatprep.subr.bf16.mxu0 %v19132_v4  ;;  %v18334_v4 = vcombine.high %v9063_v63, %v9079_v0  ;;  %v18496_v57 = vcombine.high %v9224_v53, %v9240_v54 }
 0x8d6   : > { %15505 = vmatpush1.bf16.msra.mxu1 %v19129_v12  ;;  %v9112_v12 = vld [vmem:[#allocation16 + $0x4a8] sm:$0xff] }
 0x8d7   : > { %15587 = vmatpush1.bf16.msra.mxu0 %v19131_v13  ;;  %15506 = vmatprep.subr.bf16.mxu1 %v19162_v15  ;;  %v18333_v13 = vcombine.low %v9063_v63, %v9079_v0  ;;  %v18335_v15 = vcombine.low %v9064_v1, %v9080_v2  ;;  %v18368_v18 = vcombine.high %v9096_v10, %v9112_v12  ;;  %v9287_v0 = vld [vmem:[#allocation16 + $0xa20] sm:$0xff]  ;;  %v9288_v2 = vld [vmem:[#allocation16 + $0xa28] sm:$0xff] }
 0x8d8   : > { %15588 = vmatprep.subr.bf16.mxu0 %v19164_v16  ;;  %v18366_v16 = vcombine.high %v9095_v7, %v9111_v9  ;;  %v9303_v1 = vld [vmem:[#allocation16 + $0xaa0] sm:$0xff] }
 0x8da   : > { %15507 = vmatpush1.bf16.msra.mxu1 %v19161_v14  ;;  %v9144_v14 = vld [vmem:[#allocation16 + $0x5a8] sm:$0xff] }
 0x8db   : > { %15589 = vmatpush1.bf16.msra.mxu0 %v19163_v23  ;;  %15508 = vmatprep.subr.bf16.mxu1 %v19194_v24  ;;  %v18365_v23 = vcombine.low %v9095_v7, %v9111_v9  ;;  %v18367_v24 = vcombine.low %v9096_v10, %v9112_v12  ;;  %v18400_v22 = vcombine.high %v9128_v21, %v9144_v14  ;;  %v9319_v9 = vld [vmem:[#allocation16 + $0xb20] sm:$0xff]  ;;  %v9320_v12 = vld [vmem:[#allocation16 + $0xb28] sm:$0xff] }
 0x8dc   : > { %15590 = vmatprep.subr.bf16.mxu0 %v19196_v27  ;;  %v18398_v27 = vcombine.high %v9127_v20, %v9143_v11  ;;  %v9335_v10 = vld [vmem:[#allocation16 + $0xba0] sm:$0xff] }
 0x8de   : > { %15509 = vmatpush1.bf16.msra.mxu1 %v19193_v36  ;;  %v9176_v36 = vld [vmem:[#allocation16 + $0x6a8] sm:$0xff] }
 0x8df   : > { %15591 = vmatpush1.bf16.msra.mxu0 %v19195_v37  ;;  %15510 = vmatprep.subr.bf16.mxu1 %v19226_v38  ;;  %v18397_v37 = vcombine.low %v9127_v20, %v9143_v11  ;;  %v18399_v38 = vcombine.low %v9128_v21, %v9144_v14  ;;  %v18432_v40 = vcombine.high %v9160_v34, %v9176_v36  ;;  %v9351_v11 = vld [vmem:[#allocation16 + $0xc20] sm:$0xff]  ;;  %v9352_v14 = vld [vmem:[#allocation16 + $0xc28] sm:$0xff] }
 0x8e0   : > { %15592 = vmatprep.subr.bf16.mxu0 %v19228_v39  ;;  %v18430_v39 = vcombine.high %v9159_v32, %v9175_v33  ;;  %v9367_v21 = vld [vmem:[#allocation16 + $0xca0] sm:$0xff] }
 0x8e2   : > { %15511 = vmatpush1.bf16.msra.mxu1 %v19225_v45  ;;  %v9208_v45 = vld [vmem:[#allocation16 + $0x7a8] sm:$0xff] }
 0x8e3   : > { %15593 = vmatpush1.bf16.msra.mxu0 %v19227_v48  ;;  %15603 = vmatprep.subr.bf16.mxu1 %v18238_v49  ;;  %v18429_v48 = vcombine.low %v9159_v32, %v9175_v33  ;;  %v18431_v49 = vcombine.low %v9160_v34, %v9176_v36  ;;  %v18464_v51 = vcombine.high %v9192_v44, %v9208_v45  ;;  %v9383_v33 = vld [vmem:[#allocation16 + $0xd20] sm:$0xff]  ;;  %v9384_v36 = vld [vmem:[#allocation16 + $0xd28] sm:$0xff] }
 0x8e4   : > { %15685 = vmatprep.subr.bf16.mxu0 %v18240_v50  ;;  %v18462_v50 = vcombine.high %v9191_v41, %v9207_v43  ;;  %v9399_v34 = vld [vmem:[#allocation16 + $0xda0] sm:$0xff] }
 0x8e5   : > { %15513 = vmatmul.mubr.bf16.vlgmr.msra.gmra.mrb[16].mxu1 %v22523_v6 }
 0x8e6   : > { %15595 = vmatmul.mubr.bf16.vlgmr.msra.gmra.mrb[12].mxu0 %v22523_v6  ;;  %15604 = vmatpush1.bf16.msra.mxu1 %v18237_v25  ;;  %v9239_v25 = vld [vmem:[#allocation16 + $0x8a0] sm:$0xff] }
 0x8e7   : > { %15635 = vmatprep.mubr.bf16.mxu1 %v22504_v46  ;;  %15686 = vmatpush1.bf16.msra.mxu0 %v18239_v55  ;;  %v18461_v55 = vcombine.low %v9191_v41, %v9207_v43  ;;  %v18494_v56 = vcombine.high %v9223_v52, %v9239_v25  ;;  %v9415_v43 = vld [vmem:[#allocation16 + $0xe20] sm:$0xff] }
 0x8e8   : > { %15717 = vmatprep.mubr.bf16.mxu0 %v22504_v46  ;;  %15605 = vmatprep.subr.bf16.mxu1 %v18270_v28  ;;  %v18463_v28 = vcombine.low %v9192_v44, %v9208_v45  ;;  %v9431_v44 = vld [vmem:[#allocation16 + $0xea0] sm:$0xff]  ;;  %v9416_v45 = vld [vmem:[#allocation16 + $0xe28] sm:$0xff] }
 0x8e9   : > { %15687 = vmatprep.subr.bf16.mxu0 %v18272_v31  ;;  %v9255_v31 = vld [vmem:[#allocation16 + $0x920] sm:$0xff] }
 0x8ea   : > { %15606 = vmatpush1.bf16.msra.mxu1 %v18269_v60  ;;  %v9272_v60 = vld [vmem:[#allocation16 + $0x9a8] sm:$0xff] }
 0x8eb   : > { %15688 = vmatpush1.bf16.msra.mxu0 %v18271_v61  ;;  %15607 = vmatprep.subr.bf16.mxu1 %v18302_v62  ;;  %v18493_v61 = vcombine.low %v9223_v52, %v9239_v25  ;;  %v18495_v62 = vcombine.low %v9224_v53, %v9240_v54  ;;  %v18528_v63 = vcombine.high %v9256_v30, %v9272_v60  ;;  %v9447_v25 = vld [vmem:[#allocation16 + $0xf20] sm:$0xff]  ;;  %v9448_v54 = vld [vmem:[#allocation16 + $0xf28] sm:$0xff] }
 0x8ec   : > { %15689 = vmatprep.subr.bf16.mxu0 %v18304_v35  ;;  %v18526_v35 = vcombine.high %v9255_v31, %v9271_v59  ;;  %v9463_v53 = vld [vmem:[#allocation16 + $0xfa0] sm:$0xff] }
 0x8ee   : > { %15608 = vmatpush1.bf16.msra.mxu1 %v18301_v3  ;;  %v9304_v3 = vld [vmem:[#allocation16 + $0xaa8] sm:$0xff] }
 0x8ef   : > { %15690 = vmatpush1.bf16.msra.mxu0 %v18303_v42  ;;  %15609 = vmatprep.subr.bf16.mxu1 %v18334_v4  ;;  %v18525_v42 = vcombine.low %v9255_v31, %v9271_v59  ;;  %v18527_v4 = vcombine.low %v9256_v30, %v9272_v60  ;;  %v18560_v7 = vcombine.high %v9288_v2, %v9304_v3  ;;  %v9479_v59 = vld [vmem:[#allocation16 + $0x1020] sm:$0xff]  ;;  %v9480_v60 = vld [vmem:[#allocation16 + $0x1028] sm:$0xff] }
 0x8f0   : > { %15691 = vmatprep.subr.bf16.mxu0 %v18336_v5  ;;  %v18558_v5 = vcombine.high %v9287_v0, %v9303_v1  ;;  %v9495_v30 = vld [vmem:[#allocation16 + $0x10a0] sm:$0xff] }
 0x8f2   : > { %15610 = vmatpush1.bf16.msra.mxu1 %v18333_v13  ;;  %v9336_v13 = vld [vmem:[#allocation16 + $0xba8] sm:$0xff] }
 0x8f3   : > { %15692 = vmatpush1.bf16.msra.mxu0 %v18335_v15  ;;  %15611 = vmatprep.subr.bf16.mxu1 %v18366_v16  ;;  %v18557_v15 = vcombine.low %v9287_v0, %v9303_v1  ;;  %v18559_v16 = vcombine.low %v9288_v2, %v9304_v3  ;;  %v18592_v20 = vcombine.high %v9320_v12, %v9336_v13  ;;  %v9511_v1 = vld [vmem:[#allocation16 + $0x1120] sm:$0xff] }
 0x8f4   : > { %15693 = vmatprep.subr.bf16.mxu0 %v18368_v18  ;;  %v18590_v18 = vcombine.high %v9319_v9, %v9335_v10  ;;  %v9527_v2 = vld [vmem:[#allocation16 + $0x11a0] sm:$0xff]  ;;  %v18749_v3 = vcombine.low %v9479_v59, %v9495_v30 }
 0x8f6   : > { %15612 = vmatpush1.bf16.msra.mxu1 %v18365_v23  ;;  %v9368_v23 = vld [vmem:[#allocation16 + $0xca8] sm:$0xff] }
 0x8f7   : > { %15694 = vmatpush1.bf16.msra.mxu0 %v18367_v24  ;;  %15613 = vmatprep.subr.bf16.mxu1 %v18398_v27  ;;  %v18589_v24 = vcombine.low %v9319_v9, %v9335_v10  ;;  %v18591_v27 = vcombine.low %v9320_v12, %v9336_v13  ;;  %v18624_v32 = vcombine.high %v9352_v14, %v9368_v23  ;;  %v9543_v9 = vld [vmem:[#allocation16 + $0x1220] sm:$0xff]  ;;  %v9544_v13 = vld [vmem:[#allocation16 + $0x1228] sm:$0xff] }
 0x8f8   : > { %15695 = vmatprep.subr.bf16.mxu0 %v18400_v22  ;;  %v18622_v22 = vcombine.high %v9351_v11, %v9367_v21  ;;  %v9559_v10 = vld [vmem:[#allocation16 + $0x12a0] sm:$0xff] }
 0x8fa   : > { %15614 = vmatpush1.bf16.msra.mxu1 %v18397_v37  ;;  %v9400_v37 = vld [vmem:[#allocation16 + $0xda8] sm:$0xff] }
 0x8fb   : > { %15696 = vmatpush1.bf16.msra.mxu0 %v18399_v38  ;;  %15615 = vmatprep.subr.bf16.mxu1 %v18430_v39  ;;  %v18621_v38 = vcombine.low %v9351_v11, %v9367_v21  ;;  %v18623_v39 = vcombine.low %v9352_v14, %v9368_v23  ;;  %v18656_v41 = vcombine.high %v9384_v36, %v9400_v37  ;;  %v9575_v21 = vld [vmem:[#allocation16 + $0x1320] sm:$0xff]  ;;  %v9576_v23 = vld [vmem:[#allocation16 + $0x1328] sm:$0xff] }
 0x8fc   : > { %15697 = vmatprep.subr.bf16.mxu0 %v18432_v40  ;;  %v18654_v40 = vcombine.high %v9383_v33, %v9399_v34  ;;  %v9591_v14 = vld [vmem:[#allocation16 + $0x13a0] sm:$0xff] }
 0x8fe   : > { %15616 = vmatpush1.bf16.msra.mxu1 %v18429_v48  ;;  %v9432_v48 = vld [vmem:[#allocation16 + $0xea8] sm:$0xff] }
 0x8ff   : > { %15698 = vmatpush1.bf16.msra.mxu0 %v18431_v49  ;;  %15617 = vmatprep.subr.bf16.mxu1 %v18462_v50  ;;  %v18653_v49 = vcombine.low %v9383_v33, %v9399_v34  ;;  %v18655_v50 = vcombine.low %v9384_v36, %v9400_v37  ;;  %v18688_v52 = vcombine.high %v9416_v45, %v9432_v48  ;;  %v9607_v34 = vld [vmem:[#allocation16 + $0x1420] sm:$0xff]  ;;  %v9608_v37 = vld [vmem:[#allocation16 + $0x1428] sm:$0xff] }
 0x900   : > { %15699 = vmatprep.subr.bf16.mxu0 %v18464_v51  ;;  %v18686_v51 = vcombine.high %v9415_v43, %v9431_v44  ;;  %v9623_v36 = vld [vmem:[#allocation16 + $0x14a0] sm:$0xff] }
 0x902   : > { %15618 = vmatpush1.bf16.msra.mxu1 %v18461_v55  ;;  %v9464_v55 = vld [vmem:[#allocation16 + $0xfa8] sm:$0xff] }
 0x903   : > { %15700 = vmatpush1.bf16.msra.mxu0 %v18463_v28  ;;  %15619 = vmatprep.subr.bf16.mxu1 %v18494_v56  ;;  %v18685_v28 = vcombine.low %v9415_v43, %v9431_v44  ;;  %v18687_v56 = vcombine.low %v9416_v45, %v9432_v48  ;;  %v18720_v31 = vcombine.high %v9448_v54, %v9464_v55  ;;  %v9639_v44 = vld [vmem:[#allocation16 + $0x1520] sm:$0xff]  ;;  %v9640_v48 = vld [vmem:[#allocation16 + $0x1528] sm:$0xff] }
 0x904   : > { %15701 = vmatprep.subr.bf16.mxu0 %v18496_v57  ;;  %v18718_v57 = vcombine.high %v9447_v25, %v9463_v53  ;;  %v9655_v45 = vld [vmem:[#allocation16 + $0x15a0] sm:$0xff] }
 0x906   : > { %15620 = vmatpush1.bf16.msra.mxu1 %v18493_v61  ;;  %v9496_v61 = vld [vmem:[#allocation16 + $0x10a8] sm:$0xff] }
 0x907   : > { %15702 = vmatpush1.bf16.msra.mxu0 %v18495_v62  ;;  %15621 = vmatprep.subr.bf16.mxu1 %v18526_v35  ;;  %v18717_v62 = vcombine.low %v9447_v25, %v9463_v53  ;;  %v18719_v35 = vcombine.low %v9448_v54, %v9464_v55  ;;  %v18752_v0 = vcombine.high %v9480_v60, %v9496_v61  ;;  %v9671_v54 = vld [vmem:[#allocation16 + $0x1620] sm:$0xff] }
 0x908   : > { %15703 = vmatprep.subr.bf16.mxu0 %v18528_v63  ;;  %v18750_v63 = vcombine.high %v9479_v59, %v9495_v30  ;;  %v18910_v25 = vcombine.high %v9639_v44, %v9655_v45  ;;  %v9687_v55 = vld [vmem:[#allocation16 + $0x16a0] sm:$0xff] }
 0x90a   : > { %15622 = vmatpush1.bf16.msra.mxu1 %v18525_v42  ;;  %v9512_v42 = vld [vmem:[#allocation16 + $0x1128] sm:$0xff] }
 0x90b   : > { %15704 = vmatpush1.bf16.msra.mxu0 %v18527_v4  ;;  %15623 = vmatprep.subr.bf16.mxu1 %v18558_v5  ;;  %v9528_v4 = vld [vmem:[#allocation16 + $0x11a8] sm:$0xff]  ;;  %v18751_v5 = vcombine.low %v9480_v60, %v9496_v61  ;;  %v18909_v60 = vcombine.low %v9639_v44, %v9655_v45 }
 0x90c   : > { %15705 = vmatprep.subr.bf16.mxu0 %v18560_v7  ;;  %v18782_v7 = vcombine.high %v9511_v1, %v9527_v2  ;;  %v18784_v12 = vcombine.high %v9512_v42, %v9528_v4  ;;  %v9768_v44 = vld [vmem:[#allocation16 + $0x1928] sm:$0xff] }
 0x90d   : > { %v9784_v45 = vld [vmem:[#allocation16 + $0x19a8] sm:$0xff] }
 0x90e   : > { %15624 = vmatpush1.bf16.msra.mxu1 %v18557_v15  ;;  %v9560_v15 = vld [vmem:[#allocation16 + $0x12a8] sm:$0xff] }
 0x90f   : > { %15706 = vmatpush1.bf16.msra.mxu0 %v18559_v16  ;;  %15625 = vmatprep.subr.bf16.mxu1 %v18590_v18  ;;  %v18781_v16 = vcombine.low %v9511_v1, %v9527_v2  ;;  %v18783_v18 = vcombine.low %v9512_v42, %v9528_v4  ;;  %v18816_v11 = vcombine.high %v9544_v13, %v9560_v15  ;;  %v9703_v1 = vld [vmem:[#allocation16 + $0x1720] sm:$0xff] }
 0x910   : > { %15707 = vmatprep.subr.bf16.mxu0 %v18592_v20  ;;  %v18814_v20 = vcombine.high %v9543_v9, %v9559_v10  ;;  %v9719_v2 = vld [vmem:[#allocation16 + $0x17a0] sm:$0xff] }
 0x912   : > { %15626 = vmatpush1.bf16.msra.mxu1 %v18589_v24  ;;  %v9592_v24 = vld [vmem:[#allocation16 + $0x13a8] sm:$0xff] }
 0x913   : > { %15708 = vmatpush1.bf16.msra.mxu0 %v18591_v27  ;;  %15627 = vmatprep.subr.bf16.mxu1 %v18622_v22  ;;  %v18813_v27 = vcombine.low %v9543_v9, %v9559_v10  ;;  %v18815_v22 = vcombine.low %v9544_v13, %v9560_v15  ;;  %v18848_v33 = vcombine.high %v9576_v23, %v9592_v24  ;;  %v9720_v9 = vld [vmem:[#allocation16 + $0x17a8] sm:$0xff] }
 0x914   : > { %15709 = vmatprep.subr.bf16.mxu0 %v18624_v32  ;;  %v18846_v32 = vcombine.high %v9575_v21, %v9591_v14 }
 0x916   : > { %15628 = vmatpush1.bf16.msra.mxu1 %v18621_v38  ;;  %v9624_v38 = vld [vmem:[#allocation16 + $0x14a8] sm:$0xff] }
 0x917   : > { %15710 = vmatpush1.bf16.msra.mxu0 %v18623_v39  ;;  %15629 = vmatprep.subr.bf16.mxu1 %v18654_v40  ;;  %v18845_v39 = vcombine.low %v9575_v21, %v9591_v14  ;;  %v18847_v40 = vcombine.low %v9576_v23, %v9592_v24  ;;  %v18880_v43 = vcombine.high %v9608_v37, %v9624_v38 }
 0x918   : > { %15711 = vmatprep.subr.bf16.mxu0 %v18656_v41  ;;  %v18878_v41 = vcombine.high %v9607_v34, %v9623_v36  ;;  %v18974_v23 = vcombine.high %v9703_v1, %v9719_v2 }
 0x91a   : > { %15630 = vmatpush1.bf16.msra.mxu1 %v18653_v49  ;;  %v9656_v49 = vld [vmem:[#allocation16 + $0x15a8] sm:$0xff] }
 0x91b   : > { %15712 = vmatpush1.bf16.msra.mxu0 %v18655_v50  ;;  %15631 = vmatprep.subr.bf16.mxu1 %v18686_v51  ;;  %v18877_v50 = vcombine.low %v9607_v34, %v9623_v36  ;;  %v22541_v51 = vld [vmem:[#allocation17] sm:$0xff]  ;;  %v18912_v53 = vcombine.high %v9640_v48, %v9656_v49  ;;  %v18911_v61 = vcombine.low %v9640_v48, %v9656_v49  ;;  %v9736_v34 = vld [vmem:[#allocation16 + $0x1828] sm:$0xff] }
 0x91c   : > { %15713 = vmatprep.subr.bf16.mxu0 %v18688_v52  ;;  %v18879_v52 = vcombine.low %v9608_v37, %v9624_v38  ;;  %v10002_v59 = vrot.slane %v22541_v51, %v22469_v19  ;;  %v10010_v30 = vrot.slane %v22541_v51, %v22472_v29  ;;  %v9752_v36 = vld [vmem:[#allocation16 + $0x18a8] sm:$0xff]  ;;  %v18973_v37 = vcombine.low %v9703_v1, %v9719_v2 }
 0x91d   : > { %v19007_v49 = vcombine.low %v9736_v34, %v9752_v36  ;;  %v9848_v1 = vld [vmem:[#allocation16 + $0x1ba8] sm:$0xff] }
 0x91e   : > { %15632 = vmatpush1.bf16.msra.mxu1 %v18685_v28  ;;  %v9998_v28 = vrot.slane %v22541_v51, %v22464_v26 }
 0x91f   : > { %15714 = vmatpush1.bf16.msra.mxu0 %v18687_v56  ;;  %15633 = vmatprep.subr.bf16.mxu1 %v18718_v57  ;;  %v10006_v56 = vrot.slane %v22541_v51, %v22483_v8  ;;  %v9672_v57 = vld [vmem:[#allocation16 + $0x1628] sm:$0xff] }
 0x920   : > { %15715 = vmatprep.subr.bf16.mxu0 %v18720_v31  ;;  %v9688_v31 = vld [vmem:[#allocation16 + $0x16a8] sm:$0xff] }
 0x921   : > { %v18943_v14 = vcombine.low %v9672_v57, %v9688_v31 }
 0x922   : > { %15634 = vmatpush1.bf16.msra.mxu1 %v18717_v62  ;;  %v18942_v62 = vcombine.high %v9671_v54, %v9687_v55 }
 0x923   : > { %15716 = vmatpush1.bf16.msra.mxu0 %v18719_v35  ;;  %15644 = vmatprep.subr.bf16.mxu1 %v18750_v63 }
 0x924   : > { %15726 = vmatprep.subr.bf16.mxu0 %v18752_v0  ;;  %v18944_v0 = vcombine.high %v9672_v57, %v9688_v31  ;;  %v19039_v57 = vcombine.low %v9768_v44, %v9784_v45 }
 0x925   : > { %15636 = vmatmul.mubr.bf16.vlgmr.msra.gmra.mrb[20].mxu1 %v22506_v47 }
 0x926   : > { %15718 = vmatmul.mubr.bf16.vlgmr.msra.gmra.mrb[16].mxu0 %v22506_v47  ;;  %15645 = vmatpush1.bf16.msra.mxu1 %v18749_v3 }
 0x927   : > { %15676 = vmatprep.mubr.bf16.mxu1 %v22516_v58  ;;  %15727 = vmatpush1.bf16.msra.mxu0 %v18751_v5 }
 0x928   : > { %15758 = vmatprep.mubr.bf16.mxu0 %v22516_v58  ;;  %15646 = vmatprep.subr.bf16.mxu1 %v18782_v7  ;;  %v9704_v7 = vld [vmem:[#allocation16 + $0x1728] sm:$0xff] }
 0x929   : > { %15728 = vmatprep.subr.bf16.mxu0 %v18784_v12  ;;  %v18975_v38 = vcombine.low %v9704_v7, %v9720_v9 }
 0x92a   : > { %15647 = vmatpush1.bf16.msra.mxu1 %v18781_v16  ;;  %v18941_v16 = vcombine.low %v9671_v54, %v9687_v55  ;;  %v9800_v54 = vld [vmem:[#allocation16 + $0x1a28] sm:$0xff] }
 0x92b   : > { %15729 = vmatpush1.bf16.msra.mxu0 %v18783_v18  ;;  %15648 = vmatprep.subr.bf16.mxu1 %v18814_v20  ;;  %v9816_v55 = vld [vmem:[#allocation16 + $0x1aa8] sm:$0xff] }
 0x92c   : > { %15730 = vmatprep.subr.bf16.mxu0 %v18816_v11 }
 0x92e   : > { %15649 = vmatpush1.bf16.msra.mxu1 %v18813_v27 }
 0x92f   : > { %15731 = vmatpush1.bf16.msra.mxu0 %v18815_v22  ;;  %15650 = vmatprep.subr.bf16.mxu1 %v18846_v32  ;;  %v18976_v22 = vcombine.high %v9704_v7, %v9720_v9  ;;  %v9735_v32 = vld [vmem:[#allocation16 + $0x1820] sm:$0xff] }
 0x930   : > { %15732 = vmatprep.subr.bf16.mxu0 %v18848_v33  ;;  %v9751_v33 = vld [vmem:[#allocation16 + $0x18a0] sm:$0xff] }
 0x931   : > { %v19005_v48 = vcombine.low %v9735_v32, %v9751_v33 }
 0x932   : > { %15651 = vmatpush1.bf16.msra.mxu1 %v18845_v39  ;;  %v19006_v39 = vcombine.high %v9735_v32, %v9751_v33 }
 0x933   : > { %15733 = vmatpush1.bf16.msra.mxu0 %v18847_v40  ;;  %15652 = vmatprep.subr.bf16.mxu1 %v18878_v41  ;;  %v19008_v40 = vcombine.high %v9736_v34, %v9752_v36  ;;  %v9767_v41 = vld [vmem:[#allocation16 + $0x1920] sm:$0xff] }
 0x934   : > { %15734 = vmatprep.subr.bf16.mxu0 %v18880_v43  ;;  %v9783_v43 = vld [vmem:[#allocation16 + $0x19a0] sm:$0xff] }
 0x935   : > { %v9927_v36 = vld [vmem:[#allocation16 + $0x1e20] sm:$0xff] }
 0x936   : > { %15653 = vmatpush1.bf16.msra.mxu1 %v18877_v50  ;;  %v19038_v50 = vcombine.high %v9767_v41, %v9783_v43 }
 0x937   : > { %15735 = vmatpush1.bf16.msra.mxu0 %v18879_v52  ;;  %15654 = vmatprep.subr.bf16.mxu1 %v18910_v25  ;;  %v19040_v52 = vcombine.high %v9768_v44, %v9784_v45  ;;  %v9799_v25 = vld [vmem:[#allocation16 + $0x1a20] sm:$0xff] }
 0x938   : > { %v15350_v35 = vpop.f32.mrb[12].mxu1  ;;  %v15432_v63 = vpop.f32.mrb[8].mxu0  ;;  %15736 = vmatprep.subr.bf16.mxu0 %v18912_v53  ;;  %v9815_v53 = vld [vmem:[#allocation16 + $0x1aa0] sm:$0xff] }
 0x939   : > { %v19302_v3 = vadd.f32 %v15350_v35, %v9998_v28  ;;  %v19304_v42 = vadd.f32 %v15432_v63, %v10006_v56  ;;  %v15352_v4 = vpop.f32.mrb[13].mxu1  ;;  %v15434_v5 = vpop.f32.mrb[9].mxu0  ;;  %v19037_v28 = vcombine.low %v9767_v41, %v9783_v43  ;;  %v19070_v31 = vcombine.high %v9799_v25, %v9815_v53 }
 0x93a   : > { %v19303_v10 = vadd.f32 %v15352_v4, %v10002_v59  ;;  %v19305_v12 = vadd.f32 %v15434_v5, %v10010_v30  ;;  %v15354_v13 = vpop.f32.mrb[14].mxu1  ;;  %v15436_v15 = vpop.f32.mrb[10].mxu0  ;;  %15655 = vmatpush1.bf16.msra.mxu1 %v18909_v60  ;;  %v19072_v60 = vcombine.high %v9800_v54, %v9816_v55  ;;  %v19071_v5 = vcombine.low %v9800_v54, %v9816_v55 }
 0x93b   : > { %v19253_v18 = vmul.f32 -1.442695, %v19302_v3  ;;  %v19255_v20 = vmul.f32 -1.442695, %v19304_v42  ;;  %15737 = vmatpush1.bf16.msra.mxu0 %v18911_v61  ;;  %v15355_v11 = vpop.f32.mrb[15].mxu1  ;;  %v15437_v21 = vpop.f32.mrb[11].mxu0  ;;  %15656 = vmatprep.subr.bf16.mxu1 %v18942_v62  ;;  %v19069_v42 = vcombine.low %v9799_v25, %v9815_v53 }
 0x93c   : > { %v19254_v24 = vmul.f32 -1.442695, %v19303_v10  ;;  %v19256_v27 = vmul.f32 -1.442695, %v19305_v12  ;;  %15738 = vmatprep.subr.bf16.mxu0 %v18944_v0  ;;  %v9831_v61 = vld [vmem:[#allocation16 + $0x1b20] sm:$0xff]  ;;  %v9832_v0 = vld [vmem:[#allocation16 + $0x1b28] sm:$0xff] }
 0x93d   : > { %21379 = vpow2.f32 %v19253_v18  ;;  %v9847_v62 = vld [vmem:[#allocation16 + $0x1ba0] sm:$0xff]  ;;  %v19104_v9 = vcombine.high %v9832_v0, %v9848_v1  ;;  %v9864_v13 = vld [vmem:[#allocation16 + $0x1c28] sm:$0xff]  ;;  %v19103_v18 = vcombine.low %v9832_v0, %v9848_v1  ;;  %v9017_v0 = vld [vmem:[#allocation16 + $0x1b0] sm:$0xff] }
 0x93e   : > { %21381 = vpow2.f32 %v19255_v20  ;;  %15657 = vmatpush1.bf16.msra.mxu1 %v18941_v16  ;;  %v19102_v7 = vcombine.high %v9831_v61, %v9847_v62  ;;  %v9863_v10 = vld [vmem:[#allocation16 + $0x1c20] sm:$0xff]  ;;  %v9880_v15 = vld [vmem:[#allocation16 + $0x1ca8] sm:$0xff]  ;;  %v19101_v16 = vcombine.low %v9831_v61, %v9847_v62 }
 0x93f   : > { %21383 = vpow2.f32 %v19254_v24  ;;  %15739 = vmatpush1.bf16.msra.mxu0 %v18943_v14  ;;  %15658 = vmatprep.subr.bf16.mxu1 %v18974_v23  ;;  %v9879_v12 = vld [vmem:[#allocation16 + $0x1ca0] sm:$0xff]  ;;  %v19136_v11 = vcombine.high %v9864_v13, %v9880_v15  ;;  %v9896_v23 = vld [vmem:[#allocation16 + $0x1d28] sm:$0xff] }
 0x940   : > { %21385 = vpow2.f32 %v19256_v27  ;;  %15740 = vmatprep.subr.bf16.mxu0 %v18976_v22  ;;  %v19134_v20 = vcombine.high %v9863_v10, %v9879_v12  ;;  %v9895_v21 = vld [vmem:[#allocation16 + $0x1d20] sm:$0xff]  ;;  %v9912_v24 = vld [vmem:[#allocation16 + $0x1da8] sm:$0xff]  ;;  %v19133_v27 = vcombine.low %v9863_v10, %v9879_v12  ;;  %v19135_v22 = vcombine.low %v9864_v13, %v9880_v15  ;;  %v9034_v10 = vld [vmem:[#allocation16 + $0x238] sm:$0xff] }
 0x941   : > { %v9911_v14 = vld [vmem:[#allocation16 + $0x1da0] sm:$0xff]  ;;  %v19168_v34 = vcombine.high %v9896_v23, %v9912_v24  ;;  %v19167_v45 = vcombine.low %v9896_v23, %v9912_v24  ;;  %v9960_v25 = vld [vmem:[#allocation16 + $0x1f28] sm:$0xff]  ;;  %v9050_v12 = vld [vmem:[#allocation16 + $0x2b8] sm:$0xff] }
 0x942   : > { %15659 = vmatpush1.bf16.msra.mxu1 %v18973_v37  ;;  %v19166_v32 = vcombine.high %v9895_v21, %v9911_v14  ;;  %v9943_v37 = vld [vmem:[#allocation16 + $0x1ea0] sm:$0xff]  ;;  %v19165_v43 = vcombine.low %v9895_v21, %v9911_v14  ;;  %v9976_v53 = vld [vmem:[#allocation16 + $0x1fa8] sm:$0xff]  ;;  %v9066_v21 = vld [vmem:[#allocation16 + $0x338] sm:$0xff]  ;;  %v18307_v24 = vcombine.low %v9034_v10, %v9050_v12 }
 0x943   : > { %15741 = vmatpush1.bf16.msra.mxu0 %v18975_v38  ;;  %15660 = vmatprep.subr.bf16.mxu1 %v19006_v39  ;;  %v9928_v39 = vld [vmem:[#allocation16 + $0x1e28] sm:$0xff]  ;;  %v19197_v54 = vcombine.low %v9927_v36, %v9943_v37  ;;  %v19231_v61 = vcombine.low %v9960_v25, %v9976_v53  ;;  %v9082_v14 = vld [vmem:[#allocation16 + $0x3b8] sm:$0xff] }
 0x944   : > { %15742 = vmatprep.subr.bf16.mxu0 %v19008_v40  ;;  %v9944_v40 = vld [vmem:[#allocation16 + $0x1ea8] sm:$0xff] }
 0x945   : > { %v19199_v55 = vcombine.low %v9928_v39, %v9944_v40 }
 0x946   : > { %15661 = vmatpush1.bf16.msra.mxu1 %v19005_v48  ;;  %v19198_v48 = vcombine.high %v9927_v36, %v9943_v37  ;;  %v9114_v36 = vld [vmem:[#allocation16 + $0x4b8] sm:$0xff] }
 0x947   : > { %v21380_v56 = vpop.eup %21379  ;;  %15743 = vmatpush1.bf16.msra.mxu0 %v19007_v49  ;;  %15662 = vmatprep.subr.bf16.mxu1 %v19038_v50  ;;  %v19200_v49 = vcombine.high %v9928_v39, %v9944_v40  ;;  %v9959_v50 = vld [vmem:[#allocation16 + $0x1f20] sm:$0xff] }
 0x948   : > { %v21382_v59 = vpop.eup %21381  ;;  %v16683_v30 = vadd.f32 1.0, %v21380_v56  ;;  %15744 = vmatprep.subr.bf16.mxu0 %v19040_v52  ;;  %v9975_v52 = vld [vmem:[#allocation16 + $0x1fa0] sm:$0xff]  ;;  %v19232_v56 = vcombine.high %v9960_v25, %v9976_v53  ;;  %v9161_v25 = vld [vmem:[#allocation16 + $0x630] sm:$0xff] }
 0x949   : > { %v21384_v35 = vpop.eup %21383  ;;  %v16685_v63 = vadd.f32 1.0, %v21382_v59  ;;  %v8970_v59 = vld [vmem:[#allocation16 + $0x38] sm:$0xff]  ;;  %v9177_v53 = vld [vmem:[#allocation16 + $0x6b0] sm:$0xff] }
 0x94a   : > { %v21386_v2 = vpop.eup %21385  ;;  %21387 = vrcp.f32 %v16683_v30  ;;  %v16684_v3 = vadd.f32 1.0, %v21384_v35  ;;  %15663 = vmatpush1.bf16.msra.mxu1 %v19037_v28  ;;  %v19230_v28 = vcombine.high %v9959_v50, %v9975_v52  ;;  %v8986_v30 = vld [vmem:[#allocation16 + $0xb8] sm:$0xff] }
 0x94b   : > { %21389 = vrcp.f32 %v16685_v63  ;;  %v16686_v4 = vadd.f32 1.0, %v21386_v2  ;;  %15745 = vmatpush1.bf16.msra.mxu0 %v19039_v57  ;;  %15664 = vmatprep.subr.bf16.mxu1 %v19070_v31  ;;  %v8969_v57 = vld [vmem:[#allocation16 + $0x30] sm:$0xff]  ;;  %v18244_v35 = vcombine.high %v8970_v59, %v8986_v30  ;;  %v9002_v2 = vld [vmem:[#allocation16 + $0x138] sm:$0xff] }
 0x94c   : > { %21391 = vrcp.f32 %v16684_v3  ;;  %15746 = vmatprep.subr.bf16.mxu0 %v19072_v60  ;;  %v8985_v31 = vld [vmem:[#allocation16 + $0xb0] sm:$0xff]  ;;  %v19229_v60 = vcombine.low %v9959_v50, %v9975_v52  ;;  %v9018_v3 = vld [vmem:[#allocation16 + $0x1b8] sm:$0xff] }
 0x94d   : > { %21393 = vrcp.f32 %v16686_v4  ;;  %v18242_v62 = vcombine.high %v8969_v57, %v8985_v31  ;;  %v9001_v63 = vld [vmem:[#allocation16 + $0x130] sm:$0xff]  ;;  %v18241_v1 = vcombine.low %v8969_v57, %v8985_v31  ;;  %v18275_v15 = vcombine.low %v9002_v2, %v9018_v3 }
 0x94e   : > { %15665 = vmatpush1.bf16.msra.mxu1 %v19069_v42  ;;  %v18243_v42 = vcombine.low %v8970_v59, %v8986_v30  ;;  %v18274_v4 = vcombine.high %v9001_v63, %v9017_v0  ;;  %v18273_v13 = vcombine.low %v9001_v63, %v9017_v0  ;;  %v18434_v57 = vcombine.high %v9161_v25, %v9177_v53  ;;  %v9193_v59 = vld [vmem:[#allocation16 + $0x730] sm:$0xff] }
 0x94f   : > { %15747 = vmatpush1.bf16.msra.mxu0 %v19071_v5  ;;  %15666 = vmatprep.subr.bf16.mxu1 %v19102_v7  ;;  %v9033_v5 = vld [vmem:[#allocation16 + $0x230] sm:$0xff] }
 0x950   : > { %15748 = vmatprep.subr.bf16.mxu0 %v19104_v9  ;;  %v9049_v7 = vld [vmem:[#allocation16 + $0x2b0] sm:$0xff]  ;;  %v18276_v9 = vcombine.high %v9002_v2, %v9018_v3  ;;  %v9226_v3 = vld [vmem:[#allocation16 + $0x838] sm:$0xff] }
 0x951   : > { %v18305_v23 = vcombine.low %v9033_v5, %v9049_v7  ;;  %v9209_v30 = vld [vmem:[#allocation16 + $0x7b0] sm:$0xff] }
 0x952   : > { %15667 = vmatpush1.bf16.msra.mxu1 %v19101_v16  ;;  %v18306_v16 = vcombine.high %v9033_v5, %v9049_v7  ;;  %v18466_v63 = vcombine.high %v9193_v59, %v9209_v30  ;;  %v9241_v2 = vld [vmem:[#allocation16 + $0x8b0] sm:$0xff] }
 0x953   : > { %15749 = vmatpush1.bf16.msra.mxu0 %v19103_v18  ;;  %15668 = vmatprep.subr.bf16.mxu1 %v19134_v20  ;;  %v18308_v18 = vcombine.high %v9034_v10, %v9050_v12  ;;  %v9065_v20 = vld [vmem:[#allocation16 + $0x330] sm:$0xff] }
 0x954   : > { %v21388_v33 = vpop.eup %21387  ;;  %15750 = vmatprep.subr.bf16.mxu0 %v19136_v11  ;;  %v9081_v11 = vld [vmem:[#allocation16 + $0x3b0] sm:$0xff] }
 0x955   : > { %v21390_v38 = vpop.eup %21389  ;;  %16779 = vst [vmem:[%s22552_s22] sm:$0xff] %v21388_v33  ;;  %v9113_v33 = vld [vmem:[#allocation16 + $0x4b0] sm:$0xff]  ;;  %v18337_v37 = vcombine.low %v9065_v20, %v9081_v11 }
 0x956   : > { %v21392_v41 = vpop.eup %21391  ;;  %16781 = vst [vmem:[%s22552_s22 + $0x10] sm:$0xff] %v21390_v38  ;;  %15669 = vmatpush1.bf16.msra.mxu1 %v19133_v27  ;;  %v18338_v27 = vcombine.high %v9065_v20, %v9081_v11  ;;  %v18339_v38 = vcombine.low %v9066_v21, %v9082_v14  ;;  %v9257_v10 = vld [vmem:[#allocation16 + $0x930] sm:$0xff] }
 0x957   : > { %v21394_v44 = vpop.eup %21393  ;;  %16780 = vst [vmem:[%s22552_s22 + $0x8] sm:$0xff] %v21392_v41  ;;  %15751 = vmatpush1.bf16.msra.mxu0 %v19135_v22  ;;  %15670 = vmatprep.subr.bf16.mxu1 %v19166_v32  ;;  %v18340_v22 = vcombine.high %v9066_v21, %v9082_v14  ;;  %v9097_v32 = vld [vmem:[#allocation16 + $0x430] sm:$0xff] }
 0x958   : > { %16782 = vst [vmem:[%s22552_s22 + $0x18] sm:$0xff] %v21394_v44  ;;  %15752 = vmatprep.subr.bf16.mxu0 %v19168_v34  ;;  %v9098_v34 = vld [vmem:[#allocation16 + $0x438] sm:$0xff]  ;;  %v18370_v39 = vcombine.high %v9097_v32, %v9113_v33  ;;  %v9129_v41 = vld [vmem:[#allocation16 + $0x530] sm:$0xff] }
 0x959   : > { %v18372_v40 = vcombine.high %v9098_v34, %v9114_v36  ;;  %v9130_v44 = vld [vmem:[#allocation16 + $0x538] sm:$0xff]  ;;  %v9273_v12 = vld [vmem:[#allocation16 + $0x9b0] sm:$0xff] }
 0x95a   : > { %15671 = vmatpush1.bf16.msra.mxu1 %v19165_v43  ;;  %v9145_v43 = vld [vmem:[#allocation16 + $0x5b0] sm:$0xff]  ;;  %v18530_v20 = vcombine.high %v9257_v10, %v9273_v12 }
 0x95b   : > { %15753 = vmatpush1.bf16.msra.mxu0 %v19167_v45  ;;  %15672 = vmatprep.subr.bf16.mxu1 %v19198_v48  ;;  %v9146_v45 = vld [vmem:[#allocation16 + $0x5b8] sm:$0xff]  ;;  %v18369_v48 = vcombine.low %v9097_v32, %v9113_v33  ;;  %v18402_v50 = vcombine.high %v9129_v41, %v9145_v43  ;;  %v9289_v21 = vld [vmem:[#allocation16 + $0xa30] sm:$0xff] }
 0x95c   : > { %15754 = vmatprep.subr.bf16.mxu0 %v19200_v49  ;;  %v18371_v49 = vcombine.low %v9098_v34, %v9114_v36  ;;  %v18404_v52 = vcombine.high %v9130_v44, %v9146_v45  ;;  %v9305_v14 = vld [vmem:[#allocation16 + $0xab0] sm:$0xff] }
 0x95d   : > { %v18562_v32 = vcombine.high %v9289_v21, %v9305_v14  ;;  %v9321_v34 = vld [vmem:[#allocation16 + $0xb30] sm:$0xff] }
 0x95e   : > { %15673 = vmatpush1.bf16.msra.mxu1 %v19197_v54  ;;  %v9162_v54 = vld [vmem:[#allocation16 + $0x638] sm:$0xff]  ;;  %v9337_v36 = vld [vmem:[#allocation16 + $0xbb0] sm:$0xff] }
 0x95f   : > { %15755 = vmatpush1.bf16.msra.mxu0 %v19199_v55  ;;  %15674 = vmatprep.subr.bf16.mxu1 %v19230_v28  ;;  %v9178_v55 = vld [vmem:[#allocation16 + $0x6b8] sm:$0xff]  ;;  %v18401_v28 = vcombine.low %v9129_v41, %v9145_v43  ;;  %v18594_v41 = vcombine.high %v9321_v34, %v9337_v36 }
 0x960   : > { %15756 = vmatprep.subr.bf16.mxu0 %v19232_v56  ;;  %v18403_v56 = vcombine.low %v9130_v44, %v9146_v45  ;;  %v18436_v31 = vcombine.high %v9162_v54, %v9178_v55  ;;  %v9353_v44 = vld [vmem:[#allocation16 + $0xc30] sm:$0xff] }
 0x961   : > { %v9369_v45 = vld [vmem:[#allocation16 + $0xcb0] sm:$0xff] }
 0x962   : > { %15675 = vmatpush1.bf16.msra.mxu1 %v19229_v60  ;;  %v9194_v60 = vld [vmem:[#allocation16 + $0x738] sm:$0xff] }
 0x963   : > { %15757 = vmatpush1.bf16.msra.mxu0 %v19231_v61  ;;  %15767 = vmatprep.subr.bf16.mxu1 %v18242_v62  ;;  %v9210_v61 = vld [vmem:[#allocation16 + $0x7b8] sm:$0xff]  ;;  %v18433_v62 = vcombine.low %v9161_v25, %v9177_v53  ;;  %v18626_v25 = vcombine.high %v9353_v44, %v9369_v45 }
 0x964   : > { %15849 = vmatprep.subr.bf16.mxu0 %v18244_v35  ;;  %v18435_v35 = vcombine.low %v9162_v54, %v9178_v55  ;;  %v18468_v0 = vcombine.high %v9194_v60, %v9210_v61  ;;  %v18467_v5 = vcombine.low %v9194_v60, %v9210_v61  ;;  %v9385_v54 = vld [vmem:[#allocation16 + $0xd30] sm:$0xff] }
 0x965   : > { %15677 = vmatmul.mubr.bf16.vlgmr.msra.gmra.mrb[20].mxu1 %v22523_v6  ;;  %v9401_v55 = vld [vmem:[#allocation16 + $0xdb0] sm:$0xff] }
 0x966   : > { %15759 = vmatmul.mubr.bf16.vlgmr.msra.gmra.mrb[16].mxu0 %v22523_v6  ;;  %15768 = vmatpush1.bf16.msra.mxu1 %v18241_v1  ;;  %v9225_v1 = vld [vmem:[#allocation16 + $0x830] sm:$0xff] }
 0x967   : > { %15799 = vmatprep.mubr.bf16.mxu1 %v22504_v46  ;;  %15850 = vmatpush1.bf16.msra.mxu0 %v18243_v42  ;;  %v9242_v42 = vld [vmem:[#allocation16 + $0x8b8] sm:$0xff]  ;;  %v18498_v7 = vcombine.high %v9225_v1, %v9241_v2  ;;  %v9417_v60 = vld [vmem:[#allocation16 + $0xe30] sm:$0xff] }
 0x968   : > { %15881 = vmatprep.mubr.bf16.mxu0 %v22504_v46  ;;  %15769 = vmatprep.subr.bf16.mxu1 %v18274_v4  ;;  %v18465_v4 = vcombine.low %v9193_v59, %v9209_v30  ;;  %v18658_v59 = vcombine.high %v9385_v54, %v9401_v55  ;;  %v9433_v61 = vld [vmem:[#allocation16 + $0xeb0] sm:$0xff] }
 0x969   : > { %15851 = vmatprep.subr.bf16.mxu0 %v18276_v9  ;;  %v18500_v9 = vcombine.high %v9226_v3, %v9242_v42 }
 0x96a   : > { %15770 = vmatpush1.bf16.msra.mxu1 %v18273_v13  ;;  %v9258_v13 = vld [vmem:[#allocation16 + $0x938] sm:$0xff] }
 0x96b   : > { %15852 = vmatpush1.bf16.msra.mxu0 %v18275_v15  ;;  %15771 = vmatprep.subr.bf16.mxu1 %v18306_v16  ;;  %v9274_v15 = vld [vmem:[#allocation16 + $0x9b8] sm:$0xff]  ;;  %v18497_v16 = vcombine.low %v9225_v1, %v9241_v2  ;;  %v18690_v1 = vcombine.high %v9417_v60, %v9433_v61 }
 0x96c   : > { %15853 = vmatprep.subr.bf16.mxu0 %v18308_v18  ;;  %v18499_v18 = vcombine.low %v9226_v3, %v9242_v42  ;;  %v18532_v11 = vcombine.high %v9258_v13, %v9274_v15  ;;  %v9449_v3 = vld [vmem:[#allocation16 + $0xf30] sm:$0xff] }
 0x96d   : > { %v9465_v42 = vld [vmem:[#allocation16 + $0xfb0] sm:$0xff] }
 0x96e   : > { %15772 = vmatpush1.bf16.msra.mxu1 %v18305_v23  ;;  %v9290_v23 = vld [vmem:[#allocation16 + $0xa38] sm:$0xff] }
 0x96f   : > { %15854 = vmatpush1.bf16.msra.mxu0 %v18307_v24  ;;  %15773 = vmatprep.subr.bf16.mxu1 %v18338_v27  ;;  %v9306_v24 = vld [vmem:[#allocation16 + $0xab8] sm:$0xff]  ;;  %v18529_v27 = vcombine.low %v9257_v10, %v9273_v12  ;;  %v18722_v10 = vcombine.high %v9449_v3, %v9465_v42 }
 0x970   : > { %15855 = vmatprep.subr.bf16.mxu0 %v18340_v22  ;;  %v18531_v22 = vcombine.low %v9258_v13, %v9274_v15  ;;  %v18564_v33 = vcombine.high %v9290_v23, %v9306_v24  ;;  %v9481_v13 = vld [vmem:[#allocation16 + $0x1030] sm:$0xff] }
 0x971   : > { %v9497_v15 = vld [vmem:[#allocation16 + $0x10b0] sm:$0xff] }
 0x972   : > { %15774 = vmatpush1.bf16.msra.mxu1 %v18337_v37  ;;  %v9322_v37 = vld [vmem:[#allocation16 + $0xb38] sm:$0xff] }
 0x973   : > { %15856 = vmatpush1.bf16.msra.mxu0 %v18339_v38  ;;  %15775 = vmatprep.subr.bf16.mxu1 %v18370_v39  ;;  %v9338_v38 = vld [vmem:[#allocation16 + $0xbb8] sm:$0xff]  ;;  %v18561_v39 = vcombine.low %v9289_v21, %v9305_v14  ;;  %v18754_v21 = vcombine.high %v9481_v13, %v9497_v15 }
 0x974   : > { %15857 = vmatprep.subr.bf16.mxu0 %v18372_v40  ;;  %v18563_v40 = vcombine.low %v9290_v23, %v9306_v24  ;;  %v18596_v43 = vcombine.high %v9322_v37, %v9338_v38  ;;  %v9513_v23 = vld [vmem:[#allocation16 + $0x1130] sm:$0xff] }
 0x975   : > { %v9529_v24 = vld [vmem:[#allocation16 + $0x11b0] sm:$0xff] }
 0x976   : > { %15776 = vmatpush1.bf16.msra.mxu1 %v18369_v48  ;;  %v9354_v48 = vld [vmem:[#allocation16 + $0xc38] sm:$0xff] }
 0x977   : > { %15858 = vmatpush1.bf16.msra.mxu0 %v18371_v49  ;;  %15777 = vmatprep.subr.bf16.mxu1 %v18402_v50  ;;  %v9370_v49 = vld [vmem:[#allocation16 + $0xcb8] sm:$0xff]  ;;  %v18593_v50 = vcombine.low %v9321_v34, %v9337_v36  ;;  %v18786_v34 = vcombine.high %v9513_v23, %v9529_v24  ;;  %v9545_v36 = vld [vmem:[#allocation16 + $0x1230] sm:$0xff] }
 0x978   : > { %15859 = vmatprep.subr.bf16.mxu0 %v18404_v52  ;;  %v18595_v52 = vcombine.low %v9322_v37, %v9338_v38  ;;  %v18628_v53 = vcombine.high %v9354_v48, %v9370_v49  ;;  %v9561_v37 = vld [vmem:[#allocation16 + $0x12b0] sm:$0xff] }
 0x97a   : > { %15778 = vmatpush1.bf16.msra.mxu1 %v18401_v28  ;;  %v9386_v28 = vld [vmem:[#allocation16 + $0xd38] sm:$0xff] }
 0x97b   : > { %15860 = vmatpush1.bf16.msra.mxu0 %v18403_v56  ;;  %15779 = vmatprep.subr.bf16.mxu1 %v18434_v57  ;;  %v9402_v56 = vld [vmem:[#allocation16 + $0xdb8] sm:$0xff]  ;;  %v18625_v57 = vcombine.low %v9353_v44, %v9369_v45  ;;  %v18818_v44 = vcombine.high %v9545_v36, %v9561_v37 }
 0x97c   : > { %15861 = vmatprep.subr.bf16.mxu0 %v18436_v31  ;;  %v18627_v31 = vcombine.low %v9354_v48, %v9370_v49  ;;  %v18660_v30 = vcombine.high %v9386_v28, %v9402_v56  ;;  %v9577_v48 = vld [vmem:[#allocation16 + $0x1330] sm:$0xff] }
 0x97d   : > { %v9593_v49 = vld [vmem:[#allocation16 + $0x13b0] sm:$0xff] }
 0x97e   : > { %15780 = vmatpush1.bf16.msra.mxu1 %v18433_v62  ;;  %v9418_v62 = vld [vmem:[#allocation16 + $0xe38] sm:$0xff] }
 0x97f   : > { %15862 = vmatpush1.bf16.msra.mxu0 %v18435_v35  ;;  %15781 = vmatprep.subr.bf16.mxu1 %v18466_v63  ;;  %v9434_v35 = vld [vmem:[#allocation16 + $0xeb8] sm:$0xff]  ;;  %v18657_v63 = vcombine.low %v9385_v54, %v9401_v55  ;;  %v18850_v54 = vcombine.high %v9577_v48, %v9593_v49 }
 0x980   : > { %15863 = vmatprep.subr.bf16.mxu0 %v18468_v0  ;;  %v18659_v0 = vcombine.low %v9386_v28, %v9402_v56  ;;  %v18692_v2 = vcombine.high %v9418_v62, %v9434_v35  ;;  %v9609_v28 = vld [vmem:[#allocation16 + $0x1430] sm:$0xff] }
 0x981   : > { %v9625_v56 = vld [vmem:[#allocation16 + $0x14b0] sm:$0xff] }
 0x982   : > { %15782 = vmatpush1.bf16.msra.mxu1 %v18465_v4  ;;  %v9450_v4 = vld [vmem:[#allocation16 + $0xf38] sm:$0xff] }
 0x983   : > { %15864 = vmatpush1.bf16.msra.mxu0 %v18467_v5  ;;  %15783 = vmatprep.subr.bf16.mxu1 %v18498_v7  ;;  %v9466_v5 = vld [vmem:[#allocation16 + $0xfb8] sm:$0xff]  ;;  %v18689_v7 = vcombine.low %v9417_v60, %v9433_v61  ;;  %v18882_v60 = vcombine.high %v9609_v28, %v9625_v56 }
 0x984   : > { %15865 = vmatprep.subr.bf16.mxu0 %v18500_v9  ;;  %v18691_v9 = vcombine.low %v9418_v62, %v9434_v35  ;;  %v18724_v12 = vcombine.high %v9450_v4, %v9466_v5  ;;  %v9641_v62 = vld [vmem:[#allocation16 + $0x1530] sm:$0xff] }
 0x985   : > { %v9657_v35 = vld [vmem:[#allocation16 + $0x15b0] sm:$0xff] }
 0x986   : > { %15784 = vmatpush1.bf16.msra.mxu1 %v18497_v16  ;;  %v9482_v16 = vld [vmem:[#allocation16 + $0x1038] sm:$0xff] }
 0x987   : > { %15866 = vmatpush1.bf16.msra.mxu0 %v18499_v18  ;;  %15785 = vmatprep.subr.bf16.mxu1 %v18530_v20  ;;  %v9498_v18 = vld [vmem:[#allocation16 + $0x10b8] sm:$0xff]  ;;  %v18721_v20 = vcombine.low %v9449_v3, %v9465_v42  ;;  %v22570_v3 = vsub.s32 6, %v22461_v17  ;;  %v22573_v42 = vsub.s32 5, %v22461_v17 }
 0x988   : > { %15867 = vmatprep.subr.bf16.mxu0 %v18532_v11  ;;  %v18723_v11 = vcombine.low %v9450_v4, %v9466_v5  ;;  %v18756_v14 = vcombine.high %v9482_v16, %v9498_v18  ;;  %v22576_v5 = vsub.s32 7, %v22461_v17 }
 0x98a   : > { %15786 = vmatpush1.bf16.msra.mxu1 %v18529_v27  ;;  %v18753_v27 = vcombine.low %v9481_v13, %v9497_v15  ;;  %v9674_v15 = vld [vmem:[#allocation16 + $0x1638] sm:$0xff] }
 0x98b   : > { %15868 = vmatpush1.bf16.msra.mxu0 %v18531_v22  ;;  %15787 = vmatprep.subr.bf16.mxu1 %v18562_v32  ;;  %v9514_v22 = vld [vmem:[#allocation16 + $0x1138] sm:$0xff] }
 0x98c   : > { %15869 = vmatprep.subr.bf16.mxu0 %v18564_v33  ;;  %v9530_v32 = vld [vmem:[#allocation16 + $0x11b8] sm:$0xff]  ;;  %v18755_v33 = vcombine.low %v9482_v16, %v9498_v18  ;;  %v10022_v18 = vrot.slane %v22541_v51, %v22570_v3 }
 0x98d   : > { %v18788_v38 = vcombine.high %v9514_v22, %v9530_v32  ;;  %v9690_v16 = vld [vmem:[#allocation16 + $0x16b8] sm:$0xff] }
 0x98e   : > { %15788 = vmatpush1.bf16.msra.mxu1 %v18561_v39  ;;  %v9546_v39 = vld [vmem:[#allocation16 + $0x1238] sm:$0xff] }
 0x98f   : > { %15870 = vmatpush1.bf16.msra.mxu0 %v18563_v40  ;;  %15789 = vmatprep.subr.bf16.mxu1 %v18594_v41  ;;  %v9562_v40 = vld [vmem:[#allocation16 + $0x12b8] sm:$0xff]  ;;  %v18785_v41 = vcombine.low %v9513_v23, %v9529_v24  ;;  %v18948_v24 = vcombine.high %v9674_v15, %v9690_v16 }
 0x990   : > { %15871 = vmatprep.subr.bf16.mxu0 %v18596_v43  ;;  %v18787_v43 = vcombine.low %v9514_v22, %v9530_v32  ;;  %v18820_v45 = vcombine.high %v9546_v39, %v9562_v40  ;;  %v9721_v22 = vld [vmem:[#allocation16 + $0x17b0] sm:$0xff] }
 0x992   : > { %15790 = vmatpush1.bf16.msra.mxu1 %v18593_v50  ;;  %v9578_v50 = vld [vmem:[#allocation16 + $0x1338] sm:$0xff] }
 0x993   : > { %15872 = vmatpush1.bf16.msra.mxu0 %v18595_v52  ;;  %15791 = vmatprep.subr.bf16.mxu1 %v18626_v25  ;;  %v9594_v52 = vld [vmem:[#allocation16 + $0x13b8] sm:$0xff]  ;;  %v18817_v25 = vcombine.low %v9545_v36, %v9561_v37 }
 0x994   : > { %15873 = vmatprep.subr.bf16.mxu0 %v18628_v53  ;;  %v18819_v53 = vcombine.low %v9546_v39, %v9562_v40  ;;  %v18852_v55 = vcombine.high %v9578_v50, %v9594_v52  ;;  %v9706_v36 = vld [vmem:[#allocation16 + $0x1738] sm:$0xff] }
 0x995   : > { %v9722_v37 = vld [vmem:[#allocation16 + $0x17b8] sm:$0xff] }
 0x996   : > { %15792 = vmatpush1.bf16.msra.mxu1 %v18625_v57  ;;  %v9610_v57 = vld [vmem:[#allocation16 + $0x1438] sm:$0xff] }
 0x997   : > { %15874 = vmatpush1.bf16.msra.mxu0 %v18627_v31  ;;  %15793 = vmatprep.subr.bf16.mxu1 %v18658_v59  ;;  %v9626_v31 = vld [vmem:[#allocation16 + $0x14b8] sm:$0xff]  ;;  %v18849_v59 = vcombine.low %v9577_v48, %v9593_v49  ;;  %v18947_v49 = vcombine.low %v9674_v15, %v9690_v16 }
 0x998   : > { %15875 = vmatprep.subr.bf16.mxu0 %v18660_v30  ;;  %v18851_v30 = vcombine.low %v9578_v50, %v9594_v52  ;;  %v18884_v61 = vcombine.high %v9610_v57, %v9626_v31  ;;  %v18883_v4 = vcombine.low %v9610_v57, %v9626_v31  ;;  %v9737_v52 = vld [vmem:[#allocation16 + $0x1830] sm:$0xff]  ;;  %v9738_v57 = vld [vmem:[#allocation16 + $0x1838] sm:$0xff] }
 0x999   : > { %v9754_v31 = vld [vmem:[#allocation16 + $0x18b8] sm:$0xff] }
 0x99a   : > { %15794 = vmatpush1.bf16.msra.mxu1 %v18657_v63  ;;  %v22567_v63 = vsub.s32 4, %v22461_v17  ;;  %v10026_v17 = vrot.slane %v22541_v51, %v22576_v5  ;;  %v9818_v15 = vld [vmem:[#allocation16 + $0x1ab8] sm:$0xff] }
 0x99b   : > { %15876 = vmatpush1.bf16.msra.mxu0 %v18659_v0  ;;  %15795 = vmatprep.subr.bf16.mxu1 %v18690_v1  ;;  %v9642_v0 = vld [vmem:[#allocation16 + $0x1538] sm:$0xff] }
 0x99c   : > { %15877 = vmatprep.subr.bf16.mxu0 %v18692_v2  ;;  %v9658_v1 = vld [vmem:[#allocation16 + $0x15b8] sm:$0xff]  ;;  %v18881_v2 = vcombine.low %v9609_v28, %v9625_v56  ;;  %v10014_v13 = vrot.slane %v22541_v51, %v22567_v63  ;;  %v9753_v28 = vld [vmem:[#allocation16 + $0x18b0] sm:$0xff] }
 0x99e   : > { %15796 = vmatpush1.bf16.msra.mxu1 %v18689_v7  ;;  %v18914_v7 = vcombine.high %v9641_v62, %v9657_v35 }
 0x99f   : > { %15878 = vmatpush1.bf16.msra.mxu0 %v18691_v9  ;;  %15797 = vmatprep.subr.bf16.mxu1 %v18722_v10  ;;  %v18916_v9 = vcombine.high %v9642_v0, %v9658_v1  ;;  %v9673_v10 = vld [vmem:[#allocation16 + $0x1630] sm:$0xff] }
 0x9a0   : > { %15879 = vmatprep.subr.bf16.mxu0 %v18724_v12  ;;  %v9689_v12 = vld [vmem:[#allocation16 + $0x16b0] sm:$0xff] }
 0x9a2   : > { %15798 = vmatpush1.bf16.msra.mxu1 %v18721_v20  ;;  %v10018_v20 = vrot.slane %v22541_v51, %v22573_v42 }
 0x9a3   : > { %15880 = vmatpush1.bf16.msra.mxu0 %v18723_v11  ;;  %15808 = vmatprep.subr.bf16.mxu1 %v18754_v21  ;;  %v18913_v11 = vcombine.low %v9641_v62, %v9657_v35  ;;  %v18915_v21 = vcombine.low %v9642_v0, %v9658_v1  ;;  %v9769_v62 = vld [vmem:[#allocation16 + $0x1930] sm:$0xff]  ;;  %v9770_v0 = vld [vmem:[#allocation16 + $0x1938] sm:$0xff] }
 0x9a4   : > { %15890 = vmatprep.subr.bf16.mxu0 %v18756_v14  ;;  %v18946_v14 = vcombine.high %v9673_v10, %v9689_v12  ;;  %v9785_v35 = vld [vmem:[#allocation16 + $0x19b0] sm:$0xff]  ;;  %v9786_v1 = vld [vmem:[#allocation16 + $0x19b8] sm:$0xff] }
 0x9a5   : > { %15800 = vmatmul.mubr.bf16.vlgmr.msra.gmra.mrb[24].mxu1 %v22506_v47  ;;  %v19041_v16 = vcombine.low %v9769_v62, %v9785_v35 }
 0x9a6   : > { %15882 = vmatmul.mubr.bf16.vlgmr.msra.gmra.mrb[20].mxu0 %v22506_v47  ;;  %15809 = vmatpush1.bf16.msra.mxu1 %v18753_v27  ;;  %v9705_v27 = vld [vmem:[#allocation16 + $0x1730] sm:$0xff] }
 0x9a7   : > { %15840 = vmatprep.mubr.bf16.mxu1 %v22516_v58  ;;  %15891 = vmatpush1.bf16.msra.mxu0 %v18755_v33  ;;  %v18978_v50 = vcombine.high %v9705_v27, %v9721_v22 }
 0x9a8   : > { %15922 = vmatprep.mubr.bf16.mxu0 %v22516_v58  ;;  %15810 = vmatprep.subr.bf16.mxu1 %v18786_v34 }
 0x9a9   : > { %15892 = vmatprep.subr.bf16.mxu0 %v18788_v38 }
 0x9aa   : > { %15811 = vmatpush1.bf16.msra.mxu1 %v18785_v41 }
 0x9ab   : > { %15893 = vmatpush1.bf16.msra.mxu0 %v18787_v43  ;;  %15812 = vmatprep.subr.bf16.mxu1 %v18818_v44  ;;  %v18945_v43 = vcombine.low %v9673_v10, %v9689_v12  ;;  %v9801_v10 = vld [vmem:[#allocation16 + $0x1a30] sm:$0xff] }
 0x9ac   : > { %15894 = vmatprep.subr.bf16.mxu0 %v18820_v45  ;;  %v9817_v12 = vld [vmem:[#allocation16 + $0x1ab0] sm:$0xff] }
 0x9ae   : > { %15813 = vmatpush1.bf16.msra.mxu1 %v18817_v25 }
 0x9af   : > { %15895 = vmatpush1.bf16.msra.mxu0 %v18819_v53  ;;  %15814 = vmatprep.subr.bf16.mxu1 %v18850_v54 }
 0x9b0   : > { %15896 = vmatprep.subr.bf16.mxu0 %v18852_v55  ;;  %v18980_v55 = vcombine.high %v9706_v36, %v9722_v37 }
 0x9b2   : > { %15815 = vmatpush1.bf16.msra.mxu1 %v18849_v59  ;;  %v18977_v59 = vcombine.low %v9705_v27, %v9721_v22 }
 0x9b3   : > { %15897 = vmatpush1.bf16.msra.mxu0 %v18851_v30  ;;  %15816 = vmatprep.subr.bf16.mxu1 %v18882_v60  ;;  %v18979_v30 = vcombine.low %v9706_v36, %v9722_v37  ;;  %v19010_v60 = vcombine.high %v9737_v52, %v9753_v28  ;;  %v19073_v37 = vcombine.low %v9801_v10, %v9817_v12 }
 0x9b4   : > { %15898 = vmatprep.subr.bf16.mxu0 %v18884_v61  ;;  %v19012_v61 = vcombine.high %v9738_v57, %v9754_v31 }
 0x9b6   : > { %15817 = vmatpush1.bf16.msra.mxu1 %v18881_v2  ;;  %v19009_v2 = vcombine.low %v9737_v52, %v9753_v28 }
 0x9b7   : > { %15899 = vmatpush1.bf16.msra.mxu0 %v18883_v4  ;;  %15818 = vmatprep.subr.bf16.mxu1 %v18914_v7  ;;  %v19011_v4 = vcombine.low %v9738_v57, %v9754_v31  ;;  %v19042_v7 = vcombine.high %v9769_v62, %v9785_v35  ;;  %v9930_v62 = vld [vmem:[#allocation16 + $0x1e38] sm:$0xff] }
 0x9b8   : > { %v15514_v23 = vpop.f32.mrb[16].mxu1  ;;  %15900 = vmatprep.subr.bf16.mxu0 %v18916_v9  ;;  %v19044_v9 = vcombine.high %v9770_v0, %v9786_v1  ;;  %v9946_v35 = vld [vmem:[#allocation16 + $0x1eb8] sm:$0xff] }
 0x9b9   : > { %v19306_v32 = vadd.f32 %v15514_v23, %v10014_v13  ;;  %v15596_v33 = vpop.f32.mrb[12].mxu0  ;;  %v15516_v34 = vpop.f32.mrb[17].mxu1  ;;  %v9802_v13 = vld [vmem:[#allocation16 + $0x1a38] sm:$0xff]  ;;  %v9833_v23 = vld [vmem:[#allocation16 + $0x1b30] sm:$0xff] }
 0x9ba   : > { %v19308_v38 = vadd.f32 %v15596_v33, %v10022_v18  ;;  %v19307_v39 = vadd.f32 %v15516_v34, %v10018_v20  ;;  %v15598_v40 = vpop.f32.mrb[13].mxu0  ;;  %v15518_v41 = vpop.f32.mrb[18].mxu1  ;;  %15819 = vmatpush1.bf16.msra.mxu1 %v18913_v11  ;;  %v19043_v20 = vcombine.low %v9770_v0, %v9786_v1  ;;  %v19074_v11 = vcombine.high %v9801_v10, %v9817_v12  ;;  %v9850_v33 = vld [vmem:[#allocation16 + $0x1bb8] sm:$0xff]  ;;  %v9961_v10 = vld [vmem:[#allocation16 + $0x1f30] sm:$0xff] }
 0x9bb   : > { %v19257_v51 = vmul.f32 -1.442695, %v19306_v32  ;;  %v19309_v44 = vadd.f32 %v15598_v40, %v10026_v17  ;;  %v15600_v45 = vpop.f32.mrb[14].mxu0  ;;  %15901 = vmatpush1.bf16.msra.mxu0 %v18915_v21  ;;  %v15519_v48 = vpop.f32.mrb[19].mxu1  ;;  %15820 = vmatprep.subr.bf16.mxu1 %v18946_v14  ;;  %v19076_v14 = vcombine.high %v9802_v13, %v9818_v15  ;;  %v9834_v32 = vld [vmem:[#allocation16 + $0x1b38] sm:$0xff]  ;;  %v9977_v12 = vld [vmem:[#allocation16 + $0x1fb0] sm:$0xff] }
 0x9bc   : > { %v19259_v25 = vmul.f32 -1.442695, %v19308_v38  ;;  %v19258_v53 = vmul.f32 -1.442695, %v19307_v39  ;;  %v15601_v54 = vpop.f32.mrb[15].mxu0  ;;  %15902 = vmatprep.subr.bf16.mxu0 %v18948_v24  ;;  %v9849_v24 = vld [vmem:[#allocation16 + $0x1bb0] sm:$0xff]  ;;  %v19075_v39 = vcombine.low %v9802_v13, %v9818_v15  ;;  %v19108_v41 = vcombine.high %v9834_v32, %v9850_v33 }
 0x9bd   : > { %21395 = vpow2.f32 %v19257_v51  ;;  %v19260_v56 = vmul.f32 -1.442695, %v19309_v44  ;;  %v19106_v40 = vcombine.high %v9833_v23, %v9849_v24  ;;  %v9881_v51 = vld [vmem:[#allocation16 + $0x1cb0] sm:$0xff]  ;;  %v9866_v44 = vld [vmem:[#allocation16 + $0x1c38] sm:$0xff]  ;;  %v19105_v48 = vcombine.low %v9833_v23, %v9849_v24  ;;  %v8988_v23 = vld [vmem:[#allocation16 + $0xc8] sm:$0xff] }
 0x9be   : > { %21397 = vpow2.f32 %v19259_v25  ;;  %15821 = vmatpush1.bf16.msra.mxu1 %v18945_v43  ;;  %v9865_v43 = vld [vmem:[#allocation16 + $0x1c30] sm:$0xff]  ;;  %v9882_v45 = vld [vmem:[#allocation16 + $0x1cb8] sm:$0xff]  ;;  %v19233_v24 = vcombine.low %v9961_v10, %v9977_v12 }
 0x9bf   : > { %21399 = vpow2.f32 %v19258_v53  ;;  %15903 = vmatpush1.bf16.msra.mxu0 %v18947_v49  ;;  %15822 = vmatprep.subr.bf16.mxu1 %v18978_v50  ;;  %v19107_v49 = vcombine.low %v9834_v32, %v9850_v33  ;;  %v19138_v50 = vcombine.high %v9865_v43, %v9881_v51  ;;  %v19140_v52 = vcombine.high %v9866_v44, %v9882_v45  ;;  %v9897_v25 = vld [vmem:[#allocation16 + $0x1d30] sm:$0xff]  ;;  %v9898_v54 = vld [vmem:[#allocation16 + $0x1d38] sm:$0xff]  ;;  %v9003_v33 = vld [vmem:[#allocation16 + $0x140] sm:$0xff] }
 0x9c0   : > { %21401 = vpow2.f32 %v19260_v56  ;;  %15904 = vmatprep.subr.bf16.mxu0 %v18980_v55  ;;  %v9913_v53 = vld [vmem:[#allocation16 + $0x1db0] sm:$0xff]  ;;  %v9914_v55 = vld [vmem:[#allocation16 + $0x1db8] sm:$0xff]  ;;  %v19137_v28 = vcombine.low %v9865_v43, %v9881_v51  ;;  %v19139_v56 = vcombine.low %v9866_v44, %v9882_v45  ;;  %v9051_v43 = vld [vmem:[#allocation16 + $0x2c0] sm:$0xff] }
 0x9c1   : > { %v19170_v57 = vcombine.high %v9897_v25, %v9913_v53  ;;  %v19169_v1 = vcombine.low %v9897_v25, %v9913_v53  ;;  %v9962_v13 = vld [vmem:[#allocation16 + $0x1f38] sm:$0xff]  ;;  %v9036_v44 = vld [vmem:[#allocation16 + $0x248] sm:$0xff]  ;;  %v9067_v25 = vld [vmem:[#allocation16 + $0x340] sm:$0xff] }
 0x9c2   : > { %15823 = vmatpush1.bf16.msra.mxu1 %v18977_v59  ;;  %v19172_v59 = vcombine.high %v9898_v54, %v9914_v55  ;;  %v9978_v15 = vld [vmem:[#allocation16 + $0x1fb8] sm:$0xff]  ;;  %v9052_v45 = vld [vmem:[#allocation16 + $0x2c8] sm:$0xff]  ;;  %v9083_v53 = vld [vmem:[#allocation16 + $0x3c0] sm:$0xff] }
 0x9c3   : > { %15905 = vmatpush1.bf16.msra.mxu0 %v18979_v30  ;;  %15824 = vmatprep.subr.bf16.mxu1 %v19010_v60  ;;  %v9929_v30 = vld [vmem:[#allocation16 + $0x1e30] sm:$0xff] }
 0x9c4   : > { %15906 = vmatprep.subr.bf16.mxu0 %v19012_v61  ;;  %v9945_v60 = vld [vmem:[#allocation16 + $0x1eb0] sm:$0xff] }
 0x9c6   : > { %15825 = vmatpush1.bf16.msra.mxu1 %v19009_v2 }
 0x9c7   : > { %v21396_v18 = vpop.eup %21395  ;;  %15907 = vmatpush1.bf16.msra.mxu0 %v19011_v4  ;;  %15826 = vmatprep.subr.bf16.mxu1 %v19042_v7  ;;  %v19171_v4 = vcombine.low %v9898_v54, %v9914_v55  ;;  %v19202_v7 = vcombine.high %v9929_v30, %v9945_v60  ;;  %v9068_v54 = vld [vmem:[#allocation16 + $0x348] sm:$0xff] }
 0x9c8   : > { %v21398_v17 = vpop.eup %21397  ;;  %v16687_v21 = vadd.f32 1.0, %v21396_v18  ;;  %15908 = vmatprep.subr.bf16.mxu0 %v19044_v9  ;;  %v19204_v9 = vcombine.high %v9930_v62, %v9946_v35  ;;  %v19203_v18 = vcombine.low %v9930_v62, %v9946_v35  ;;  %v9084_v55 = vld [vmem:[#allocation16 + $0x3c8] sm:$0xff]  ;;  %v18341_v62 = vcombine.low %v9067_v25, %v9083_v53 }
 0x9c9   : > { %v21400_v27 = vpop.eup %21399  ;;  %v16689_v22 = vadd.f32 1.0, %v21398_v17  ;;  %v8971_v17 = vld [vmem:[#allocation16 + $0x40] sm:$0xff]  ;;  %v18343_v35 = vcombine.low %v9068_v54, %v9084_v55 }
 0x9ca   : > { %v21402_v34 = vpop.eup %21401  ;;  %21403 = vrcp.f32 %v16687_v21  ;;  %v16688_v36 = vadd.f32 1.0, %v21400_v27  ;;  %15827 = vmatpush1.bf16.msra.mxu1 %v19041_v16  ;;  %v19201_v16 = vcombine.low %v9929_v30, %v9945_v60  ;;  %v8987_v21 = vld [vmem:[#allocation16 + $0xc0] sm:$0xff]  ;;  %v19235_v27 = vcombine.low %v9962_v13, %v9978_v15  ;;  %v9100_v60 = vld [vmem:[#allocation16 + $0x448] sm:$0xff] }
 0x9cb   : > { %21405 = vrcp.f32 %v16689_v22  ;;  %v16690_v38 = vadd.f32 1.0, %v21402_v34  ;;  %15909 = vmatpush1.bf16.msra.mxu0 %v19043_v20  ;;  %15828 = vmatprep.subr.bf16.mxu1 %v19074_v11  ;;  %v19234_v20 = vcombine.high %v9961_v10, %v9977_v12  ;;  %v19236_v11 = vcombine.high %v9962_v13, %v9978_v15  ;;  %v9019_v34 = vld [vmem:[#allocation16 + $0x1c0] sm:$0xff] }
 0x9cc   : > { %21407 = vrcp.f32 %v16688_v36  ;;  %15910 = vmatprep.subr.bf16.mxu0 %v19076_v14  ;;  %v8972_v14 = vld [vmem:[#allocation16 + $0x48] sm:$0xff]  ;;  %v18246_v22 = vcombine.high %v8971_v17, %v8987_v21  ;;  %v18245_v36 = vcombine.low %v8971_v17, %v8987_v21  ;;  %v9115_v30 = vld [vmem:[#allocation16 + $0x4c0] sm:$0xff] }
 0x9cd   : > { %21409 = vrcp.f32 %v16690_v38  ;;  %v18248_v32 = vcombine.high %v8972_v14, %v8988_v23  ;;  %v9020_v38 = vld [vmem:[#allocation16 + $0x1c8] sm:$0xff] }
 0x9ce   : > { %15829 = vmatpush1.bf16.msra.mxu1 %v19073_v37  ;;  %v9004_v37 = vld [vmem:[#allocation16 + $0x148] sm:$0xff] }
 0x9cf   : > { %15911 = vmatpush1.bf16.msra.mxu0 %v19075_v39  ;;  %15830 = vmatprep.subr.bf16.mxu1 %v19106_v40  ;;  %v18247_v39 = vcombine.low %v8972_v14, %v8988_v23  ;;  %v18278_v40 = vcombine.high %v9003_v33, %v9019_v34  ;;  %v18280_v51 = vcombine.high %v9004_v37, %v9020_v38 }
 0x9d0   : > { %15912 = vmatprep.subr.bf16.mxu0 %v19108_v41  ;;  %v9035_v41 = vld [vmem:[#allocation16 + $0x240] sm:$0xff] }
 0x9d2   : > { %15831 = vmatpush1.bf16.msra.mxu1 %v19105_v48  ;;  %v18277_v48 = vcombine.low %v9003_v33, %v9019_v34 }
 0x9d3   : > { %15913 = vmatpush1.bf16.msra.mxu0 %v19107_v49  ;;  %15832 = vmatprep.subr.bf16.mxu1 %v19138_v50  ;;  %v18279_v49 = vcombine.low %v9004_v37, %v9020_v38  ;;  %v18310_v50 = vcombine.high %v9035_v41, %v9051_v43  ;;  %v9227_v38 = vld [vmem:[#allocation16 + $0x840] sm:$0xff] }
 0x9d4   : > { %v21404_v31 = vpop.eup %21403  ;;  %15914 = vmatprep.subr.bf16.mxu0 %v19140_v52  ;;  %v18312_v52 = vcombine.high %v9036_v44, %v9052_v45 }
 0x9d5   : > { %v21406_v61 = vpop.eup %21405  ;;  %16783 = vst [vmem:[%s22552_s22 + $0x20] sm:$0xff] %v21404_v31  ;;  %v18344_v31 = vcombine.high %v9068_v54, %v9084_v55 }
 0x9d6   : > { %v21408_v0 = vpop.eup %21407  ;;  %16785 = vst [vmem:[%s22552_s22 + $0x30] sm:$0xff] %v21406_v61  ;;  %15833 = vmatpush1.bf16.msra.mxu1 %v19137_v28  ;;  %v18309_v28 = vcombine.low %v9035_v41, %v9051_v43  ;;  %v9116_v61 = vld [vmem:[#allocation16 + $0x4c8] sm:$0xff] }
 0x9d7   : > { %v21410_v2 = vpop.eup %21409  ;;  %16784 = vst [vmem:[%s22552_s22 + $0x28] sm:$0xff] %v21408_v0  ;;  %15915 = vmatpush1.bf16.msra.mxu0 %v19139_v56  ;;  %15834 = vmatprep.subr.bf16.mxu1 %v19170_v57  ;;  %v18311_v56 = vcombine.low %v9036_v44, %v9052_v45  ;;  %v18342_v57 = vcombine.high %v9067_v25, %v9083_v53  ;;  %v9244_v41 = vld [vmem:[#allocation16 + $0x8c8] sm:$0xff] }
 0x9d8   : > { %16786 = vst [vmem:[%s22552_s22 + $0x38] sm:$0xff] %v21410_v2  ;;  %15916 = vmatprep.subr.bf16.mxu0 %v19172_v59  ;;  %v9099_v59 = vld [vmem:[#allocation16 + $0x440] sm:$0xff]  ;;  %v18375_v12 = vcombine.low %v9100_v60, %v9116_v61 }
 0x9d9   : > { %v18374_v0 = vcombine.high %v9099_v59, %v9115_v30  ;;  %v9131_v2 = vld [vmem:[#allocation16 + $0x540] sm:$0xff]  ;;  %v18373_v10 = vcombine.low %v9099_v59, %v9115_v30 }
 0x9da   : > { %15835 = vmatpush1.bf16.msra.mxu1 %v19169_v1  ;;  %v18376_v1 = vcombine.high %v9100_v60, %v9116_v61 }
 0x9db   : > { %15917 = vmatpush1.bf16.msra.mxu0 %v19171_v4  ;;  %15836 = vmatprep.subr.bf16.mxu1 %v19202_v7  ;;  %v9147_v4 = vld [vmem:[#allocation16 + $0x5c0] sm:$0xff]  ;;  %v9132_v7 = vld [vmem:[#allocation16 + $0x548] sm:$0xff] }
 0x9dc   : > { %15918 = vmatprep.subr.bf16.mxu0 %v19204_v9  ;;  %v9148_v9 = vld [vmem:[#allocation16 + $0x5c8] sm:$0xff]  ;;  %v18406_v13 = vcombine.high %v9131_v2, %v9147_v4  ;;  %v18405_v17 = vcombine.low %v9131_v2, %v9147_v4 }
 0x9dd   : > { %v18408_v15 = vcombine.high %v9132_v7, %v9148_v9  ;;  %v18407_v21 = vcombine.low %v9132_v7, %v9148_v9 }
 0x9de   : > { %15837 = vmatpush1.bf16.msra.mxu1 %v19201_v16  ;;  %v9163_v16 = vld [vmem:[#allocation16 + $0x640] sm:$0xff] }
 0x9df   : > { %15919 = vmatpush1.bf16.msra.mxu0 %v19203_v18  ;;  %15838 = vmatprep.subr.bf16.mxu1 %v19234_v20  ;;  %v9179_v18 = vld [vmem:[#allocation16 + $0x6c0] sm:$0xff]  ;;  %v9164_v20 = vld [vmem:[#allocation16 + $0x648] sm:$0xff] }
 0x9e0   : > { %15920 = vmatprep.subr.bf16.mxu0 %v19236_v11  ;;  %v9180_v11 = vld [vmem:[#allocation16 + $0x6c8] sm:$0xff]  ;;  %v18438_v14 = vcombine.high %v9163_v16, %v9179_v18  ;;  %v18437_v33 = vcombine.low %v9163_v16, %v9179_v18 }
 0x9e1   : > { %v18440_v23 = vcombine.high %v9164_v20, %v9180_v11  ;;  %v18439_v34 = vcombine.low %v9164_v20, %v9180_v11 }
 0x9e2   : > { %15839 = vmatpush1.bf16.msra.mxu1 %v19233_v24  ;;  %v9195_v24 = vld [vmem:[#allocation16 + $0x740] sm:$0xff] }
 0x9e3   : > { %15921 = vmatpush1.bf16.msra.mxu0 %v19235_v27  ;;  %15931 = vmatprep.subr.bf16.mxu1 %v18246_v22  ;;  %v9211_v27 = vld [vmem:[#allocation16 + $0x7c0] sm:$0xff]  ;;  %v9196_v22 = vld [vmem:[#allocation16 + $0x748] sm:$0xff] }
 0x9e4   : > { %16013 = vmatprep.subr.bf16.mxu0 %v18248_v32  ;;  %v9212_v32 = vld [vmem:[#allocation16 + $0x7c8] sm:$0xff]  ;;  %v18469_v43 = vcombine.low %v9195_v24, %v9211_v27 }
 0x9e5   : > { %15841 = vmatmul.mubr.bf16.vlgmr.msra.gmra.mrb[24].mxu1 %v22523_v6  ;;  %v18472_v37 = vcombine.high %v9196_v22, %v9212_v32 }
 0x9e6   : > { %15923 = vmatmul.mubr.bf16.vlgmr.msra.gmra.mrb[20].mxu0 %v22523_v6  ;;  %15932 = vmatpush1.bf16.msra.mxu1 %v18245_v36  ;;  %v18470_v36 = vcombine.high %v9195_v24, %v9211_v27 }
 0x9e7   : > { %15963 = vmatprep.mubr.bf16.mxu1 %v22504_v46  ;;  %16014 = vmatpush1.bf16.msra.mxu0 %v18247_v39  ;;  %v9243_v39 = vld [vmem:[#allocation16 + $0x8c0] sm:$0xff] }
 0x9e8   : > { %16045 = vmatprep.mubr.bf16.mxu0 %v22504_v46  ;;  %15933 = vmatprep.subr.bf16.mxu1 %v18278_v40  ;;  %v9228_v40 = vld [vmem:[#allocation16 + $0x848] sm:$0xff]  ;;  %v18502_v44 = vcombine.high %v9227_v38, %v9243_v39  ;;  %v18501_v25 = vcombine.low %v9227_v38, %v9243_v39 }
 0x9e9   : > { %16015 = vmatprep.subr.bf16.mxu0 %v18280_v51  ;;  %v18471_v51 = vcombine.low %v9196_v22, %v9212_v32  ;;  %v18504_v45 = vcombine.high %v9228_v40, %v9244_v41  ;;  %v18503_v53 = vcombine.low %v9228_v40, %v9244_v41 }
 0x9ea   : > { %15934 = vmatpush1.bf16.msra.mxu1 %v18277_v48  ;;  %v9259_v48 = vld [vmem:[#allocation16 + $0x940] sm:$0xff] }
 0x9eb   : > { %16016 = vmatpush1.bf16.msra.mxu0 %v18279_v49  ;;  %15935 = vmatprep.subr.bf16.mxu1 %v18310_v50  ;;  %v9275_v49 = vld [vmem:[#allocation16 + $0x9c0] sm:$0xff]  ;;  %v9260_v50 = vld [vmem:[#allocation16 + $0x948] sm:$0xff] }
 0x9ec   : > { %16017 = vmatprep.subr.bf16.mxu0 %v18312_v52  ;;  %v9276_v52 = vld [vmem:[#allocation16 + $0x9c8] sm:$0xff]  ;;  %v18534_v54 = vcombine.high %v9259_v48, %v9275_v49  ;;  %v18533_v59 = vcombine.low %v9259_v48, %v9275_v49 }
 0x9ed   : > { %v18536_v55 = vcombine.high %v9260_v50, %v9276_v52  ;;  %v18535_v30 = vcombine.low %v9260_v50, %v9276_v52 }
 0x9ee   : > { %15936 = vmatpush1.bf16.msra.mxu1 %v18309_v28  ;;  %v9291_v28 = vld [vmem:[#allocation16 + $0xa40] sm:$0xff] }
 0x9ef   : > { %16018 = vmatpush1.bf16.msra.mxu0 %v18311_v56  ;;  %15937 = vmatprep.subr.bf16.mxu1 %v18342_v57  ;;  %v9307_v56 = vld [vmem:[#allocation16 + $0xac0] sm:$0xff]  ;;  %v9292_v57 = vld [vmem:[#allocation16 + $0xa48] sm:$0xff] }
 0x9f0   : > { %16019 = vmatprep.subr.bf16.mxu0 %v18344_v31  ;;  %v9308_v31 = vld [vmem:[#allocation16 + $0xac8] sm:$0xff]  ;;  %v18566_v60 = vcombine.high %v9291_v28, %v9307_v56  ;;  %v18565_v2 = vcombine.low %v9291_v28, %v9307_v56 }
 0x9f1   : > { %v18568_v61 = vcombine.high %v9292_v57, %v9308_v31  ;;  %v18567_v4 = vcombine.low %v9292_v57, %v9308_v31 }
 0x9f2   : > { %15938 = vmatpush1.bf16.msra.mxu1 %v18341_v62  ;;  %v9323_v62 = vld [vmem:[#allocation16 + $0xb40] sm:$0xff] }
 0x9f3   : > { %16020 = vmatpush1.bf16.msra.mxu0 %v18343_v35  ;;  %15939 = vmatprep.subr.bf16.mxu1 %v18374_v0  ;;  %v9339_v35 = vld [vmem:[#allocation16 + $0xbc0] sm:$0xff]  ;;  %v9324_v0 = vld [vmem:[#allocation16 + $0xb48] sm:$0xff] }
 0x9f4   : > { %16021 = vmatprep.subr.bf16.mxu0 %v18376_v1  ;;  %v9340_v1 = vld [vmem:[#allocation16 + $0xbc8] sm:$0xff]  ;;  %v18598_v7 = vcombine.high %v9323_v62, %v9339_v35  ;;  %v18597_v16 = vcombine.low %v9323_v62, %v9339_v35 }
 0x9f5   : > { %v18600_v9 = vcombine.high %v9324_v0, %v9340_v1  ;;  %v18599_v18 = vcombine.low %v9324_v0, %v9340_v1  ;;  %v9532_v62 = vld [vmem:[#allocation16 + $0x11c8] sm:$0xff]  ;;  %v9547_v1 = vld [vmem:[#allocation16 + $0x1240] sm:$0xff] }
 0x9f6   : > { %15940 = vmatpush1.bf16.msra.mxu1 %v18373_v10  ;;  %v9355_v10 = vld [vmem:[#allocation16 + $0xc40] sm:$0xff] }
 0x9f7   : > { %16022 = vmatpush1.bf16.msra.mxu0 %v18375_v12  ;;  %15941 = vmatprep.subr.bf16.mxu1 %v18406_v13  ;;  %v9371_v12 = vld [vmem:[#allocation16 + $0xcc0] sm:$0xff]  ;;  %v9356_v13 = vld [vmem:[#allocation16 + $0xc48] sm:$0xff] }
 0x9f8   : > { %16023 = vmatprep.subr.bf16.mxu0 %v18408_v15  ;;  %v9372_v15 = vld [vmem:[#allocation16 + $0xcc8] sm:$0xff]  ;;  %v18630_v20 = vcombine.high %v9355_v10, %v9371_v12  ;;  %v18629_v24 = vcombine.low %v9355_v10, %v9371_v12 }
 0x9f9   : > { %v18632_v11 = vcombine.high %v9356_v13, %v9372_v15  ;;  %v18631_v27 = vcombine.low %v9356_v13, %v9372_v15 }
 0x9fa   : > { %15942 = vmatpush1.bf16.msra.mxu1 %v18405_v17  ;;  %v9387_v17 = vld [vmem:[#allocation16 + $0xd40] sm:$0xff] }
 0x9fb   : > { %16024 = vmatpush1.bf16.msra.mxu0 %v18407_v21  ;;  %15943 = vmatprep.subr.bf16.mxu1 %v18438_v14  ;;  %v9403_v21 = vld [vmem:[#allocation16 + $0xdc0] sm:$0xff]  ;;  %v9388_v14 = vld [vmem:[#allocation16 + $0xd48] sm:$0xff] }
 0x9fc   : > { %16025 = vmatprep.subr.bf16.mxu0 %v18440_v23  ;;  %v9404_v23 = vld [vmem:[#allocation16 + $0xdc8] sm:$0xff]  ;;  %v18662_v22 = vcombine.high %v9387_v17, %v9403_v21  ;;  %v18661_v38 = vcombine.low %v9387_v17, %v9403_v21 }
 0x9fd   : > { %v18664_v32 = vcombine.high %v9388_v14, %v9404_v23  ;;  %v18663_v39 = vcombine.low %v9388_v14, %v9404_v23 }
 0x9fe   : > { %15944 = vmatpush1.bf16.msra.mxu1 %v18437_v33  ;;  %v9419_v33 = vld [vmem:[#allocation16 + $0xe40] sm:$0xff] }
 0x9ff   : > { %16026 = vmatpush1.bf16.msra.mxu0 %v18439_v34  ;;  %15945 = vmatprep.subr.bf16.mxu1 %v18470_v36  ;;  %v9435_v34 = vld [vmem:[#allocation16 + $0xec0] sm:$0xff]  ;;  %v9420_v36 = vld [vmem:[#allocation16 + $0xe48] sm:$0xff] }
 0xa00   : > { %16027 = vmatprep.subr.bf16.mxu0 %v18472_v37  ;;  %v9436_v37 = vld [vmem:[#allocation16 + $0xec8] sm:$0xff]  ;;  %v18694_v40 = vcombine.high %v9419_v33, %v9435_v34  ;;  %v18693_v48 = vcombine.low %v9419_v33, %v9435_v34 }
 0xa01   : > { %v18696_v41 = vcombine.high %v9420_v36, %v9436_v37  ;;  %v18695_v49 = vcombine.low %v9420_v36, %v9436_v37 }
 0xa02   : > { %15946 = vmatpush1.bf16.msra.mxu1 %v18469_v43  ;;  %v9451_v43 = vld [vmem:[#allocation16 + $0xf40] sm:$0xff] }
 0xa03   : > { %16028 = vmatpush1.bf16.msra.mxu0 %v18471_v51  ;;  %15947 = vmatprep.subr.bf16.mxu1 %v18502_v44  ;;  %v9467_v51 = vld [vmem:[#allocation16 + $0xfc0] sm:$0xff]  ;;  %v9452_v44 = vld [vmem:[#allocation16 + $0xf48] sm:$0xff] }
 0xa04   : > { %16029 = vmatprep.subr.bf16.mxu0 %v18504_v45  ;;  %v9468_v45 = vld [vmem:[#allocation16 + $0xfc8] sm:$0xff]  ;;  %v18726_v50 = vcombine.high %v9451_v43, %v9467_v51  ;;  %v18725_v28 = vcombine.low %v9451_v43, %v9467_v51 }
 0xa05   : > { %v18728_v52 = vcombine.high %v9452_v44, %v9468_v45  ;;  %v18727_v56 = vcombine.low %v9452_v44, %v9468_v45  ;;  %v22598_v51 = vld [vmem:[#allocation17 + $0x8] sm:$0xff] }
 0xa06   : > { %15948 = vmatpush1.bf16.msra.mxu1 %v18501_v25  ;;  %v9483_v25 = vld [vmem:[#allocation16 + $0x1040] sm:$0xff] }
 0xa07   : > { %16030 = vmatpush1.bf16.msra.mxu0 %v18503_v53  ;;  %15949 = vmatprep.subr.bf16.mxu1 %v18534_v54  ;;  %v9499_v53 = vld [vmem:[#allocation16 + $0x10c0] sm:$0xff]  ;;  %v9484_v54 = vld [vmem:[#allocation16 + $0x1048] sm:$0xff] }
 0xa08   : > { %16031 = vmatprep.subr.bf16.mxu0 %v18536_v55  ;;  %v9500_v55 = vld [vmem:[#allocation16 + $0x10c8] sm:$0xff]  ;;  %v18758_v57 = vcombine.high %v9483_v25, %v9499_v53 }
 0xa09   : > { %v18760_v31 = vcombine.high %v9484_v54, %v9500_v55  ;;  %v18759_v35 = vcombine.low %v9484_v54, %v9500_v55  ;;  %v10038_v54 = vrot.slane %v22598_v51, %v22483_v8  ;;  %v10034_v55 = vrot.slane %v22598_v51, %v22469_v19 }
 0xa0a   : > { %15950 = vmatpush1.bf16.msra.mxu1 %v18533_v59  ;;  %v9515_v59 = vld [vmem:[#allocation16 + $0x1140] sm:$0xff] }
 0xa0b   : > { %16032 = vmatpush1.bf16.msra.mxu0 %v18535_v30  ;;  %15951 = vmatprep.subr.bf16.mxu1 %v18566_v60  ;;  %v9531_v30 = vld [vmem:[#allocation16 + $0x11c0] sm:$0xff]  ;;  %v18757_v60 = vcombine.low %v9483_v25, %v9499_v53  ;;  %v9676_v25 = vld [vmem:[#allocation16 + $0x1648] sm:$0xff] }
 0xa0c   : > { %16033 = vmatprep.subr.bf16.mxu0 %v18568_v61  ;;  %v9516_v61 = vld [vmem:[#allocation16 + $0x1148] sm:$0xff]  ;;  %v18790_v0 = vcombine.high %v9515_v59, %v9531_v30  ;;  %v18789_v10 = vcombine.low %v9515_v59, %v9531_v30 }
 0xa0d   : > { %v18791_v12 = vcombine.low %v9516_v61, %v9532_v62  ;;  %v9692_v53 = vld [vmem:[#allocation16 + $0x16c8] sm:$0xff] }
 0xa0e   : > { %15952 = vmatpush1.bf16.msra.mxu1 %v18565_v2  ;;  %v9563_v2 = vld [vmem:[#allocation16 + $0x12c0] sm:$0xff]  ;;  %v18952_v30 = vcombine.high %v9676_v25, %v9692_v53 }
 0xa0f   : > { %16034 = vmatpush1.bf16.msra.mxu0 %v18567_v4  ;;  %15953 = vmatprep.subr.bf16.mxu1 %v18598_v7  ;;  %v18792_v4 = vcombine.high %v9516_v61, %v9532_v62  ;;  %v9548_v7 = vld [vmem:[#allocation16 + $0x1248] sm:$0xff]  ;;  %v18822_v13 = vcombine.high %v9547_v1, %v9563_v2  ;;  %v18821_v17 = vcombine.low %v9547_v1, %v9563_v2  ;;  %v9723_v61 = vld [vmem:[#allocation16 + $0x17c0] sm:$0xff] }
 0xa10   : > { %16035 = vmatprep.subr.bf16.mxu0 %v18600_v9  ;;  %v9564_v9 = vld [vmem:[#allocation16 + $0x12c8] sm:$0xff] }
 0xa11   : > { %v18824_v15 = vcombine.high %v9548_v7, %v9564_v9  ;;  %v18823_v21 = vcombine.low %v9548_v7, %v9564_v9  ;;  %v9708_v1 = vld [vmem:[#allocation16 + $0x1748] sm:$0xff] }
 0xa12   : > { %15954 = vmatpush1.bf16.msra.mxu1 %v18597_v16  ;;  %v9579_v16 = vld [vmem:[#allocation16 + $0x1340] sm:$0xff]  ;;  %v9724_v2 = vld [vmem:[#allocation16 + $0x17c8] sm:$0xff] }
 0xa13   : > { %16036 = vmatpush1.bf16.msra.mxu0 %v18599_v18  ;;  %15955 = vmatprep.subr.bf16.mxu1 %v18630_v20  ;;  %v9595_v18 = vld [vmem:[#allocation16 + $0x13c0] sm:$0xff]  ;;  %v9580_v20 = vld [vmem:[#allocation16 + $0x1348] sm:$0xff] }
 0xa14   : > { %16037 = vmatprep.subr.bf16.mxu0 %v18632_v11  ;;  %v9596_v11 = vld [vmem:[#allocation16 + $0x13c8] sm:$0xff]  ;;  %v18854_v14 = vcombine.high %v9579_v16, %v9595_v18  ;;  %v18853_v33 = vcombine.low %v9579_v16, %v9595_v18 }
 0xa15   : > { %v18856_v23 = vcombine.high %v9580_v20, %v9596_v11  ;;  %v18855_v34 = vcombine.low %v9580_v20, %v9596_v11  ;;  %v18951_v20 = vcombine.low %v9676_v25, %v9692_v53  ;;  %v9804_v25 = vld [vmem:[#allocation16 + $0x1a48] sm:$0xff] }
 0xa16   : > { %15956 = vmatpush1.bf16.msra.mxu1 %v18629_v24  ;;  %v9611_v24 = vld [vmem:[#allocation16 + $0x1440] sm:$0xff]  ;;  %v9820_v53 = vld [vmem:[#allocation16 + $0x1ac8] sm:$0xff] }
 0xa17   : > { %16038 = vmatpush1.bf16.msra.mxu0 %v18631_v27  ;;  %15957 = vmatprep.subr.bf16.mxu1 %v18662_v22  ;;  %v9627_v27 = vld [vmem:[#allocation16 + $0x14c0] sm:$0xff]  ;;  %v9612_v22 = vld [vmem:[#allocation16 + $0x1448] sm:$0xff] }
 0xa18   : > { %16039 = vmatprep.subr.bf16.mxu0 %v18664_v32  ;;  %v9628_v32 = vld [vmem:[#allocation16 + $0x14c8] sm:$0xff]  ;;  %v18886_v36 = vcombine.high %v9611_v24, %v9627_v27  ;;  %v18885_v43 = vcombine.low %v9611_v24, %v9627_v27  ;;  %v18984_v24 = vcombine.high %v9708_v1, %v9724_v2  ;;  %v9755_v27 = vld [vmem:[#allocation16 + $0x18c0] sm:$0xff] }
 0xa19   : > { %v18888_v37 = vcombine.high %v9612_v22, %v9628_v32  ;;  %v18887_v44 = vcombine.low %v9612_v22, %v9628_v32  ;;  %v9740_v32 = vld [vmem:[#allocation16 + $0x1848] sm:$0xff] }
 0xa1a   : > { %15958 = vmatpush1.bf16.msra.mxu1 %v18661_v38  ;;  %v9643_v38 = vld [vmem:[#allocation16 + $0x1540] sm:$0xff] }
 0xa1b   : > { %16040 = vmatpush1.bf16.msra.mxu0 %v18663_v39  ;;  %15959 = vmatprep.subr.bf16.mxu1 %v18694_v40  ;;  %v9659_v39 = vld [vmem:[#allocation16 + $0x15c0] sm:$0xff]  ;;  %v9644_v40 = vld [vmem:[#allocation16 + $0x1548] sm:$0xff] }
 0xa1c   : > { %16041 = vmatprep.subr.bf16.mxu0 %v18696_v41  ;;  %v9660_v41 = vld [vmem:[#allocation16 + $0x15c8] sm:$0xff]  ;;  %v18918_v45 = vcombine.high %v9643_v38, %v9659_v39 }
 0xa1e   : > { %15960 = vmatpush1.bf16.msra.mxu1 %v18693_v48  ;;  %v18920_v48 = vcombine.high %v9644_v40, %v9660_v41 }
 0xa1f   : > { %16042 = vmatpush1.bf16.msra.mxu0 %v18695_v49  ;;  %15961 = vmatprep.subr.bf16.mxu1 %v18726_v50  ;;  %v9675_v49 = vld [vmem:[#allocation16 + $0x1640] sm:$0xff] }
 0xa20   : > { %16043 = vmatprep.subr.bf16.mxu0 %v18728_v52  ;;  %v9691_v50 = vld [vmem:[#allocation16 + $0x16c0] sm:$0xff]  ;;  %v10030_v52 = vrot.slane %v22598_v51, %v22464_v26 }
 0xa22   : > { %15962 = vmatpush1.bf16.msra.mxu1 %v18725_v28  ;;  %v18917_v28 = vcombine.low %v9643_v38, %v9659_v39  ;;  %v9771_v39 = vld [vmem:[#allocation16 + $0x1940] sm:$0xff] }
 0xa23   : > { %16044 = vmatpush1.bf16.msra.mxu0 %v18727_v56  ;;  %15972 = vmatprep.subr.bf16.mxu1 %v18758_v57  ;;  %v10042_v56 = vrot.slane %v22598_v51, %v22472_v29  ;;  %v18919_v57 = vcombine.low %v9644_v40, %v9660_v41  ;;  %v9787_v40 = vld [vmem:[#allocation16 + $0x19c0] sm:$0xff]  ;;  %v9772_v41 = vld [vmem:[#allocation16 + $0x1948] sm:$0xff] }
 0xa24   : > { %16054 = vmatprep.subr.bf16.mxu0 %v18760_v31  ;;  %v18950_v31 = vcombine.high %v9675_v49, %v9691_v50 }
 0xa25   : > { %15964 = vmatmul.mubr.bf16.vlgmr.msra.gmra.mrb[28].mxu1 %v22506_v47 }
 0xa26   : > { %16046 = vmatmul.mubr.bf16.vlgmr.msra.gmra.mrb[24].mxu0 %v22506_v47  ;;  %15973 = vmatpush1.bf16.msra.mxu1 %v18757_v60  ;;  %v9707_v60 = vld [vmem:[#allocation16 + $0x1740] sm:$0xff] }
 0xa27   : > { %16004 = vmatprep.mubr.bf16.mxu1 %v22516_v58  ;;  %16055 = vmatpush1.bf16.msra.mxu0 %v18759_v35  ;;  %v18982_v11 = vcombine.high %v9707_v60, %v9723_v61 }
 0xa28   : > { %16086 = vmatprep.mubr.bf16.mxu0 %v22516_v58  ;;  %15974 = vmatprep.subr.bf16.mxu1 %v18790_v0 }
 0xa29   : > { %16056 = vmatprep.subr.bf16.mxu0 %v18792_v4 }
 0xa2a   : > { %15975 = vmatpush1.bf16.msra.mxu1 %v18789_v10 }
 0xa2b   : > { %16057 = vmatpush1.bf16.msra.mxu0 %v18791_v12  ;;  %15976 = vmatprep.subr.bf16.mxu1 %v18822_v13  ;;  %v18949_v12 = vcombine.low %v9675_v49, %v9691_v50  ;;  %v9803_v50 = vld [vmem:[#allocation16 + $0x1a40] sm:$0xff] }
 0xa2c   : > { %16058 = vmatprep.subr.bf16.mxu0 %v18824_v15 }
 0xa2e   : > { %15977 = vmatpush1.bf16.msra.mxu1 %v18821_v17  ;;  %v9739_v17 = vld [vmem:[#allocation16 + $0x1840] sm:$0xff] }
 0xa2f   : > { %16059 = vmatpush1.bf16.msra.mxu0 %v18823_v21  ;;  %15978 = vmatprep.subr.bf16.mxu1 %v18854_v14 }
 0xa30   : > { %16060 = vmatprep.subr.bf16.mxu0 %v18856_v23 }
 0xa32   : > { %15979 = vmatpush1.bf16.msra.mxu1 %v18853_v33  ;;  %v9756_v33 = vld [vmem:[#allocation16 + $0x18c8] sm:$0xff] }
 0xa33   : > { %16061 = vmatpush1.bf16.msra.mxu0 %v18855_v34  ;;  %15980 = vmatprep.subr.bf16.mxu1 %v18886_v36  ;;  %v18981_v34 = vcombine.low %v9707_v60, %v9723_v61  ;;  %v18983_v36 = vcombine.low %v9708_v1, %v9724_v2  ;;  %v19016_v38 = vcombine.high %v9740_v32, %v9756_v33  ;;  %v9851_v60 = vld [vmem:[#allocation16 + $0x1bc0] sm:$0xff] }
 0xa34   : > { %16062 = vmatprep.subr.bf16.mxu0 %v18888_v37  ;;  %v19014_v37 = vcombine.high %v9739_v17, %v9755_v27 }
 0xa36   : > { %15981 = vmatpush1.bf16.msra.mxu1 %v18885_v43  ;;  %v9788_v43 = vld [vmem:[#allocation16 + $0x19c8] sm:$0xff] }
 0xa37   : > { %16063 = vmatpush1.bf16.msra.mxu0 %v18887_v44  ;;  %15982 = vmatprep.subr.bf16.mxu1 %v18918_v45  ;;  %v19013_v44 = vcombine.low %v9739_v17, %v9755_v27  ;;  %v19015_v45 = vcombine.low %v9740_v32, %v9756_v33  ;;  %v19048_v49 = vcombine.high %v9772_v41, %v9788_v43  ;;  %v9916_v27 = vld [vmem:[#allocation16 + $0x1dc8] sm:$0xff] }
 0xa38   : > { %v15678_v59 = vpop.f32.mrb[20].mxu1  ;;  %16064 = vmatprep.subr.bf16.mxu0 %v18920_v48  ;;  %v19046_v48 = vcombine.high %v9771_v39, %v9787_v40 }
 0xa39   : > { %v19310_v62 = vadd.f32 %v15678_v59, %v10030_v52  ;;  %v15760_v35 = vpop.f32.mrb[16].mxu0  ;;  %v15680_v0 = vpop.f32.mrb[21].mxu1  ;;  %v9819_v52 = vld [vmem:[#allocation16 + $0x1ac0] sm:$0xff]  ;;  %v19080_v59 = vcombine.high %v9804_v25, %v9820_v53 }
 0xa3a   : > { %v19312_v4 = vadd.f32 %v15760_v35, %v10038_v54  ;;  %v19311_v7 = vadd.f32 %v15680_v0, %v10034_v55  ;;  %v15762_v9 = vpop.f32.mrb[17].mxu0  ;;  %v15682_v10 = vpop.f32.mrb[22].mxu1  ;;  %15983 = vmatpush1.bf16.msra.mxu1 %v18917_v28  ;;  %v19045_v54 = vcombine.low %v9771_v39, %v9787_v40  ;;  %v19047_v28 = vcombine.low %v9772_v41, %v9788_v43  ;;  %v9836_v35 = vld [vmem:[#allocation16 + $0x1b48] sm:$0xff] }
 0xa3b   : > { %v19261_v13 = vmul.f32 -1.442695, %v19310_v62  ;;  %v19313_v15 = vadd.f32 %v15762_v9, %v10042_v56  ;;  %v15764_v16 = vpop.f32.mrb[18].mxu0  ;;  %16065 = vmatpush1.bf16.msra.mxu0 %v18919_v57  ;;  %v15683_v18 = vpop.f32.mrb[23].mxu1  ;;  %15984 = vmatprep.subr.bf16.mxu1 %v18950_v31  ;;  %v19078_v56 = vcombine.high %v9803_v50, %v9819_v52  ;;  %v9852_v0 = vld [vmem:[#allocation16 + $0x1bc8] sm:$0xff]  ;;  %v19079_v9 = vcombine.low %v9804_v25, %v9820_v53  ;;  %v9979_v25 = vld [vmem:[#allocation16 + $0x1fc0] sm:$0xff] }
 0xa3c   : > { %v19263_v21 = vmul.f32 -1.442695, %v19312_v4  ;;  %v19262_v14 = vmul.f32 -1.442695, %v19311_v7  ;;  %v15765_v23 = vpop.f32.mrb[19].mxu0  ;;  %16066 = vmatprep.subr.bf16.mxu0 %v18952_v30  ;;  %v9835_v30 = vld [vmem:[#allocation16 + $0x1b40] sm:$0xff]  ;;  %v19077_v4 = vcombine.low %v9803_v50, %v9819_v52 }
 0xa3d   : > { %21411 = vpow2.f32 %v19261_v13  ;;  %v19264_v22 = vmul.f32 -1.442695, %v19313_v15  ;;  %v19110_v10 = vcombine.high %v9835_v30, %v9851_v60  ;;  %v9867_v13 = vld [vmem:[#allocation16 + $0x1c40] sm:$0xff]  ;;  %v9868_v16 = vld [vmem:[#allocation16 + $0x1c48] sm:$0xff] }
 0xa3e   : > { %21413 = vpow2.f32 %v19263_v21  ;;  %15985 = vmatpush1.bf16.msra.mxu1 %v18949_v12  ;;  %v19112_v12 = vcombine.high %v9836_v35, %v9852_v0  ;;  %v9883_v15 = vld [vmem:[#allocation16 + $0x1cc0] sm:$0xff]  ;;  %v9884_v18 = vld [vmem:[#allocation16 + $0x1cc8] sm:$0xff] }
 0xa3f   : > { %21415 = vpow2.f32 %v19262_v14  ;;  %16067 = vmatpush1.bf16.msra.mxu0 %v18951_v20  ;;  %15986 = vmatprep.subr.bf16.mxu1 %v18982_v11  ;;  %v19109_v20 = vcombine.low %v9835_v30, %v9851_v60  ;;  %v19111_v11 = vcombine.low %v9836_v35, %v9852_v0  ;;  %v19142_v17 = vcombine.high %v9867_v13, %v9883_v15  ;;  %v9899_v14 = vld [vmem:[#allocation16 + $0x1d40] sm:$0xff]  ;;  %v9932_v40 = vld [vmem:[#allocation16 + $0x1e48] sm:$0xff]  ;;  %v8974_v30 = vld [vmem:[#allocation16 + $0x58] sm:$0xff] }
 0xa40   : > { %21417 = vpow2.f32 %v19264_v22  ;;  %16068 = vmatprep.subr.bf16.mxu0 %v18984_v24  ;;  %v19144_v21 = vcombine.high %v9868_v16, %v9884_v18  ;;  %v9915_v23 = vld [vmem:[#allocation16 + $0x1dc0] sm:$0xff]  ;;  %v9900_v24 = vld [vmem:[#allocation16 + $0x1d48] sm:$0xff]  ;;  %v19141_v22 = vcombine.low %v9867_v13, %v9883_v15  ;;  %v19143_v32 = vcombine.low %v9868_v16, %v9884_v18  ;;  %v8990_v60 = vld [vmem:[#allocation16 + $0xd8] sm:$0xff] }
 0xa41   : > { %v19174_v33 = vcombine.high %v9899_v14, %v9915_v23  ;;  %v9948_v41 = vld [vmem:[#allocation16 + $0x1ec8] sm:$0xff]  ;;  %v9963_v52 = vld [vmem:[#allocation16 + $0x1f40] sm:$0xff]  ;;  %v18252_v0 = vcombine.high %v8974_v30, %v8990_v60  ;;  %v9037_v13 = vld [vmem:[#allocation16 + $0x250] sm:$0xff] }
 0xa42   : > { %15987 = vmatpush1.bf16.msra.mxu1 %v18981_v34  ;;  %v19208_v50 = vcombine.high %v9932_v40, %v9948_v41  ;;  %v9964_v53 = vld [vmem:[#allocation16 + $0x1f48] sm:$0xff]  ;;  %v9053_v15 = vld [vmem:[#allocation16 + $0x2d0] sm:$0xff]  ;;  %v9038_v18 = vld [vmem:[#allocation16 + $0x258] sm:$0xff] }
 0xa43   : > { %16069 = vmatpush1.bf16.msra.mxu0 %v18983_v36  ;;  %15988 = vmatprep.subr.bf16.mxu1 %v19014_v37  ;;  %v19176_v36 = vcombine.high %v9900_v24, %v9916_v27  ;;  %v9931_v37 = vld [vmem:[#allocation16 + $0x1e40] sm:$0xff] }
 0xa44   : > { %16070 = vmatprep.subr.bf16.mxu0 %v19016_v38  ;;  %v9947_v38 = vld [vmem:[#allocation16 + $0x1ec0] sm:$0xff] }
 0xa46   : > { %15989 = vmatpush1.bf16.msra.mxu1 %v19013_v44  ;;  %v19173_v44 = vcombine.low %v9899_v14, %v9915_v23  ;;  %v9069_v23 = vld [vmem:[#allocation16 + $0x350] sm:$0xff] }
 0xa47   : > { %v21412_v55 = vpop.eup %21411  ;;  %16071 = vmatpush1.bf16.msra.mxu0 %v19015_v45  ;;  %15990 = vmatprep.subr.bf16.mxu1 %v19046_v48  ;;  %v19175_v48 = vcombine.low %v9900_v24, %v9916_v27  ;;  %v9085_v24 = vld [vmem:[#allocation16 + $0x3d0] sm:$0xff]  ;;  %v9070_v27 = vld [vmem:[#allocation16 + $0x358] sm:$0xff] }
 0xa48   : > { %v21414_v57 = vpop.eup %21413  ;;  %v16691_v31 = vadd.f32 1.0, %v21412_v55  ;;  %16072 = vmatprep.subr.bf16.mxu0 %v19048_v49  ;;  %v19206_v49 = vcombine.high %v9931_v37, %v9947_v38  ;;  %v19205_v55 = vcombine.low %v9931_v37, %v9947_v38  ;;  %v9101_v37 = vld [vmem:[#allocation16 + $0x450] sm:$0xff] }
 0xa49   : > { %v21416_v61 = vpop.eup %21415  ;;  %v16693_v62 = vadd.f32 1.0, %v21414_v57  ;;  %v9117_v38 = vld [vmem:[#allocation16 + $0x4d0] sm:$0xff] }
 0xa4a   : > { %v21418_v1 = vpop.eup %21417  ;;  %21419 = vrcp.f32 %v16691_v31  ;;  %v16692_v2 = vadd.f32 1.0, %v21416_v61  ;;  %15991 = vmatpush1.bf16.msra.mxu1 %v19045_v54  ;;  %v9980_v54 = vld [vmem:[#allocation16 + $0x1fc8] sm:$0xff]  ;;  %v8973_v31 = vld [vmem:[#allocation16 + $0x50] sm:$0xff]  ;;  %v19237_v61 = vcombine.low %v9963_v52, %v9979_v25 }
 0xa4b   : > { %21421 = vrcp.f32 %v16693_v62  ;;  %v16694_v7 = vadd.f32 1.0, %v21418_v1  ;;  %16073 = vmatpush1.bf16.msra.mxu0 %v19047_v28  ;;  %15992 = vmatprep.subr.bf16.mxu1 %v19078_v56  ;;  %v19207_v28 = vcombine.low %v9932_v40, %v9948_v41  ;;  %v19238_v56 = vcombine.high %v9963_v52, %v9979_v25  ;;  %v9005_v1 = vld [vmem:[#allocation16 + $0x150] sm:$0xff]  ;;  %v9118_v40 = vld [vmem:[#allocation16 + $0x4d8] sm:$0xff] }
 0xa4c   : > { %21423 = vrcp.f32 %v16692_v2  ;;  %16074 = vmatprep.subr.bf16.mxu0 %v19080_v59  ;;  %v19240_v57 = vcombine.high %v9964_v53, %v9980_v54  ;;  %v8989_v59 = vld [vmem:[#allocation16 + $0xd0] sm:$0xff]  ;;  %v19239_v62 = vcombine.low %v9964_v53, %v9980_v54  ;;  %v18345_v41 = vcombine.low %v9069_v23, %v9085_v24  ;;  %v9150_v52 = vld [vmem:[#allocation16 + $0x5d8] sm:$0xff] }
 0xa4d   : > { %21425 = vrcp.f32 %v16694_v7  ;;  %v18250_v35 = vcombine.high %v8973_v31, %v8989_v59  ;;  %v9021_v2 = vld [vmem:[#allocation16 + $0x1d0] sm:$0xff]  ;;  %v9006_v7 = vld [vmem:[#allocation16 + $0x158] sm:$0xff]  ;;  %v18377_v25 = vcombine.low %v9101_v37, %v9117_v38 }
 0xa4e   : > { %15993 = vmatpush1.bf16.msra.mxu1 %v19077_v4  ;;  %v18249_v4 = vcombine.low %v8973_v31, %v8989_v59  ;;  %v9182_v31 = vld [vmem:[#allocation16 + $0x6d8] sm:$0xff] }
 0xa4f   : > { %16075 = vmatpush1.bf16.msra.mxu0 %v19079_v9  ;;  %15994 = vmatprep.subr.bf16.mxu1 %v19110_v10  ;;  %v9022_v9 = vld [vmem:[#allocation16 + $0x1d8] sm:$0xff]  ;;  %v18251_v10 = vcombine.low %v8974_v30, %v8990_v60 }
 0xa50   : > { %16076 = vmatprep.subr.bf16.mxu0 %v19112_v12  ;;  %v18282_v12 = vcombine.high %v9005_v1, %v9021_v2  ;;  %v18284_v16 = vcombine.high %v9006_v7, %v9022_v9 }
 0xa52   : > { %15995 = vmatpush1.bf16.msra.mxu1 %v19109_v20  ;;  %v9054_v20 = vld [vmem:[#allocation16 + $0x2d8] sm:$0xff] }
 0xa53   : > { %16077 = vmatpush1.bf16.msra.mxu0 %v19111_v11  ;;  %15996 = vmatprep.subr.bf16.mxu1 %v19142_v17  ;;  %v18281_v11 = vcombine.low %v9005_v1, %v9021_v2  ;;  %v18283_v17 = vcombine.low %v9006_v7, %v9022_v9  ;;  %v18316_v14 = vcombine.high %v9038_v18, %v9054_v20  ;;  %v9214_v1 = vld [vmem:[#allocation16 + $0x7d8] sm:$0xff] }
 0xa54   : > { %v21420_v34 = vpop.eup %21419  ;;  %16078 = vmatprep.subr.bf16.mxu0 %v19144_v21  ;;  %v18314_v21 = vcombine.high %v9037_v13, %v9053_v15 }
 0xa55   : > { %v21422_v39 = vpop.eup %21421  ;;  %16787 = vst [vmem:[%s22552_s22 + $0x40] sm:$0xff] %v21420_v34  ;;  %v18346_v34 = vcombine.high %v9069_v23, %v9085_v24  ;;  %v9278_v23 = vld [vmem:[#allocation16 + $0x9d8] sm:$0xff] }
 0xa56   : > { %v21424_v43 = vpop.eup %21423  ;;  %16789 = vst [vmem:[%s22552_s22 + $0x50] sm:$0xff] %v21422_v39  ;;  %15997 = vmatpush1.bf16.msra.mxu1 %v19141_v22  ;;  %v9086_v22 = vld [vmem:[#allocation16 + $0x3d8] sm:$0xff] }
 0xa57   : > { %v21426_v45 = vpop.eup %21425  ;;  %16788 = vst [vmem:[%s22552_s22 + $0x48] sm:$0xff] %v21424_v43  ;;  %16079 = vmatpush1.bf16.msra.mxu0 %v19143_v32  ;;  %15998 = vmatprep.subr.bf16.mxu1 %v19174_v33  ;;  %v18313_v32 = vcombine.low %v9037_v13, %v9053_v15  ;;  %v18315_v33 = vcombine.low %v9038_v18, %v9054_v20  ;;  %v9102_v39 = vld [vmem:[#allocation16 + $0x458] sm:$0xff] }
 0xa58   : > { %16790 = vst [vmem:[%s22552_s22 + $0x58] sm:$0xff] %v21426_v45  ;;  %16080 = vmatprep.subr.bf16.mxu0 %v19176_v36  ;;  %v18348_v36 = vcombine.high %v9070_v27, %v9086_v22  ;;  %v18347_v43 = vcombine.low %v9070_v27, %v9086_v22  ;;  %v18380_v45 = vcombine.high %v9102_v39, %v9118_v40  ;;  %v9230_v13 = vld [vmem:[#allocation16 + $0x858] sm:$0xff] }
 0xa59   : > { %v18379_v53 = vcombine.low %v9102_v39, %v9118_v40  ;;  %v9246_v15 = vld [vmem:[#allocation16 + $0x8d8] sm:$0xff] }
 0xa5a   : > { %15999 = vmatpush1.bf16.msra.mxu1 %v19173_v44  ;;  %v18378_v44 = vcombine.high %v9101_v37, %v9117_v38  ;;  %v18507_v27 = vcombine.low %v9230_v13, %v9246_v15  ;;  %v9310_v37 = vld [vmem:[#allocation16 + $0xad8] sm:$0xff] }
 0xa5b   : > { %16081 = vmatpush1.bf16.msra.mxu0 %v19175_v48  ;;  %16000 = vmatprep.subr.bf16.mxu1 %v19206_v49  ;;  %v9133_v48 = vld [vmem:[#allocation16 + $0x550] sm:$0xff] }
 0xa5c   : > { %16082 = vmatprep.subr.bf16.mxu0 %v19208_v50  ;;  %v9149_v49 = vld [vmem:[#allocation16 + $0x5d0] sm:$0xff]  ;;  %v9134_v50 = vld [vmem:[#allocation16 + $0x558] sm:$0xff] }
 0xa5d   : > { %v18410_v54 = vcombine.high %v9133_v48, %v9149_v49  ;;  %v18409_v59 = vcombine.low %v9133_v48, %v9149_v49  ;;  %v18411_v30 = vcombine.low %v9134_v50, %v9150_v52  ;;  %v9342_v48 = vld [vmem:[#allocation16 + $0xbd8] sm:$0xff] }
 0xa5e   : > { %16001 = vmatpush1.bf16.msra.mxu1 %v19205_v55  ;;  %v18412_v55 = vcombine.high %v9134_v50, %v9150_v52 }
 0xa5f   : > { %16083 = vmatpush1.bf16.msra.mxu0 %v19207_v28  ;;  %16002 = vmatprep.subr.bf16.mxu1 %v19238_v56  ;;  %v9165_v28 = vld [vmem:[#allocation16 + $0x650] sm:$0xff] }
 0xa60   : > { %16084 = vmatprep.subr.bf16.mxu0 %v19240_v57  ;;  %v9181_v56 = vld [vmem:[#allocation16 + $0x6d0] sm:$0xff]  ;;  %v9166_v57 = vld [vmem:[#allocation16 + $0x658] sm:$0xff] }
 0xa61   : > { %v18442_v60 = vcombine.high %v9165_v28, %v9181_v56  ;;  %v18441_v2 = vcombine.low %v9165_v28, %v9181_v56  ;;  %v9374_v28 = vld [vmem:[#allocation16 + $0xcd8] sm:$0xff] }
 0xa62   : > { %16003 = vmatpush1.bf16.msra.mxu1 %v19237_v61  ;;  %v18444_v61 = vcombine.high %v9166_v57, %v9182_v31 }
 0xa63   : > { %16085 = vmatpush1.bf16.msra.mxu0 %v19239_v62  ;;  %16095 = vmatprep.subr.bf16.mxu1 %v18250_v35  ;;  %v9197_v62 = vld [vmem:[#allocation16 + $0x750] sm:$0xff] }
 0xa64   : > { %16177 = vmatprep.subr.bf16.mxu0 %v18252_v0  ;;  %v9213_v35 = vld [vmem:[#allocation16 + $0x7d0] sm:$0xff]  ;;  %v9198_v0 = vld [vmem:[#allocation16 + $0x758] sm:$0xff] }
 0xa65   : > { %16005 = vmatmul.mubr.bf16.vlgmr.msra.gmra.mrb[28].mxu1 %v22523_v6  ;;  %v18474_v7 = vcombine.high %v9197_v62, %v9213_v35  ;;  %v18476_v9 = vcombine.high %v9198_v0, %v9214_v1  ;;  %v18475_v18 = vcombine.low %v9198_v0, %v9214_v1 }
 0xa66   : > { %16087 = vmatmul.mubr.bf16.vlgmr.msra.gmra.mrb[24].mxu0 %v22523_v6  ;;  %16096 = vmatpush1.bf16.msra.mxu1 %v18249_v4  ;;  %v18443_v4 = vcombine.low %v9166_v57, %v9182_v31 }
 0xa67   : > { %16127 = vmatprep.mubr.bf16.mxu1 %v22504_v46  ;;  %16178 = vmatpush1.bf16.msra.mxu0 %v18251_v10  ;;  %v9229_v10 = vld [vmem:[#allocation16 + $0x850] sm:$0xff] }
 0xa68   : > { %16209 = vmatprep.mubr.bf16.mxu0 %v22504_v46  ;;  %16097 = vmatprep.subr.bf16.mxu1 %v18282_v12  ;;  %v9245_v12 = vld [vmem:[#allocation16 + $0x8d0] sm:$0xff] }
 0xa69   : > { %16179 = vmatprep.subr.bf16.mxu0 %v18284_v16  ;;  %v18473_v16 = vcombine.low %v9197_v62, %v9213_v35  ;;  %v18506_v20 = vcombine.high %v9229_v10, %v9245_v12  ;;  %v18505_v24 = vcombine.low %v9229_v10, %v9245_v12  ;;  %v9406_v62 = vld [vmem:[#allocation16 + $0xdd8] sm:$0xff] }
 0xa6a   : > { %16098 = vmatpush1.bf16.msra.mxu1 %v18281_v11  ;;  %v18508_v11 = vcombine.high %v9230_v13, %v9246_v15  ;;  %v9438_v10 = vld [vmem:[#allocation16 + $0xed8] sm:$0xff] }
 0xa6b   : > { %16180 = vmatpush1.bf16.msra.mxu0 %v18283_v17  ;;  %16099 = vmatprep.subr.bf16.mxu1 %v18314_v21  ;;  %v9261_v17 = vld [vmem:[#allocation16 + $0x950] sm:$0xff] }
 0xa6c   : > { %16181 = vmatprep.subr.bf16.mxu0 %v18316_v14  ;;  %v9277_v21 = vld [vmem:[#allocation16 + $0x9d0] sm:$0xff]  ;;  %v9262_v14 = vld [vmem:[#allocation16 + $0x958] sm:$0xff] }
 0xa6d   : > { %v18538_v22 = vcombine.high %v9261_v17, %v9277_v21  ;;  %v18537_v38 = vcombine.low %v9261_v17, %v9277_v21  ;;  %v18539_v39 = vcombine.low %v9262_v14, %v9278_v23  ;;  %v9470_v17 = vld [vmem:[#allocation16 + $0xfd8] sm:$0xff] }
 0xa6e   : > { %16100 = vmatpush1.bf16.msra.mxu1 %v18313_v32  ;;  %v18540_v32 = vcombine.high %v9262_v14, %v9278_v23 }
 0xa6f   : > { %16182 = vmatpush1.bf16.msra.mxu0 %v18315_v33  ;;  %16101 = vmatprep.subr.bf16.mxu1 %v18346_v34  ;;  %v9293_v33 = vld [vmem:[#allocation16 + $0xa50] sm:$0xff] }
 0xa70   : > { %16183 = vmatprep.subr.bf16.mxu0 %v18348_v36  ;;  %v9309_v34 = vld [vmem:[#allocation16 + $0xad0] sm:$0xff]  ;;  %v9294_v36 = vld [vmem:[#allocation16 + $0xa58] sm:$0xff] }
 0xa71   : > { %v18570_v40 = vcombine.high %v9293_v33, %v9309_v34  ;;  %v18569_v49 = vcombine.low %v9293_v33, %v9309_v34  ;;  %v18571_v50 = vcombine.low %v9294_v36, %v9310_v37  ;;  %v9502_v33 = vld [vmem:[#allocation16 + $0x10d8] sm:$0xff] }
 0xa72   : > { %16102 = vmatpush1.bf16.msra.mxu1 %v18345_v41  ;;  %v18572_v41 = vcombine.high %v9294_v36, %v9310_v37 }
 0xa73   : > { %16184 = vmatpush1.bf16.msra.mxu0 %v18347_v43  ;;  %16103 = vmatprep.subr.bf16.mxu1 %v18378_v44  ;;  %v9325_v43 = vld [vmem:[#allocation16 + $0xb50] sm:$0xff] }
 0xa74   : > { %16185 = vmatprep.subr.bf16.mxu0 %v18380_v45  ;;  %v9341_v44 = vld [vmem:[#allocation16 + $0xbd0] sm:$0xff]  ;;  %v9326_v45 = vld [vmem:[#allocation16 + $0xb58] sm:$0xff] }
 0xa75   : > { %v18602_v52 = vcombine.high %v9325_v43, %v9341_v44  ;;  %v18601_v56 = vcombine.low %v9325_v43, %v9341_v44  ;;  %v18603_v57 = vcombine.low %v9326_v45, %v9342_v48  ;;  %v9518_v43 = vld [vmem:[#allocation16 + $0x1158] sm:$0xff] }
 0xa76   : > { %16104 = vmatpush1.bf16.msra.mxu1 %v18377_v25  ;;  %v18604_v25 = vcombine.high %v9326_v45, %v9342_v48  ;;  %v9534_v44 = vld [vmem:[#allocation16 + $0x11d8] sm:$0xff] }
 0xa77   : > { %16186 = vmatpush1.bf16.msra.mxu0 %v18379_v53  ;;  %16105 = vmatprep.subr.bf16.mxu1 %v18410_v54  ;;  %v9357_v53 = vld [vmem:[#allocation16 + $0xc50] sm:$0xff] }
 0xa78   : > { %16187 = vmatprep.subr.bf16.mxu0 %v18412_v55  ;;  %v9373_v54 = vld [vmem:[#allocation16 + $0xcd0] sm:$0xff]  ;;  %v9358_v55 = vld [vmem:[#allocation16 + $0xc58] sm:$0xff] }
 0xa79   : > { %v18634_v31 = vcombine.high %v9357_v53, %v9373_v54  ;;  %v18633_v35 = vcombine.low %v9357_v53, %v9373_v54  ;;  %v18635_v0 = vcombine.low %v9358_v55, %v9374_v28  ;;  %v9566_v53 = vld [vmem:[#allocation16 + $0x12d8] sm:$0xff] }
 0xa7a   : > { %16106 = vmatpush1.bf16.msra.mxu1 %v18409_v59  ;;  %v18636_v59 = vcombine.high %v9358_v55, %v9374_v28  ;;  %v18795_v55 = vcombine.low %v9518_v43, %v9534_v44 }
 0xa7b   : > { %16188 = vmatpush1.bf16.msra.mxu0 %v18411_v30  ;;  %16107 = vmatprep.subr.bf16.mxu1 %v18442_v60  ;;  %v9389_v30 = vld [vmem:[#allocation16 + $0xd50] sm:$0xff] }
 0xa7c   : > { %16189 = vmatprep.subr.bf16.mxu0 %v18444_v61  ;;  %v9405_v60 = vld [vmem:[#allocation16 + $0xdd0] sm:$0xff]  ;;  %v9390_v61 = vld [vmem:[#allocation16 + $0xd58] sm:$0xff] }
 0xa7d   : > { %v18666_v1 = vcombine.high %v9389_v30, %v9405_v60  ;;  %v18665_v12 = vcombine.low %v9389_v30, %v9405_v60  ;;  %v18667_v13 = vcombine.low %v9390_v61, %v9406_v62  ;;  %v9598_v30 = vld [vmem:[#allocation16 + $0x13d8] sm:$0xff] }
 0xa7e   : > { %16108 = vmatpush1.bf16.msra.mxu1 %v18441_v2  ;;  %v18668_v2 = vcombine.high %v9390_v61, %v9406_v62 }
 0xa7f   : > { %16190 = vmatpush1.bf16.msra.mxu0 %v18443_v4  ;;  %16109 = vmatprep.subr.bf16.mxu1 %v18474_v7  ;;  %v9421_v4 = vld [vmem:[#allocation16 + $0xe50] sm:$0xff] }
 0xa80   : > { %16191 = vmatprep.subr.bf16.mxu0 %v18476_v9  ;;  %v9437_v7 = vld [vmem:[#allocation16 + $0xed0] sm:$0xff]  ;;  %v9422_v9 = vld [vmem:[#allocation16 + $0xe58] sm:$0xff] }
 0xa81   : > { %v18698_v15 = vcombine.high %v9421_v4, %v9437_v7  ;;  %v18697_v21 = vcombine.low %v9421_v4, %v9437_v7  ;;  %v18699_v14 = vcombine.low %v9422_v9, %v9438_v10  ;;  %v9630_v4 = vld [vmem:[#allocation16 + $0x14d8] sm:$0xff] }
 0xa82   : > { %16110 = vmatpush1.bf16.msra.mxu1 %v18473_v16  ;;  %v18700_v16 = vcombine.high %v9422_v9, %v9438_v10 }
 0xa83   : > { %16192 = vmatpush1.bf16.msra.mxu0 %v18475_v18  ;;  %16111 = vmatprep.subr.bf16.mxu1 %v18506_v20  ;;  %v9453_v18 = vld [vmem:[#allocation16 + $0xf50] sm:$0xff] }
 0xa84   : > { %16193 = vmatprep.subr.bf16.mxu0 %v18508_v11  ;;  %v9469_v20 = vld [vmem:[#allocation16 + $0xfd0] sm:$0xff]  ;;  %v9454_v11 = vld [vmem:[#allocation16 + $0xf58] sm:$0xff] }
 0xa85   : > { %v18730_v23 = vcombine.high %v9453_v18, %v9469_v20  ;;  %v18729_v34 = vcombine.low %v9453_v18, %v9469_v20  ;;  %v18731_v36 = vcombine.low %v9454_v11, %v9470_v17  ;;  %v9662_v18 = vld [vmem:[#allocation16 + $0x15d8] sm:$0xff] }
 0xa86   : > { %16112 = vmatpush1.bf16.msra.mxu1 %v18505_v24  ;;  %v18732_v24 = vcombine.high %v9454_v11, %v9470_v17 }
 0xa87   : > { %16194 = vmatpush1.bf16.msra.mxu0 %v18507_v27  ;;  %16113 = vmatprep.subr.bf16.mxu1 %v18538_v22  ;;  %v9485_v27 = vld [vmem:[#allocation16 + $0x1050] sm:$0xff] }
 0xa88   : > { %16195 = vmatprep.subr.bf16.mxu0 %v18540_v32  ;;  %v9501_v22 = vld [vmem:[#allocation16 + $0x10d0] sm:$0xff]  ;;  %v9486_v32 = vld [vmem:[#allocation16 + $0x1058] sm:$0xff] }
 0xa89   : > { %v18762_v37 = vcombine.high %v9485_v27, %v9501_v22  ;;  %v18763_v45 = vcombine.low %v9486_v32, %v9502_v33 }
 0xa8a   : > { %16114 = vmatpush1.bf16.msra.mxu1 %v18537_v38  ;;  %v18764_v38 = vcombine.high %v9486_v32, %v9502_v33  ;;  %v10054_v32 = vrot.slane %v22598_v51, %v22570_v3  ;;  %v10050_v33 = vrot.slane %v22598_v51, %v22573_v42 }
 0xa8b   : > { %16196 = vmatpush1.bf16.msra.mxu0 %v18539_v39  ;;  %16115 = vmatprep.subr.bf16.mxu1 %v18570_v40  ;;  %v9517_v39 = vld [vmem:[#allocation16 + $0x1150] sm:$0xff] }
 0xa8c   : > { %16197 = vmatprep.subr.bf16.mxu0 %v18572_v41  ;;  %v9533_v40 = vld [vmem:[#allocation16 + $0x11d0] sm:$0xff]  ;;  %v18761_v41 = vcombine.low %v9485_v27, %v9501_v22  ;;  %v9678_v27 = vld [vmem:[#allocation16 + $0x1658] sm:$0xff] }
 0xa8d   : > { %v18794_v48 = vcombine.high %v9517_v39, %v9533_v40  ;;  %v18793_v54 = vcombine.low %v9517_v39, %v9533_v40  ;;  %v9694_v22 = vld [vmem:[#allocation16 + $0x16d8] sm:$0xff] }
 0xa8e   : > { %16116 = vmatpush1.bf16.msra.mxu1 %v18569_v49  ;;  %v9549_v49 = vld [vmem:[#allocation16 + $0x1250] sm:$0xff]  ;;  %v18956_v40 = vcombine.high %v9678_v27, %v9694_v22 }
 0xa8f   : > { %16198 = vmatpush1.bf16.msra.mxu0 %v18571_v50  ;;  %16117 = vmatprep.subr.bf16.mxu1 %v18602_v52  ;;  %v9565_v50 = vld [vmem:[#allocation16 + $0x12d0] sm:$0xff]  ;;  %v18796_v52 = vcombine.high %v9518_v43, %v9534_v44 }
 0xa90   : > { %16199 = vmatprep.subr.bf16.mxu0 %v18604_v25  ;;  %v9550_v25 = vld [vmem:[#allocation16 + $0x1258] sm:$0xff]  ;;  %v18826_v28 = vcombine.high %v9549_v49, %v9565_v50  ;;  %v18825_v60 = vcombine.low %v9549_v49, %v9565_v50  ;;  %v9725_v43 = vld [vmem:[#allocation16 + $0x17d0] sm:$0xff] }
 0xa91   : > { %v18827_v61 = vcombine.low %v9550_v25, %v9566_v53  ;;  %v9710_v49 = vld [vmem:[#allocation16 + $0x1758] sm:$0xff] }
 0xa92   : > { %16118 = vmatpush1.bf16.msra.mxu1 %v18601_v56  ;;  %v18828_v56 = vcombine.high %v9550_v25, %v9566_v53  ;;  %v9726_v50 = vld [vmem:[#allocation16 + $0x17d8] sm:$0xff] }
 0xa93   : > { %16200 = vmatpush1.bf16.msra.mxu0 %v18603_v57  ;;  %16119 = vmatprep.subr.bf16.mxu1 %v18634_v31  ;;  %v9581_v57 = vld [vmem:[#allocation16 + $0x1350] sm:$0xff] }
 0xa94   : > { %16201 = vmatprep.subr.bf16.mxu0 %v18636_v59  ;;  %v9597_v31 = vld [vmem:[#allocation16 + $0x13d0] sm:$0xff]  ;;  %v9582_v59 = vld [vmem:[#allocation16 + $0x1358] sm:$0xff] }
 0xa95   : > { %v18858_v62 = vcombine.high %v9581_v57, %v9597_v31  ;;  %v18857_v7 = vcombine.low %v9581_v57, %v9597_v31  ;;  %v18859_v9 = vcombine.low %v9582_v59, %v9598_v30  ;;  %v18955_v31 = vcombine.low %v9678_v27, %v9694_v22  ;;  %v9822_v27 = vld [vmem:[#allocation16 + $0x1ad8] sm:$0xff] }
 0xa96   : > { %16120 = vmatpush1.bf16.msra.mxu1 %v18633_v35  ;;  %v18860_v35 = vcombine.high %v9582_v59, %v9598_v30  ;;  %v9741_v30 = vld [vmem:[#allocation16 + $0x1850] sm:$0xff] }
 0xa97   : > { %16202 = vmatpush1.bf16.msra.mxu0 %v18635_v0  ;;  %16121 = vmatprep.subr.bf16.mxu1 %v18666_v1  ;;  %v9613_v0 = vld [vmem:[#allocation16 + $0x1450] sm:$0xff] }
 0xa98   : > { %16203 = vmatprep.subr.bf16.mxu0 %v18668_v2  ;;  %v9629_v1 = vld [vmem:[#allocation16 + $0x14d0] sm:$0xff]  ;;  %v9614_v2 = vld [vmem:[#allocation16 + $0x1458] sm:$0xff] }
 0xa99   : > { %v18890_v10 = vcombine.high %v9613_v0, %v9629_v1  ;;  %v18889_v20 = vcombine.low %v9613_v0, %v9629_v1  ;;  %v18891_v11 = vcombine.low %v9614_v2, %v9630_v4  ;;  %v9757_v0 = vld [vmem:[#allocation16 + $0x18d0] sm:$0xff] }
 0xa9a   : > { %16122 = vmatpush1.bf16.msra.mxu1 %v18665_v12  ;;  %v18892_v12 = vcombine.high %v9614_v2, %v9630_v4  ;;  %v9742_v2 = vld [vmem:[#allocation16 + $0x1858] sm:$0xff] }
 0xa9b   : > { %16204 = vmatpush1.bf16.msra.mxu0 %v18667_v13  ;;  %16123 = vmatprep.subr.bf16.mxu1 %v18698_v15  ;;  %v9645_v13 = vld [vmem:[#allocation16 + $0x1550] sm:$0xff]  ;;  %v9758_v4 = vld [vmem:[#allocation16 + $0x18d8] sm:$0xff] }
 0xa9c   : > { %16205 = vmatprep.subr.bf16.mxu0 %v18700_v16  ;;  %v9661_v15 = vld [vmem:[#allocation16 + $0x15d0] sm:$0xff]  ;;  %v9646_v16 = vld [vmem:[#allocation16 + $0x1558] sm:$0xff] }
 0xa9d   : > { %v18922_v17 = vcombine.high %v9645_v13, %v9661_v15 }
 0xa9e   : > { %16124 = vmatpush1.bf16.msra.mxu1 %v18697_v21  ;;  %v18924_v21 = vcombine.high %v9646_v16, %v9662_v18 }
 0xa9f   : > { %16206 = vmatpush1.bf16.msra.mxu0 %v18699_v14  ;;  %16125 = vmatprep.subr.bf16.mxu1 %v18730_v23  ;;  %v9677_v14 = vld [vmem:[#allocation16 + $0x1650] sm:$0xff] }
 0xaa0   : > { %16207 = vmatprep.subr.bf16.mxu0 %v18732_v24  ;;  %v9693_v23 = vld [vmem:[#allocation16 + $0x16d0] sm:$0xff]  ;;  %v10046_v24 = vrot.slane %v22598_v51, %v22567_v63 }
 0xaa2   : > { %16126 = vmatpush1.bf16.msra.mxu1 %v18729_v34  ;;  %v18921_v34 = vcombine.low %v9645_v13, %v9661_v15  ;;  %v9773_v13 = vld [vmem:[#allocation16 + $0x1950] sm:$0xff] }
 0xaa3   : > { %16208 = vmatpush1.bf16.msra.mxu0 %v18731_v36  ;;  %16136 = vmatprep.subr.bf16.mxu1 %v18762_v37  ;;  %v10058_v36 = vrot.slane %v22598_v51, %v22576_v5  ;;  %v18923_v37 = vcombine.low %v9646_v16, %v9662_v18  ;;  %v9789_v15 = vld [vmem:[#allocation16 + $0x19d0] sm:$0xff]  ;;  %v9774_v16 = vld [vmem:[#allocation16 + $0x1958] sm:$0xff] }
 0xaa4   : > { %16218 = vmatprep.subr.bf16.mxu0 %v18764_v38  ;;  %v18954_v38 = vcombine.high %v9677_v14, %v9693_v23  ;;  %v9790_v18 = vld [vmem:[#allocation16 + $0x19d8] sm:$0xff]  ;;  %v19049_v22 = vcombine.low %v9773_v13, %v9789_v15 }
 0xaa5   : > { %16128 = vmatmul.mubr.bf16.vlgmr.msra.gmra.mrb[32].mxu1 %v22506_v47 }
 0xaa6   : > { %16210 = vmatmul.mubr.bf16.vlgmr.msra.gmra.mrb[28].mxu0 %v22506_v47  ;;  %16137 = vmatpush1.bf16.msra.mxu1 %v18761_v41  ;;  %v9709_v41 = vld [vmem:[#allocation16 + $0x1750] sm:$0xff] }
 0xaa7   : > { %16168 = vmatprep.mubr.bf16.mxu1 %v22516_v58  ;;  %16219 = vmatpush1.bf16.msra.mxu0 %v18763_v45  ;;  %v18986_v59 = vcombine.high %v9709_v41, %v9725_v43 }
 0xaa8   : > { %16250 = vmatprep.mubr.bf16.mxu0 %v22516_v58  ;;  %16138 = vmatprep.subr.bf16.mxu1 %v18794_v48 }
 0xaa9   : > { %16220 = vmatprep.subr.bf16.mxu0 %v18796_v52 }
 0xaaa   : > { %16139 = vmatpush1.bf16.msra.mxu1 %v18793_v54 }
 0xaab   : > { %16221 = vmatpush1.bf16.msra.mxu0 %v18795_v55  ;;  %16140 = vmatprep.subr.bf16.mxu1 %v18826_v28  ;;  %v18953_v55 = vcombine.low %v9677_v14, %v9693_v23  ;;  %v9805_v14 = vld [vmem:[#allocation16 + $0x1a50] sm:$0xff] }
 0xaac   : > { %16222 = vmatprep.subr.bf16.mxu0 %v18828_v56  ;;  %v9821_v23 = vld [vmem:[#allocation16 + $0x1ad0] sm:$0xff] }
 0xaae   : > { %16141 = vmatpush1.bf16.msra.mxu1 %v18825_v60 }
 0xaaf   : > { %16223 = vmatpush1.bf16.msra.mxu0 %v18827_v61  ;;  %16142 = vmatprep.subr.bf16.mxu1 %v18858_v62 }
 0xab0   : > { %16224 = vmatprep.subr.bf16.mxu0 %v18860_v35  ;;  %v18988_v35 = vcombine.high %v9710_v49, %v9726_v50 }
 0xab2   : > { %16143 = vmatpush1.bf16.msra.mxu1 %v18857_v7  ;;  %v18985_v7 = vcombine.low %v9709_v41, %v9725_v43 }
 0xab3   : > { %16225 = vmatpush1.bf16.msra.mxu0 %v18859_v9  ;;  %16144 = vmatprep.subr.bf16.mxu1 %v18890_v10  ;;  %v18987_v9 = vcombine.low %v9710_v49, %v9726_v50  ;;  %v19018_v10 = vcombine.high %v9741_v30, %v9757_v0  ;;  %v19081_v50 = vcombine.low %v9805_v14, %v9821_v23 }
 0xab4   : > { %16226 = vmatprep.subr.bf16.mxu0 %v18892_v12  ;;  %v19020_v12 = vcombine.high %v9742_v2, %v9758_v4 }
 0xab6   : > { %16145 = vmatpush1.bf16.msra.mxu1 %v18889_v20  ;;  %v19017_v20 = vcombine.low %v9741_v30, %v9757_v0 }
 0xab7   : > { %16227 = vmatpush1.bf16.msra.mxu0 %v18891_v11  ;;  %16146 = vmatprep.subr.bf16.mxu1 %v18922_v17  ;;  %v19019_v11 = vcombine.low %v9742_v2, %v9758_v4  ;;  %v19050_v17 = vcombine.high %v9773_v13, %v9789_v15  ;;  %v9934_v13 = vld [vmem:[#allocation16 + $0x1e58] sm:$0xff] }
 0xab8   : > { %v15842_v39 = vpop.f32.mrb[24].mxu1  ;;  %16228 = vmatprep.subr.bf16.mxu0 %v18924_v21  ;;  %v19052_v21 = vcombine.high %v9774_v16, %v9790_v18  ;;  %v9950_v15 = vld [vmem:[#allocation16 + $0x1ed8] sm:$0xff] }
 0xab9   : > { %v19314_v44 = vadd.f32 %v15842_v39, %v10046_v24  ;;  %v15924_v45 = vpop.f32.mrb[20].mxu0  ;;  %v15844_v48 = vpop.f32.mrb[25].mxu1  ;;  %v9806_v24 = vld [vmem:[#allocation16 + $0x1a58] sm:$0xff]  ;;  %v9837_v39 = vld [vmem:[#allocation16 + $0x1b50] sm:$0xff] }
 0xaba   : > { %v19316_v52 = vadd.f32 %v15924_v45, %v10054_v32  ;;  %v19315_v25 = vadd.f32 %v15844_v48, %v10050_v33  ;;  %v15926_v53 = vpop.f32.mrb[21].mxu0  ;;  %v15846_v54 = vpop.f32.mrb[26].mxu1  ;;  %16147 = vmatpush1.bf16.msra.mxu1 %v18921_v34  ;;  %v19051_v33 = vcombine.low %v9774_v16, %v9790_v18  ;;  %v19082_v34 = vcombine.high %v9805_v14, %v9821_v23  ;;  %v9854_v45 = vld [vmem:[#allocation16 + $0x1bd8] sm:$0xff]  ;;  %v9965_v14 = vld [vmem:[#allocation16 + $0x1f50] sm:$0xff] }
 0xabb   : > { %v19265_v51 = vmul.f32 -1.442695, %v19314_v44  ;;  %v19317_v28 = vadd.f32 %v15926_v53, %v10058_v36  ;;  %v15928_v56 = vpop.f32.mrb[22].mxu0  ;;  %16229 = vmatpush1.bf16.msra.mxu0 %v18923_v37  ;;  %v15847_v57 = vpop.f32.mrb[27].mxu1  ;;  %16148 = vmatprep.subr.bf16.mxu1 %v18954_v38  ;;  %v19084_v38 = vcombine.high %v9806_v24, %v9822_v27  ;;  %v9838_v44 = vld [vmem:[#allocation16 + $0x1b58] sm:$0xff]  ;;  %v9981_v23 = vld [vmem:[#allocation16 + $0x1fd0] sm:$0xff] }
 0xabc   : > { %v19267_v60 = vmul.f32 -1.442695, %v19316_v52  ;;  %v19266_v61 = vmul.f32 -1.442695, %v19315_v25  ;;  %v15929_v62 = vpop.f32.mrb[23].mxu0  ;;  %16230 = vmatprep.subr.bf16.mxu0 %v18956_v40  ;;  %v9853_v40 = vld [vmem:[#allocation16 + $0x1bd0] sm:$0xff]  ;;  %v19083_v25 = vcombine.low %v9806_v24, %v9822_v27  ;;  %v19116_v54 = vcombine.high %v9838_v44, %v9854_v45 }
 0xabd   : > { %21427 = vpow2.f32 %v19265_v51  ;;  %v19268_v1 = vmul.f32 -1.442695, %v19317_v28  ;;  %v19114_v53 = vcombine.high %v9837_v39, %v9853_v40  ;;  %v9885_v51 = vld [vmem:[#allocation16 + $0x1cd0] sm:$0xff]  ;;  %v9870_v28 = vld [vmem:[#allocation16 + $0x1c58] sm:$0xff]  ;;  %v19113_v57 = vcombine.low %v9837_v39, %v9853_v40  ;;  %v8992_v39 = vld [vmem:[#allocation16 + $0xe8] sm:$0xff] }
 0xabe   : > { %21429 = vpow2.f32 %v19267_v60  ;;  %16149 = vmatpush1.bf16.msra.mxu1 %v18953_v55  ;;  %v9869_v55 = vld [vmem:[#allocation16 + $0x1c50] sm:$0xff]  ;;  %v9886_v56 = vld [vmem:[#allocation16 + $0x1cd8] sm:$0xff]  ;;  %v19241_v40 = vcombine.low %v9965_v14, %v9981_v23 }
 0xabf   : > { %21431 = vpow2.f32 %v19266_v61  ;;  %16231 = vmatpush1.bf16.msra.mxu0 %v18955_v31  ;;  %16150 = vmatprep.subr.bf16.mxu1 %v18986_v59  ;;  %v19115_v31 = vcombine.low %v9838_v44, %v9854_v45  ;;  %v19146_v59 = vcombine.high %v9869_v55, %v9885_v51  ;;  %v19148_v30 = vcombine.high %v9870_v28, %v9886_v56  ;;  %v9901_v60 = vld [vmem:[#allocation16 + $0x1d50] sm:$0xff]  ;;  %v9902_v62 = vld [vmem:[#allocation16 + $0x1d58] sm:$0xff]  ;;  %v9007_v45 = vld [vmem:[#allocation16 + $0x160] sm:$0xff] }
 0xac0   : > { %21433 = vpow2.f32 %v19268_v1  ;;  %16232 = vmatprep.subr.bf16.mxu0 %v18988_v35  ;;  %v9917_v61 = vld [vmem:[#allocation16 + $0x1dd0] sm:$0xff]  ;;  %v9918_v35 = vld [vmem:[#allocation16 + $0x1dd8] sm:$0xff]  ;;  %v19145_v0 = vcombine.low %v9869_v55, %v9885_v51  ;;  %v19147_v1 = vcombine.low %v9870_v28, %v9886_v56  ;;  %v9055_v55 = vld [vmem:[#allocation16 + $0x2e0] sm:$0xff] }
 0xac1   : > { %v19178_v2 = vcombine.high %v9901_v60, %v9917_v61  ;;  %v19177_v18 = vcombine.low %v9901_v60, %v9917_v61  ;;  %v9966_v24 = vld [vmem:[#allocation16 + $0x1f58] sm:$0xff]  ;;  %v9040_v28 = vld [vmem:[#allocation16 + $0x268] sm:$0xff]  ;;  %v9071_v60 = vld [vmem:[#allocation16 + $0x360] sm:$0xff] }
 0xac2   : > { %16151 = vmatpush1.bf16.msra.mxu1 %v18985_v7  ;;  %v19180_v7 = vcombine.high %v9902_v62, %v9918_v35  ;;  %v9982_v27 = vld [vmem:[#allocation16 + $0x1fd8] sm:$0xff]  ;;  %v9056_v56 = vld [vmem:[#allocation16 + $0x2e8] sm:$0xff]  ;;  %v9087_v61 = vld [vmem:[#allocation16 + $0x3e0] sm:$0xff] }
 0xac3   : > { %16233 = vmatpush1.bf16.msra.mxu0 %v18987_v9  ;;  %16152 = vmatprep.subr.bf16.mxu1 %v19018_v10  ;;  %v9933_v9 = vld [vmem:[#allocation16 + $0x1e50] sm:$0xff] }
 0xac4   : > { %16234 = vmatprep.subr.bf16.mxu0 %v19020_v12  ;;  %v9949_v10 = vld [vmem:[#allocation16 + $0x1ed0] sm:$0xff] }
 0xac6   : > { %16153 = vmatpush1.bf16.msra.mxu1 %v19017_v20 }
 0xac7   : > { %v21428_v32 = vpop.eup %21427  ;;  %16235 = vmatpush1.bf16.msra.mxu0 %v19019_v11  ;;  %16154 = vmatprep.subr.bf16.mxu1 %v19050_v17  ;;  %v19179_v11 = vcombine.low %v9902_v62, %v9918_v35  ;;  %v19210_v17 = vcombine.high %v9933_v9, %v9949_v10  ;;  %v9072_v62 = vld [vmem:[#allocation16 + $0x368] sm:$0xff] }
 0xac8   : > { %v21430_v36 = vpop.eup %21429  ;;  %v16695_v37 = vadd.f32 1.0, %v21428_v32  ;;  %16236 = vmatprep.subr.bf16.mxu0 %v19052_v21  ;;  %v19212_v21 = vcombine.high %v9934_v13, %v9950_v15  ;;  %v19211_v32 = vcombine.low %v9934_v13, %v9950_v15  ;;  %v9088_v35 = vld [vmem:[#allocation16 + $0x3e8] sm:$0xff]  ;;  %v18349_v13 = vcombine.low %v9071_v60, %v9087_v61 }
 0xac9   : > { %v21432_v41 = vpop.eup %21431  ;;  %v16697_v43 = vadd.f32 1.0, %v21430_v36  ;;  %v8975_v36 = vld [vmem:[#allocation16 + $0x60] sm:$0xff]  ;;  %v18351_v15 = vcombine.low %v9072_v62, %v9088_v35 }
 0xaca   : > { %v21434_v48 = vpop.eup %21433  ;;  %21435 = vrcp.f32 %v16695_v37  ;;  %v16696_v49 = vadd.f32 1.0, %v21432_v41  ;;  %16155 = vmatpush1.bf16.msra.mxu1 %v19049_v22  ;;  %v19209_v22 = vcombine.low %v9933_v9, %v9949_v10  ;;  %v8991_v37 = vld [vmem:[#allocation16 + $0xe0] sm:$0xff]  ;;  %v19243_v41 = vcombine.low %v9966_v24, %v9982_v27  ;;  %v9104_v10 = vld [vmem:[#allocation16 + $0x468] sm:$0xff] }
 0xacb   : > { %21437 = vrcp.f32 %v16697_v43  ;;  %v16698_v52 = vadd.f32 1.0, %v21434_v48  ;;  %16237 = vmatpush1.bf16.msra.mxu0 %v19051_v33  ;;  %16156 = vmatprep.subr.bf16.mxu1 %v19082_v34  ;;  %v19242_v33 = vcombine.high %v9965_v14, %v9981_v23  ;;  %v19244_v34 = vcombine.high %v9966_v24, %v9982_v27  ;;  %v9023_v48 = vld [vmem:[#allocation16 + $0x1e0] sm:$0xff] }
 0xacc   : > { %21439 = vrcp.f32 %v16696_v49  ;;  %16238 = vmatprep.subr.bf16.mxu0 %v19084_v38  ;;  %v8976_v38 = vld [vmem:[#allocation16 + $0x68] sm:$0xff]  ;;  %v18254_v43 = vcombine.high %v8975_v36, %v8991_v37  ;;  %v18253_v49 = vcombine.low %v8975_v36, %v8991_v37  ;;  %v9119_v9 = vld [vmem:[#allocation16 + $0x4e0] sm:$0xff] }
 0xacd   : > { %21441 = vrcp.f32 %v16698_v52  ;;  %v18256_v44 = vcombine.high %v8976_v38, %v8992_v39  ;;  %v9024_v52 = vld [vmem:[#allocation16 + $0x1e8] sm:$0xff] }
 0xace   : > { %16157 = vmatpush1.bf16.msra.mxu1 %v19081_v50  ;;  %v9008_v50 = vld [vmem:[#allocation16 + $0x168] sm:$0xff] }
 0xacf   : > { %16239 = vmatpush1.bf16.msra.mxu0 %v19083_v25  ;;  %16158 = vmatprep.subr.bf16.mxu1 %v19114_v53  ;;  %v18255_v25 = vcombine.low %v8976_v38, %v8992_v39  ;;  %v18286_v53 = vcombine.high %v9007_v45, %v9023_v48  ;;  %v18288_v51 = vcombine.high %v9008_v50, %v9024_v52 }
 0xad0   : > { %16240 = vmatprep.subr.bf16.mxu0 %v19116_v54  ;;  %v9039_v54 = vld [vmem:[#allocation16 + $0x260] sm:$0xff] }
 0xad2   : > { %16159 = vmatpush1.bf16.msra.mxu1 %v19113_v57  ;;  %v18285_v57 = vcombine.low %v9007_v45, %v9023_v48 }
 0xad3   : > { %16241 = vmatpush1.bf16.msra.mxu0 %v19115_v31  ;;  %16160 = vmatprep.subr.bf16.mxu1 %v19146_v59  ;;  %v18287_v31 = vcombine.low %v9008_v50, %v9024_v52  ;;  %v18318_v59 = vcombine.high %v9039_v54, %v9055_v55  ;;  %v9231_v52 = vld [vmem:[#allocation16 + $0x860] sm:$0xff] }
 0xad4   : > { %v21436_v4 = vpop.eup %21435  ;;  %16242 = vmatprep.subr.bf16.mxu0 %v19148_v30  ;;  %v18320_v30 = vcombine.high %v9040_v28, %v9056_v56 }
 0xad5   : > { %v21438_v12 = vpop.eup %21437  ;;  %16791 = vst [vmem:[%s22552_s22 + $0x60] sm:$0xff] %v21436_v4  ;;  %v18352_v4 = vcombine.high %v9072_v62, %v9088_v35 }
 0xad6   : > { %v21440_v16 = vpop.eup %21439  ;;  %16793 = vst [vmem:[%s22552_s22 + $0x70] sm:$0xff] %v21438_v12  ;;  %16161 = vmatpush1.bf16.msra.mxu1 %v19145_v0  ;;  %v18317_v0 = vcombine.low %v9039_v54, %v9055_v55  ;;  %v9120_v12 = vld [vmem:[#allocation16 + $0x4e8] sm:$0xff] }
 0xad7   : > { %v21442_v20 = vpop.eup %21441  ;;  %16792 = vst [vmem:[%s22552_s22 + $0x68] sm:$0xff] %v21440_v16  ;;  %16243 = vmatpush1.bf16.msra.mxu0 %v19147_v1  ;;  %16162 = vmatprep.subr.bf16.mxu1 %v19178_v2  ;;  %v18319_v1 = vcombine.low %v9040_v28, %v9056_v56  ;;  %v18350_v2 = vcombine.high %v9071_v60, %v9087_v61  ;;  %v9248_v54 = vld [vmem:[#allocation16 + $0x8e8] sm:$0xff] }
 0xad8   : > { %16794 = vst [vmem:[%s22552_s22 + $0x78] sm:$0xff] %v21442_v20  ;;  %16244 = vmatprep.subr.bf16.mxu0 %v19180_v7  ;;  %v9103_v7 = vld [vmem:[#allocation16 + $0x460] sm:$0xff]  ;;  %v18383_v23 = vcombine.low %v9104_v10, %v9120_v12 }
 0xad9   : > { %v18382_v16 = vcombine.high %v9103_v7, %v9119_v9  ;;  %v9135_v20 = vld [vmem:[#allocation16 + $0x560] sm:$0xff]  ;;  %v18381_v14 = vcombine.low %v9103_v7, %v9119_v9 }
 0xada   : > { %16163 = vmatpush1.bf16.msra.mxu1 %v19177_v18  ;;  %v18384_v18 = vcombine.high %v9104_v10, %v9120_v12 }
 0xadb   : > { %16245 = vmatpush1.bf16.msra.mxu0 %v19179_v11  ;;  %16164 = vmatprep.subr.bf16.mxu1 %v19210_v17  ;;  %v9151_v11 = vld [vmem:[#allocation16 + $0x5e0] sm:$0xff]  ;;  %v9136_v17 = vld [vmem:[#allocation16 + $0x568] sm:$0xff] }
 0xadc   : > { %16246 = vmatprep.subr.bf16.mxu0 %v19212_v21  ;;  %v9152_v21 = vld [vmem:[#allocation16 + $0x5e8] sm:$0xff]  ;;  %v18414_v24 = vcombine.high %v9135_v20, %v9151_v11  ;;  %v18413_v36 = vcombine.low %v9135_v20, %v9151_v11 }
 0xadd   : > { %v18416_v27 = vcombine.high %v9136_v17, %v9152_v21  ;;  %v18415_v37 = vcombine.low %v9136_v17, %v9152_v21 }
 0xade   : > { %16165 = vmatpush1.bf16.msra.mxu1 %v19209_v22  ;;  %v9167_v22 = vld [vmem:[#allocation16 + $0x660] sm:$0xff] }
 0xadf   : > { %16247 = vmatpush1.bf16.msra.mxu0 %v19211_v32  ;;  %16166 = vmatprep.subr.bf16.mxu1 %v19242_v33  ;;  %v9183_v32 = vld [vmem:[#allocation16 + $0x6e0] sm:$0xff]  ;;  %v9168_v33 = vld [vmem:[#allocation16 + $0x668] sm:$0xff] }
 0xae0   : > { %16248 = vmatprep.subr.bf16.mxu0 %v19244_v34  ;;  %v9184_v34 = vld [vmem:[#allocation16 + $0x6e8] sm:$0xff]  ;;  %v18446_v38 = vcombine.high %v9167_v22, %v9183_v32  ;;  %v18445_v45 = vcombine.low %v9167_v22, %v9183_v32 }
 0xae1   : > { %v18448_v39 = vcombine.high %v9168_v33, %v9184_v34  ;;  %v18447_v48 = vcombine.low %v9168_v33, %v9184_v34 }
 0xae2   : > { %16167 = vmatpush1.bf16.msra.mxu1 %v19241_v40  ;;  %v9199_v40 = vld [vmem:[#allocation16 + $0x760] sm:$0xff] }
 0xae3   : > { %16249 = vmatpush1.bf16.msra.mxu0 %v19243_v41  ;;  %16259 = vmatprep.subr.bf16.mxu1 %v18254_v43  ;;  %v9215_v41 = vld [vmem:[#allocation16 + $0x7e0] sm:$0xff]  ;;  %v9200_v43 = vld [vmem:[#allocation16 + $0x768] sm:$0xff] }
 0xae4   : > { %16341 = vmatprep.subr.bf16.mxu0 %v18256_v44  ;;  %v9216_v44 = vld [vmem:[#allocation16 + $0x7e8] sm:$0xff]  ;;  %v18477_v55 = vcombine.low %v9199_v40, %v9215_v41 }
 0xae5   : > { %16169 = vmatmul.mubr.bf16.vlgmr.msra.gmra.mrb[32].mxu1 %v22523_v6  ;;  %v18480_v50 = vcombine.high %v9200_v43, %v9216_v44 }
 0xae6   : > { %16251 = vmatmul.mubr.bf16.vlgmr.msra.gmra.mrb[28].mxu0 %v22523_v6  ;;  %16260 = vmatpush1.bf16.msra.mxu1 %v18253_v49  ;;  %v18478_v49 = vcombine.high %v9199_v40, %v9215_v41 }
 0xae7   : > { %16291 = vmatprep.mubr.bf16.mxu1 %v22504_v46  ;;  %16342 = vmatpush1.bf16.msra.mxu0 %v18255_v25  ;;  %v9247_v25 = vld [vmem:[#allocation16 + $0x8e0] sm:$0xff] }
 0xae8   : > { %16373 = vmatprep.mubr.bf16.mxu0 %v22504_v46  ;;  %16261 = vmatprep.subr.bf16.mxu1 %v18286_v53  ;;  %v9232_v53 = vld [vmem:[#allocation16 + $0x868] sm:$0xff]  ;;  %v18510_v28 = vcombine.high %v9231_v52, %v9247_v25  ;;  %v18509_v60 = vcombine.low %v9231_v52, %v9247_v25 }
 0xae9   : > { %16343 = vmatprep.subr.bf16.mxu0 %v18288_v51  ;;  %v18479_v51 = vcombine.low %v9200_v43, %v9216_v44  ;;  %v18512_v56 = vcombine.high %v9232_v53, %v9248_v54  ;;  %v18511_v61 = vcombine.low %v9232_v53, %v9248_v54 }
 0xaea   : > { %16262 = vmatpush1.bf16.msra.mxu1 %v18285_v57  ;;  %v9263_v57 = vld [vmem:[#allocation16 + $0x960] sm:$0xff] }
 0xaeb   : > { %16344 = vmatpush1.bf16.msra.mxu0 %v18287_v31  ;;  %16263 = vmatprep.subr.bf16.mxu1 %v18318_v59  ;;  %v9279_v31 = vld [vmem:[#allocation16 + $0x9e0] sm:$0xff]  ;;  %v9264_v59 = vld [vmem:[#allocation16 + $0x968] sm:$0xff] }
 0xaec   : > { %16345 = vmatprep.subr.bf16.mxu0 %v18320_v30  ;;  %v9280_v30 = vld [vmem:[#allocation16 + $0x9e8] sm:$0xff]  ;;  %v18542_v62 = vcombine.high %v9263_v57, %v9279_v31  ;;  %v18541_v7 = vcombine.low %v9263_v57, %v9279_v31 }
 0xaed   : > { %v18544_v35 = vcombine.high %v9264_v59, %v9280_v30  ;;  %v18543_v9 = vcombine.low %v9264_v59, %v9280_v30 }
 0xaee   : > { %16264 = vmatpush1.bf16.msra.mxu1 %v18317_v0  ;;  %v9295_v0 = vld [vmem:[#allocation16 + $0xa60] sm:$0xff] }
 0xaef   : > { %16346 = vmatpush1.bf16.msra.mxu0 %v18319_v1  ;;  %16265 = vmatprep.subr.bf16.mxu1 %v18350_v2  ;;  %v9311_v1 = vld [vmem:[#allocation16 + $0xae0] sm:$0xff]  ;;  %v9296_v2 = vld [vmem:[#allocation16 + $0xa68] sm:$0xff] }
 0xaf0   : > { %16347 = vmatprep.subr.bf16.mxu0 %v18352_v4  ;;  %v9312_v4 = vld [vmem:[#allocation16 + $0xae8] sm:$0xff]  ;;  %v18574_v10 = vcombine.high %v9295_v0, %v9311_v1  ;;  %v18573_v20 = vcombine.low %v9295_v0, %v9311_v1 }
 0xaf1   : > { %v18576_v12 = vcombine.high %v9296_v2, %v9312_v4  ;;  %v18575_v11 = vcombine.low %v9296_v2, %v9312_v4 }
 0xaf2   : > { %16266 = vmatpush1.bf16.msra.mxu1 %v18349_v13  ;;  %v9327_v13 = vld [vmem:[#allocation16 + $0xb60] sm:$0xff] }
 0xaf3   : > { %16348 = vmatpush1.bf16.msra.mxu0 %v18351_v15  ;;  %16267 = vmatprep.subr.bf16.mxu1 %v18382_v16  ;;  %v9343_v15 = vld [vmem:[#allocation16 + $0xbe0] sm:$0xff]  ;;  %v9328_v16 = vld [vmem:[#allocation16 + $0xb68] sm:$0xff] }
 0xaf4   : > { %16349 = vmatprep.subr.bf16.mxu0 %v18384_v18  ;;  %v9344_v18 = vld [vmem:[#allocation16 + $0xbe8] sm:$0xff]  ;;  %v18606_v17 = vcombine.high %v9327_v13, %v9343_v15  ;;  %v18605_v22 = vcombine.low %v9327_v13, %v9343_v15 }
 0xaf5   : > { %v18608_v21 = vcombine.high %v9328_v16, %v9344_v18  ;;  %v18607_v32 = vcombine.low %v9328_v16, %v9344_v18  ;;  %v9536_v13 = vld [vmem:[#allocation16 + $0x11e8] sm:$0xff]  ;;  %v9551_v18 = vld [vmem:[#allocation16 + $0x1260] sm:$0xff] }
 0xaf6   : > { %16268 = vmatpush1.bf16.msra.mxu1 %v18381_v14  ;;  %v9359_v14 = vld [vmem:[#allocation16 + $0xc60] sm:$0xff] }
 0xaf7   : > { %16350 = vmatpush1.bf16.msra.mxu0 %v18383_v23  ;;  %16269 = vmatprep.subr.bf16.mxu1 %v18414_v24  ;;  %v9375_v23 = vld [vmem:[#allocation16 + $0xce0] sm:$0xff]  ;;  %v9360_v24 = vld [vmem:[#allocation16 + $0xc68] sm:$0xff] }
 0xaf8   : > { %16351 = vmatprep.subr.bf16.mxu0 %v18416_v27  ;;  %v9376_v27 = vld [vmem:[#allocation16 + $0xce8] sm:$0xff]  ;;  %v18638_v33 = vcombine.high %v9359_v14, %v9375_v23  ;;  %v18637_v40 = vcombine.low %v9359_v14, %v9375_v23 }
 0xaf9   : > { %v18640_v34 = vcombine.high %v9360_v24, %v9376_v27  ;;  %v18639_v41 = vcombine.low %v9360_v24, %v9376_v27 }
 0xafa   : > { %16270 = vmatpush1.bf16.msra.mxu1 %v18413_v36  ;;  %v9391_v36 = vld [vmem:[#allocation16 + $0xd60] sm:$0xff] }
 0xafb   : > { %16352 = vmatpush1.bf16.msra.mxu0 %v18415_v37  ;;  %16271 = vmatprep.subr.bf16.mxu1 %v18446_v38  ;;  %v9407_v37 = vld [vmem:[#allocation16 + $0xde0] sm:$0xff]  ;;  %v9392_v38 = vld [vmem:[#allocation16 + $0xd68] sm:$0xff] }
 0xafc   : > { %16353 = vmatprep.subr.bf16.mxu0 %v18448_v39  ;;  %v9408_v39 = vld [vmem:[#allocation16 + $0xde8] sm:$0xff]  ;;  %v18670_v43 = vcombine.high %v9391_v36, %v9407_v37  ;;  %v18669_v52 = vcombine.low %v9391_v36, %v9407_v37 }
 0xafd   : > { %v18672_v44 = vcombine.high %v9392_v38, %v9408_v39  ;;  %v18671_v25 = vcombine.low %v9392_v38, %v9408_v39 }
 0xafe   : > { %16272 = vmatpush1.bf16.msra.mxu1 %v18445_v45  ;;  %v9423_v45 = vld [vmem:[#allocation16 + $0xe60] sm:$0xff] }
 0xaff   : > { %16354 = vmatpush1.bf16.msra.mxu0 %v18447_v48  ;;  %16273 = vmatprep.subr.bf16.mxu1 %v18478_v49  ;;  %v9439_v48 = vld [vmem:[#allocation16 + $0xee0] sm:$0xff]  ;;  %v9424_v49 = vld [vmem:[#allocation16 + $0xe68] sm:$0xff] }
 0xb00   : > { %16355 = vmatprep.subr.bf16.mxu0 %v18480_v50  ;;  %v9440_v50 = vld [vmem:[#allocation16 + $0xee8] sm:$0xff]  ;;  %v18702_v53 = vcombine.high %v9423_v45, %v9439_v48  ;;  %v18701_v57 = vcombine.low %v9423_v45, %v9439_v48 }
 0xb01   : > { %v18704_v54 = vcombine.high %v9424_v49, %v9440_v50  ;;  %v18703_v31 = vcombine.low %v9424_v49, %v9440_v50 }
 0xb02   : > { %16274 = vmatpush1.bf16.msra.mxu1 %v18477_v55  ;;  %v9455_v55 = vld [vmem:[#allocation16 + $0xf60] sm:$0xff] }
 0xb03   : > { %16356 = vmatpush1.bf16.msra.mxu0 %v18479_v51  ;;  %16275 = vmatprep.subr.bf16.mxu1 %v18510_v28  ;;  %v9471_v51 = vld [vmem:[#allocation16 + $0xfe0] sm:$0xff]  ;;  %v9456_v28 = vld [vmem:[#allocation16 + $0xf68] sm:$0xff] }
 0xb04   : > { %16357 = vmatprep.subr.bf16.mxu0 %v18512_v56  ;;  %v9472_v56 = vld [vmem:[#allocation16 + $0xfe8] sm:$0xff]  ;;  %v18734_v59 = vcombine.high %v9455_v55, %v9471_v51  ;;  %v18733_v0 = vcombine.low %v9455_v55, %v9471_v51  ;;  %v22640_v51 = vld [vmem:[#allocation17 + $0x10] sm:$0xff] }
 0xb05   : > { %v18736_v30 = vcombine.high %v9456_v28, %v9472_v56  ;;  %v18735_v1 = vcombine.low %v9456_v28, %v9472_v56 }
 0xb06   : > { %16276 = vmatpush1.bf16.msra.mxu1 %v18509_v60  ;;  %v9487_v60 = vld [vmem:[#allocation16 + $0x1060] sm:$0xff] }
 0xb07   : > { %16358 = vmatpush1.bf16.msra.mxu0 %v18511_v61  ;;  %16277 = vmatprep.subr.bf16.mxu1 %v18542_v62  ;;  %v9503_v61 = vld [vmem:[#allocation16 + $0x10e0] sm:$0xff]  ;;  %v9488_v62 = vld [vmem:[#allocation16 + $0x1068] sm:$0xff] }
 0xb08   : > { %16359 = vmatprep.subr.bf16.mxu0 %v18544_v35  ;;  %v9504_v35 = vld [vmem:[#allocation16 + $0x10e8] sm:$0xff]  ;;  %v18766_v2 = vcombine.high %v9487_v60, %v9503_v61 }
 0xb09   : > { %v18768_v4 = vcombine.high %v9488_v62, %v9504_v35  ;;  %v18767_v15 = vcombine.low %v9488_v62, %v9504_v35  ;;  %v10070_v62 = vrot.slane %v22640_v51, %v22483_v8  ;;  %v10066_v35 = vrot.slane %v22640_v51, %v22469_v19 }
 0xb0a   : > { %16278 = vmatpush1.bf16.msra.mxu1 %v18541_v7  ;;  %v9519_v7 = vld [vmem:[#allocation16 + $0x1160] sm:$0xff] }
 0xb0b   : > { %16360 = vmatpush1.bf16.msra.mxu0 %v18543_v9  ;;  %16279 = vmatprep.subr.bf16.mxu1 %v18574_v10  ;;  %v9535_v9 = vld [vmem:[#allocation16 + $0x11e0] sm:$0xff]  ;;  %v18765_v10 = vcombine.low %v9487_v60, %v9503_v61  ;;  %v9680_v60 = vld [vmem:[#allocation16 + $0x1668] sm:$0xff] }
 0xb0c   : > { %16361 = vmatprep.subr.bf16.mxu0 %v18576_v12  ;;  %v9520_v12 = vld [vmem:[#allocation16 + $0x1168] sm:$0xff]  ;;  %v18798_v16 = vcombine.high %v9519_v7, %v9535_v9  ;;  %v18797_v14 = vcombine.low %v9519_v7, %v9535_v9 }
 0xb0d   : > { %v18799_v23 = vcombine.low %v9520_v12, %v9536_v13  ;;  %v9696_v61 = vld [vmem:[#allocation16 + $0x16e8] sm:$0xff] }
 0xb0e   : > { %16280 = vmatpush1.bf16.msra.mxu1 %v18573_v20  ;;  %v9567_v20 = vld [vmem:[#allocation16 + $0x12e0] sm:$0xff]  ;;  %v18960_v9 = vcombine.high %v9680_v60, %v9696_v61 }
 0xb0f   : > { %16362 = vmatpush1.bf16.msra.mxu0 %v18575_v11  ;;  %16281 = vmatprep.subr.bf16.mxu1 %v18606_v17  ;;  %v18800_v11 = vcombine.high %v9520_v12, %v9536_v13  ;;  %v9552_v17 = vld [vmem:[#allocation16 + $0x1268] sm:$0xff]  ;;  %v18830_v24 = vcombine.high %v9551_v18, %v9567_v20  ;;  %v18829_v36 = vcombine.low %v9551_v18, %v9567_v20  ;;  %v9727_v12 = vld [vmem:[#allocation16 + $0x17e0] sm:$0xff] }
 0xb10   : > { %16363 = vmatprep.subr.bf16.mxu0 %v18608_v21  ;;  %v9568_v21 = vld [vmem:[#allocation16 + $0x12e8] sm:$0xff] }
 0xb11   : > { %v18832_v27 = vcombine.high %v9552_v17, %v9568_v21  ;;  %v18831_v37 = vcombine.low %v9552_v17, %v9568_v21  ;;  %v9712_v18 = vld [vmem:[#allocation16 + $0x1768] sm:$0xff] }
 0xb12   : > { %16282 = vmatpush1.bf16.msra.mxu1 %v18605_v22  ;;  %v9583_v22 = vld [vmem:[#allocation16 + $0x1360] sm:$0xff]  ;;  %v9728_v20 = vld [vmem:[#allocation16 + $0x17e8] sm:$0xff] }
 0xb13   : > { %16364 = vmatpush1.bf16.msra.mxu0 %v18607_v32  ;;  %16283 = vmatprep.subr.bf16.mxu1 %v18638_v33  ;;  %v9599_v32 = vld [vmem:[#allocation16 + $0x13e0] sm:$0xff]  ;;  %v9584_v33 = vld [vmem:[#allocation16 + $0x1368] sm:$0xff] }
 0xb14   : > { %16365 = vmatprep.subr.bf16.mxu0 %v18640_v34  ;;  %v9600_v34 = vld [vmem:[#allocation16 + $0x13e8] sm:$0xff]  ;;  %v18862_v38 = vcombine.high %v9583_v22, %v9599_v32  ;;  %v18861_v45 = vcombine.low %v9583_v22, %v9599_v32 }
 0xb15   : > { %v18864_v39 = vcombine.high %v9584_v33, %v9600_v34  ;;  %v18863_v48 = vcombine.low %v9584_v33, %v9600_v34  ;;  %v18959_v33 = vcombine.low %v9680_v60, %v9696_v61  ;;  %v9808_v60 = vld [vmem:[#allocation16 + $0x1a68] sm:$0xff] }
 0xb16   : > { %16284 = vmatpush1.bf16.msra.mxu1 %v18637_v40  ;;  %v9615_v40 = vld [vmem:[#allocation16 + $0x1460] sm:$0xff]  ;;  %v9824_v61 = vld [vmem:[#allocation16 + $0x1ae8] sm:$0xff] }
 0xb17   : > { %16366 = vmatpush1.bf16.msra.mxu0 %v18639_v41  ;;  %16285 = vmatprep.subr.bf16.mxu1 %v18670_v43  ;;  %v9631_v41 = vld [vmem:[#allocation16 + $0x14e0] sm:$0xff]  ;;  %v9616_v43 = vld [vmem:[#allocation16 + $0x1468] sm:$0xff] }
 0xb18   : > { %16367 = vmatprep.subr.bf16.mxu0 %v18672_v44  ;;  %v9632_v44 = vld [vmem:[#allocation16 + $0x14e8] sm:$0xff]  ;;  %v18894_v49 = vcombine.high %v9615_v40, %v9631_v41  ;;  %v18893_v55 = vcombine.low %v9615_v40, %v9631_v41  ;;  %v18992_v40 = vcombine.high %v9712_v18, %v9728_v20  ;;  %v9759_v41 = vld [vmem:[#allocation16 + $0x18e0] sm:$0xff] }
 0xb19   : > { %v18896_v50 = vcombine.high %v9616_v43, %v9632_v44  ;;  %v18895_v28 = vcombine.low %v9616_v43, %v9632_v44  ;;  %v9744_v44 = vld [vmem:[#allocation16 + $0x1868] sm:$0xff] }
 0xb1a   : > { %16286 = vmatpush1.bf16.msra.mxu1 %v18669_v52  ;;  %v9647_v52 = vld [vmem:[#allocation16 + $0x1560] sm:$0xff] }
 0xb1b   : > { %16368 = vmatpush1.bf16.msra.mxu0 %v18671_v25  ;;  %16287 = vmatprep.subr.bf16.mxu1 %v18702_v53  ;;  %v9663_v25 = vld [vmem:[#allocation16 + $0x15e0] sm:$0xff]  ;;  %v9648_v53 = vld [vmem:[#allocation16 + $0x1568] sm:$0xff] }
 0xb1c   : > { %16369 = vmatprep.subr.bf16.mxu0 %v18704_v54  ;;  %v9664_v54 = vld [vmem:[#allocation16 + $0x15e8] sm:$0xff]  ;;  %v18926_v56 = vcombine.high %v9647_v52, %v9663_v25 }
 0xb1e   : > { %16288 = vmatpush1.bf16.msra.mxu1 %v18701_v57  ;;  %v18928_v57 = vcombine.high %v9648_v53, %v9664_v54 }
 0xb1f   : > { %16370 = vmatpush1.bf16.msra.mxu0 %v18703_v31  ;;  %16289 = vmatprep.subr.bf16.mxu1 %v18734_v59  ;;  %v9679_v31 = vld [vmem:[#allocation16 + $0x1660] sm:$0xff] }
 0xb20   : > { %16371 = vmatprep.subr.bf16.mxu0 %v18736_v30  ;;  %v9695_v59 = vld [vmem:[#allocation16 + $0x16e0] sm:$0xff]  ;;  %v10062_v30 = vrot.slane %v22640_v51, %v22464_v26 }
 0xb22   : > { %16290 = vmatpush1.bf16.msra.mxu1 %v18733_v0  ;;  %v18925_v0 = vcombine.low %v9647_v52, %v9663_v25  ;;  %v9775_v25 = vld [vmem:[#allocation16 + $0x1960] sm:$0xff] }
 0xb23   : > { %16372 = vmatpush1.bf16.msra.mxu0 %v18735_v1  ;;  %16300 = vmatprep.subr.bf16.mxu1 %v18766_v2  ;;  %v10074_v1 = vrot.slane %v22640_v51, %v22472_v29  ;;  %v18927_v2 = vcombine.low %v9648_v53, %v9664_v54  ;;  %v9791_v53 = vld [vmem:[#allocation16 + $0x19e0] sm:$0xff]  ;;  %v9776_v54 = vld [vmem:[#allocation16 + $0x1968] sm:$0xff] }
 0xb24   : > { %16382 = vmatprep.subr.bf16.mxu0 %v18768_v4  ;;  %v18958_v4 = vcombine.high %v9679_v31, %v9695_v59 }
 0xb25   : > { %16292 = vmatmul.mubr.bf16.vlgmr.msra.gmra.mrb[36].mxu1 %v22506_v47 }
 0xb26   : > { %16374 = vmatmul.mubr.bf16.vlgmr.msra.gmra.mrb[32].mxu0 %v22506_v47  ;;  %16301 = vmatpush1.bf16.msra.mxu1 %v18765_v10  ;;  %v9711_v10 = vld [vmem:[#allocation16 + $0x1760] sm:$0xff] }
 0xb27   : > { %16332 = vmatprep.mubr.bf16.mxu1 %v22516_v58  ;;  %16383 = vmatpush1.bf16.msra.mxu0 %v18767_v15  ;;  %v18990_v34 = vcombine.high %v9711_v10, %v9727_v12 }
 0xb28   : > { %16414 = vmatprep.mubr.bf16.mxu0 %v22516_v58  ;;  %16302 = vmatprep.subr.bf16.mxu1 %v18798_v16 }
 0xb29   : > { %16384 = vmatprep.subr.bf16.mxu0 %v18800_v11 }
 0xb2a   : > { %16303 = vmatpush1.bf16.msra.mxu1 %v18797_v14 }
 0xb2b   : > { %16385 = vmatpush1.bf16.msra.mxu0 %v18799_v23  ;;  %16304 = vmatprep.subr.bf16.mxu1 %v18830_v24  ;;  %v18957_v23 = vcombine.low %v9679_v31, %v9695_v59  ;;  %v9807_v59 = vld [vmem:[#allocation16 + $0x1a60] sm:$0xff] }
 0xb2c   : > { %16386 = vmatprep.subr.bf16.mxu0 %v18832_v27 }
 0xb2e   : > { %16305 = vmatpush1.bf16.msra.mxu1 %v18829_v36  ;;  %v9743_v36 = vld [vmem:[#allocation16 + $0x1860] sm:$0xff] }
 0xb2f   : > { %16387 = vmatpush1.bf16.msra.mxu0 %v18831_v37  ;;  %16306 = vmatprep.subr.bf16.mxu1 %v18862_v38 }
 0xb30   : > { %16388 = vmatprep.subr.bf16.mxu0 %v18864_v39 }
 0xb32   : > { %16307 = vmatpush1.bf16.msra.mxu1 %v18861_v45  ;;  %v9760_v45 = vld [vmem:[#allocation16 + $0x18e8] sm:$0xff] }
 0xb33   : > { %16389 = vmatpush1.bf16.msra.mxu0 %v18863_v48  ;;  %16308 = vmatprep.subr.bf16.mxu1 %v18894_v49  ;;  %v18989_v48 = vcombine.low %v9711_v10, %v9727_v12  ;;  %v18991_v49 = vcombine.low %v9712_v18, %v9728_v20  ;;  %v19024_v52 = vcombine.high %v9744_v44, %v9760_v45  ;;  %v9855_v10 = vld [vmem:[#allocation16 + $0x1be0] sm:$0xff] }
 0xb34   : > { %16390 = vmatprep.subr.bf16.mxu0 %v18896_v50  ;;  %v19022_v50 = vcombine.high %v9743_v36, %v9759_v41 }
 0xb36   : > { %16309 = vmatpush1.bf16.msra.mxu1 %v18893_v55  ;;  %v9792_v55 = vld [vmem:[#allocation16 + $0x19e8] sm:$0xff] }
 0xb37   : > { %16391 = vmatpush1.bf16.msra.mxu0 %v18895_v28  ;;  %16310 = vmatprep.subr.bf16.mxu1 %v18926_v56  ;;  %v19021_v28 = vcombine.low %v9743_v36, %v9759_v41  ;;  %v19023_v56 = vcombine.low %v9744_v44, %v9760_v45  ;;  %v19056_v31 = vcombine.high %v9776_v54, %v9792_v55  ;;  %v9920_v41 = vld [vmem:[#allocation16 + $0x1de8] sm:$0xff] }
 0xb38   : > { %v16006_v7 = vpop.f32.mrb[28].mxu1  ;;  %16392 = vmatprep.subr.bf16.mxu0 %v18928_v57  ;;  %v19054_v57 = vcombine.high %v9775_v25, %v9791_v53 }
 0xb39   : > { %v19318_v13 = vadd.f32 %v16006_v7, %v10062_v30  ;;  %v16088_v15 = vpop.f32.mrb[24].mxu0  ;;  %v16008_v16 = vpop.f32.mrb[29].mxu1  ;;  %v9823_v30 = vld [vmem:[#allocation16 + $0x1ae0] sm:$0xff]  ;;  %v19088_v7 = vcombine.high %v9808_v60, %v9824_v61 }
 0xb3a   : > { %v19320_v11 = vadd.f32 %v16088_v15, %v10070_v62  ;;  %v19319_v17 = vadd.f32 %v16008_v16, %v10066_v35  ;;  %v16090_v21 = vpop.f32.mrb[25].mxu0  ;;  %v16010_v14 = vpop.f32.mrb[30].mxu1  ;;  %16311 = vmatpush1.bf16.msra.mxu1 %v18925_v0  ;;  %v19053_v62 = vcombine.low %v9775_v25, %v9791_v53  ;;  %v19055_v0 = vcombine.low %v9776_v54, %v9792_v55  ;;  %v9840_v15 = vld [vmem:[#allocation16 + $0x1b68] sm:$0xff] }
 0xb3b   : > { %v19269_v24 = vmul.f32 -1.442695, %v19318_v13  ;;  %v19321_v27 = vadd.f32 %v16090_v21, %v10074_v1  ;;  %v16092_v22 = vpop.f32.mrb[26].mxu0  ;;  %16393 = vmatpush1.bf16.msra.mxu0 %v18927_v2  ;;  %v16011_v32 = vpop.f32.mrb[31].mxu1  ;;  %16312 = vmatprep.subr.bf16.mxu1 %v18958_v4  ;;  %v19086_v1 = vcombine.high %v9807_v59, %v9823_v30  ;;  %v9856_v16 = vld [vmem:[#allocation16 + $0x1be8] sm:$0xff]  ;;  %v19087_v21 = vcombine.low %v9808_v60, %v9824_v61  ;;  %v9983_v60 = vld [vmem:[#allocation16 + $0x1fe0] sm:$0xff] }
 0xb3c   : > { %v19271_v37 = vmul.f32 -1.442695, %v19320_v11  ;;  %v19270_v38 = vmul.f32 -1.442695, %v19319_v17  ;;  %v16093_v39 = vpop.f32.mrb[27].mxu0  ;;  %16394 = vmatprep.subr.bf16.mxu0 %v18960_v9  ;;  %v9839_v9 = vld [vmem:[#allocation16 + $0x1b60] sm:$0xff]  ;;  %v19085_v11 = vcombine.low %v9807_v59, %v9823_v30 }
 0xb3d   : > { %21443 = vpow2.f32 %v19269_v24  ;;  %v19272_v43 = vmul.f32 -1.442695, %v19321_v27  ;;  %v19118_v14 = vcombine.high %v9839_v9, %v9855_v10  ;;  %v9871_v24 = vld [vmem:[#allocation16 + $0x1c60] sm:$0xff]  ;;  %v9872_v22 = vld [vmem:[#allocation16 + $0x1c68] sm:$0xff] }
 0xb3e   : > { %21445 = vpow2.f32 %v19271_v37  ;;  %16313 = vmatpush1.bf16.msra.mxu1 %v18957_v23  ;;  %v19120_v23 = vcombine.high %v9840_v15, %v9856_v16  ;;  %v9887_v27 = vld [vmem:[#allocation16 + $0x1ce0] sm:$0xff]  ;;  %v9888_v32 = vld [vmem:[#allocation16 + $0x1ce8] sm:$0xff] }
 0xb3f   : > { %21447 = vpow2.f32 %v19270_v38  ;;  %16395 = vmatpush1.bf16.msra.mxu0 %v18959_v33  ;;  %16314 = vmatprep.subr.bf16.mxu1 %v18990_v34  ;;  %v19117_v33 = vcombine.low %v9839_v9, %v9855_v10  ;;  %v19119_v34 = vcombine.low %v9840_v15, %v9856_v16  ;;  %v19150_v36 = vcombine.high %v9871_v24, %v9887_v27  ;;  %v9903_v38 = vld [vmem:[#allocation16 + $0x1d60] sm:$0xff]  ;;  %v9936_v53 = vld [vmem:[#allocation16 + $0x1e68] sm:$0xff]  ;;  %v8978_v9 = vld [vmem:[#allocation16 + $0x78] sm:$0xff] }
 0xb40   : > { %21449 = vpow2.f32 %v19272_v43  ;;  %16396 = vmatprep.subr.bf16.mxu0 %v18992_v40  ;;  %v19152_v37 = vcombine.high %v9872_v22, %v9888_v32  ;;  %v9919_v39 = vld [vmem:[#allocation16 + $0x1de0] sm:$0xff]  ;;  %v9904_v40 = vld [vmem:[#allocation16 + $0x1d68] sm:$0xff]  ;;  %v19149_v43 = vcombine.low %v9871_v24, %v9887_v27  ;;  %v19151_v44 = vcombine.low %v9872_v22, %v9888_v32  ;;  %v8994_v10 = vld [vmem:[#allocation16 + $0xf8] sm:$0xff] }
 0xb41   : > { %v19182_v45 = vcombine.high %v9903_v38, %v9919_v39  ;;  %v9952_v54 = vld [vmem:[#allocation16 + $0x1ee8] sm:$0xff]  ;;  %v9967_v30 = vld [vmem:[#allocation16 + $0x1f60] sm:$0xff]  ;;  %v18260_v16 = vcombine.high %v8978_v9, %v8994_v10  ;;  %v9041_v24 = vld [vmem:[#allocation16 + $0x270] sm:$0xff] }
 0xb42   : > { %16315 = vmatpush1.bf16.msra.mxu1 %v18989_v48  ;;  %v19216_v59 = vcombine.high %v9936_v53, %v9952_v54  ;;  %v9968_v61 = vld [vmem:[#allocation16 + $0x1f68] sm:$0xff]  ;;  %v9057_v27 = vld [vmem:[#allocation16 + $0x2f0] sm:$0xff]  ;;  %v9042_v32 = vld [vmem:[#allocation16 + $0x278] sm:$0xff] }
 0xb43   : > { %16397 = vmatpush1.bf16.msra.mxu0 %v18991_v49  ;;  %16316 = vmatprep.subr.bf16.mxu1 %v19022_v50  ;;  %v19184_v49 = vcombine.high %v9904_v40, %v9920_v41  ;;  %v9935_v50 = vld [vmem:[#allocation16 + $0x1e60] sm:$0xff] }
 0xb44   : > { %16398 = vmatprep.subr.bf16.mxu0 %v19024_v52  ;;  %v9951_v52 = vld [vmem:[#allocation16 + $0x1ee0] sm:$0xff] }
 0xb46   : > { %16317 = vmatpush1.bf16.msra.mxu1 %v19021_v28  ;;  %v19181_v28 = vcombine.low %v9903_v38, %v9919_v39  ;;  %v9073_v39 = vld [vmem:[#allocation16 + $0x370] sm:$0xff] }
 0xb47   : > { %v21444_v35 = vpop.eup %21443  ;;  %16399 = vmatpush1.bf16.msra.mxu0 %v19023_v56  ;;  %16318 = vmatprep.subr.bf16.mxu1 %v19054_v57  ;;  %v19183_v57 = vcombine.low %v9904_v40, %v9920_v41  ;;  %v9089_v40 = vld [vmem:[#allocation16 + $0x3f0] sm:$0xff]  ;;  %v9074_v41 = vld [vmem:[#allocation16 + $0x378] sm:$0xff] }
 0xb48   : > { %v21446_v2 = vpop.eup %21445  ;;  %v16699_v4 = vadd.f32 1.0, %v21444_v35  ;;  %16400 = vmatprep.subr.bf16.mxu0 %v19056_v31  ;;  %v19214_v31 = vcombine.high %v9935_v50, %v9951_v52  ;;  %v19213_v35 = vcombine.low %v9935_v50, %v9951_v52  ;;  %v9105_v50 = vld [vmem:[#allocation16 + $0x470] sm:$0xff] }
 0xb49   : > { %v21448_v12 = vpop.eup %21447  ;;  %v16701_v13 = vadd.f32 1.0, %v21446_v2  ;;  %v9121_v52 = vld [vmem:[#allocation16 + $0x4f0] sm:$0xff] }
 0xb4a   : > { %v21450_v18 = vpop.eup %21449  ;;  %21451 = vrcp.f32 %v16699_v4  ;;  %v16700_v20 = vadd.f32 1.0, %v21448_v12  ;;  %16319 = vmatpush1.bf16.msra.mxu1 %v19053_v62  ;;  %v9984_v62 = vld [vmem:[#allocation16 + $0x1fe8] sm:$0xff]  ;;  %v8977_v4 = vld [vmem:[#allocation16 + $0x70] sm:$0xff]  ;;  %v19245_v12 = vcombine.low %v9967_v30, %v9983_v60 }
 0xb4b   : > { %21453 = vrcp.f32 %v16701_v13  ;;  %v16702_v17 = vadd.f32 1.0, %v21450_v18  ;;  %16401 = vmatpush1.bf16.msra.mxu0 %v19055_v0  ;;  %16320 = vmatprep.subr.bf16.mxu1 %v19086_v1  ;;  %v19215_v0 = vcombine.low %v9936_v53, %v9952_v54  ;;  %v19246_v1 = vcombine.high %v9967_v30, %v9983_v60  ;;  %v9009_v18 = vld [vmem:[#allocation16 + $0x170] sm:$0xff]  ;;  %v9122_v53 = vld [vmem:[#allocation16 + $0x4f8] sm:$0xff] }
 0xb4c   : > { %21455 = vrcp.f32 %v16700_v20  ;;  %16402 = vmatprep.subr.bf16.mxu0 %v19088_v7  ;;  %v19248_v2 = vcombine.high %v9968_v61, %v9984_v62  ;;  %v8993_v7 = vld [vmem:[#allocation16 + $0xf0] sm:$0xff]  ;;  %v19247_v13 = vcombine.low %v9968_v61, %v9984_v62  ;;  %v18385_v30 = vcombine.low %v9105_v50, %v9121_v52 }
 0xb4d   : > { %21457 = vrcp.f32 %v16702_v17  ;;  %v18258_v15 = vcombine.high %v8977_v4, %v8993_v7  ;;  %v9025_v20 = vld [vmem:[#allocation16 + $0x1f0] sm:$0xff]  ;;  %v9010_v17 = vld [vmem:[#allocation16 + $0x178] sm:$0xff] }
 0xb4e   : > { %16321 = vmatpush1.bf16.msra.mxu1 %v19085_v11  ;;  %v18257_v11 = vcombine.low %v8977_v4, %v8993_v7 }
 0xb4f   : > { %16403 = vmatpush1.bf16.msra.mxu0 %v19087_v21  ;;  %16322 = vmatprep.subr.bf16.mxu1 %v19118_v14  ;;  %v9026_v21 = vld [vmem:[#allocation16 + $0x1f8] sm:$0xff]  ;;  %v18259_v14 = vcombine.low %v8978_v9, %v8994_v10 }
 0xb50   : > { %16404 = vmatprep.subr.bf16.mxu0 %v19120_v23  ;;  %v18290_v23 = vcombine.high %v9009_v18, %v9025_v20  ;;  %v18292_v22 = vcombine.high %v9010_v17, %v9026_v21 }
 0xb52   : > { %16323 = vmatpush1.bf16.msra.mxu1 %v19117_v33  ;;  %v9058_v33 = vld [vmem:[#allocation16 + $0x2f8] sm:$0xff] }
 0xb53   : > { %16405 = vmatpush1.bf16.msra.mxu0 %v19119_v34  ;;  %16324 = vmatprep.subr.bf16.mxu1 %v19150_v36  ;;  %v18289_v34 = vcombine.low %v9009_v18, %v9025_v20  ;;  %v18291_v36 = vcombine.low %v9010_v17, %v9026_v21  ;;  %v18324_v38 = vcombine.high %v9042_v32, %v9058_v33  ;;  %v9233_v21 = vld [vmem:[#allocation16 + $0x870] sm:$0xff] }
 0xb54   : > { %v21452_v48 = vpop.eup %21451  ;;  %16406 = vmatprep.subr.bf16.mxu0 %v19152_v37  ;;  %v18322_v37 = vcombine.high %v9041_v24, %v9057_v27 }
 0xb55   : > { %v21454_v25 = vpop.eup %21453  ;;  %16795 = vst [vmem:[%s22552_s22 + $0x80] sm:$0xff] %v21452_v48  ;;  %v18354_v48 = vcombine.high %v9073_v39, %v9089_v40 }
 0xb56   : > { %v21456_v55 = vpop.eup %21455  ;;  %16797 = vst [vmem:[%s22552_s22 + $0x90] sm:$0xff] %v21454_v25  ;;  %16325 = vmatpush1.bf16.msra.mxu1 %v19149_v43  ;;  %v9090_v43 = vld [vmem:[#allocation16 + $0x3f8] sm:$0xff] }
 0xb57   : > { %v21458_v56 = vpop.eup %21457  ;;  %16796 = vst [vmem:[%s22552_s22 + $0x88] sm:$0xff] %v21456_v55  ;;  %16407 = vmatpush1.bf16.msra.mxu0 %v19151_v44  ;;  %16326 = vmatprep.subr.bf16.mxu1 %v19182_v45  ;;  %v18321_v44 = vcombine.low %v9041_v24, %v9057_v27  ;;  %v18323_v45 = vcombine.low %v9042_v32, %v9058_v33  ;;  %v9106_v25 = vld [vmem:[#allocation16 + $0x478] sm:$0xff] }
 0xb58   : > { %16798 = vst [vmem:[%s22552_s22 + $0x98] sm:$0xff] %v21458_v56  ;;  %16408 = vmatprep.subr.bf16.mxu0 %v19184_v49  ;;  %v18356_v49 = vcombine.high %v9074_v41, %v9090_v43  ;;  %v18355_v54 = vcombine.low %v9074_v41, %v9090_v43  ;;  %v18386_v55 = vcombine.high %v9105_v50, %v9121_v52  ;;  %v9137_v56 = vld [vmem:[#allocation16 + $0x570] sm:$0xff]  ;;  %v9250_v24 = vld [vmem:[#allocation16 + $0x8f8] sm:$0xff] }
 0xb59   : > { %v18387_v60 = vcombine.low %v9106_v25, %v9122_v53 }
 0xb5a   : > { %16327 = vmatpush1.bf16.msra.mxu1 %v19181_v28  ;;  %v18388_v28 = vcombine.high %v9106_v25, %v9122_v53 }
 0xb5b   : > { %16409 = vmatpush1.bf16.msra.mxu0 %v19183_v57  ;;  %16328 = vmatprep.subr.bf16.mxu1 %v19214_v31  ;;  %v9153_v57 = vld [vmem:[#allocation16 + $0x5f0] sm:$0xff]  ;;  %v9138_v31 = vld [vmem:[#allocation16 + $0x578] sm:$0xff] }
 0xb5c   : > { %16410 = vmatprep.subr.bf16.mxu0 %v19216_v59  ;;  %v9154_v59 = vld [vmem:[#allocation16 + $0x5f8] sm:$0xff]  ;;  %v18418_v61 = vcombine.high %v9137_v56, %v9153_v57  ;;  %v18417_v4 = vcombine.low %v9137_v56, %v9153_v57 }
 0xb5d   : > { %v18420_v62 = vcombine.high %v9138_v31, %v9154_v59  ;;  %v18419_v7 = vcombine.low %v9138_v31, %v9154_v59 }
 0xb5e   : > { %16329 = vmatpush1.bf16.msra.mxu1 %v19213_v35  ;;  %v9169_v35 = vld [vmem:[#allocation16 + $0x670] sm:$0xff] }
 0xb5f   : > { %16411 = vmatpush1.bf16.msra.mxu0 %v19215_v0  ;;  %16330 = vmatprep.subr.bf16.mxu1 %v19246_v1  ;;  %v9185_v0 = vld [vmem:[#allocation16 + $0x6f0] sm:$0xff]  ;;  %v9170_v1 = vld [vmem:[#allocation16 + $0x678] sm:$0xff] }
 0xb60   : > { %16412 = vmatprep.subr.bf16.mxu0 %v19248_v2  ;;  %v9186_v2 = vld [vmem:[#allocation16 + $0x6f8] sm:$0xff]  ;;  %v18450_v9 = vcombine.high %v9169_v35, %v9185_v0  ;;  %v18449_v18 = vcombine.low %v9169_v35, %v9185_v0 }
 0xb61   : > { %v18452_v10 = vcombine.high %v9170_v1, %v9186_v2  ;;  %v18451_v20 = vcombine.low %v9170_v1, %v9186_v2 }
 0xb62   : > { %16331 = vmatpush1.bf16.msra.mxu1 %v19245_v12  ;;  %v9201_v12 = vld [vmem:[#allocation16 + $0x770] sm:$0xff] }
 0xb63   : > { %16413 = vmatpush1.bf16.msra.mxu0 %v19247_v13  ;;  %16423 = vmatprep.subr.bf16.mxu1 %v18258_v15  ;;  %v9217_v13 = vld [vmem:[#allocation16 + $0x7f0] sm:$0xff]  ;;  %v9202_v15 = vld [vmem:[#allocation16 + $0x778] sm:$0xff] }
 0xb64   : > { %16505 = vmatprep.subr.bf16.mxu0 %v18260_v16  ;;  %v9218_v16 = vld [vmem:[#allocation16 + $0x7f8] sm:$0xff]  ;;  %v18481_v27 = vcombine.low %v9201_v12, %v9217_v13 }
 0xb65   : > { %16333 = vmatmul.mubr.bf16.vlgmr.msra.gmra.mrb[36].mxu1 %v22523_v6  ;;  %v18484_v17 = vcombine.high %v9202_v15, %v9218_v16 }
 0xb66   : > { %16415 = vmatmul.mubr.bf16.vlgmr.msra.gmra.mrb[32].mxu0 %v22523_v6  ;;  %16424 = vmatpush1.bf16.msra.mxu1 %v18257_v11  ;;  %v18482_v11 = vcombine.high %v9201_v12, %v9217_v13 }
 0xb67   : > { %16455 = vmatprep.mubr.bf16.mxu1 %v22504_v46  ;;  %16506 = vmatpush1.bf16.msra.mxu0 %v18259_v14  ;;  %v9249_v14 = vld [vmem:[#allocation16 + $0x8f0] sm:$0xff] }
 0xb68   : > { %16537 = vmatprep.mubr.bf16.mxu0 %v22504_v46  ;;  %16425 = vmatprep.subr.bf16.mxu1 %v18290_v23  ;;  %v18353_v46 = vcombine.low %v9073_v39, %v9089_v40  ;;  %v9234_v23 = vld [vmem:[#allocation16 + $0x878] sm:$0xff]  ;;  %v18514_v32 = vcombine.high %v9233_v21, %v9249_v14  ;;  %v18513_v39 = vcombine.low %v9233_v21, %v9249_v14 }
 0xb69   : > { %16507 = vmatprep.subr.bf16.mxu0 %v18292_v22  ;;  %v18483_v22 = vcombine.low %v9202_v15, %v9218_v16  ;;  %v18516_v33 = vcombine.high %v9234_v23, %v9250_v24  ;;  %v18515_v40 = vcombine.low %v9234_v23, %v9250_v24 }
 0xb6a   : > { %16426 = vmatpush1.bf16.msra.mxu1 %v18289_v34  ;;  %v9265_v34 = vld [vmem:[#allocation16 + $0x970] sm:$0xff] }
 0xb6b   : > { %16508 = vmatpush1.bf16.msra.mxu0 %v18291_v36  ;;  %16427 = vmatprep.subr.bf16.mxu1 %v18322_v37  ;;  %v9281_v36 = vld [vmem:[#allocation16 + $0x9f0] sm:$0xff]  ;;  %v9266_v37 = vld [vmem:[#allocation16 + $0x978] sm:$0xff] }
 0xb6c   : > { %16509 = vmatprep.subr.bf16.mxu0 %v18324_v38  ;;  %v9282_v38 = vld [vmem:[#allocation16 + $0x9f8] sm:$0xff]  ;;  %v18546_v41 = vcombine.high %v9265_v34, %v9281_v36  ;;  %v18545_v50 = vcombine.low %v9265_v34, %v9281_v36 }
 0xb6d   : > { %v18548_v43 = vcombine.high %v9266_v37, %v9282_v38  ;;  %v18547_v52 = vcombine.low %v9266_v37, %v9282_v38 }
 0xb6e   : > { %16428 = vmatpush1.bf16.msra.mxu1 %v18321_v44  ;;  %v9297_v44 = vld [vmem:[#allocation16 + $0xa70] sm:$0xff] }
 0xb6f   : > { %16510 = vmatpush1.bf16.msra.mxu0 %v18323_v45  ;;  %16429 = vmatprep.subr.bf16.mxu1 %v18354_v48  ;;  %v9313_v45 = vld [vmem:[#allocation16 + $0xaf0] sm:$0xff]  ;;  %v9298_v48 = vld [vmem:[#allocation16 + $0xa78] sm:$0xff] }
 0xb70   : > { %16511 = vmatprep.subr.bf16.mxu0 %v18356_v49  ;;  %v9314_v49 = vld [vmem:[#allocation16 + $0xaf8] sm:$0xff]  ;;  %v18578_v25 = vcombine.high %v9297_v44, %v9313_v45  ;;  %v18577_v56 = vcombine.low %v9297_v44, %v9313_v45 }
 0xb71   : > { %v18580_v53 = vcombine.high %v9298_v48, %v9314_v49  ;;  %v18579_v57 = vcombine.low %v9298_v48, %v9314_v49 }
 0xb72   : > { %16430 = vmatpush1.bf16.msra.mxu1 %v18353_v46  ;;  %v9329_v46 = vld [vmem:[#allocation16 + $0xb70] sm:$0xff] }
 0xb73   : > { %16512 = vmatpush1.bf16.msra.mxu0 %v18355_v54  ;;  %16431 = vmatprep.subr.bf16.mxu1 %v18386_v55  ;;  %v9345_v54 = vld [vmem:[#allocation16 + $0xbf0] sm:$0xff]  ;;  %v9330_v55 = vld [vmem:[#allocation16 + $0xb78] sm:$0xff] }
 0xb74   : > { %16513 = vmatprep.subr.bf16.mxu0 %v18388_v28  ;;  %v9346_v28 = vld [vmem:[#allocation16 + $0xbf8] sm:$0xff]  ;;  %v18610_v31 = vcombine.high %v9329_v46, %v9345_v54  ;;  %v18609_v35 = vcombine.low %v9329_v46, %v9345_v54 }
 0xb75   : > { %v18612_v59 = vcombine.high %v9330_v55, %v9346_v28  ;;  %v18611_v0 = vcombine.low %v9330_v55, %v9346_v28  ;;  %v9538_v46 = vld [vmem:[#allocation16 + $0x11f8] sm:$0xff]  ;;  %v9553_v28 = vld [vmem:[#allocation16 + $0x1270] sm:$0xff] }
 0xb76   : > { %16432 = vmatpush1.bf16.msra.mxu1 %v18385_v30  ;;  %v9361_v30 = vld [vmem:[#allocation16 + $0xc70] sm:$0xff] }
 0xb77   : > { %16514 = vmatpush1.bf16.msra.mxu0 %v18387_v60  ;;  %16433 = vmatprep.subr.bf16.mxu1 %v18418_v61  ;;  %v9377_v60 = vld [vmem:[#allocation16 + $0xcf0] sm:$0xff]  ;;  %v9362_v61 = vld [vmem:[#allocation16 + $0xc78] sm:$0xff] }
 0xb78   : > { %16515 = vmatprep.subr.bf16.mxu0 %v18420_v62  ;;  %v9378_v62 = vld [vmem:[#allocation16 + $0xcf8] sm:$0xff]  ;;  %v18642_v1 = vcombine.high %v9361_v30, %v9377_v60  ;;  %v18641_v12 = vcombine.low %v9361_v30, %v9377_v60 }
 0xb79   : > { %v18644_v2 = vcombine.high %v9362_v61, %v9378_v62  ;;  %v18643_v13 = vcombine.low %v9362_v61, %v9378_v62 }
 0xb7a   : > { %16434 = vmatpush1.bf16.msra.mxu1 %v18417_v4  ;;  %v9393_v4 = vld [vmem:[#allocation16 + $0xd70] sm:$0xff] }
 0xb7b   : > { %16516 = vmatpush1.bf16.msra.mxu0 %v18419_v7  ;;  %16435 = vmatprep.subr.bf16.mxu1 %v18450_v9  ;;  %v9409_v7 = vld [vmem:[#allocation16 + $0xdf0] sm:$0xff]  ;;  %v9394_v9 = vld [vmem:[#allocation16 + $0xd78] sm:$0xff] }
 0xb7c   : > { %16517 = vmatprep.subr.bf16.mxu0 %v18452_v10  ;;  %v9410_v10 = vld [vmem:[#allocation16 + $0xdf8] sm:$0xff]  ;;  %v18674_v15 = vcombine.high %v9393_v4, %v9409_v7  ;;  %v18673_v21 = vcombine.low %v9393_v4, %v9409_v7 }
 0xb7d   : > { %v18676_v16 = vcombine.high %v9394_v9, %v9410_v10  ;;  %v18675_v14 = vcombine.low %v9394_v9, %v9410_v10  ;;  %v9617_v10 = vld [vmem:[#allocation16 + $0x1470] sm:$0xff] }
 0xb7e   : > { %16436 = vmatpush1.bf16.msra.mxu1 %v18449_v18  ;;  %v9425_v18 = vld [vmem:[#allocation16 + $0xe70] sm:$0xff] }
 0xb7f   : > { %16518 = vmatpush1.bf16.msra.mxu0 %v18451_v20  ;;  %16437 = vmatprep.subr.bf16.mxu1 %v18482_v11  ;;  %v9441_v20 = vld [vmem:[#allocation16 + $0xef0] sm:$0xff]  ;;  %v9426_v11 = vld [vmem:[#allocation16 + $0xe78] sm:$0xff] }
 0xb80   : > { %16519 = vmatprep.subr.bf16.mxu0 %v18484_v17  ;;  %v9442_v17 = vld [vmem:[#allocation16 + $0xef8] sm:$0xff]  ;;  %v18706_v23 = vcombine.high %v9425_v18, %v9441_v20  ;;  %v18705_v34 = vcombine.low %v9425_v18, %v9441_v20 }
 0xb81   : > { %v18708_v24 = vcombine.high %v9426_v11, %v9442_v17  ;;  %v18707_v36 = vcombine.low %v9426_v11, %v9442_v17  ;;  %v9649_v11 = vld [vmem:[#allocation16 + $0x1570] sm:$0xff] }
 0xb82   : > { %16438 = vmatpush1.bf16.msra.mxu1 %v18481_v27  ;;  %v9457_v27 = vld [vmem:[#allocation16 + $0xf70] sm:$0xff] }
 0xb83   : > { %16520 = vmatpush1.bf16.msra.mxu0 %v18483_v22  ;;  %16439 = vmatprep.subr.bf16.mxu1 %v18514_v32  ;;  %v9473_v22 = vld [vmem:[#allocation16 + $0xff0] sm:$0xff]  ;;  %v9458_v32 = vld [vmem:[#allocation16 + $0xf78] sm:$0xff] }
 0xb84   : > { %16521 = vmatprep.subr.bf16.mxu0 %v18516_v33  ;;  %v9474_v33 = vld [vmem:[#allocation16 + $0xff8] sm:$0xff]  ;;  %v18738_v37 = vcombine.high %v9457_v27, %v9473_v22  ;;  %v18737_v44 = vcombine.low %v9457_v27, %v9473_v22  ;;  %v9665_v17 = vld [vmem:[#allocation16 + $0x15f0] sm:$0xff] }
 0xb85   : > { %v18740_v38 = vcombine.high %v9458_v32, %v9474_v33  ;;  %v18739_v45 = vcombine.low %v9458_v32, %v9474_v33  ;;  %v18930_v27 = vcombine.high %v9649_v11, %v9665_v17  ;;  %v9681_v32 = vld [vmem:[#allocation16 + $0x1670] sm:$0xff] }
 0xb86   : > { %16440 = vmatpush1.bf16.msra.mxu1 %v18513_v39  ;;  %v9489_v39 = vld [vmem:[#allocation16 + $0x1070] sm:$0xff] }
 0xb87   : > { %16522 = vmatpush1.bf16.msra.mxu0 %v18515_v40  ;;  %16441 = vmatprep.subr.bf16.mxu1 %v18546_v41  ;;  %v9505_v40 = vld [vmem:[#allocation16 + $0x10f0] sm:$0xff]  ;;  %v9490_v41 = vld [vmem:[#allocation16 + $0x1078] sm:$0xff] }
 0xb88   : > { %16523 = vmatprep.subr.bf16.mxu0 %v18548_v43  ;;  %v9506_v43 = vld [vmem:[#allocation16 + $0x10f8] sm:$0xff]  ;;  %v18770_v48 = vcombine.high %v9489_v39, %v9505_v40  ;;  %v9697_v33 = vld [vmem:[#allocation16 + $0x16f0] sm:$0xff] }
 0xb89   : > { %v18772_v49 = vcombine.high %v9490_v41, %v9506_v43  ;;  %v18771_v54 = vcombine.low %v9490_v41, %v9506_v43  ;;  %v10090_v41 = vrot.slane %v22640_v51, %v22576_v5 }
 0xb8a   : > { %16442 = vmatpush1.bf16.msra.mxu1 %v18545_v50  ;;  %v9521_v50 = vld [vmem:[#allocation16 + $0x1170] sm:$0xff] }
 0xb8b   : > { %16524 = vmatpush1.bf16.msra.mxu0 %v18547_v52  ;;  %16443 = vmatprep.subr.bf16.mxu1 %v18578_v25  ;;  %v9537_v52 = vld [vmem:[#allocation16 + $0x11f0] sm:$0xff]  ;;  %v18769_v25 = vcombine.low %v9489_v39, %v9505_v40  ;;  %v10082_v39 = vrot.slane %v22640_v51, %v22573_v42  ;;  %v18929_v40 = vcombine.low %v9649_v11, %v9665_v17  ;;  %v9794_v11 = vld [vmem:[#allocation16 + $0x19f8] sm:$0xff] }
 0xb8c   : > { %16525 = vmatprep.subr.bf16.mxu0 %v18580_v53  ;;  %v9522_v53 = vld [vmem:[#allocation16 + $0x1178] sm:$0xff]  ;;  %v18802_v55 = vcombine.high %v9521_v50, %v9537_v52  ;;  %v18801_v30 = vcombine.low %v9521_v50, %v9537_v52  ;;  %v9729_v50 = vld [vmem:[#allocation16 + $0x17f0] sm:$0xff] }
 0xb8d   : > { %v18803_v60 = vcombine.low %v9522_v53, %v9538_v46 }
 0xb8e   : > { %16444 = vmatpush1.bf16.msra.mxu1 %v18577_v56  ;;  %v9569_v56 = vld [vmem:[#allocation16 + $0x12f0] sm:$0xff] }
 0xb8f   : > { %16526 = vmatpush1.bf16.msra.mxu0 %v18579_v57  ;;  %16445 = vmatprep.subr.bf16.mxu1 %v18610_v31  ;;  %v18804_v57 = vcombine.high %v9522_v53, %v9538_v46  ;;  %v9554_v31 = vld [vmem:[#allocation16 + $0x1278] sm:$0xff]  ;;  %v18834_v61 = vcombine.high %v9553_v28, %v9569_v56  ;;  %v18833_v4 = vcombine.low %v9553_v28, %v9569_v56 }
 0xb90   : > { %16527 = vmatprep.subr.bf16.mxu0 %v18612_v59  ;;  %v9570_v59 = vld [vmem:[#allocation16 + $0x12f8] sm:$0xff] }
 0xb91   : > { %v18836_v62 = vcombine.high %v9554_v31, %v9570_v59  ;;  %v9714_v46 = vld [vmem:[#allocation16 + $0x1778] sm:$0xff] }
 0xb92   : > { %16446 = vmatpush1.bf16.msra.mxu1 %v18609_v35  ;;  %v9585_v35 = vld [vmem:[#allocation16 + $0x1370] sm:$0xff] }
 0xb93   : > { %16528 = vmatpush1.bf16.msra.mxu0 %v18611_v0  ;;  %16447 = vmatprep.subr.bf16.mxu1 %v18642_v1  ;;  %v9601_v0 = vld [vmem:[#allocation16 + $0x13f0] sm:$0xff]  ;;  %v9586_v1 = vld [vmem:[#allocation16 + $0x1378] sm:$0xff] }
 0xb94   : > { %16529 = vmatprep.subr.bf16.mxu0 %v18644_v2  ;;  %v9602_v2 = vld [vmem:[#allocation16 + $0x13f8] sm:$0xff]  ;;  %v18866_v7 = vcombine.high %v9585_v35, %v9601_v0 }
 0xb95   : > { %v18868_v9 = vcombine.high %v9586_v1, %v9602_v2 }
 0xb96   : > { %16448 = vmatpush1.bf16.msra.mxu1 %v18641_v12  ;;  %v9633_v12 = vld [vmem:[#allocation16 + $0x14f0] sm:$0xff] }
 0xb97   : > { %16530 = vmatpush1.bf16.msra.mxu0 %v18643_v13  ;;  %16449 = vmatprep.subr.bf16.mxu1 %v18674_v15  ;;  %v9618_v13 = vld [vmem:[#allocation16 + $0x1478] sm:$0xff]  ;;  %v18898_v18 = vcombine.high %v9617_v10, %v9633_v12 }
 0xb98   : > { %16531 = vmatprep.subr.bf16.mxu0 %v18676_v16  ;;  %v9634_v15 = vld [vmem:[#allocation16 + $0x14f8] sm:$0xff]  ;;  %v18867_v16 = vcombine.low %v9586_v1, %v9602_v2 }
 0xb99   : > { %v18900_v20 = vcombine.high %v9618_v13, %v9634_v15 }
 0xb9a   : > { %16450 = vmatpush1.bf16.msra.mxu1 %v18673_v21  ;;  %v9650_v21 = vld [vmem:[#allocation16 + $0x1578] sm:$0xff] }
 0xb9b   : > { %16532 = vmatpush1.bf16.msra.mxu0 %v18675_v14  ;;  %16451 = vmatprep.subr.bf16.mxu1 %v18706_v23  ;;  %v9666_v14 = vld [vmem:[#allocation16 + $0x15f8] sm:$0xff]  ;;  %v18897_v23 = vcombine.low %v9617_v10, %v9633_v12 }
 0xb9c   : > { %16533 = vmatprep.subr.bf16.mxu0 %v18708_v24  ;;  %v18899_v24 = vcombine.low %v9618_v13, %v9634_v15  ;;  %v18932_v22 = vcombine.high %v9650_v21, %v9666_v14  ;;  %v18931_v43 = vcombine.low %v9650_v21, %v9666_v14  ;;  %v9762_v10 = vld [vmem:[#allocation16 + $0x18f8] sm:$0xff] }
 0xb9e   : > { %16452 = vmatpush1.bf16.msra.mxu1 %v18705_v34  ;;  %v10078_v34 = vrot.slane %v22640_v51, %v22567_v63 }
 0xb9f   : > { %16534 = vmatpush1.bf16.msra.mxu0 %v18707_v36  ;;  %16453 = vmatprep.subr.bf16.mxu1 %v18738_v37  ;;  %v9682_v36 = vld [vmem:[#allocation16 + $0x1678] sm:$0xff] }
 0xba0   : > { %16535 = vmatprep.subr.bf16.mxu0 %v18740_v38  ;;  %v9698_v37 = vld [vmem:[#allocation16 + $0x16f8] sm:$0xff]  ;;  %v10086_v38 = vrot.slane %v22640_v51, %v22570_v3 }
 0xba2   : > { %16454 = vmatpush1.bf16.msra.mxu1 %v18737_v44  ;;  %v18962_v44 = vcombine.high %v9681_v32, %v9697_v33 }
 0xba3   : > { %16536 = vmatpush1.bf16.msra.mxu0 %v18739_v45  ;;  %16464 = vmatprep.subr.bf16.mxu1 %v18770_v48  ;;  %v18964_v48 = vcombine.high %v9682_v36, %v9698_v37 }
 0xba4   : > { %16546 = vmatprep.subr.bf16.mxu0 %v18772_v49  ;;  %v9713_v49 = vld [vmem:[#allocation16 + $0x1770] sm:$0xff] }
 0xba5   : > { %16456 = vmatmul.mubr.bf16.vlgmr.msra.gmra.mrb[40].mxu1 %v22506_v47  ;;  %v18993_v12 = vcombine.low %v9713_v49, %v9729_v50 }
 0xba6   : > { %16538 = vmatmul.mubr.bf16.vlgmr.msra.gmra.mrb[36].mxu0 %v22506_v47  ;;  %16465 = vmatpush1.bf16.msra.mxu1 %v18769_v25  ;;  %v18835_v47 = vcombine.low %v9554_v31, %v9570_v59  ;;  %v18961_v31 = vcombine.low %v9681_v32, %v9697_v33  ;;  %v9826_v32 = vld [vmem:[#allocation16 + $0x1af8] sm:$0xff] }
 0xba7   : > { %16496 = vmatprep.mubr.bf16.mxu1 %v22516_v58  ;;  %16547 = vmatpush1.bf16.msra.mxu0 %v18771_v54  ;;  %v9730_v54 = vld [vmem:[#allocation16 + $0x17f8] sm:$0xff] }
 0xba8   : > { %16578 = vmatprep.mubr.bf16.mxu0 %v22516_v58  ;;  %16466 = vmatprep.subr.bf16.mxu1 %v18802_v55  ;;  %v18865_v58 = vcombine.low %v9585_v35, %v9601_v0  ;;  %v9745_v35 = vld [vmem:[#allocation16 + $0x1870] sm:$0xff]  ;;  %v18995_v13 = vcombine.low %v9714_v46, %v9730_v54 }
 0xba9   : > { %16548 = vmatprep.subr.bf16.mxu0 %v18804_v57 }
 0xbaa   : > { %16467 = vmatpush1.bf16.msra.mxu1 %v18801_v30 }
 0xbab   : > { %16549 = vmatpush1.bf16.msra.mxu0 %v18803_v60  ;;  %16468 = vmatprep.subr.bf16.mxu1 %v18834_v61  ;;  %v18963_v61 = vcombine.low %v9682_v36, %v9698_v37 }
 0xbac   : > { %16550 = vmatprep.subr.bf16.mxu0 %v18836_v62  ;;  %v18994_v62 = vcombine.high %v9713_v49, %v9729_v50  ;;  %v9858_v49 = vld [vmem:[#allocation16 + $0x1bf8] sm:$0xff] }
 0xbae   : > { %16469 = vmatpush1.bf16.msra.mxu1 %v18833_v4  ;;  %v18996_v4 = vcombine.high %v9714_v46, %v9730_v54 }
 0xbaf   : > { %16551 = vmatpush1.bf16.msra.mxu0 %v18835_v47  ;;  %16470 = vmatprep.subr.bf16.mxu1 %v18866_v7  ;;  %v9761_v47 = vld [vmem:[#allocation16 + $0x18f0] sm:$0xff] }
 0xbb0   : > { %16552 = vmatprep.subr.bf16.mxu0 %v18868_v9  ;;  %v9746_v9 = vld [vmem:[#allocation16 + $0x1878] sm:$0xff]  ;;  %v19026_v15 = vcombine.high %v9745_v35, %v9761_v47  ;;  %v19025_v17 = vcombine.low %v9745_v35, %v9761_v47 }
 0xbb1   : > { %v19027_v21 = vcombine.low %v9746_v9, %v9762_v10  ;;  %v9906_v35 = vld [vmem:[#allocation16 + $0x1d78] sm:$0xff] }
 0xbb2   : > { %16471 = vmatpush1.bf16.msra.mxu1 %v18865_v58  ;;  %v19028_v58 = vcombine.high %v9746_v9, %v9762_v10  ;;  %v9937_v9 = vld [vmem:[#allocation16 + $0x1e70] sm:$0xff] }
 0xbb3   : > { %16553 = vmatpush1.bf16.msra.mxu0 %v18867_v16  ;;  %16472 = vmatprep.subr.bf16.mxu1 %v18898_v18  ;;  %v9777_v16 = vld [vmem:[#allocation16 + $0x1970] sm:$0xff] }
 0xbb4   : > { %16554 = vmatprep.subr.bf16.mxu0 %v18900_v20  ;;  %v9793_v18 = vld [vmem:[#allocation16 + $0x19f0] sm:$0xff]  ;;  %v9778_v20 = vld [vmem:[#allocation16 + $0x1978] sm:$0xff] }
 0xbb5   : > { %v19058_v14 = vcombine.high %v9777_v16, %v9793_v18  ;;  %v19057_v33 = vcombine.low %v9777_v16, %v9793_v18  ;;  %v19059_v36 = vcombine.low %v9778_v20, %v9794_v11  ;;  %v9953_v10 = vld [vmem:[#allocation16 + $0x1ef0] sm:$0xff] }
 0xbb6   : > { %16473 = vmatpush1.bf16.msra.mxu1 %v18897_v23  ;;  %v19060_v23 = vcombine.high %v9778_v20, %v9794_v11  ;;  %v19218_v11 = vcombine.high %v9937_v9, %v9953_v10 }
 0xbb7   : > { %16555 = vmatpush1.bf16.msra.mxu0 %v18899_v24  ;;  %16474 = vmatprep.subr.bf16.mxu1 %v18930_v27  ;;  %v9809_v24 = vld [vmem:[#allocation16 + $0x1a70] sm:$0xff] }
 0xbb8   : > { %v16170_v45 = vpop.f32.mrb[32].mxu1  ;;  %16556 = vmatprep.subr.bf16.mxu0 %v18932_v22  ;;  %v9825_v27 = vld [vmem:[#allocation16 + $0x1af0] sm:$0xff]  ;;  %v9810_v22 = vld [vmem:[#allocation16 + $0x1a78] sm:$0xff] }
 0xbb9   : > { %v19322_v52 = vadd.f32 %v16170_v45, %v10078_v34  ;;  %v16252_v25 = vpop.f32.mrb[28].mxu0  ;;  %v16172_v53 = vpop.f32.mrb[33].mxu1  ;;  %v19090_v37 = vcombine.high %v9809_v24, %v9825_v27  ;;  %v19091_v46 = vcombine.low %v9810_v22, %v9826_v32 }
 0xbba   : > { %v19324_v55 = vadd.f32 %v16252_v25, %v10086_v38  ;;  %v19323_v28 = vadd.f32 %v16172_v53, %v10082_v39  ;;  %v16254_v56 = vpop.f32.mrb[29].mxu0  ;;  %v16174_v57 = vpop.f32.mrb[34].mxu1  ;;  %16475 = vmatpush1.bf16.msra.mxu1 %v18929_v40  ;;  %v19092_v40 = vcombine.high %v9810_v22, %v9826_v32  ;;  %v19089_v25 = vcombine.low %v9809_v24, %v9825_v27  ;;  %v9986_v24 = vld [vmem:[#allocation16 + $0x1ff8] sm:$0xff] }
 0xbbb   : > { %v19273_v51 = vmul.f32 -1.442695, %v19322_v52  ;;  %v19325_v59 = vadd.f32 %v16254_v56, %v10090_v41  ;;  %v16256_v30 = vpop.f32.mrb[30].mxu0  ;;  %16557 = vmatpush1.bf16.msra.mxu0 %v18931_v43  ;;  %v16175_v60 = vpop.f32.mrb[35].mxu1  ;;  %16476 = vmatprep.subr.bf16.mxu1 %v18962_v44  ;;  %v9841_v41 = vld [vmem:[#allocation16 + $0x1b70] sm:$0xff]  ;;  %v9874_v57 = vld [vmem:[#allocation16 + $0x1c78] sm:$0xff]  ;;  %v19217_v27 = vcombine.low %v9937_v9, %v9953_v10 }
 0xbbc   : > { %v19275_v0 = vmul.f32 -1.442695, %v19324_v55  ;;  %v19274_v1 = vmul.f32 -1.442695, %v19323_v28  ;;  %v16257_v2 = vpop.f32.mrb[31].mxu0  ;;  %16558 = vmatprep.subr.bf16.mxu0 %v18964_v48  ;;  %v9857_v43 = vld [vmem:[#allocation16 + $0x1bf0] sm:$0xff] }
 0xbbd   : > { %21459 = vpow2.f32 %v19273_v51  ;;  %v19276_v7 = vmul.f32 -1.442695, %v19325_v59  ;;  %v9842_v48 = vld [vmem:[#allocation16 + $0x1b78] sm:$0xff]  ;;  %v19122_v54 = vcombine.high %v9841_v41, %v9857_v43  ;;  %v9873_v28 = vld [vmem:[#allocation16 + $0x1c70] sm:$0xff]  ;;  %v19121_v51 = vcombine.low %v9841_v41, %v9857_v43 }
 0xbbe   : > { %21461 = vpow2.f32 %v19275_v0  ;;  %16477 = vmatpush1.bf16.msra.mxu1 %v18961_v31  ;;  %v19124_v55 = vcombine.high %v9842_v48, %v9858_v49  ;;  %v9889_v56 = vld [vmem:[#allocation16 + $0x1cf0] sm:$0xff]  ;;  %v9890_v31 = vld [vmem:[#allocation16 + $0x1cf8] sm:$0xff]  ;;  %v19123_v59 = vcombine.low %v9842_v48, %v9858_v49 }
 0xbbf   : > { %21463 = vpow2.f32 %v19274_v1  ;;  %16559 = vmatpush1.bf16.msra.mxu0 %v18963_v61  ;;  %16478 = vmatprep.subr.bf16.mxu1 %v18994_v62  ;;  %v19154_v30 = vcombine.high %v9873_v28, %v9889_v56  ;;  %v19156_v60 = vcombine.high %v9874_v57, %v9890_v31  ;;  %v9905_v61 = vld [vmem:[#allocation16 + $0x1d70] sm:$0xff]  ;;  %v9922_v0 = vld [vmem:[#allocation16 + $0x1df8] sm:$0xff]  ;;  %v19153_v1 = vcombine.low %v9873_v28, %v9889_v56 }
 0xbc0   : > { %21465 = vpow2.f32 %v19276_v7  ;;  %16560 = vmatprep.subr.bf16.mxu0 %v18996_v4  ;;  %v9921_v62 = vld [vmem:[#allocation16 + $0x1df0] sm:$0xff]  ;;  %v19155_v2 = vcombine.low %v9874_v57, %v9890_v31  ;;  %v19188_v7 = vcombine.high %v9906_v35, %v9922_v0  ;;  %v19187_v20 = vcombine.low %v9906_v35, %v9922_v0 }
 0xbc1   : > { %v19186_v4 = vcombine.high %v9905_v61, %v9921_v62  ;;  %v19185_v16 = vcombine.low %v9905_v61, %v9921_v62 }
 0xbc2   : > { %16479 = vmatpush1.bf16.msra.mxu1 %v18993_v12 }
 0xbc3   : > { %16561 = vmatpush1.bf16.msra.mxu0 %v18995_v13  ;;  %16480 = vmatprep.subr.bf16.mxu1 %v19026_v15  ;;  %v9938_v13 = vld [vmem:[#allocation16 + $0x1e78] sm:$0xff] }
 0xbc4   : > { %16562 = vmatprep.subr.bf16.mxu0 %v19028_v58  ;;  %v9954_v15 = vld [vmem:[#allocation16 + $0x1ef8] sm:$0xff] }
 0xbc5   : > { %v19219_v22 = vcombine.low %v9938_v13, %v9954_v15 }
 0xbc6   : > { %16481 = vmatpush1.bf16.msra.mxu1 %v19025_v17  ;;  %v19220_v17 = vcombine.high %v9938_v13, %v9954_v15 }
 0xbc7   : > { %v21460_v34 = vpop.eup %21459  ;;  %16563 = vmatpush1.bf16.msra.mxu0 %v19027_v21  ;;  %16482 = vmatprep.subr.bf16.mxu1 %v19058_v14  ;;  %v9969_v21 = vld [vmem:[#allocation16 + $0x1f70] sm:$0xff] }
 0xbc8   : > { %v21462_v38 = vpop.eup %21461  ;;  %v16703_v39 = vadd.f32 1.0, %v21460_v34  ;;  %16564 = vmatprep.subr.bf16.mxu0 %v19060_v23  ;;  %v9985_v14 = vld [vmem:[#allocation16 + $0x1ff0] sm:$0xff]  ;;  %v9970_v23 = vld [vmem:[#allocation16 + $0x1f78] sm:$0xff] }
 0xbc9   : > { %v21464_v44 = vpop.eup %21463  ;;  %v16705_v45 = vadd.f32 1.0, %v21462_v38  ;;  %v19250_v32 = vcombine.high %v9969_v21, %v9985_v14  ;;  %v19249_v34 = vcombine.low %v9969_v21, %v9985_v14 }
 0xbca   : > { %v21466_v50 = vpop.eup %21465  ;;  %21467 = vrcp.f32 %v16703_v39  ;;  %v16704_v52 = vadd.f32 1.0, %v21464_v44  ;;  %16483 = vmatpush1.bf16.msra.mxu1 %v19057_v33  ;;  %v19252_v33 = vcombine.high %v9970_v23, %v9986_v24 }
 0xbcb   : > { %21469 = vrcp.f32 %v16705_v45  ;;  %v16706_v53 = vadd.f32 1.0, %v21466_v50  ;;  %16565 = vmatpush1.bf16.msra.mxu0 %v19059_v36  ;;  %16484 = vmatprep.subr.bf16.mxu1 %v19090_v37  ;;  %v19251_v36 = vcombine.low %v9970_v23, %v9986_v24  ;;  %v22676_v37 = vld [vmem:[#allocation17 + $0x18] sm:$0xff] }
 0xbcc   : > { %21471 = vrcp.f32 %v16704_v52  ;;  %16566 = vmatprep.subr.bf16.mxu0 %v19092_v40  ;;  %v10094_v38 = vrot.slane %v22676_v37, %v22464_v26  ;;  %v10102_v39 = vrot.slane %v22676_v37, %v22483_v8  ;;  %v10098_v40 = vrot.slane %v22676_v37, %v22469_v19 }
 0xbcd   : > { %21473 = vrcp.f32 %v16706_v53  ;;  %v10106_v41 = vrot.slane %v22676_v37, %v22472_v29 }
 0xbce   : > { %16485 = vmatpush1.bf16.msra.mxu1 %v19089_v25 }
 0xbcf   : > { %16567 = vmatpush1.bf16.msra.mxu0 %v19091_v46  ;;  %16486 = vmatprep.subr.bf16.mxu1 %v19122_v54 }
 0xbd0   : > { %16568 = vmatprep.subr.bf16.mxu0 %v19124_v55 }
 0xbd2   : > { %16487 = vmatpush1.bf16.msra.mxu1 %v19121_v51 }
 0xbd3   : > { %16569 = vmatpush1.bf16.msra.mxu0 %v19123_v59  ;;  %16488 = vmatprep.subr.bf16.mxu1 %v19154_v30 }
 0xbd4   : > { %v21468_v47 = vpop.eup %21467  ;;  %16570 = vmatprep.subr.bf16.mxu0 %v19156_v60 }
 0xbd5   : > { %v21470_v12 = vpop.eup %21469  ;;  %16799 = vst [vmem:[%s22552_s22 + $0xa0] sm:$0xff] %v21468_v47 }
 0xbd6   : > { %v21472_v58 = vpop.eup %21471  ;;  %16801 = vst [vmem:[%s22552_s22 + $0xb0] sm:$0xff] %v21470_v12  ;;  %16489 = vmatpush1.bf16.msra.mxu1 %v19153_v1 }
 0xbd7   : > { %v21474_v18 = vpop.eup %21473  ;;  %16800 = vst [vmem:[%s22552_s22 + $0xa8] sm:$0xff] %v21472_v58  ;;  %16571 = vmatpush1.bf16.msra.mxu0 %v19155_v2  ;;  %16490 = vmatprep.subr.bf16.mxu1 %v19186_v4 }
 0xbd8   : > { %16802 = vst [vmem:[%s22552_s22 + $0xb8] sm:$0xff] %v21474_v18  ;;  %16572 = vmatprep.subr.bf16.mxu0 %v19188_v7 }
 0xbda   : > { %16491 = vmatpush1.bf16.msra.mxu1 %v19185_v16 }
 0xbdb   : > { %16573 = vmatpush1.bf16.msra.mxu0 %v19187_v20  ;;  %16492 = vmatprep.subr.bf16.mxu1 %v19218_v11 }
 0xbdc   : > { %16574 = vmatprep.subr.bf16.mxu0 %v19220_v17 }
 0xbde   : > { %16493 = vmatpush1.bf16.msra.mxu1 %v19217_v27 }
 0xbdf   : > { %16575 = vmatpush1.bf16.msra.mxu0 %v19219_v22  ;;  %16494 = vmatprep.subr.bf16.mxu1 %v19250_v32 }
 0xbe0   : > { %16576 = vmatprep.subr.bf16.mxu0 %v19252_v33 }
 0xbe2   : > { %16495 = vmatpush1.bf16.msra.mxu1 %v19249_v34 }
 0xbe3   : > { %16577 = vmatpush1.bf16.msra.mxu0 %v19251_v36 }
 0xbe5   : > { %16497 = vmatmul.mubr.bf16.vlgmr.msra.gmra.mrb[40].mxu1 %v22523_v6 }
 0xbe6   : > { %16579 = vmatmul.mubr.bf16.vlgmr.msra.gmra.mrb[36].mxu0 %v22523_v6 }
 0xc38   : > { %v16334_v43 = vpop.f32.mrb[36].mxu1 }
 0xc39   : > { %v19326_v44 = vadd.f32 %v16334_v43, %v10094_v38  ;;  %v16416_v45 = vpop.f32.mrb[32].mxu0  ;;  %v16336_v48 = vpop.f32.mrb[37].mxu1 }
 0xc3a   : > { %v19328_v49 = vadd.f32 %v16416_v45, %v10102_v39  ;;  %v19327_v6 = vadd.f32 %v16336_v48, %v10098_v40  ;;  %v16418_v50 = vpop.f32.mrb[33].mxu0  ;;  %v16338_v52 = vpop.f32.mrb[38].mxu1 }
 0xc3b   : > { %v19277_v25 = vmul.f32 -1.442695, %v19326_v44  ;;  %v19329_v53 = vadd.f32 %v16418_v50, %v10106_v41  ;;  %v16420_v26 = vpop.f32.mrb[34].mxu0  ;;  %v16339_v46 = vpop.f32.mrb[39].mxu1 }
 0xc3c   : > { %v19279_v54 = vmul.f32 -1.442695, %v19328_v49  ;;  %v19278_v8 = vmul.f32 -1.442695, %v19327_v6  ;;  %v16421_v55 = vpop.f32.mrb[35].mxu0 }
 0xc3d   : > { %21475 = vpow2.f32 %v19277_v25  ;;  %v19280_v19 = vmul.f32 -1.442695, %v19329_v53 }
 0xc3e   : > { %21477 = vpow2.f32 %v19279_v54 }
 0xc3f   : > { %21479 = vpow2.f32 %v19278_v8 }
 0xc40   : > { %21481 = vpow2.f32 %v19280_v19 }
 0xc47   : > { %v21476_v29 = vpop.eup %21475 }
 0xc48   : > { %v21478_v28 = vpop.eup %21477  ;;  %v16707_v56 = vadd.f32 1.0, %v21476_v29 }
 0xc49   : > { %v21480_v57 = vpop.eup %21479  ;;  %v16709_v31 = vadd.f32 1.0, %v21478_v28 }
 0xc4a   : > { %v21482_v51 = vpop.eup %21481  ;;  %21483 = vrcp.f32 %v16707_v56  ;;  %v16708_v59 = vadd.f32 1.0, %v21480_v57 }
 0xc4b   : > { %21485 = vrcp.f32 %v16709_v31  ;;  %v16710_v30 = vadd.f32 1.0, %v21482_v51 }
 0xc4c   : > { %21487 = vrcp.f32 %v16708_v59 }
 0xc4d   : > { %21489 = vrcp.f32 %v16710_v30 }
 0xc54   : > { %v21484_v60 = vpop.eup %21483 }
 0xc55   : > { %v21486_v61 = vpop.eup %21485  ;;  %16803 = vst [vmem:[%s22552_s22 + $0xc0] sm:$0xff] %v21484_v60 }
 0xc56   : > { %v21488_v62 = vpop.eup %21487  ;;  %16805 = vst [vmem:[%s22552_s22 + $0xd0] sm:$0xff] %v21486_v61 }
 0xc57   : > { %v21490_v35 = vpop.eup %21489  ;;  %16804 = vst [vmem:[%s22552_s22 + $0xc8] sm:$0xff] %v21488_v62 }
 0xc58   : > { %16806 = vst [vmem:[%s22552_s22 + $0xd8] sm:$0xff] %v21490_v35 }
 0xc59   : > { %21804 = shalt.err (!%p21801_p12)
}
 0xc5a   : > { %s21805_s12 = scalar_lea.hbm %s22695_s25, 256  ;;  %s21809_s15 = scalar_lea.hbm %s22832_s2, 512 }
 0xc5b   : > { %p21806_p13 = scmp.ne.s32.totalorder %s22695_s25, %s21805_s12  ;;  %p21810_p2 = scmp.lt.u32.totalorder %s22695_s25, %s22832_s2 }
 0xc5c   : > { %p21811_p6 = scmp.lt.u32.totalorder %s21809_s15, %s21805_s12  ;;  %p21813_p5 = scmp.lt.u32.totalorder %s21805_s12, %s22695_s25 }
 0xc5d   : > { %p21807_p1 = pnand %p21806_p13, %p22833_p9 }
 0xc5e   : > { %p21812_p10 = por %p21811_p6, %p21810_p2 }
 0xc5f   : > { %p21808_p3 = pneg %p21807_p1 }
 0xc60   : > { %p21814_p0 = por %p21813_p5, %p21812_p10 }
 0xc62   : > { %p21815_p7 = pnand %p21814_p0, %p21808_p3 }
 0xc64   : > { %21818 = shalt.err (!%p21815_p7)
}
 0xc65   : > { %19559 = dma.vmem_to_hbm [thread:$0]  (%p22833_p9), %s16848_s13, 256, %s22695_s25, %s16819_s24   ;;  %v10110_v0 = vrot.slane %v22676_v37, %v22567_v63  ;;  %v10118_v1 = vrot.slane %v22676_v37, %v22570_v3  ;;  %v10114_v2 = vrot.slane %v22676_v37, %v22573_v42  ;;  %v10122_v4 = vrot.slane %v22676_v37, %v22576_v5 }
 0xc66   : > { %s19294_s13 = sshll.u32 %s22014_s23, 12  ;;  %s16833_s25 = sshll.u32 %s22552_s22, 4  ;;  %s22732_s25 = int_to_ptr.vmem [resolvable:$true] %s16833_s25 }
 0xc67   : > { %s22834_s21 = sld [smem:[#allocation36_spill]]  ;;  %s16814_s23 = scalar_lea.sflag [#allocation4], %s22317_s30 }
 0xc68   : > { %s21819_s10 = scalar_lea.vmem %s22732_s25, 4096  ;;  %s21932_s12 = smov [#allocation19]  }
 0xc69   : > { %p21820_p11 = scmp.ne.s32.totalorder %s22732_s25, %s21819_s10  ;;  %s21823_s16 = sshll.u32 %s21932_s12, 4  ;;  %s21824_s16 = int_to_ptr.vmem [resolvable:$false] %s21823_s16 }
 0xc6a   : > { %s21825_s11 = scalar_lea.vmem %s21824_s16, 8192  ;;  %p21826_p12 = scmp.lt.s32.totalorder %s22732_s25, %s21824_s16 }
 0xc6b   : > { %p21821_p8 = pnand %p21820_p11, %p22833_p9  ;;  %p21827_p13 = scmp.lt.s32.totalorder %s21825_s11, %s21819_s10 }
 0xc6d   : > { %s22730_s26 = scalar_lea.hbm %s22834_s21, %s19294_s13  ;;  %p21822_p4 = pneg %p21821_p8 }
 0xc6e   : > { %p21828_p1 = por %p21827_p13, %p21826_p12 }
 0xc70   : > { %p21829_p3 = pnand %p21828_p1, %p21822_p4 }
 0xcb8   : > { %v16498_v47 = vpop.f32.mrb[40].mxu1 }
 0xcb9   : > { %v19330_v7 = vadd.f32 %v16498_v47, %v10110_v0  ;;  %v16580_v9 = vpop.f32.mrb[36].mxu0  ;;  %v16500_v10 = vpop.f32.mrb[41].mxu1 }
 0xcba   : > { %v19332_v12 = vadd.f32 %v16580_v9, %v10118_v1  ;;  %v19331_v13 = vadd.f32 %v16500_v10, %v10114_v2  ;;  %v16582_v15 = vpop.f32.mrb[37].mxu0  ;;  %v16502_v58 = vpop.f32.mrb[42].mxu1 }
 0xcbb   : > { %v19281_v16 = vmul.f32 -1.442695, %v19330_v7  ;;  %v19333_v18 = vadd.f32 %v16582_v15, %v10122_v4  ;;  %v16584_v63 = vpop.f32.mrb[38].mxu0  ;;  %v16503_v20 = vpop.f32.mrb[43].mxu1 }
 0xcbc   : > { %v19283_v11 = vmul.f32 -1.442695, %v19332_v12  ;;  %v19282_v3 = vmul.f32 -1.442695, %v19331_v13  ;;  %v16585_v17 = vpop.f32.mrb[39].mxu0 }
 0xcbd   : > { %21491 = vpow2.f32 %v19281_v16  ;;  %v19284_v42 = vmul.f32 -1.442695, %v19333_v18 }
 0xcbe   : > { %21493 = vpow2.f32 %v19283_v11 }
 0xcbf   : > { %21495 = vpow2.f32 %v19282_v3 }
 0xcc0   : > { %21497 = vpow2.f32 %v19284_v42 }
 0xcc7   : > { %v21492_v5 = vpop.eup %21491 }
 0xcc8   : > { %v21494_v21 = vpop.eup %21493  ;;  %v16711_v14 = vadd.f32 1.0, %v21492_v5 }
 0xcc9   : > { %v21496_v23 = vpop.eup %21495  ;;  %v16713_v24 = vadd.f32 1.0, %v21494_v21 }
 0xcca   : > { %v21498_v27 = vpop.eup %21497  ;;  %21499 = vrcp.f32 %v16711_v14  ;;  %v16712_v22 = vadd.f32 1.0, %v21496_v23 }
 0xccb   : > { %21501 = vrcp.f32 %v16713_v24  ;;  %v16714_v32 = vadd.f32 1.0, %v21498_v27 }
 0xccc   : > { %21503 = vrcp.f32 %v16712_v22 }
 0xccd   : > { %21505 = vrcp.f32 %v16714_v32 }
 0xcd4   : > { %v21500_v33 = vpop.eup %21499 }
 0xcd5   : > { %v21502_v34 = vpop.eup %21501  ;;  %16807 = vst [vmem:[%s22552_s22 + $0xe0] sm:$0xff] %v21500_v33 }
 0xcd6   : > { %v21504_v36 = vpop.eup %21503  ;;  %16809 = vst [vmem:[%s22552_s22 + $0xf0] sm:$0xff] %v21502_v34 }
 0xcd7   : > { %v21506_v37 = vpop.eup %21505  ;;  %16808 = vst [vmem:[%s22552_s22 + $0xe8] sm:$0xff] %v21504_v36 }
 0xcd8   : > { %16810 = vst [vmem:[%s22552_s22 + $0xf8] sm:$0xff] %v21506_v37 }
 0xcd9   : > { %21832 = shalt.err (!%p21829_p3)
}
 0xcda   : > { %s21833_s30 = scalar_lea.hbm %s22730_s26, 4096  ;;  %s21837_s28 = scalar_lea.hbm %s22834_s21, 8192 }
 0xcdb   : > { %p21834_p2 = scmp.ne.s32.totalorder %s22730_s26, %s21833_s30  ;;  %p21838_p5 = scmp.lt.u32.totalorder %s22730_s26, %s22834_s21 }
 0xcdc   : > { %p21839_p0 = scmp.lt.u32.totalorder %s21837_s28, %s21833_s30  ;;  %p21841_p11 = scmp.lt.u32.totalorder %s21833_s30, %s22730_s26 }
 0xcdd   : > { %p21835_p6 = pnand %p21834_p2, %p22833_p9 }
 0xcde   : > { %p21840_p7 = por %p21839_p0, %p21838_p5 }
 0xcdf   : > { %p21836_p10 = pneg %p21835_p6 }
 0xce0   : > { %p21842_p8 = por %p21841_p11, %p21840_p7 }
 0xce2   : > { %p21843_p4 = pnand %p21842_p8, %p21836_p10 }
 0xce4   : > { %21846 = shalt.err (!%p21843_p4)
}
 0xce5   : > { %19558 = dma.vmem_to_hbm [thread:$0]  (%p22833_p9), %s22732_s25, 4096, %s22730_s26, %s16814_s23  }
 0xce6 PF: > { %s16859_s24 = sand.u32 1, %s21901_s17   ;;  %p22835_p12 = scmp.ne.s32.totalorder %s22815_s3, 0 }
 0xce7   : > { %p22836_p13 = scmp.ge.s32.totalorder %s21913_s20, 2  ;;  %s16860_s0 = scalar_lea.sflag [#allocation4], %s16859_s24 }
 0xce9   : > { %p19595_p1 = pnand %p22836_p13, %p22835_p12 }
 0xceb   : > { %21892 = dma.done.wait (!%p19595_p1), %s16860_s0, 4096  }
 0xcec   : > { %21894 = vsyncadd (!%p19595_p1), %s16860_s0, 4294963200  ;;  %s16869_s10 = scalar_lea.sflag [#allocation21], %s16859_s24 }
 0xced   : > { %21896 = dma.done.wait (!%p19595_p1), %s16869_s10, 256  }
 0xcee   : > { %21898 = vsyncadd (!%p19595_p1), %s16869_s10, 4294967040  ;;  %p35_p9 = scmp.ge.s32.totalorder %s22214_s27, 4   ;;  %s22837_s17 = smov %s21905_s18 }
 0xcef   : > { %s22838_s18 = smov %s21909_s19  ;;  %s22839_s19 = smov %s22226_s14 }
 0xcf0   : > { %s22840_s20 = smov %s22214_s27  ;;  %37 = sbr.rel (!%p35_p9) target bundleno = 20 (0x14), region = 167 }
 0xcf7   :  { %16874 = vsyncpa [#allocation3], 1 }
 0xcf8   :  { %16876 = vsyncpa [#allocation3 + $0x1], 1 }
 0xcf9   :  { %16877 = vsyncpa [#allocation6], 1 }
 0xcfa   :  { %16879 = vsyncpa [#allocation6 + $0x1], 1 }
 0xcfb   :  { %16880 = vsyncpa [#allocation9], 1 }
 0xcfc   :  { %16881 = vsyncpa [#allocation12], 1 }
 0xcfd   :  { %16882 = vsyncpa [#allocation15], 1 }
 0xcfe   :  { %16883 = vsyncpa [#allocation18], 1 }
 0xcff   :  { %16884 = vsyncpa [#allocation4], 1 }
 0xd00   :  { %16886 = vsyncpa [#allocation4 + $0x1], 1 }
 0xd01   :  { %16887 = vsyncpa [#allocation21], 1 }
 0xd02   :  { %16889 = vsyncpa [#allocation21 + $0x1], 1 }

</bundles_post_ra>
